<compile_context>
chip_gen: v5e
topology: v5e:2x2
jax: 0.10.0
libtpu: 0.0.40
codegen_flags: <defaults>
</compile_context>

<pallas_src>
import numpy as np
import jax
import jax.numpy as jnp
from jax.experimental import pallas as pl
from jax.experimental.pallas import tpu as pltpu

# ---------------- config (stand-ins for cfg.MODEL.ROI_TWO_DIS.CLS.*) ----------
NUM_CLASSES    = 9
OUT_CLASSES    = NUM_CLASSES * 2
SAMPLE_WEIGHTS = 1.0
LOSS_DIRECT_W  = 0.1
LOSS_GRL_W     = 0.1
SAMPLES_THRESH = 0.5
GRL_LAMBDA     = 0.1   # GradientReversal: identity in the forward pass

# scaled-down "resnet.layer4" (3 bottleneck blocks, first has stride-2 downsample)
IN_CHANNELS  = 128
WIDTH        = 64
OUT_CHANNELS = 256
NUM_BLOCKS   = 3
BN_EPS       = 1e-5

# spatial / batch configuration of the toy problem
N_TOTAL = 8        # batch
H0 = W0 = 8        # input spatial
H1 = W1 = 4        # after the stride-2 bottleneck
H2 = W2 = 2        # after the 3x3 valid classifier conv
N_SUB   = 4        # samples per grid step (grid=(2,) -> both v7x TCs busy)

P0, P1, P2 = H0 * W0, H1 * W1, H2 * W2          # 64, 16, 4
ROWS0, ROWS1, ROWS2 = N_SUB * P0, N_SUB * P1, N_SUB * P2   # 256, 64, 16


# =========================== the fused forward kernel ==========================
def _forward_kernel(x_ref,
                    w1_0, b1_0, w2_0, b2_0, w3_0, b3_0, wd_0, bd_0,
                    w1_1, b1_1, w2_1, b2_1, w3_1, b3_1,
                    w1_2, b1_2, w2_2, b2_2, w3_2, b3_2,
                    wc, bc, fcw, fcb,
                    g2a, gda, g2b, gcl, gpl,
                    out_ref):
    f32, bf16 = jnp.float32, jnp.bfloat16

    def mm(a, b):
        return jnp.dot(a, b, preferred_element_type=f32)

    def conv3x3(y, g_ref, w_ref, b_ref, rows_out, c_out):
        # 3x3 conv as 9 taps: (0/1 spatial-gather matmul) then (tap-weight matmul).
        acc = jnp.zeros((rows_out, c_out), f32)
        for t in range(9):
            shifted = mm(g_ref[t], y).astype(bf16)   # exact 0/1 row selection
            acc = acc + mm(shifted, w_ref[t])
        return acc + b_ref[...]

    def bottleneck(x, w1, b1, w2, b2, g2, w3, b3, res):
        # 1x1 conv + folded-BN + ReLU
        y = jnp.maximum(mm(x, w1[...]) + b1[...], 0.0).astype(bf16)
        # 3x3 conv + folded-BN + ReLU (spatial handled by g2)
        y = jnp.maximum(conv3x3(y, g2, w2, b2, res.shape[0], WIDTH), 0.0).astype(bf16)
        # 1x1 conv + folded-BN + residual + ReLU
        return jnp.maximum(mm(y, w3[...]) + b3[...] + res, 0.0).astype(bf16)

    x = x_ref[...]                                            # (ROWS0, Cin) bf16

    # ---- bottleneck 0: stride 2, projection shortcut ----
    xs = mm(gda[...], x).astype(bf16)                         # strided spatial gather
    res0 = mm(xs, wd_0[...]) + bd_0[...]                      # downsample 1x1 + BN
    y = bottleneck(x, w1_0, b1_0, w2_0, b2_0, g2a, w3_0, b3_0, res0)   # (ROWS1, 256)

    # ---- bottlenecks 1, 2: identity shortcut ----
    y = bottleneck(y, w1_1, b1_1, w2_1, b2_1, g2b, w3_1, b3_1, y.astype(f32))
    y = bottleneck(y, w1_2, b1_2, w2_2, b2_2, g2b, w3_2, b3_2, y.astype(f32))

    # ---- classifiers: Conv2d(C, C, 3, stride=1) (valid padding) + bias ----
    yc = conv3x3(y, gcl, wc, bc, ROWS2, OUT_CHANNELS).astype(bf16)      # (ROWS2, 256)

    # ---- torch.mean(dim=(2,3)) as a 0/0.25 matmul, fused with dis_score Linear ----
    pooled = mm(gpl[...], yc).astype(bf16)                    # (N_SUB, 256)
    logits = mm(pooled, fcw[...]) + fcb[...]                  # (N_SUB, OUT_CLASSES)
    out_ref[0] = logits.astype(out_ref.dtype)


# =============== spatial gather matrices (built once, in numpy) =================
def _conv_gather_np(n, h, w, ksize, stride, pad):
    ho = (h + 2 * pad - ksize) // stride + 1
    wo = (w + 2 * pad - ksize) // stride + 1
    pi, po = h * w, ho * wo
    g = np.zeros((ksize * ksize, n * po, n * pi), np.float32)
    for di in range(ksize):
        for dj in range(ksize):
            t = di * ksize + dj
            for b in range(n):
                for oy in range(ho):
                    for ox in range(wo):
                        iy = oy * stride + di - pad
                        ix = ox * stride + dj - pad
                        if 0 <= iy < h and 0 <= ix < w:
                            g[t, b * po + oy * wo + ox, b * pi + iy * w + ix] = 1.0
    return g


def make_gather_mats(n_sub):
    bf16 = jnp.bfloat16
    g2a = _conv_gather_np(n_sub, H0, W0, 3, 2, 1)        # block-0 conv2: (9, n*P1, n*P0)
    gda = _conv_gather_np(n_sub, H0, W0, 1, 2, 0)[0]     # stride-2 downsample: (n*P1, n*P0)
    g2b = _conv_gather_np(n_sub, H1, W1, 3, 1, 1)        # blocks 1/2 conv2: (9, n*P1, n*P1)
    gcl = _conv_gather_np(n_sub, H1, W1, 3, 1, 0)        # classifier conv: (9, n*P2, n*P1)
    gpl = np.zeros((n_sub, n_sub * P2), np.float32)      # spatial mean pool
    for b in range(n_sub):
        gpl[b, b * P2:(b + 1) * P2] = 1.0 / P2
    return [jnp.asarray(a, bf16) for a in (g2a, gda, g2b, gcl, gpl)]


# ----------------------- deterministic parameter construction ------------------
def conv_weight(key, kh, kw, cin, cout):
    std = (2.0 / (kh * kw * cin)) ** 0.5
    return std * jax.random.normal(key, (kh, kw, cin, cout), jnp.float32)


def frozen_bn_params(key, c):
    k1, k2, k3 = jax.random.split(key, 3)
    gamma = 1.0 + 0.01 * jax.random.normal(k1, (c,), jnp.float32)
    beta = 0.01 * jax.random.normal(k2, (c,), jnp.float32)
    running_mean = 0.01 * jax.random.normal(k3, (c,), jnp.float32)
    running_var = jnp.ones((c,), jnp.float32)
    scale = gamma / jnp.sqrt(running_var + BN_EPS)
    bias = beta - running_mean * scale
    return scale, bias


def make_bottleneck_params(key, cin, width, cout, has_downsample):
    ks = jax.random.split(key, 8)
    p = {
        'w1': conv_weight(ks[0], 1, 1, cin, width),
        'bn1': frozen_bn_params(ks[1], width),
        'w2': conv_weight(ks[2], 3, 3, width, width),
        'bn2': frozen_bn_params(ks[3], width),
        'w3': conv_weight(ks[4], 1, 1, width, cout),
        'bn3': frozen_bn_params(ks[5], cout),
    }
    if has_downsample:
        p['wd'] = conv_weight(ks[6], 1, 1, cin, cout)
        p['bnd'] = frozen_bn_params(ks[7], cout)
    return p


def make_params(key):
    ks = jax.random.split(key, NUM_BLOCKS + 3)
    layer4, cin = [], IN_CHANNELS
    for b in range(NUM_BLOCKS):
        layer4.append(make_bottleneck_params(ks[b], cin, WIDTH, OUT_CHANNELS,
                                             has_downsample=(b == 0)))
        cin = OUT_CHANNELS
    C = OUT_CHANNELS
    cls_w = conv_weight(ks[NUM_BLOCKS], 3, 3, C, C)                        # classifiers conv
    cls_b = 0.01 * jax.random.normal(ks[NUM_BLOCKS + 1], (C,), jnp.float32)
    fc_w = 0.01 * jax.random.normal(ks[NUM_BLOCKS + 2], (C, OUT_CLASSES),  # dis_score, std=0.01
                                    jnp.float32)
    fc_b = jnp.zeros((OUT_CLASSES,), jnp.float32)                          # dis_score bias = 0
    return {'layer4': layer4, 'cls_w': cls_w, 'cls_b': cls_b,
            'fc_w': fc_w, 'fc_b': fc_b}


def prepare_params(params):
    """Fold FrozenBN scales into conv weights, stack 3x3 taps, cast to bf16.
    Returns the flat, ordered operand list the fused kernel expects."""
    bf16, f32 = jnp.bfloat16, jnp.float32
    ops, cin = [], IN_CHANNELS
    for b, p in enumerate(params['layer4']):
        s1, bb1 = p['bn1']; s2, bb2 = p['bn2']; s3, bb3 = p['bn3']
        ops += [(p['w1'].reshape(cin, WIDTH) * s1).astype(bf16),
                bb1.reshape(1, WIDTH).astype(f32),
                (p['w2'].reshape(9, WIDTH, WIDTH) * s2).astype(bf16),
                bb2.reshape(1, WIDTH).astype(f32),
                (p['w3'].reshape(WIDTH, OUT_CHANNELS) * s3).astype(bf16),
                bb3.reshape(1, OUT_CHANNELS).astype(f32)]
        if b == 0:
            sd, bbd = p['bnd']
            ops += [(p['wd'].reshape(cin, OUT_CHANNELS) * sd).astype(bf16),
                    bbd.reshape(1, OUT_CHANNELS).astype(f32)]
        cin = OUT_CHANNELS
    ops += [params['cls_w'].reshape(9, OUT_CHANNELS, OUT_CHANNELS).astype(bf16),
            params['cls_b'].reshape(1, OUT_CHANNELS).astype(f32),
            params['fc_w'].astype(bf16),
            params['fc_b'].reshape(1, OUT_CLASSES).astype(f32)]
    return ops + make_gather_mats(N_SUB)


# ----------------------- fused forward: wrapper around pallas_call -------------
def dis_logits_forward(operands, x_nchw):
    n = x_nchw.shape[0]
    assert n % N_SUB == 0
    n_steps = n // N_SUB
    x = jnp.transpose(x_nchw, (0, 2, 3, 1)).reshape(n * P0, IN_CHANNELS)
    x = x.astype(jnp.bfloat16)

    def whole(shape):
        zeros = (0,) * len(shape)
        return pl.BlockSpec(tuple(shape), lambda i, z=zeros: z)

    in_specs = [pl.BlockSpec((ROWS0, IN_CHANNELS), lambda i: (i, 0))]
    in_specs += [whole(op.shape) for op in operands]

    out = pl.pallas_call(
        _forward_kernel,
        out_shape=jax.ShapeDtypeStruct((n_steps, N_SUB, OUT_CLASSES), jnp.float32),
        grid_spec=pltpu.PrefetchScalarGridSpec(
            num_scalar_prefetch=0,
            grid=(n_steps,),
            in_specs=in_specs,
            out_specs=pl.BlockSpec((1, N_SUB, OUT_CLASSES), lambda i: (i, 0, 0)),
        ),
        compiler_params=pltpu.CompilerParams(
            dimension_semantics=("parallel",)),
    )(x, *operands)
    return out.reshape(n, OUT_CLASSES)


# ----------------------- full module forward (losses in plain JAX) -------------
def discriminator_forward(operands, dis_features, pred_cls, target, domain='source'):
    del target  # unused by the reference forward
    pred = jax.nn.softmax(pred_cls, axis=1)
    score_mx = jnp.max(pred)
    pred_v = jnp.max(pred, axis=1)
    pred_idx = jnp.argmax(pred, axis=1)

    # GradientReversal is identity in the forward pass, so forward_direct and
    # forward_grl see the same extractor+classifier output; compute logits once.
    logits = dis_logits_forward(operands, dis_features)

    # ---- forward_direct: CrossEntropy on threshold-selected ROIs ----
    dl = logits.reshape(-1, NUM_CLASSES, 2).sum(axis=2)
    logp = jax.nn.log_softmax(dl, axis=1)
    ce = -jnp.take_along_axis(logp, pred_idx[:, None], axis=1)[:, 0]
    m = pred_v > score_mx * SAMPLES_THRESH          # always non-empty (global-max row)
    loss_direct = jnp.sum(jnp.where(m, ce, 0.0)) / jnp.maximum(jnp.sum(m), 1)

    # ---- forward_grl: per-class BCE(p, target=1) on selected ROIs ----
    probs2 = jax.nn.softmax(logits.reshape(-1, NUM_CLASSES, 2), axis=2).reshape(-1, OUT_CLASSES)
    loss_grl = 0.0 * jnp.sum(probs2)
    for ii in range(1, NUM_CLASSES):
        sel = (pred_idx == ii) & (pred_v > SAMPLES_THRESH * score_mx)
        col = ii * 2 + 1 if domain == 'source' else ii * 2
        nll = -jnp.maximum(jnp.log(probs2[:, col]), -100.0)  # BCELoss clamps log at -100
        c = jnp.sum(sel)
        term = jnp.where(c > 0,
                         jnp.sum(jnp.where(sel, nll, 0.0)) / jnp.maximum(c, 1),
                         0.0)
        loss_grl = loss_grl + term

    loss = LOSS_DIRECT_W * loss_direct + LOSS_GRL_W * loss_grl
    if domain == 'source':
        loss = loss * SAMPLE_WEIGHTS
    return loss


# ----------------------------------- main ---------------------------------------
if __name__ == "__main__":
    key = jax.random.PRNGKey(0)
    kparams, kx, kc = jax.random.split(key, 3)
    params = make_params(kparams)
    operands = prepare_params(params)   # BN-folded bf16 weights + gather matrices

    dis_features = jax.random.normal(kx, (N_TOTAL, IN_CHANNELS, H0, W0), jnp.float32)  # NCHW
    pred_cls = jax.random.normal(kc, (N_TOTAL, NUM_CLASSES), jnp.float32)
    target = jnp.zeros((N_TOTAL,), jnp.int32)   # unused, kept for interface parity

    fwd = jax.jit(discriminator_forward, static_argnames=('domain',))
    loss = fwd(operands, dis_features, pred_cls, target, domain='source')
    jax.block_until_ready(loss)
    print("KERNEL_OK")
</pallas_src>

<mosaic_0001>
module attributes {stable_mosaic.version = 11 : i64} {
  func.func @_forward_kernel(%arg0: i32, %arg1: memref<256x128xbf16, #tpu.memory_space<vmem>>, %arg2: memref<128x64xbf16, #tpu.memory_space<vmem>>, %arg3: memref<1x64xf32, #tpu.memory_space<vmem>>, %arg4: memref<9x64x64xbf16, #tpu.memory_space<vmem>>, %arg5: memref<1x64xf32, #tpu.memory_space<vmem>>, %arg6: memref<64x256xbf16, #tpu.memory_space<vmem>>, %arg7: memref<1x256xf32, #tpu.memory_space<vmem>>, %arg8: memref<128x256xbf16, #tpu.memory_space<vmem>>, %arg9: memref<1x256xf32, #tpu.memory_space<vmem>>, %arg10: memref<256x64xbf16, #tpu.memory_space<vmem>>, %arg11: memref<1x64xf32, #tpu.memory_space<vmem>>, %arg12: memref<9x64x64xbf16, #tpu.memory_space<vmem>>, %arg13: memref<1x64xf32, #tpu.memory_space<vmem>>, %arg14: memref<64x256xbf16, #tpu.memory_space<vmem>>, %arg15: memref<1x256xf32, #tpu.memory_space<vmem>>, %arg16: memref<256x64xbf16, #tpu.memory_space<vmem>>, %arg17: memref<1x64xf32, #tpu.memory_space<vmem>>, %arg18: memref<9x64x64xbf16, #tpu.memory_space<vmem>>, %arg19: memref<1x64xf32, #tpu.memory_space<vmem>>, %arg20: memref<64x256xbf16, #tpu.memory_space<vmem>>, %arg21: memref<1x256xf32, #tpu.memory_space<vmem>>, %arg22: memref<9x256x256xbf16, #tpu.memory_space<vmem>>, %arg23: memref<1x256xf32, #tpu.memory_space<vmem>>, %arg24: memref<256x18xbf16, #tpu.memory_space<vmem>>, %arg25: memref<1x18xf32, #tpu.memory_space<vmem>>, %arg26: memref<9x64x256xbf16, #tpu.memory_space<vmem>>, %arg27: memref<64x256xbf16, #tpu.memory_space<vmem>>, %arg28: memref<9x64x64xbf16, #tpu.memory_space<vmem>>, %arg29: memref<9x16x64xbf16, #tpu.memory_space<vmem>>, %arg30: memref<4x16xbf16, #tpu.memory_space<vmem>>, %arg31: memref<1x4x18xf32, #tpu.memory_space<vmem>>) attributes {dimension_semantics = [#tpu.dimension_semantics<parallel>], iteration_bounds = array<i64: 2>, scalar_prefetch = 0 : i64, scratch_operands = 0 : i64, tpu.core_type = #tpu.core_type<tc>, window_params = [{transform_indices = @transform_0, window_bounds = array<i64: 256, 128>}, {pipeline_mode = #tpu.pipeline_mode<synchronous>, transform_indices = @transform_1, window_bounds = array<i64: 128, 64>}, {pipeline_mode = #tpu.pipeline_mode<synchronous>, transform_indices = @transform_2, window_bounds = array<i64: 1, 64>}, {pipeline_mode = #tpu.pipeline_mode<synchronous>, transform_indices = @transform_3, window_bounds = array<i64: 9, 64, 64>}, {pipeline_mode = #tpu.pipeline_mode<synchronous>, transform_indices = @transform_4, window_bounds = array<i64: 1, 64>}, {pipeline_mode = #tpu.pipeline_mode<synchronous>, transform_indices = @transform_5, window_bounds = array<i64: 64, 256>}, {pipeline_mode = #tpu.pipeline_mode<synchronous>, transform_indices = @transform_6, window_bounds = array<i64: 1, 256>}, {pipeline_mode = #tpu.pipeline_mode<synchronous>, transform_indices = @transform_7, window_bounds = array<i64: 128, 256>}, {pipeline_mode = #tpu.pipeline_mode<synchronous>, transform_indices = @transform_8, window_bounds = array<i64: 1, 256>}, {pipeline_mode = #tpu.pipeline_mode<synchronous>, transform_indices = @transform_9, window_bounds = array<i64: 256, 64>}, {pipeline_mode = #tpu.pipeline_mode<synchronous>, transform_indices = @transform_10, window_bounds = array<i64: 1, 64>}, {pipeline_mode = #tpu.pipeline_mode<synchronous>, transform_indices = @transform_11, window_bounds = array<i64: 9, 64, 64>}, {pipeline_mode = #tpu.pipeline_mode<synchronous>, transform_indices = @transform_12, window_bounds = array<i64: 1, 64>}, {pipeline_mode = #tpu.pipeline_mode<synchronous>, transform_indices = @transform_13, window_bounds = array<i64: 64, 256>}, {pipeline_mode = #tpu.pipeline_mode<synchronous>, transform_indices = @transform_14, window_bounds = array<i64: 1, 256>}, {pipeline_mode = #tpu.pipeline_mode<synchronous>, transform_indices = @transform_15, window_bounds = array<i64: 256, 64>}, {pipeline_mode = #tpu.pipeline_mode<synchronous>, transform_indices = @transform_16, window_bounds = array<i64: 1, 64>}, {pipeline_mode = #tpu.pipeline_mode<synchronous>, transform_indices = @transform_17, window_bounds = array<i64: 9, 64, 64>}, {pipeline_mode = #tpu.pipeline_mode<synchronous>, transform_indices = @transform_18, window_bounds = array<i64: 1, 64>}, {pipeline_mode = #tpu.pipeline_mode<synchronous>, transform_indices = @transform_19, window_bounds = array<i64: 64, 256>}, {pipeline_mode = #tpu.pipeline_mode<synchronous>, transform_indices = @transform_20, window_bounds = array<i64: 1, 256>}, {pipeline_mode = #tpu.pipeline_mode<synchronous>, transform_indices = @transform_21, window_bounds = array<i64: 9, 256, 256>}, {pipeline_mode = #tpu.pipeline_mode<synchronous>, transform_indices = @transform_22, window_bounds = array<i64: 1, 256>}, {pipeline_mode = #tpu.pipeline_mode<synchronous>, transform_indices = @transform_23, window_bounds = array<i64: 256, 18>}, {pipeline_mode = #tpu.pipeline_mode<synchronous>, transform_indices = @transform_24, window_bounds = array<i64: 1, 18>}, {pipeline_mode = #tpu.pipeline_mode<synchronous>, transform_indices = @transform_25, window_bounds = array<i64: 9, 64, 256>}, {pipeline_mode = #tpu.pipeline_mode<synchronous>, transform_indices = @transform_26, window_bounds = array<i64: 64, 256>}, {pipeline_mode = #tpu.pipeline_mode<synchronous>, transform_indices = @transform_27, window_bounds = array<i64: 9, 64, 64>}, {pipeline_mode = #tpu.pipeline_mode<synchronous>, transform_indices = @transform_28, window_bounds = array<i64: 9, 16, 64>}, {pipeline_mode = #tpu.pipeline_mode<synchronous>, transform_indices = @transform_29, window_bounds = array<i64: 4, 16>}, {transform_indices = @transform_30, window_bounds = array<i64: 1, 4, 18>}]} {
    %c0 = arith.constant 0 : index
    %c0_0 = arith.constant 0 : index
    %0 = vector.load %arg1[%c0, %c0_0] : memref<256x128xbf16, #tpu.memory_space<vmem>>, vector<256x128xbf16>
    %c0_1 = arith.constant 0 : index
    %c0_2 = arith.constant 0 : index
    %1 = vector.load %arg27[%c0_1, %c0_2] : memref<64x256xbf16, #tpu.memory_space<vmem>>, vector<64x256xbf16>
    %cst = arith.constant dense<0.000000e+00> : vector<64x128xf32>
    %2 = tpu.matmul %1, %0, %cst {dimension_numbers = #tpu.dot_dimension_numbers<[1], [0], [0], [1], [0, 0, 1, 1], [], []>} : vector<64x256xbf16>, vector<256x128xbf16>, vector<64x128xf32> -> vector<64x128xf32>
    %3 = arith.truncf %2 : vector<64x128xf32> to vector<64x128xbf16>
    %c0_3 = arith.constant 0 : index
    %c0_4 = arith.constant 0 : index
    %4 = vector.load %arg8[%c0_3, %c0_4] : memref<128x256xbf16, #tpu.memory_space<vmem>>, vector<128x256xbf16>
    %cst_5 = arith.constant dense<0.000000e+00> : vector<64x256xf32>
    %5 = tpu.matmul %3, %4, %cst_5 {dimension_numbers = #tpu.dot_dimension_numbers<[1], [0], [0], [1], [0, 0, 1, 1], [], []>} : vector<64x128xbf16>, vector<128x256xbf16>, vector<64x256xf32> -> vector<64x256xf32>
    %c0_6 = arith.constant 0 : index
    %c0_7 = arith.constant 0 : index
    %6 = vector.load %arg9[%c0_6, %c0_7] : memref<1x256xf32, #tpu.memory_space<vmem>>, vector<1x256xf32>
    %7 = vector.broadcast %6 : vector<1x256xf32> to vector<64x256xf32>
    %8 = arith.addf %5, %7 : vector<64x256xf32>
    %c0_8 = arith.constant 0 : index
    %c0_9 = arith.constant 0 : index
    %9 = vector.load %arg2[%c0_8, %c0_9] : memref<128x64xbf16, #tpu.memory_space<vmem>>, vector<128x64xbf16>
    %cst_10 = arith.constant dense<0.000000e+00> : vector<256x64xf32>
    %10 = tpu.matmul %0, %9, %cst_10 {dimension_numbers = #tpu.dot_dimension_numbers<[1], [0], [0], [1], [0, 0, 1, 1], [], []>} : vector<256x128xbf16>, vector<128x64xbf16>, vector<256x64xf32> -> vector<256x64xf32>
    %c0_11 = arith.constant 0 : index
    %c0_12 = arith.constant 0 : index
    %11 = vector.load %arg3[%c0_11, %c0_12] : memref<1x64xf32, #tpu.memory_space<vmem>>, vector<1x64xf32>
    %12 = vector.broadcast %11 : vector<1x64xf32> to vector<256x64xf32>
    %13 = arith.addf %10, %12 : vector<256x64xf32>
    %cst_13 = arith.constant 0.000000e+00 : f32
    %14 = vector.broadcast %cst_13 : f32 to vector<256x64xf32>
    %15 = arith.maximumf %13, %14 : vector<256x64xf32>
    %16 = arith.truncf %15 : vector<256x64xf32> to vector<256x64xbf16>
    %cst_14 = arith.constant 0.000000e+00 : f32
    %17 = vector.broadcast %cst_14 : f32 to vector<64x64xf32>
    %c0_15 = arith.constant 0 : index
    %c0_16 = arith.constant 0 : index
    %c0_17 = arith.constant 0 : index
    %18 = vector.load %arg26[%c0_15, %c0_16, %c0_17] : memref<9x64x256xbf16, #tpu.memory_space<vmem>>, vector<1x64x256xbf16>
    %19 = vector.shape_cast %18 : vector<1x64x256xbf16> to vector<64x256xbf16>
    %cst_18 = arith.constant dense<0.000000e+00> : vector<64x64xf32>
    %20 = tpu.matmul %19, %16, %cst_18 {dimension_numbers = #tpu.dot_dimension_numbers<[1], [0], [0], [1], [0, 0, 1, 1], [], []>} : vector<64x256xbf16>, vector<256x64xbf16>, vector<64x64xf32> -> vector<64x64xf32>
    %21 = arith.truncf %20 : vector<64x64xf32> to vector<64x64xbf16>
    %c0_19 = arith.constant 0 : index
    %c0_20 = arith.constant 0 : index
    %c0_21 = arith.constant 0 : index
    %22 = vector.load %arg4[%c0_19, %c0_20, %c0_21] : memref<9x64x64xbf16, #tpu.memory_space<vmem>>, vector<1x64x64xbf16>
    %23 = vector.shape_cast %22 : vector<1x64x64xbf16> to vector<64x64xbf16>
    %cst_22 = arith.constant dense<0.000000e+00> : vector<64x64xf32>
    %24 = tpu.matmul %21, %23, %cst_22 {dimension_numbers = #tpu.dot_dimension_numbers<[1], [0], [0], [1], [0, 0, 1, 1], [], []>} : vector<64x64xbf16>, vector<64x64xbf16>, vector<64x64xf32> -> vector<64x64xf32>
    %25 = arith.addf %17, %24 : vector<64x64xf32>
    %c1 = arith.constant 1 : index
    %c0_23 = arith.constant 0 : index
    %c0_24 = arith.constant 0 : index
    %26 = vector.load %arg26[%c1, %c0_23, %c0_24] : memref<9x64x256xbf16, #tpu.memory_space<vmem>>, vector<1x64x256xbf16>
    %27 = vector.shape_cast %26 : vector<1x64x256xbf16> to vector<64x256xbf16>
    %cst_25 = arith.constant dense<0.000000e+00> : vector<64x64xf32>
    %28 = tpu.matmul %27, %16, %cst_25 {dimension_numbers = #tpu.dot_dimension_numbers<[1], [0], [0], [1], [0, 0, 1, 1], [], []>} : vector<64x256xbf16>, vector<256x64xbf16>, vector<64x64xf32> -> vector<64x64xf32>
    %29 = arith.truncf %28 : vector<64x64xf32> to vector<64x64xbf16>
    %c1_26 = arith.constant 1 : index
    %c0_27 = arith.constant 0 : index
    %c0_28 = arith.constant 0 : index
    %30 = vector.load %arg4[%c1_26, %c0_27, %c0_28] : memref<9x64x64xbf16, #tpu.memory_space<vmem>>, vector<1x64x64xbf16>
    %31 = vector.shape_cast %30 : vector<1x64x64xbf16> to vector<64x64xbf16>
    %cst_29 = arith.constant dense<0.000000e+00> : vector<64x64xf32>
    %32 = tpu.matmul %29, %31, %cst_29 {dimension_numbers = #tpu.dot_dimension_numbers<[1], [0], [0], [1], [0, 0, 1, 1], [], []>} : vector<64x64xbf16>, vector<64x64xbf16>, vector<64x64xf32> -> vector<64x64xf32>
    %33 = arith.addf %25, %32 : vector<64x64xf32>
    %c2 = arith.constant 2 : index
    %c0_30 = arith.constant 0 : index
    %c0_31 = arith.constant 0 : index
    %34 = vector.load %arg26[%c2, %c0_30, %c0_31] : memref<9x64x256xbf16, #tpu.memory_space<vmem>>, vector<1x64x256xbf16>
    %35 = vector.shape_cast %34 : vector<1x64x256xbf16> to vector<64x256xbf16>
    %cst_32 = arith.constant dense<0.000000e+00> : vector<64x64xf32>
    %36 = tpu.matmul %35, %16, %cst_32 {dimension_numbers = #tpu.dot_dimension_numbers<[1], [0], [0], [1], [0, 0, 1, 1], [], []>} : vector<64x256xbf16>, vector<256x64xbf16>, vector<64x64xf32> -> vector<64x64xf32>
    %37 = arith.truncf %36 : vector<64x64xf32> to vector<64x64xbf16>
    %c2_33 = arith.constant 2 : index
    %c0_34 = arith.constant 0 : index
    %c0_35 = arith.constant 0 : index
    %38 = vector.load %arg4[%c2_33, %c0_34, %c0_35] : memref<9x64x64xbf16, #tpu.memory_space<vmem>>, vector<1x64x64xbf16>
    %39 = vector.shape_cast %38 : vector<1x64x64xbf16> to vector<64x64xbf16>
    %cst_36 = arith.constant dense<0.000000e+00> : vector<64x64xf32>
    %40 = tpu.matmul %37, %39, %cst_36 {dimension_numbers = #tpu.dot_dimension_numbers<[1], [0], [0], [1], [0, 0, 1, 1], [], []>} : vector<64x64xbf16>, vector<64x64xbf16>, vector<64x64xf32> -> vector<64x64xf32>
    %41 = arith.addf %33, %40 : vector<64x64xf32>
    %c3 = arith.constant 3 : index
    %c0_37 = arith.constant 0 : index
    %c0_38 = arith.constant 0 : index
    %42 = vector.load %arg26[%c3, %c0_37, %c0_38] : memref<9x64x256xbf16, #tpu.memory_space<vmem>>, vector<1x64x256xbf16>
    %43 = vector.shape_cast %42 : vector<1x64x256xbf16> to vector<64x256xbf16>
    %cst_39 = arith.constant dense<0.000000e+00> : vector<64x64xf32>
    %44 = tpu.matmul %43, %16, %cst_39 {dimension_numbers = #tpu.dot_dimension_numbers<[1], [0], [0], [1], [0, 0, 1, 1], [], []>} : vector<64x256xbf16>, vector<256x64xbf16>, vector<64x64xf32> -> vector<64x64xf32>
    %45 = arith.truncf %44 : vector<64x64xf32> to vector<64x64xbf16>
    %c3_40 = arith.constant 3 : index
    %c0_41 = arith.constant 0 : index
    %c0_42 = arith.constant 0 : index
    %46 = vector.load %arg4[%c3_40, %c0_41, %c0_42] : memref<9x64x64xbf16, #tpu.memory_space<vmem>>, vector<1x64x64xbf16>
    %47 = vector.shape_cast %46 : vector<1x64x64xbf16> to vector<64x64xbf16>
    %cst_43 = arith.constant dense<0.000000e+00> : vector<64x64xf32>
    %48 = tpu.matmul %45, %47, %cst_43 {dimension_numbers = #tpu.dot_dimension_numbers<[1], [0], [0], [1], [0, 0, 1, 1], [], []>} : vector<64x64xbf16>, vector<64x64xbf16>, vector<64x64xf32> -> vector<64x64xf32>
    %49 = arith.addf %41, %48 : vector<64x64xf32>
    %c4 = arith.constant 4 : index
    %c0_44 = arith.constant 0 : index
    %c0_45 = arith.constant 0 : index
    %50 = vector.load %arg26[%c4, %c0_44, %c0_45] : memref<9x64x256xbf16, #tpu.memory_space<vmem>>, vector<1x64x256xbf16>
    %51 = vector.shape_cast %50 : vector<1x64x256xbf16> to vector<64x256xbf16>
    %cst_46 = arith.constant dense<0.000000e+00> : vector<64x64xf32>
    %52 = tpu.matmul %51, %16, %cst_46 {dimension_numbers = #tpu.dot_dimension_numbers<[1], [0], [0], [1], [0, 0, 1, 1], [], []>} : vector<64x256xbf16>, vector<256x64xbf16>, vector<64x64xf32> -> vector<64x64xf32>
    %53 = arith.truncf %52 : vector<64x64xf32> to vector<64x64xbf16>
    %c4_47 = arith.constant 4 : index
    %c0_48 = arith.constant 0 : index
    %c0_49 = arith.constant 0 : index
    %54 = vector.load %arg4[%c4_47, %c0_48, %c0_49] : memref<9x64x64xbf16, #tpu.memory_space<vmem>>, vector<1x64x64xbf16>
    %55 = vector.shape_cast %54 : vector<1x64x64xbf16> to vector<64x64xbf16>
    %cst_50 = arith.constant dense<0.000000e+00> : vector<64x64xf32>
    %56 = tpu.matmul %53, %55, %cst_50 {dimension_numbers = #tpu.dot_dimension_numbers<[1], [0], [0], [1], [0, 0, 1, 1], [], []>} : vector<64x64xbf16>, vector<64x64xbf16>, vector<64x64xf32> -> vector<64x64xf32>
    %57 = arith.addf %49, %56 : vector<64x64xf32>
    %c5 = arith.constant 5 : index
    %c0_51 = arith.constant 0 : index
    %c0_52 = arith.constant 0 : index
    %58 = vector.load %arg26[%c5, %c0_51, %c0_52] : memref<9x64x256xbf16, #tpu.memory_space<vmem>>, vector<1x64x256xbf16>
    %59 = vector.shape_cast %58 : vector<1x64x256xbf16> to vector<64x256xbf16>
    %cst_53 = arith.constant dense<0.000000e+00> : vector<64x64xf32>
    %60 = tpu.matmul %59, %16, %cst_53 {dimension_numbers = #tpu.dot_dimension_numbers<[1], [0], [0], [1], [0, 0, 1, 1], [], []>} : vector<64x256xbf16>, vector<256x64xbf16>, vector<64x64xf32> -> vector<64x64xf32>
    %61 = arith.truncf %60 : vector<64x64xf32> to vector<64x64xbf16>
    %c5_54 = arith.constant 5 : index
    %c0_55 = arith.constant 0 : index
    %c0_56 = arith.constant 0 : index
    %62 = vector.load %arg4[%c5_54, %c0_55, %c0_56] : memref<9x64x64xbf16, #tpu.memory_space<vmem>>, vector<1x64x64xbf16>
    %63 = vector.shape_cast %62 : vector<1x64x64xbf16> to vector<64x64xbf16>
    %cst_57 = arith.constant dense<0.000000e+00> : vector<64x64xf32>
    %64 = tpu.matmul %61, %63, %cst_57 {dimension_numbers = #tpu.dot_dimension_numbers<[1], [0], [0], [1], [0, 0, 1, 1], [], []>} : vector<64x64xbf16>, vector<64x64xbf16>, vector<64x64xf32> -> vector<64x64xf32>
    %65 = arith.addf %57, %64 : vector<64x64xf32>
    %c6 = arith.constant 6 : index
    %c0_58 = arith.constant 0 : index
    %c0_59 = arith.constant 0 : index
    %66 = vector.load %arg26[%c6, %c0_58, %c0_59] : memref<9x64x256xbf16, #tpu.memory_space<vmem>>, vector<1x64x256xbf16>
    %67 = vector.shape_cast %66 : vector<1x64x256xbf16> to vector<64x256xbf16>
    %cst_60 = arith.constant dense<0.000000e+00> : vector<64x64xf32>
    %68 = tpu.matmul %67, %16, %cst_60 {dimension_numbers = #tpu.dot_dimension_numbers<[1], [0], [0], [1], [0, 0, 1, 1], [], []>} : vector<64x256xbf16>, vector<256x64xbf16>, vector<64x64xf32> -> vector<64x64xf32>
    %69 = arith.truncf %68 : vector<64x64xf32> to vector<64x64xbf16>
    %c6_61 = arith.constant 6 : index
    %c0_62 = arith.constant 0 : index
    %c0_63 = arith.constant 0 : index
    %70 = vector.load %arg4[%c6_61, %c0_62, %c0_63] : memref<9x64x64xbf16, #tpu.memory_space<vmem>>, vector<1x64x64xbf16>
    %71 = vector.shape_cast %70 : vector<1x64x64xbf16> to vector<64x64xbf16>
    %cst_64 = arith.constant dense<0.000000e+00> : vector<64x64xf32>
    %72 = tpu.matmul %69, %71, %cst_64 {dimension_numbers = #tpu.dot_dimension_numbers<[1], [0], [0], [1], [0, 0, 1, 1], [], []>} : vector<64x64xbf16>, vector<64x64xbf16>, vector<64x64xf32> -> vector<64x64xf32>
    %73 = arith.addf %65, %72 : vector<64x64xf32>
    %c7 = arith.constant 7 : index
    %c0_65 = arith.constant 0 : index
    %c0_66 = arith.constant 0 : index
    %74 = vector.load %arg26[%c7, %c0_65, %c0_66] : memref<9x64x256xbf16, #tpu.memory_space<vmem>>, vector<1x64x256xbf16>
    %75 = vector.shape_cast %74 : vector<1x64x256xbf16> to vector<64x256xbf16>
    %cst_67 = arith.constant dense<0.000000e+00> : vector<64x64xf32>
    %76 = tpu.matmul %75, %16, %cst_67 {dimension_numbers = #tpu.dot_dimension_numbers<[1], [0], [0], [1], [0, 0, 1, 1], [], []>} : vector<64x256xbf16>, vector<256x64xbf16>, vector<64x64xf32> -> vector<64x64xf32>
    %77 = arith.truncf %76 : vector<64x64xf32> to vector<64x64xbf16>
    %c7_68 = arith.constant 7 : index
    %c0_69 = arith.constant 0 : index
    %c0_70 = arith.constant 0 : index
    %78 = vector.load %arg4[%c7_68, %c0_69, %c0_70] : memref<9x64x64xbf16, #tpu.memory_space<vmem>>, vector<1x64x64xbf16>
    %79 = vector.shape_cast %78 : vector<1x64x64xbf16> to vector<64x64xbf16>
    %cst_71 = arith.constant dense<0.000000e+00> : vector<64x64xf32>
    %80 = tpu.matmul %77, %79, %cst_71 {dimension_numbers = #tpu.dot_dimension_numbers<[1], [0], [0], [1], [0, 0, 1, 1], [], []>} : vector<64x64xbf16>, vector<64x64xbf16>, vector<64x64xf32> -> vector<64x64xf32>
    %81 = arith.addf %73, %80 : vector<64x64xf32>
    %c8 = arith.constant 8 : index
    %c0_72 = arith.constant 0 : index
    %c0_73 = arith.constant 0 : index
    %82 = vector.load %arg26[%c8, %c0_72, %c0_73] : memref<9x64x256xbf16, #tpu.memory_space<vmem>>, vector<1x64x256xbf16>
    %83 = vector.shape_cast %82 : vector<1x64x256xbf16> to vector<64x256xbf16>
    %cst_74 = arith.constant dense<0.000000e+00> : vector<64x64xf32>
    %84 = tpu.matmul %83, %16, %cst_74 {dimension_numbers = #tpu.dot_dimension_numbers<[1], [0], [0], [1], [0, 0, 1, 1], [], []>} : vector<64x256xbf16>, vector<256x64xbf16>, vector<64x64xf32> -> vector<64x64xf32>
    %85 = arith.truncf %84 : vector<64x64xf32> to vector<64x64xbf16>
    %c8_75 = arith.constant 8 : index
    %c0_76 = arith.constant 0 : index
    %c0_77 = arith.constant 0 : index
    %86 = vector.load %arg4[%c8_75, %c0_76, %c0_77] : memref<9x64x64xbf16, #tpu.memory_space<vmem>>, vector<1x64x64xbf16>
    %87 = vector.shape_cast %86 : vector<1x64x64xbf16> to vector<64x64xbf16>
    %cst_78 = arith.constant dense<0.000000e+00> : vector<64x64xf32>
    %88 = tpu.matmul %85, %87, %cst_78 {dimension_numbers = #tpu.dot_dimension_numbers<[1], [0], [0], [1], [0, 0, 1, 1], [], []>} : vector<64x64xbf16>, vector<64x64xbf16>, vector<64x64xf32> -> vector<64x64xf32>
    %89 = arith.addf %81, %88 : vector<64x64xf32>
    %c0_79 = arith.constant 0 : index
    %c0_80 = arith.constant 0 : index
    %90 = vector.load %arg5[%c0_79, %c0_80] : memref<1x64xf32, #tpu.memory_space<vmem>>, vector<1x64xf32>
    %91 = vector.broadcast %90 : vector<1x64xf32> to vector<64x64xf32>
    %92 = arith.addf %89, %91 : vector<64x64xf32>
    %cst_81 = arith.constant 0.000000e+00 : f32
    %93 = vector.broadcast %cst_81 : f32 to vector<64x64xf32>
    %94 = arith.maximumf %92, %93 : vector<64x64xf32>
    %95 = arith.truncf %94 : vector<64x64xf32> to vector<64x64xbf16>
    %c0_82 = arith.constant 0 : index
    %c0_83 = arith.constant 0 : index
    %96 = vector.load %arg6[%c0_82, %c0_83] : memref<64x256xbf16, #tpu.memory_space<vmem>>, vector<64x256xbf16>
    %cst_84 = arith.constant dense<0.000000e+00> : vector<64x256xf32>
    %97 = tpu.matmul %95, %96, %cst_84 {dimension_numbers = #tpu.dot_dimension_numbers<[1], [0], [0], [1], [0, 0, 1, 1], [], []>} : vector<64x64xbf16>, vector<64x256xbf16>, vector<64x256xf32> -> vector<64x256xf32>
    %c0_85 = arith.constant 0 : index
    %c0_86 = arith.constant 0 : index
    %98 = vector.load %arg7[%c0_85, %c0_86] : memref<1x256xf32, #tpu.memory_space<vmem>>, vector<1x256xf32>
    %99 = vector.broadcast %98 : vector<1x256xf32> to vector<64x256xf32>
    %100 = arith.addf %97, %99 : vector<64x256xf32>
    %101 = arith.addf %100, %8 : vector<64x256xf32>
    %cst_87 = arith.constant 0.000000e+00 : f32
    %102 = vector.broadcast %cst_87 : f32 to vector<64x256xf32>
    %103 = arith.maximumf %101, %102 : vector<64x256xf32>
    %104 = arith.truncf %103 : vector<64x256xf32> to vector<64x256xbf16>
    %105 = arith.extf %104 : vector<64x256xbf16> to vector<64x256xf32>
    %c0_88 = arith.constant 0 : index
    %c0_89 = arith.constant 0 : index
    %106 = vector.load %arg10[%c0_88, %c0_89] : memref<256x64xbf16, #tpu.memory_space<vmem>>, vector<256x64xbf16>
    %cst_90 = arith.constant dense<0.000000e+00> : vector<64x64xf32>
    %107 = tpu.matmul %104, %106, %cst_90 {dimension_numbers = #tpu.dot_dimension_numbers<[1], [0], [0], [1], [0, 0, 1, 1], [], []>} : vector<64x256xbf16>, vector<256x64xbf16>, vector<64x64xf32> -> vector<64x64xf32>
    %c0_91 = arith.constant 0 : index
    %c0_92 = arith.constant 0 : index
    %108 = vector.load %arg11[%c0_91, %c0_92] : memref<1x64xf32, #tpu.memory_space<vmem>>, vector<1x64xf32>
    %109 = vector.broadcast %108 : vector<1x64xf32> to vector<64x64xf32>
    %110 = arith.addf %107, %109 : vector<64x64xf32>
    %cst_93 = arith.constant 0.000000e+00 : f32
    %111 = vector.broadcast %cst_93 : f32 to vector<64x64xf32>
    %112 = arith.maximumf %110, %111 : vector<64x64xf32>
    %113 = arith.truncf %112 : vector<64x64xf32> to vector<64x64xbf16>
    %cst_94 = arith.constant 0.000000e+00 : f32
    %114 = vector.broadcast %cst_94 : f32 to vector<64x64xf32>
    %c0_95 = arith.constant 0 : index
    %c0_96 = arith.constant 0 : index
    %c0_97 = arith.constant 0 : index
    %115 = vector.load %arg28[%c0_95, %c0_96, %c0_97] : memref<9x64x64xbf16, #tpu.memory_space<vmem>>, vector<1x64x64xbf16>
    %116 = vector.shape_cast %115 : vector<1x64x64xbf16> to vector<64x64xbf16>
    %cst_98 = arith.constant dense<0.000000e+00> : vector<64x64xf32>
    %117 = tpu.matmul %116, %113, %cst_98 {dimension_numbers = #tpu.dot_dimension_numbers<[1], [0], [0], [1], [0, 0, 1, 1], [], []>} : vector<64x64xbf16>, vector<64x64xbf16>, vector<64x64xf32> -> vector<64x64xf32>
    %118 = arith.truncf %117 : vector<64x64xf32> to vector<64x64xbf16>
    %c0_99 = arith.constant 0 : index
    %c0_100 = arith.constant 0 : index
    %c0_101 = arith.constant 0 : index
    %119 = vector.load %arg12[%c0_99, %c0_100, %c0_101] : memref<9x64x64xbf16, #tpu.memory_space<vmem>>, vector<1x64x64xbf16>
    %120 = vector.shape_cast %119 : vector<1x64x64xbf16> to vector<64x64xbf16>
    %cst_102 = arith.constant dense<0.000000e+00> : vector<64x64xf32>
    %121 = tpu.matmul %118, %120, %cst_102 {dimension_numbers = #tpu.dot_dimension_numbers<[1], [0], [0], [1], [0, 0, 1, 1], [], []>} : vector<64x64xbf16>, vector<64x64xbf16>, vector<64x64xf32> -> vector<64x64xf32>
    %122 = arith.addf %114, %121 : vector<64x64xf32>
    %c1_103 = arith.constant 1 : index
    %c0_104 = arith.constant 0 : index
    %c0_105 = arith.constant 0 : index
    %123 = vector.load %arg28[%c1_103, %c0_104, %c0_105] : memref<9x64x64xbf16, #tpu.memory_space<vmem>>, vector<1x64x64xbf16>
    %124 = vector.shape_cast %123 : vector<1x64x64xbf16> to vector<64x64xbf16>
    %cst_106 = arith.constant dense<0.000000e+00> : vector<64x64xf32>
    %125 = tpu.matmul %124, %113, %cst_106 {dimension_numbers = #tpu.dot_dimension_numbers<[1], [0], [0], [1], [0, 0, 1, 1], [], []>} : vector<64x64xbf16>, vector<64x64xbf16>, vector<64x64xf32> -> vector<64x64xf32>
    %126 = arith.truncf %125 : vector<64x64xf32> to vector<64x64xbf16>
    %c1_107 = arith.constant 1 : index
    %c0_108 = arith.constant 0 : index
    %c0_109 = arith.constant 0 : index
    %127 = vector.load %arg12[%c1_107, %c0_108, %c0_109] : memref<9x64x64xbf16, #tpu.memory_space<vmem>>, vector<1x64x64xbf16>
    %128 = vector.shape_cast %127 : vector<1x64x64xbf16> to vector<64x64xbf16>
    %cst_110 = arith.constant dense<0.000000e+00> : vector<64x64xf32>
    %129 = tpu.matmul %126, %128, %cst_110 {dimension_numbers = #tpu.dot_dimension_numbers<[1], [0], [0], [1], [0, 0, 1, 1], [], []>} : vector<64x64xbf16>, vector<64x64xbf16>, vector<64x64xf32> -> vector<64x64xf32>
    %130 = arith.addf %122, %129 : vector<64x64xf32>
    %c2_111 = arith.constant 2 : index
    %c0_112 = arith.constant 0 : index
    %c0_113 = arith.constant 0 : index
    %131 = vector.load %arg28[%c2_111, %c0_112, %c0_113] : memref<9x64x64xbf16, #tpu.memory_space<vmem>>, vector<1x64x64xbf16>
    %132 = vector.shape_cast %131 : vector<1x64x64xbf16> to vector<64x64xbf16>
    %cst_114 = arith.constant dense<0.000000e+00> : vector<64x64xf32>
    %133 = tpu.matmul %132, %113, %cst_114 {dimension_numbers = #tpu.dot_dimension_numbers<[1], [0], [0], [1], [0, 0, 1, 1], [], []>} : vector<64x64xbf16>, vector<64x64xbf16>, vector<64x64xf32> -> vector<64x64xf32>
    %134 = arith.truncf %133 : vector<64x64xf32> to vector<64x64xbf16>
    %c2_115 = arith.constant 2 : index
    %c0_116 = arith.constant 0 : index
    %c0_117 = arith.constant 0 : index
    %135 = vector.load %arg12[%c2_115, %c0_116, %c0_117] : memref<9x64x64xbf16, #tpu.memory_space<vmem>>, vector<1x64x64xbf16>
    %136 = vector.shape_cast %135 : vector<1x64x64xbf16> to vector<64x64xbf16>
    %cst_118 = arith.constant dense<0.000000e+00> : vector<64x64xf32>
    %137 = tpu.matmul %134, %136, %cst_118 {dimension_numbers = #tpu.dot_dimension_numbers<[1], [0], [0], [1], [0, 0, 1, 1], [], []>} : vector<64x64xbf16>, vector<64x64xbf16>, vector<64x64xf32> -> vector<64x64xf32>
    %138 = arith.addf %130, %137 : vector<64x64xf32>
    %c3_119 = arith.constant 3 : index
    %c0_120 = arith.constant 0 : index
    %c0_121 = arith.constant 0 : index
    %139 = vector.load %arg28[%c3_119, %c0_120, %c0_121] : memref<9x64x64xbf16, #tpu.memory_space<vmem>>, vector<1x64x64xbf16>
    %140 = vector.shape_cast %139 : vector<1x64x64xbf16> to vector<64x64xbf16>
    %cst_122 = arith.constant dense<0.000000e+00> : vector<64x64xf32>
    %141 = tpu.matmul %140, %113, %cst_122 {dimension_numbers = #tpu.dot_dimension_numbers<[1], [0], [0], [1], [0, 0, 1, 1], [], []>} : vector<64x64xbf16>, vector<64x64xbf16>, vector<64x64xf32> -> vector<64x64xf32>
    %142 = arith.truncf %141 : vector<64x64xf32> to vector<64x64xbf16>
    %c3_123 = arith.constant 3 : index
    %c0_124 = arith.constant 0 : index
    %c0_125 = arith.constant 0 : index
    %143 = vector.load %arg12[%c3_123, %c0_124, %c0_125] : memref<9x64x64xbf16, #tpu.memory_space<vmem>>, vector<1x64x64xbf16>
    %144 = vector.shape_cast %143 : vector<1x64x64xbf16> to vector<64x64xbf16>
    %cst_126 = arith.constant dense<0.000000e+00> : vector<64x64xf32>
    %145 = tpu.matmul %142, %144, %cst_126 {dimension_numbers = #tpu.dot_dimension_numbers<[1], [0], [0], [1], [0, 0, 1, 1], [], []>} : vector<64x64xbf16>, vector<64x64xbf16>, vector<64x64xf32> -> vector<64x64xf32>
    %146 = arith.addf %138, %145 : vector<64x64xf32>
    %c4_127 = arith.constant 4 : index
    %c0_128 = arith.constant 0 : index
    %c0_129 = arith.constant 0 : index
    %147 = vector.load %arg28[%c4_127, %c0_128, %c0_129] : memref<9x64x64xbf16, #tpu.memory_space<vmem>>, vector<1x64x64xbf16>
    %148 = vector.shape_cast %147 : vector<1x64x64xbf16> to vector<64x64xbf16>
    %cst_130 = arith.constant dense<0.000000e+00> : vector<64x64xf32>
    %149 = tpu.matmul %148, %113, %cst_130 {dimension_numbers = #tpu.dot_dimension_numbers<[1], [0], [0], [1], [0, 0, 1, 1], [], []>} : vector<64x64xbf16>, vector<64x64xbf16>, vector<64x64xf32> -> vector<64x64xf32>
    %150 = arith.truncf %149 : vector<64x64xf32> to vector<64x64xbf16>
    %c4_131 = arith.constant 4 : index
    %c0_132 = arith.constant 0 : index
    %c0_133 = arith.constant 0 : index
    %151 = vector.load %arg12[%c4_131, %c0_132, %c0_133] : memref<9x64x64xbf16, #tpu.memory_space<vmem>>, vector<1x64x64xbf16>
    %152 = vector.shape_cast %151 : vector<1x64x64xbf16> to vector<64x64xbf16>
    %cst_134 = arith.constant dense<0.000000e+00> : vector<64x64xf32>
    %153 = tpu.matmul %150, %152, %cst_134 {dimension_numbers = #tpu.dot_dimension_numbers<[1], [0], [0], [1], [0, 0, 1, 1], [], []>} : vector<64x64xbf16>, vector<64x64xbf16>, vector<64x64xf32> -> vector<64x64xf32>
    %154 = arith.addf %146, %153 : vector<64x64xf32>
    %c5_135 = arith.constant 5 : index
    %c0_136 = arith.constant 0 : index
    %c0_137 = arith.constant 0 : index
    %155 = vector.load %arg28[%c5_135, %c0_136, %c0_137] : memref<9x64x64xbf16, #tpu.memory_space<vmem>>, vector<1x64x64xbf16>
    %156 = vector.shape_cast %155 : vector<1x64x64xbf16> to vector<64x64xbf16>
    %cst_138 = arith.constant dense<0.000000e+00> : vector<64x64xf32>
    %157 = tpu.matmul %156, %113, %cst_138 {dimension_numbers = #tpu.dot_dimension_numbers<[1], [0], [0], [1], [0, 0, 1, 1], [], []>} : vector<64x64xbf16>, vector<64x64xbf16>, vector<64x64xf32> -> vector<64x64xf32>
    %158 = arith.truncf %157 : vector<64x64xf32> to vector<64x64xbf16>
    %c5_139 = arith.constant 5 : index
    %c0_140 = arith.constant 0 : index
    %c0_141 = arith.constant 0 : index
    %159 = vector.load %arg12[%c5_139, %c0_140, %c0_141] : memref<9x64x64xbf16, #tpu.memory_space<vmem>>, vector<1x64x64xbf16>
    %160 = vector.shape_cast %159 : vector<1x64x64xbf16> to vector<64x64xbf16>
    %cst_142 = arith.constant dense<0.000000e+00> : vector<64x64xf32>
    %161 = tpu.matmul %158, %160, %cst_142 {dimension_numbers = #tpu.dot_dimension_numbers<[1], [0], [0], [1], [0, 0, 1, 1], [], []>} : vector<64x64xbf16>, vector<64x64xbf16>, vector<64x64xf32> -> vector<64x64xf32>
    %162 = arith.addf %154, %161 : vector<64x64xf32>
    %c6_143 = arith.constant 6 : index
    %c0_144 = arith.constant 0 : index
    %c0_145 = arith.constant 0 : index
    %163 = vector.load %arg28[%c6_143, %c0_144, %c0_145] : memref<9x64x64xbf16, #tpu.memory_space<vmem>>, vector<1x64x64xbf16>
    %164 = vector.shape_cast %163 : vector<1x64x64xbf16> to vector<64x64xbf16>
    %cst_146 = arith.constant dense<0.000000e+00> : vector<64x64xf32>
    %165 = tpu.matmul %164, %113, %cst_146 {dimension_numbers = #tpu.dot_dimension_numbers<[1], [0], [0], [1], [0, 0, 1, 1], [], []>} : vector<64x64xbf16>, vector<64x64xbf16>, vector<64x64xf32> -> vector<64x64xf32>
    %166 = arith.truncf %165 : vector<64x64xf32> to vector<64x64xbf16>
    %c6_147 = arith.constant 6 : index
    %c0_148 = arith.constant 0 : index
    %c0_149 = arith.constant 0 : index
    %167 = vector.load %arg12[%c6_147, %c0_148, %c0_149] : memref<9x64x64xbf16, #tpu.memory_space<vmem>>, vector<1x64x64xbf16>
    %168 = vector.shape_cast %167 : vector<1x64x64xbf16> to vector<64x64xbf16>
    %cst_150 = arith.constant dense<0.000000e+00> : vector<64x64xf32>
    %169 = tpu.matmul %166, %168, %cst_150 {dimension_numbers = #tpu.dot_dimension_numbers<[1], [0], [0], [1], [0, 0, 1, 1], [], []>} : vector<64x64xbf16>, vector<64x64xbf16>, vector<64x64xf32> -> vector<64x64xf32>
    %170 = arith.addf %162, %169 : vector<64x64xf32>
    %c7_151 = arith.constant 7 : index
    %c0_152 = arith.constant 0 : index
    %c0_153 = arith.constant 0 : index
    %171 = vector.load %arg28[%c7_151, %c0_152, %c0_153] : memref<9x64x64xbf16, #tpu.memory_space<vmem>>, vector<1x64x64xbf16>
    %172 = vector.shape_cast %171 : vector<1x64x64xbf16> to vector<64x64xbf16>
    %cst_154 = arith.constant dense<0.000000e+00> : vector<64x64xf32>
    %173 = tpu.matmul %172, %113, %cst_154 {dimension_numbers = #tpu.dot_dimension_numbers<[1], [0], [0], [1], [0, 0, 1, 1], [], []>} : vector<64x64xbf16>, vector<64x64xbf16>, vector<64x64xf32> -> vector<64x64xf32>
    %174 = arith.truncf %173 : vector<64x64xf32> to vector<64x64xbf16>
    %c7_155 = arith.constant 7 : index
    %c0_156 = arith.constant 0 : index
    %c0_157 = arith.constant 0 : index
    %175 = vector.load %arg12[%c7_155, %c0_156, %c0_157] : memref<9x64x64xbf16, #tpu.memory_space<vmem>>, vector<1x64x64xbf16>
    %176 = vector.shape_cast %175 : vector<1x64x64xbf16> to vector<64x64xbf16>
    %cst_158 = arith.constant dense<0.000000e+00> : vector<64x64xf32>
    %177 = tpu.matmul %174, %176, %cst_158 {dimension_numbers = #tpu.dot_dimension_numbers<[1], [0], [0], [1], [0, 0, 1, 1], [], []>} : vector<64x64xbf16>, vector<64x64xbf16>, vector<64x64xf32> -> vector<64x64xf32>
    %178 = arith.addf %170, %177 : vector<64x64xf32>
    %c8_159 = arith.constant 8 : index
    %c0_160 = arith.constant 0 : index
    %c0_161 = arith.constant 0 : index
    %179 = vector.load %arg28[%c8_159, %c0_160, %c0_161] : memref<9x64x64xbf16, #tpu.memory_space<vmem>>, vector<1x64x64xbf16>
    %180 = vector.shape_cast %179 : vector<1x64x64xbf16> to vector<64x64xbf16>
    %cst_162 = arith.constant dense<0.000000e+00> : vector<64x64xf32>
    %181 = tpu.matmul %180, %113, %cst_162 {dimension_numbers = #tpu.dot_dimension_numbers<[1], [0], [0], [1], [0, 0, 1, 1], [], []>} : vector<64x64xbf16>, vector<64x64xbf16>, vector<64x64xf32> -> vector<64x64xf32>
    %182 = arith.truncf %181 : vector<64x64xf32> to vector<64x64xbf16>
    %c8_163 = arith.constant 8 : index
    %c0_164 = arith.constant 0 : index
    %c0_165 = arith.constant 0 : index
    %183 = vector.load %arg12[%c8_163, %c0_164, %c0_165] : memref<9x64x64xbf16, #tpu.memory_space<vmem>>, vector<1x64x64xbf16>
    %184 = vector.shape_cast %183 : vector<1x64x64xbf16> to vector<64x64xbf16>
    %cst_166 = arith.constant dense<0.000000e+00> : vector<64x64xf32>
    %185 = tpu.matmul %182, %184, %cst_166 {dimension_numbers = #tpu.dot_dimension_numbers<[1], [0], [0], [1], [0, 0, 1, 1], [], []>} : vector<64x64xbf16>, vector<64x64xbf16>, vector<64x64xf32> -> vector<64x64xf32>
    %186 = arith.addf %178, %185 : vector<64x64xf32>
    %c0_167 = arith.constant 0 : index
    %c0_168 = arith.constant 0 : index
    %187 = vector.load %arg13[%c0_167, %c0_168] : memref<1x64xf32, #tpu.memory_space<vmem>>, vector<1x64xf32>
    %188 = vector.broadcast %187 : vector<1x64xf32> to vector<64x64xf32>
    %189 = arith.addf %186, %188 : vector<64x64xf32>
    %cst_169 = arith.constant 0.000000e+00 : f32
    %190 = vector.broadcast %cst_169 : f32 to vector<64x64xf32>
    %191 = arith.maximumf %189, %190 : vector<64x64xf32>
    %192 = arith.truncf %191 : vector<64x64xf32> to vector<64x64xbf16>
    %c0_170 = arith.constant 0 : index
    %c0_171 = arith.constant 0 : index
    %193 = vector.load %arg14[%c0_170, %c0_171] : memref<64x256xbf16, #tpu.memory_space<vmem>>, vector<64x256xbf16>
    %cst_172 = arith.constant dense<0.000000e+00> : vector<64x256xf32>
    %194 = tpu.matmul %192, %193, %cst_172 {dimension_numbers = #tpu.dot_dimension_numbers<[1], [0], [0], [1], [0, 0, 1, 1], [], []>} : vector<64x64xbf16>, vector<64x256xbf16>, vector<64x256xf32> -> vector<64x256xf32>
    %c0_173 = arith.constant 0 : index
    %c0_174 = arith.constant 0 : index
    %195 = vector.load %arg15[%c0_173, %c0_174] : memref<1x256xf32, #tpu.memory_space<vmem>>, vector<1x256xf32>
    %196 = vector.broadcast %195 : vector<1x256xf32> to vector<64x256xf32>
    %197 = arith.addf %194, %196 : vector<64x256xf32>
    %198 = arith.addf %197, %105 : vector<64x256xf32>
    %cst_175 = arith.constant 0.000000e+00 : f32
    %199 = vector.broadcast %cst_175 : f32 to vector<64x256xf32>
    %200 = arith.maximumf %198, %199 : vector<64x256xf32>
    %201 = arith.truncf %200 : vector<64x256xf32> to vector<64x256xbf16>
    %202 = arith.extf %201 : vector<64x256xbf16> to vector<64x256xf32>
    %c0_176 = arith.constant 0 : index
    %c0_177 = arith.constant 0 : index
    %203 = vector.load %arg16[%c0_176, %c0_177] : memref<256x64xbf16, #tpu.memory_space<vmem>>, vector<256x64xbf16>
    %cst_178 = arith.constant dense<0.000000e+00> : vector<64x64xf32>
    %204 = tpu.matmul %201, %203, %cst_178 {dimension_numbers = #tpu.dot_dimension_numbers<[1], [0], [0], [1], [0, 0, 1, 1], [], []>} : vector<64x256xbf16>, vector<256x64xbf16>, vector<64x64xf32> -> vector<64x64xf32>
    %c0_179 = arith.constant 0 : index
    %c0_180 = arith.constant 0 : index
    %205 = vector.load %arg17[%c0_179, %c0_180] : memref<1x64xf32, #tpu.memory_space<vmem>>, vector<1x64xf32>
    %206 = vector.broadcast %205 : vector<1x64xf32> to vector<64x64xf32>
    %207 = arith.addf %204, %206 : vector<64x64xf32>
    %cst_181 = arith.constant 0.000000e+00 : f32
    %208 = vector.broadcast %cst_181 : f32 to vector<64x64xf32>
    %209 = arith.maximumf %207, %208 : vector<64x64xf32>
    %210 = arith.truncf %209 : vector<64x64xf32> to vector<64x64xbf16>
    %cst_182 = arith.constant 0.000000e+00 : f32
    %211 = vector.broadcast %cst_182 : f32 to vector<64x64xf32>
    %c0_183 = arith.constant 0 : index
    %c0_184 = arith.constant 0 : index
    %c0_185 = arith.constant 0 : index
    %212 = vector.load %arg28[%c0_183, %c0_184, %c0_185] : memref<9x64x64xbf16, #tpu.memory_space<vmem>>, vector<1x64x64xbf16>
    %213 = vector.shape_cast %212 : vector<1x64x64xbf16> to vector<64x64xbf16>
    %cst_186 = arith.constant dense<0.000000e+00> : vector<64x64xf32>
    %214 = tpu.matmul %213, %210, %cst_186 {dimension_numbers = #tpu.dot_dimension_numbers<[1], [0], [0], [1], [0, 0, 1, 1], [], []>} : vector<64x64xbf16>, vector<64x64xbf16>, vector<64x64xf32> -> vector<64x64xf32>
    %215 = arith.truncf %214 : vector<64x64xf32> to vector<64x64xbf16>
    %c0_187 = arith.constant 0 : index
    %c0_188 = arith.constant 0 : index
    %c0_189 = arith.constant 0 : index
    %216 = vector.load %arg18[%c0_187, %c0_188, %c0_189] : memref<9x64x64xbf16, #tpu.memory_space<vmem>>, vector<1x64x64xbf16>
    %217 = vector.shape_cast %216 : vector<1x64x64xbf16> to vector<64x64xbf16>
    %cst_190 = arith.constant dense<0.000000e+00> : vector<64x64xf32>
    %218 = tpu.matmul %215, %217, %cst_190 {dimension_numbers = #tpu.dot_dimension_numbers<[1], [0], [0], [1], [0, 0, 1, 1], [], []>} : vector<64x64xbf16>, vector<64x64xbf16>, vector<64x64xf32> -> vector<64x64xf32>
    %219 = arith.addf %211, %218 : vector<64x64xf32>
    %c1_191 = arith.constant 1 : index
    %c0_192 = arith.constant 0 : index
    %c0_193 = arith.constant 0 : index
    %220 = vector.load %arg28[%c1_191, %c0_192, %c0_193] : memref<9x64x64xbf16, #tpu.memory_space<vmem>>, vector<1x64x64xbf16>
    %221 = vector.shape_cast %220 : vector<1x64x64xbf16> to vector<64x64xbf16>
    %cst_194 = arith.constant dense<0.000000e+00> : vector<64x64xf32>
    %222 = tpu.matmul %221, %210, %cst_194 {dimension_numbers = #tpu.dot_dimension_numbers<[1], [0], [0], [1], [0, 0, 1, 1], [], []>} : vector<64x64xbf16>, vector<64x64xbf16>, vector<64x64xf32> -> vector<64x64xf32>
    %223 = arith.truncf %222 : vector<64x64xf32> to vector<64x64xbf16>
    %c1_195 = arith.constant 1 : index
    %c0_196 = arith.constant 0 : index
    %c0_197 = arith.constant 0 : index
    %224 = vector.load %arg18[%c1_195, %c0_196, %c0_197] : memref<9x64x64xbf16, #tpu.memory_space<vmem>>, vector<1x64x64xbf16>
    %225 = vector.shape_cast %224 : vector<1x64x64xbf16> to vector<64x64xbf16>
    %cst_198 = arith.constant dense<0.000000e+00> : vector<64x64xf32>
    %226 = tpu.matmul %223, %225, %cst_198 {dimension_numbers = #tpu.dot_dimension_numbers<[1], [0], [0], [1], [0, 0, 1, 1], [], []>} : vector<64x64xbf16>, vector<64x64xbf16>, vector<64x64xf32> -> vector<64x64xf32>
    %227 = arith.addf %219, %226 : vector<64x64xf32>
    %c2_199 = arith.constant 2 : index
    %c0_200 = arith.constant 0 : index
    %c0_201 = arith.constant 0 : index
    %228 = vector.load %arg28[%c2_199, %c0_200, %c0_201] : memref<9x64x64xbf16, #tpu.memory_space<vmem>>, vector<1x64x64xbf16>
    %229 = vector.shape_cast %228 : vector<1x64x64xbf16> to vector<64x64xbf16>
    %cst_202 = arith.constant dense<0.000000e+00> : vector<64x64xf32>
    %230 = tpu.matmul %229, %210, %cst_202 {dimension_numbers = #tpu.dot_dimension_numbers<[1], [0], [0], [1], [0, 0, 1, 1], [], []>} : vector<64x64xbf16>, vector<64x64xbf16>, vector<64x64xf32> -> vector<64x64xf32>
    %231 = arith.truncf %230 : vector<64x64xf32> to vector<64x64xbf16>
    %c2_203 = arith.constant 2 : index
    %c0_204 = arith.constant 0 : index
    %c0_205 = arith.constant 0 : index
    %232 = vector.load %arg18[%c2_203, %c0_204, %c0_205] : memref<9x64x64xbf16, #tpu.memory_space<vmem>>, vector<1x64x64xbf16>
    %233 = vector.shape_cast %232 : vector<1x64x64xbf16> to vector<64x64xbf16>
    %cst_206 = arith.constant dense<0.000000e+00> : vector<64x64xf32>
    %234 = tpu.matmul %231, %233, %cst_206 {dimension_numbers = #tpu.dot_dimension_numbers<[1], [0], [0], [1], [0, 0, 1, 1], [], []>} : vector<64x64xbf16>, vector<64x64xbf16>, vector<64x64xf32> -> vector<64x64xf32>
    %235 = arith.addf %227, %234 : vector<64x64xf32>
    %c3_207 = arith.constant 3 : index
    %c0_208 = arith.constant 0 : index
    %c0_209 = arith.constant 0 : index
    %236 = vector.load %arg28[%c3_207, %c0_208, %c0_209] : memref<9x64x64xbf16, #tpu.memory_space<vmem>>, vector<1x64x64xbf16>
    %237 = vector.shape_cast %236 : vector<1x64x64xbf16> to vector<64x64xbf16>
    %cst_210 = arith.constant dense<0.000000e+00> : vector<64x64xf32>
    %238 = tpu.matmul %237, %210, %cst_210 {dimension_numbers = #tpu.dot_dimension_numbers<[1], [0], [0], [1], [0, 0, 1, 1], [], []>} : vector<64x64xbf16>, vector<64x64xbf16>, vector<64x64xf32> -> vector<64x64xf32>
    %239 = arith.truncf %238 : vector<64x64xf32> to vector<64x64xbf16>
    %c3_211 = arith.constant 3 : index
    %c0_212 = arith.constant 0 : index
    %c0_213 = arith.constant 0 : index
    %240 = vector.load %arg18[%c3_211, %c0_212, %c0_213] : memref<9x64x64xbf16, #tpu.memory_space<vmem>>, vector<1x64x64xbf16>
    %241 = vector.shape_cast %240 : vector<1x64x64xbf16> to vector<64x64xbf16>
    %cst_214 = arith.constant dense<0.000000e+00> : vector<64x64xf32>
    %242 = tpu.matmul %239, %241, %cst_214 {dimension_numbers = #tpu.dot_dimension_numbers<[1], [0], [0], [1], [0, 0, 1, 1], [], []>} : vector<64x64xbf16>, vector<64x64xbf16>, vector<64x64xf32> -> vector<64x64xf32>
    %243 = arith.addf %235, %242 : vector<64x64xf32>
    %c4_215 = arith.constant 4 : index
    %c0_216 = arith.constant 0 : index
    %c0_217 = arith.constant 0 : index
    %244 = vector.load %arg28[%c4_215, %c0_216, %c0_217] : memref<9x64x64xbf16, #tpu.memory_space<vmem>>, vector<1x64x64xbf16>
    %245 = vector.shape_cast %244 : vector<1x64x64xbf16> to vector<64x64xbf16>
    %cst_218 = arith.constant dense<0.000000e+00> : vector<64x64xf32>
    %246 = tpu.matmul %245, %210, %cst_218 {dimension_numbers = #tpu.dot_dimension_numbers<[1], [0], [0], [1], [0, 0, 1, 1], [], []>} : vector<64x64xbf16>, vector<64x64xbf16>, vector<64x64xf32> -> vector<64x64xf32>
    %247 = arith.truncf %246 : vector<64x64xf32> to vector<64x64xbf16>
    %c4_219 = arith.constant 4 : index
    %c0_220 = arith.constant 0 : index
    %c0_221 = arith.constant 0 : index
    %248 = vector.load %arg18[%c4_219, %c0_220, %c0_221] : memref<9x64x64xbf16, #tpu.memory_space<vmem>>, vector<1x64x64xbf16>
    %249 = vector.shape_cast %248 : vector<1x64x64xbf16> to vector<64x64xbf16>
    %cst_222 = arith.constant dense<0.000000e+00> : vector<64x64xf32>
    %250 = tpu.matmul %247, %249, %cst_222 {dimension_numbers = #tpu.dot_dimension_numbers<[1], [0], [0], [1], [0, 0, 1, 1], [], []>} : vector<64x64xbf16>, vector<64x64xbf16>, vector<64x64xf32> -> vector<64x64xf32>
    %251 = arith.addf %243, %250 : vector<64x64xf32>
    %c5_223 = arith.constant 5 : index
    %c0_224 = arith.constant 0 : index
    %c0_225 = arith.constant 0 : index
    %252 = vector.load %arg28[%c5_223, %c0_224, %c0_225] : memref<9x64x64xbf16, #tpu.memory_space<vmem>>, vector<1x64x64xbf16>
    %253 = vector.shape_cast %252 : vector<1x64x64xbf16> to vector<64x64xbf16>
    %cst_226 = arith.constant dense<0.000000e+00> : vector<64x64xf32>
    %254 = tpu.matmul %253, %210, %cst_226 {dimension_numbers = #tpu.dot_dimension_numbers<[1], [0], [0], [1], [0, 0, 1, 1], [], []>} : vector<64x64xbf16>, vector<64x64xbf16>, vector<64x64xf32> -> vector<64x64xf32>
    %255 = arith.truncf %254 : vector<64x64xf32> to vector<64x64xbf16>
    %c5_227 = arith.constant 5 : index
    %c0_228 = arith.constant 0 : index
    %c0_229 = arith.constant 0 : index
    %256 = vector.load %arg18[%c5_227, %c0_228, %c0_229] : memref<9x64x64xbf16, #tpu.memory_space<vmem>>, vector<1x64x64xbf16>
    %257 = vector.shape_cast %256 : vector<1x64x64xbf16> to vector<64x64xbf16>
    %cst_230 = arith.constant dense<0.000000e+00> : vector<64x64xf32>
    %258 = tpu.matmul %255, %257, %cst_230 {dimension_numbers = #tpu.dot_dimension_numbers<[1], [0], [0], [1], [0, 0, 1, 1], [], []>} : vector<64x64xbf16>, vector<64x64xbf16>, vector<64x64xf32> -> vector<64x64xf32>
    %259 = arith.addf %251, %258 : vector<64x64xf32>
    %c6_231 = arith.constant 6 : index
    %c0_232 = arith.constant 0 : index
    %c0_233 = arith.constant 0 : index
    %260 = vector.load %arg28[%c6_231, %c0_232, %c0_233] : memref<9x64x64xbf16, #tpu.memory_space<vmem>>, vector<1x64x64xbf16>
    %261 = vector.shape_cast %260 : vector<1x64x64xbf16> to vector<64x64xbf16>
    %cst_234 = arith.constant dense<0.000000e+00> : vector<64x64xf32>
    %262 = tpu.matmul %261, %210, %cst_234 {dimension_numbers = #tpu.dot_dimension_numbers<[1], [0], [0], [1], [0, 0, 1, 1], [], []>} : vector<64x64xbf16>, vector<64x64xbf16>, vector<64x64xf32> -> vector<64x64xf32>
    %263 = arith.truncf %262 : vector<64x64xf32> to vector<64x64xbf16>
    %c6_235 = arith.constant 6 : index
    %c0_236 = arith.constant 0 : index
    %c0_237 = arith.constant 0 : index
    %264 = vector.load %arg18[%c6_235, %c0_236, %c0_237] : memref<9x64x64xbf16, #tpu.memory_space<vmem>>, vector<1x64x64xbf16>
    %265 = vector.shape_cast %264 : vector<1x64x64xbf16> to vector<64x64xbf16>
    %cst_238 = arith.constant dense<0.000000e+00> : vector<64x64xf32>
    %266 = tpu.matmul %263, %265, %cst_238 {dimension_numbers = #tpu.dot_dimension_numbers<[1], [0], [0], [1], [0, 0, 1, 1], [], []>} : vector<64x64xbf16>, vector<64x64xbf16>, vector<64x64xf32> -> vector<64x64xf32>
    %267 = arith.addf %259, %266 : vector<64x64xf32>
    %c7_239 = arith.constant 7 : index
    %c0_240 = arith.constant 0 : index
    %c0_241 = arith.constant 0 : index
    %268 = vector.load %arg28[%c7_239, %c0_240, %c0_241] : memref<9x64x64xbf16, #tpu.memory_space<vmem>>, vector<1x64x64xbf16>
    %269 = vector.shape_cast %268 : vector<1x64x64xbf16> to vector<64x64xbf16>
    %cst_242 = arith.constant dense<0.000000e+00> : vector<64x64xf32>
    %270 = tpu.matmul %269, %210, %cst_242 {dimension_numbers = #tpu.dot_dimension_numbers<[1], [0], [0], [1], [0, 0, 1, 1], [], []>} : vector<64x64xbf16>, vector<64x64xbf16>, vector<64x64xf32> -> vector<64x64xf32>
    %271 = arith.truncf %270 : vector<64x64xf32> to vector<64x64xbf16>
    %c7_243 = arith.constant 7 : index
    %c0_244 = arith.constant 0 : index
    %c0_245 = arith.constant 0 : index
    %272 = vector.load %arg18[%c7_243, %c0_244, %c0_245] : memref<9x64x64xbf16, #tpu.memory_space<vmem>>, vector<1x64x64xbf16>
    %273 = vector.shape_cast %272 : vector<1x64x64xbf16> to vector<64x64xbf16>
    %cst_246 = arith.constant dense<0.000000e+00> : vector<64x64xf32>
    %274 = tpu.matmul %271, %273, %cst_246 {dimension_numbers = #tpu.dot_dimension_numbers<[1], [0], [0], [1], [0, 0, 1, 1], [], []>} : vector<64x64xbf16>, vector<64x64xbf16>, vector<64x64xf32> -> vector<64x64xf32>
    %275 = arith.addf %267, %274 : vector<64x64xf32>
    %c8_247 = arith.constant 8 : index
    %c0_248 = arith.constant 0 : index
    %c0_249 = arith.constant 0 : index
    %276 = vector.load %arg28[%c8_247, %c0_248, %c0_249] : memref<9x64x64xbf16, #tpu.memory_space<vmem>>, vector<1x64x64xbf16>
    %277 = vector.shape_cast %276 : vector<1x64x64xbf16> to vector<64x64xbf16>
    %cst_250 = arith.constant dense<0.000000e+00> : vector<64x64xf32>
    %278 = tpu.matmul %277, %210, %cst_250 {dimension_numbers = #tpu.dot_dimension_numbers<[1], [0], [0], [1], [0, 0, 1, 1], [], []>} : vector<64x64xbf16>, vector<64x64xbf16>, vector<64x64xf32> -> vector<64x64xf32>
    %279 = arith.truncf %278 : vector<64x64xf32> to vector<64x64xbf16>
    %c8_251 = arith.constant 8 : index
    %c0_252 = arith.constant 0 : index
    %c0_253 = arith.constant 0 : index
    %280 = vector.load %arg18[%c8_251, %c0_252, %c0_253] : memref<9x64x64xbf16, #tpu.memory_space<vmem>>, vector<1x64x64xbf16>
    %281 = vector.shape_cast %280 : vector<1x64x64xbf16> to vector<64x64xbf16>
    %cst_254 = arith.constant dense<0.000000e+00> : vector<64x64xf32>
    %282 = tpu.matmul %279, %281, %cst_254 {dimension_numbers = #tpu.dot_dimension_numbers<[1], [0], [0], [1], [0, 0, 1, 1], [], []>} : vector<64x64xbf16>, vector<64x64xbf16>, vector<64x64xf32> -> vector<64x64xf32>
    %283 = arith.addf %275, %282 : vector<64x64xf32>
    %c0_255 = arith.constant 0 : index
    %c0_256 = arith.constant 0 : index
    %284 = vector.load %arg19[%c0_255, %c0_256] : memref<1x64xf32, #tpu.memory_space<vmem>>, vector<1x64xf32>
    %285 = vector.broadcast %284 : vector<1x64xf32> to vector<64x64xf32>
    %286 = arith.addf %283, %285 : vector<64x64xf32>
    %cst_257 = arith.constant 0.000000e+00 : f32
    %287 = vector.broadcast %cst_257 : f32 to vector<64x64xf32>
    %288 = arith.maximumf %286, %287 : vector<64x64xf32>
    %289 = arith.truncf %288 : vector<64x64xf32> to vector<64x64xbf16>
    %c0_258 = arith.constant 0 : index
    %c0_259 = arith.constant 0 : index
    %290 = vector.load %arg20[%c0_258, %c0_259] : memref<64x256xbf16, #tpu.memory_space<vmem>>, vector<64x256xbf16>
    %cst_260 = arith.constant dense<0.000000e+00> : vector<64x256xf32>
    %291 = tpu.matmul %289, %290, %cst_260 {dimension_numbers = #tpu.dot_dimension_numbers<[1], [0], [0], [1], [0, 0, 1, 1], [], []>} : vector<64x64xbf16>, vector<64x256xbf16>, vector<64x256xf32> -> vector<64x256xf32>
    %c0_261 = arith.constant 0 : index
    %c0_262 = arith.constant 0 : index
    %292 = vector.load %arg21[%c0_261, %c0_262] : memref<1x256xf32, #tpu.memory_space<vmem>>, vector<1x256xf32>
    %293 = vector.broadcast %292 : vector<1x256xf32> to vector<64x256xf32>
    %294 = arith.addf %291, %293 : vector<64x256xf32>
    %295 = arith.addf %294, %202 : vector<64x256xf32>
    %cst_263 = arith.constant 0.000000e+00 : f32
    %296 = vector.broadcast %cst_263 : f32 to vector<64x256xf32>
    %297 = arith.maximumf %295, %296 : vector<64x256xf32>
    %298 = arith.truncf %297 : vector<64x256xf32> to vector<64x256xbf16>
    %cst_264 = arith.constant 0.000000e+00 : f32
    %299 = vector.broadcast %cst_264 : f32 to vector<16x256xf32>
    %c0_265 = arith.constant 0 : index
    %c0_266 = arith.constant 0 : index
    %c0_267 = arith.constant 0 : index
    %300 = vector.load %arg29[%c0_265, %c0_266, %c0_267] : memref<9x16x64xbf16, #tpu.memory_space<vmem>>, vector<1x16x64xbf16>
    %301 = vector.shape_cast %300 : vector<1x16x64xbf16> to vector<16x64xbf16>
    %cst_268 = arith.constant dense<0.000000e+00> : vector<16x256xf32>
    %302 = tpu.matmul %301, %298, %cst_268 {dimension_numbers = #tpu.dot_dimension_numbers<[1], [0], [0], [1], [0, 0, 1, 1], [], []>} : vector<16x64xbf16>, vector<64x256xbf16>, vector<16x256xf32> -> vector<16x256xf32>
    %303 = arith.truncf %302 : vector<16x256xf32> to vector<16x256xbf16>
    %c0_269 = arith.constant 0 : index
    %c0_270 = arith.constant 0 : index
    %c0_271 = arith.constant 0 : index
    %304 = vector.load %arg22[%c0_269, %c0_270, %c0_271] : memref<9x256x256xbf16, #tpu.memory_space<vmem>>, vector<1x256x256xbf16>
    %305 = vector.shape_cast %304 : vector<1x256x256xbf16> to vector<256x256xbf16>
    %cst_272 = arith.constant dense<0.000000e+00> : vector<16x256xf32>
    %306 = tpu.matmul %303, %305, %cst_272 {dimension_numbers = #tpu.dot_dimension_numbers<[1], [0], [0], [1], [0, 0, 1, 1], [], []>} : vector<16x256xbf16>, vector<256x256xbf16>, vector<16x256xf32> -> vector<16x256xf32>
    %307 = arith.addf %299, %306 : vector<16x256xf32>
    %c1_273 = arith.constant 1 : index
    %c0_274 = arith.constant 0 : index
    %c0_275 = arith.constant 0 : index
    %308 = vector.load %arg29[%c1_273, %c0_274, %c0_275] : memref<9x16x64xbf16, #tpu.memory_space<vmem>>, vector<1x16x64xbf16>
    %309 = vector.shape_cast %308 : vector<1x16x64xbf16> to vector<16x64xbf16>
    %cst_276 = arith.constant dense<0.000000e+00> : vector<16x256xf32>
    %310 = tpu.matmul %309, %298, %cst_276 {dimension_numbers = #tpu.dot_dimension_numbers<[1], [0], [0], [1], [0, 0, 1, 1], [], []>} : vector<16x64xbf16>, vector<64x256xbf16>, vector<16x256xf32> -> vector<16x256xf32>
    %311 = arith.truncf %310 : vector<16x256xf32> to vector<16x256xbf16>
    %c1_277 = arith.constant 1 : index
    %c0_278 = arith.constant 0 : index
    %c0_279 = arith.constant 0 : index
    %312 = vector.load %arg22[%c1_277, %c0_278, %c0_279] : memref<9x256x256xbf16, #tpu.memory_space<vmem>>, vector<1x256x256xbf16>
    %313 = vector.shape_cast %312 : vector<1x256x256xbf16> to vector<256x256xbf16>
    %cst_280 = arith.constant dense<0.000000e+00> : vector<16x256xf32>
    %314 = tpu.matmul %311, %313, %cst_280 {dimension_numbers = #tpu.dot_dimension_numbers<[1], [0], [0], [1], [0, 0, 1, 1], [], []>} : vector<16x256xbf16>, vector<256x256xbf16>, vector<16x256xf32> -> vector<16x256xf32>
    %315 = arith.addf %307, %314 : vector<16x256xf32>
    %c2_281 = arith.constant 2 : index
    %c0_282 = arith.constant 0 : index
    %c0_283 = arith.constant 0 : index
    %316 = vector.load %arg29[%c2_281, %c0_282, %c0_283] : memref<9x16x64xbf16, #tpu.memory_space<vmem>>, vector<1x16x64xbf16>
    %317 = vector.shape_cast %316 : vector<1x16x64xbf16> to vector<16x64xbf16>
    %cst_284 = arith.constant dense<0.000000e+00> : vector<16x256xf32>
    %318 = tpu.matmul %317, %298, %cst_284 {dimension_numbers = #tpu.dot_dimension_numbers<[1], [0], [0], [1], [0, 0, 1, 1], [], []>} : vector<16x64xbf16>, vector<64x256xbf16>, vector<16x256xf32> -> vector<16x256xf32>
    %319 = arith.truncf %318 : vector<16x256xf32> to vector<16x256xbf16>
    %c2_285 = arith.constant 2 : index
    %c0_286 = arith.constant 0 : index
    %c0_287 = arith.constant 0 : index
    %320 = vector.load %arg22[%c2_285, %c0_286, %c0_287] : memref<9x256x256xbf16, #tpu.memory_space<vmem>>, vector<1x256x256xbf16>
    %321 = vector.shape_cast %320 : vector<1x256x256xbf16> to vector<256x256xbf16>
    %cst_288 = arith.constant dense<0.000000e+00> : vector<16x256xf32>
    %322 = tpu.matmul %319, %321, %cst_288 {dimension_numbers = #tpu.dot_dimension_numbers<[1], [0], [0], [1], [0, 0, 1, 1], [], []>} : vector<16x256xbf16>, vector<256x256xbf16>, vector<16x256xf32> -> vector<16x256xf32>
    %323 = arith.addf %315, %322 : vector<16x256xf32>
    %c3_289 = arith.constant 3 : index
    %c0_290 = arith.constant 0 : index
    %c0_291 = arith.constant 0 : index
    %324 = vector.load %arg29[%c3_289, %c0_290, %c0_291] : memref<9x16x64xbf16, #tpu.memory_space<vmem>>, vector<1x16x64xbf16>
    %325 = vector.shape_cast %324 : vector<1x16x64xbf16> to vector<16x64xbf16>
    %cst_292 = arith.constant dense<0.000000e+00> : vector<16x256xf32>
    %326 = tpu.matmul %325, %298, %cst_292 {dimension_numbers = #tpu.dot_dimension_numbers<[1], [0], [0], [1], [0, 0, 1, 1], [], []>} : vector<16x64xbf16>, vector<64x256xbf16>, vector<16x256xf32> -> vector<16x256xf32>
    %327 = arith.truncf %326 : vector<16x256xf32> to vector<16x256xbf16>
    %c3_293 = arith.constant 3 : index
    %c0_294 = arith.constant 0 : index
    %c0_295 = arith.constant 0 : index
    %328 = vector.load %arg22[%c3_293, %c0_294, %c0_295] : memref<9x256x256xbf16, #tpu.memory_space<vmem>>, vector<1x256x256xbf16>
    %329 = vector.shape_cast %328 : vector<1x256x256xbf16> to vector<256x256xbf16>
    %cst_296 = arith.constant dense<0.000000e+00> : vector<16x256xf32>
    %330 = tpu.matmul %327, %329, %cst_296 {dimension_numbers = #tpu.dot_dimension_numbers<[1], [0], [0], [1], [0, 0, 1, 1], [], []>} : vector<16x256xbf16>, vector<256x256xbf16>, vector<16x256xf32> -> vector<16x256xf32>
    %331 = arith.addf %323, %330 : vector<16x256xf32>
    %c4_297 = arith.constant 4 : index
    %c0_298 = arith.constant 0 : index
    %c0_299 = arith.constant 0 : index
    %332 = vector.load %arg29[%c4_297, %c0_298, %c0_299] : memref<9x16x64xbf16, #tpu.memory_space<vmem>>, vector<1x16x64xbf16>
    %333 = vector.shape_cast %332 : vector<1x16x64xbf16> to vector<16x64xbf16>
    %cst_300 = arith.constant dense<0.000000e+00> : vector<16x256xf32>
    %334 = tpu.matmul %333, %298, %cst_300 {dimension_numbers = #tpu.dot_dimension_numbers<[1], [0], [0], [1], [0, 0, 1, 1], [], []>} : vector<16x64xbf16>, vector<64x256xbf16>, vector<16x256xf32> -> vector<16x256xf32>
    %335 = arith.truncf %334 : vector<16x256xf32> to vector<16x256xbf16>
    %c4_301 = arith.constant 4 : index
    %c0_302 = arith.constant 0 : index
    %c0_303 = arith.constant 0 : index
    %336 = vector.load %arg22[%c4_301, %c0_302, %c0_303] : memref<9x256x256xbf16, #tpu.memory_space<vmem>>, vector<1x256x256xbf16>
    %337 = vector.shape_cast %336 : vector<1x256x256xbf16> to vector<256x256xbf16>
    %cst_304 = arith.constant dense<0.000000e+00> : vector<16x256xf32>
    %338 = tpu.matmul %335, %337, %cst_304 {dimension_numbers = #tpu.dot_dimension_numbers<[1], [0], [0], [1], [0, 0, 1, 1], [], []>} : vector<16x256xbf16>, vector<256x256xbf16>, vector<16x256xf32> -> vector<16x256xf32>
    %339 = arith.addf %331, %338 : vector<16x256xf32>
    %c5_305 = arith.constant 5 : index
    %c0_306 = arith.constant 0 : index
    %c0_307 = arith.constant 0 : index
    %340 = vector.load %arg29[%c5_305, %c0_306, %c0_307] : memref<9x16x64xbf16, #tpu.memory_space<vmem>>, vector<1x16x64xbf16>
    %341 = vector.shape_cast %340 : vector<1x16x64xbf16> to vector<16x64xbf16>
    %cst_308 = arith.constant dense<0.000000e+00> : vector<16x256xf32>
    %342 = tpu.matmul %341, %298, %cst_308 {dimension_numbers = #tpu.dot_dimension_numbers<[1], [0], [0], [1], [0, 0, 1, 1], [], []>} : vector<16x64xbf16>, vector<64x256xbf16>, vector<16x256xf32> -> vector<16x256xf32>
    %343 = arith.truncf %342 : vector<16x256xf32> to vector<16x256xbf16>
    %c5_309 = arith.constant 5 : index
    %c0_310 = arith.constant 0 : index
    %c0_311 = arith.constant 0 : index
    %344 = vector.load %arg22[%c5_309, %c0_310, %c0_311] : memref<9x256x256xbf16, #tpu.memory_space<vmem>>, vector<1x256x256xbf16>
    %345 = vector.shape_cast %344 : vector<1x256x256xbf16> to vector<256x256xbf16>
    %cst_312 = arith.constant dense<0.000000e+00> : vector<16x256xf32>
    %346 = tpu.matmul %343, %345, %cst_312 {dimension_numbers = #tpu.dot_dimension_numbers<[1], [0], [0], [1], [0, 0, 1, 1], [], []>} : vector<16x256xbf16>, vector<256x256xbf16>, vector<16x256xf32> -> vector<16x256xf32>
    %347 = arith.addf %339, %346 : vector<16x256xf32>
    %c6_313 = arith.constant 6 : index
    %c0_314 = arith.constant 0 : index
    %c0_315 = arith.constant 0 : index
    %348 = vector.load %arg29[%c6_313, %c0_314, %c0_315] : memref<9x16x64xbf16, #tpu.memory_space<vmem>>, vector<1x16x64xbf16>
    %349 = vector.shape_cast %348 : vector<1x16x64xbf16> to vector<16x64xbf16>
    %cst_316 = arith.constant dense<0.000000e+00> : vector<16x256xf32>
    %350 = tpu.matmul %349, %298, %cst_316 {dimension_numbers = #tpu.dot_dimension_numbers<[1], [0], [0], [1], [0, 0, 1, 1], [], []>} : vector<16x64xbf16>, vector<64x256xbf16>, vector<16x256xf32> -> vector<16x256xf32>
    %351 = arith.truncf %350 : vector<16x256xf32> to vector<16x256xbf16>
    %c6_317 = arith.constant 6 : index
    %c0_318 = arith.constant 0 : index
    %c0_319 = arith.constant 0 : index
    %352 = vector.load %arg22[%c6_317, %c0_318, %c0_319] : memref<9x256x256xbf16, #tpu.memory_space<vmem>>, vector<1x256x256xbf16>
    %353 = vector.shape_cast %352 : vector<1x256x256xbf16> to vector<256x256xbf16>
    %cst_320 = arith.constant dense<0.000000e+00> : vector<16x256xf32>
    %354 = tpu.matmul %351, %353, %cst_320 {dimension_numbers = #tpu.dot_dimension_numbers<[1], [0], [0], [1], [0, 0, 1, 1], [], []>} : vector<16x256xbf16>, vector<256x256xbf16>, vector<16x256xf32> -> vector<16x256xf32>
    %355 = arith.addf %347, %354 : vector<16x256xf32>
    %c7_321 = arith.constant 7 : index
    %c0_322 = arith.constant 0 : index
    %c0_323 = arith.constant 0 : index
    %356 = vector.load %arg29[%c7_321, %c0_322, %c0_323] : memref<9x16x64xbf16, #tpu.memory_space<vmem>>, vector<1x16x64xbf16>
    %357 = vector.shape_cast %356 : vector<1x16x64xbf16> to vector<16x64xbf16>
    %cst_324 = arith.constant dense<0.000000e+00> : vector<16x256xf32>
    %358 = tpu.matmul %357, %298, %cst_324 {dimension_numbers = #tpu.dot_dimension_numbers<[1], [0], [0], [1], [0, 0, 1, 1], [], []>} : vector<16x64xbf16>, vector<64x256xbf16>, vector<16x256xf32> -> vector<16x256xf32>
    %359 = arith.truncf %358 : vector<16x256xf32> to vector<16x256xbf16>
    %c7_325 = arith.constant 7 : index
    %c0_326 = arith.constant 0 : index
    %c0_327 = arith.constant 0 : index
    %360 = vector.load %arg22[%c7_325, %c0_326, %c0_327] : memref<9x256x256xbf16, #tpu.memory_space<vmem>>, vector<1x256x256xbf16>
    %361 = vector.shape_cast %360 : vector<1x256x256xbf16> to vector<256x256xbf16>
    %cst_328 = arith.constant dense<0.000000e+00> : vector<16x256xf32>
    %362 = tpu.matmul %359, %361, %cst_328 {dimension_numbers = #tpu.dot_dimension_numbers<[1], [0], [0], [1], [0, 0, 1, 1], [], []>} : vector<16x256xbf16>, vector<256x256xbf16>, vector<16x256xf32> -> vector<16x256xf32>
    %363 = arith.addf %355, %362 : vector<16x256xf32>
    %c8_329 = arith.constant 8 : index
    %c0_330 = arith.constant 0 : index
    %c0_331 = arith.constant 0 : index
    %364 = vector.load %arg29[%c8_329, %c0_330, %c0_331] : memref<9x16x64xbf16, #tpu.memory_space<vmem>>, vector<1x16x64xbf16>
    %365 = vector.shape_cast %364 : vector<1x16x64xbf16> to vector<16x64xbf16>
    %cst_332 = arith.constant dense<0.000000e+00> : vector<16x256xf32>
    %366 = tpu.matmul %365, %298, %cst_332 {dimension_numbers = #tpu.dot_dimension_numbers<[1], [0], [0], [1], [0, 0, 1, 1], [], []>} : vector<16x64xbf16>, vector<64x256xbf16>, vector<16x256xf32> -> vector<16x256xf32>
    %367 = arith.truncf %366 : vector<16x256xf32> to vector<16x256xbf16>
    %c8_333 = arith.constant 8 : index
    %c0_334 = arith.constant 0 : index
    %c0_335 = arith.constant 0 : index
    %368 = vector.load %arg22[%c8_333, %c0_334, %c0_335] : memref<9x256x256xbf16, #tpu.memory_space<vmem>>, vector<1x256x256xbf16>
    %369 = vector.shape_cast %368 : vector<1x256x256xbf16> to vector<256x256xbf16>
    %cst_336 = arith.constant dense<0.000000e+00> : vector<16x256xf32>
    %370 = tpu.matmul %367, %369, %cst_336 {dimension_numbers = #tpu.dot_dimension_numbers<[1], [0], [0], [1], [0, 0, 1, 1], [], []>} : vector<16x256xbf16>, vector<256x256xbf16>, vector<16x256xf32> -> vector<16x256xf32>
    %371 = arith.addf %363, %370 : vector<16x256xf32>
    %c0_337 = arith.constant 0 : index
    %c0_338 = arith.constant 0 : index
    %372 = vector.load %arg23[%c0_337, %c0_338] : memref<1x256xf32, #tpu.memory_space<vmem>>, vector<1x256xf32>
    %373 = vector.broadcast %372 : vector<1x256xf32> to vector<16x256xf32>
    %374 = arith.addf %371, %373 : vector<16x256xf32>
    %375 = arith.truncf %374 : vector<16x256xf32> to vector<16x256xbf16>
    %c0_339 = arith.constant 0 : index
    %c0_340 = arith.constant 0 : index
    %376 = vector.load %arg30[%c0_339, %c0_340] : memref<4x16xbf16, #tpu.memory_space<vmem>>, vector<4x16xbf16>
    %cst_341 = arith.constant dense<0.000000e+00> : vector<4x256xf32>
    %377 = tpu.matmul %376, %375, %cst_341 {dimension_numbers = #tpu.dot_dimension_numbers<[1], [0], [0], [1], [0, 0, 1, 1], [], []>} : vector<4x16xbf16>, vector<16x256xbf16>, vector<4x256xf32> -> vector<4x256xf32>
    %378 = arith.truncf %377 : vector<4x256xf32> to vector<4x256xbf16>
    %c0_342 = arith.constant 0 : index
    %c0_343 = arith.constant 0 : index
    %379 = vector.load %arg24[%c0_342, %c0_343] : memref<256x18xbf16, #tpu.memory_space<vmem>>, vector<256x18xbf16>
    %cst_344 = arith.constant dense<0.000000e+00> : vector<4x18xf32>
    %380 = tpu.matmul %378, %379, %cst_344 {dimension_numbers = #tpu.dot_dimension_numbers<[1], [0], [0], [1], [0, 0, 1, 1], [], []>} : vector<4x256xbf16>, vector<256x18xbf16>, vector<4x18xf32> -> vector<4x18xf32>
    %c0_345 = arith.constant 0 : index
    %c0_346 = arith.constant 0 : index
    %381 = vector.load %arg25[%c0_345, %c0_346] : memref<1x18xf32, #tpu.memory_space<vmem>>, vector<1x18xf32>
    %382 = vector.broadcast %381 : vector<1x18xf32> to vector<4x18xf32>
    %383 = arith.addf %380, %382 : vector<4x18xf32>
    %c0_347 = arith.constant 0 : index
    %c0_348 = arith.constant 0 : index
    %c0_349 = arith.constant 0 : index
    %384 = vector.load %arg31[%c0_347, %c0_348, %c0_349] : memref<1x4x18xf32, #tpu.memory_space<vmem>>, vector<1x4x18xf32>
    %385 = vector.shape_cast %384 : vector<1x4x18xf32> to vector<4x18xf32>
    %386 = vector.shape_cast %383 : vector<4x18xf32> to vector<1x4x18xf32>
    tpu.vector_store %arg31[%c0_347, %c0_348, %c0_349], %386 {strides = array<i32>} : memref<1x4x18xf32, #tpu.memory_space<vmem>>, vector<1x4x18xf32>,
    return
  }
  func.func @transform_0(%arg0: i32) -> (i32, i32) {
    %c0_i32 = arith.constant 0 : i32
    %c0_i32_0 = arith.constant 0 : i32
    return %arg0, %c0_i32 : i32, i32
  }
  func.func @transform_1(%arg0: i32) -> (i32, i32) {
    %c0_i32 = arith.constant 0 : i32
    %c0_i32_0 = arith.constant 0 : i32
    %c0_i32_1 = arith.constant 0 : i32
    return %c0_i32, %c0_i32_0 : i32, i32
  }
  func.func @transform_2(%arg0: i32) -> (i32, i32) {
    %c0_i32 = arith.constant 0 : i32
    %c0_i32_0 = arith.constant 0 : i32
    %c0_i32_1 = arith.constant 0 : i32
    return %c0_i32, %c0_i32_0 : i32, i32
  }
  func.func @transform_3(%arg0: i32) -> (i32, i32, i32) {
    %c0_i32 = arith.constant 0 : i32
    %c0_i32_0 = arith.constant 0 : i32
    %c0_i32_1 = arith.constant 0 : i32
    %c0_i32_2 = arith.constant 0 : i32
    return %c0_i32, %c0_i32_0, %c0_i32_1 : i32, i32, i32
  }
  func.func @transform_4(%arg0: i32) -> (i32, i32) {
    %c0_i32 = arith.constant 0 : i32
    %c0_i32_0 = arith.constant 0 : i32
    %c0_i32_1 = arith.constant 0 : i32
    return %c0_i32, %c0_i32_0 : i32, i32
  }
  func.func @transform_5(%arg0: i32) -> (i32, i32) {
    %c0_i32 = arith.constant 0 : i32
    %c0_i32_0 = arith.constant 0 : i32
    %c0_i32_1 = arith.constant 0 : i32
    return %c0_i32, %c0_i32_0 : i32, i32
  }
  func.func @transform_6(%arg0: i32) -> (i32, i32) {
    %c0_i32 = arith.constant 0 : i32
    %c0_i32_0 = arith.constant 0 : i32
    %c0_i32_1 = arith.constant 0 : i32
    return %c0_i32, %c0_i32_0 : i32, i32
  }
  func.func @transform_7(%arg0: i32) -> (i32, i32) {
    %c0_i32 = arith.constant 0 : i32
    %c0_i32_0 = arith.constant 0 : i32
    %c0_i32_1 = arith.constant 0 : i32
    return %c0_i32, %c0_i32_0 : i32, i32
  }
  func.func @transform_8(%arg0: i32) -> (i32, i32) {
    %c0_i32 = arith.constant 0 : i32
    %c0_i32_0 = arith.constant 0 : i32
    %c0_i32_1 = arith.constant 0 : i32
    return %c0_i32, %c0_i32_0 : i32, i32
  }
  func.func @transform_9(%arg0: i32) -> (i32, i32) {
    %c0_i32 = arith.constant 0 : i32
    %c0_i32_0 = arith.constant 0 : i32
    %c0_i32_1 = arith.constant 0 : i32
    return %c0_i32, %c0_i32_0 : i32, i32
  }
  func.func @transform_10(%arg0: i32) -> (i32, i32) {
    %c0_i32 = arith.constant 0 : i32
    %c0_i32_0 = arith.constant 0 : i32
    %c0_i32_1 = arith.constant 0 : i32
    return %c0_i32, %c0_i32_0 : i32, i32
  }
  func.func @transform_11(%arg0: i32) -> (i32, i32, i32) {
    %c0_i32 = arith.constant 0 : i32
    %c0_i32_0 = arith.constant 0 : i32
    %c0_i32_1 = arith.constant 0 : i32
    %c0_i32_2 = arith.constant 0 : i32
    return %c0_i32, %c0_i32_0, %c0_i32_1 : i32, i32, i32
  }
  func.func @transform_12(%arg0: i32) -> (i32, i32) {
    %c0_i32 = arith.constant 0 : i32
    %c0_i32_0 = arith.constant 0 : i32
    %c0_i32_1 = arith.constant 0 : i32
    return %c0_i32, %c0_i32_0 : i32, i32
  }
  func.func @transform_13(%arg0: i32) -> (i32, i32) {
    %c0_i32 = arith.constant 0 : i32
    %c0_i32_0 = arith.constant 0 : i32
    %c0_i32_1 = arith.constant 0 : i32
    return %c0_i32, %c0_i32_0 : i32, i32
  }
  func.func @transform_14(%arg0: i32) -> (i32, i32) {
    %c0_i32 = arith.constant 0 : i32
    %c0_i32_0 = arith.constant 0 : i32
    %c0_i32_1 = arith.constant 0 : i32
    return %c0_i32, %c0_i32_0 : i32, i32
  }
  func.func @transform_15(%arg0: i32) -> (i32, i32) {
    %c0_i32 = arith.constant 0 : i32
    %c0_i32_0 = arith.constant 0 : i32
    %c0_i32_1 = arith.constant 0 : i32
    return %c0_i32, %c0_i32_0 : i32, i32
  }
  func.func @transform_16(%arg0: i32) -> (i32, i32) {
    %c0_i32 = arith.constant 0 : i32
    %c0_i32_0 = arith.constant 0 : i32
    %c0_i32_1 = arith.constant 0 : i32
    return %c0_i32, %c0_i32_0 : i32, i32
  }
  func.func @transform_17(%arg0: i32) -> (i32, i32, i32) {
    %c0_i32 = arith.constant 0 : i32
    %c0_i32_0 = arith.constant 0 : i32
    %c0_i32_1 = arith.constant 0 : i32
    %c0_i32_2 = arith.constant 0 : i32
    return %c0_i32, %c0_i32_0, %c0_i32_1 : i32, i32, i32
  }
  func.func @transform_18(%arg0: i32) -> (i32, i32) {
    %c0_i32 = arith.constant 0 : i32
    %c0_i32_0 = arith.constant 0 : i32
    %c0_i32_1 = arith.constant 0 : i32
    return %c0_i32, %c0_i32_0 : i32, i32
  }
  func.func @transform_19(%arg0: i32) -> (i32, i32) {
    %c0_i32 = arith.constant 0 : i32
    %c0_i32_0 = arith.constant 0 : i32
    %c0_i32_1 = arith.constant 0 : i32
    return %c0_i32, %c0_i32_0 : i32, i32
  }
  func.func @transform_20(%arg0: i32) -> (i32, i32) {
    %c0_i32 = arith.constant 0 : i32
    %c0_i32_0 = arith.constant 0 : i32
    %c0_i32_1 = arith.constant 0 : i32
    return %c0_i32, %c0_i32_0 : i32, i32
  }
  func.func @transform_21(%arg0: i32) -> (i32, i32, i32) {
    %c0_i32 = arith.constant 0 : i32
    %c0_i32_0 = arith.constant 0 : i32
    %c0_i32_1 = arith.constant 0 : i32
    %c0_i32_2 = arith.constant 0 : i32
    return %c0_i32, %c0_i32_0, %c0_i32_1 : i32, i32, i32
  }
  func.func @transform_22(%arg0: i32) -> (i32, i32) {
    %c0_i32 = arith.constant 0 : i32
    %c0_i32_0 = arith.constant 0 : i32
    %c0_i32_1 = arith.constant 0 : i32
    return %c0_i32, %c0_i32_0 : i32, i32
  }
  func.func @transform_23(%arg0: i32) -> (i32, i32) {
    %c0_i32 = arith.constant 0 : i32
    %c0_i32_0 = arith.constant 0 : i32
    %c0_i32_1 = arith.constant 0 : i32
    return %c0_i32, %c0_i32_0 : i32, i32
  }
  func.func @transform_24(%arg0: i32) -> (i32, i32) {
    %c0_i32 = arith.constant 0 : i32
    %c0_i32_0 = arith.constant 0 : i32
    %c0_i32_1 = arith.constant 0 : i32
    return %c0_i32, %c0_i32_0 : i32, i32
  }
  func.func @transform_25(%arg0: i32) -> (i32, i32, i32) {
    %c0_i32 = arith.constant 0 : i32
    %c0_i32_0 = arith.constant 0 : i32
    %c0_i32_1 = arith.constant 0 : i32
    %c0_i32_2 = arith.constant 0 : i32
    return %c0_i32, %c0_i32_0, %c0_i32_1 : i32, i32, i32
  }
  func.func @transform_26(%arg0: i32) -> (i32, i32) {
    %c0_i32 = arith.constant 0 : i32
    %c0_i32_0 = arith.constant 0 : i32
    %c0_i32_1 = arith.constant 0 : i32
    return %c0_i32, %c0_i32_0 : i32, i32
  }
  func.func @transform_27(%arg0: i32) -> (i32, i32, i32) {
    %c0_i32 = arith.constant 0 : i32
    %c0_i32_0 = arith.constant 0 : i32
    %c0_i32_1 = arith.constant 0 : i32
    %c0_i32_2 = arith.constant 0 : i32
    return %c0_i32, %c0_i32_0, %c0_i32_1 : i32, i32, i32
  }
  func.func @transform_28(%arg0: i32) -> (i32, i32, i32) {
    %c0_i32 = arith.constant 0 : i32
    %c0_i32_0 = arith.constant 0 : i32
    %c0_i32_1 = arith.constant 0 : i32
    %c0_i32_2 = arith.constant 0 : i32
    return %c0_i32, %c0_i32_0, %c0_i32_1 : i32, i32, i32
  }
  func.func @transform_29(%arg0: i32) -> (i32, i32) {
    %c0_i32 = arith.constant 0 : i32
    %c0_i32_0 = arith.constant 0 : i32
    %c0_i32_1 = arith.constant 0 : i32
    return %c0_i32, %c0_i32_0 : i32, i32
  }
  func.func @transform_30(%arg0: i32) -> (i32, i32, i32) {
    %c0_i32 = arith.constant 0 : i32
    %c0_i32_0 = arith.constant 0 : i32
    %c0_i32_1 = arith.constant 0 : i32
    return %arg0, %c0_i32, %c0_i32_0 : i32, i32, i32
  }
}

</mosaic_0001>

<bundles_post_ra>
// kernel: discriminator_forward.1
= control target key start
LH: loop header
LB: loop body
LE: loop exit
PB: predicated region body
PF: predicated region fallthrough
CT: control target
= control target key end

     0   :  { %s14767_s6 = smov 1   ;;  %s14768_s10 = smov 2   ;;  %s16885_s0 = inlined_call_operand.smem [shape: u32[31], index: -1, kind: input, shape index: {}] }
   0x1   :  { %s14834_s5 = sld [smem:[%s16885_s0]]   ;;  %s14769_s14 = smov 3  }
   0x2   :  { %s14839_s9 = sld [smem:[%s16885_s0 + %s14767_s6]]   ;;  %s14770_s18 = smov 4  }
   0x3   :  { %s14844_s13 = sld [smem:[%s16885_s0 + %s14768_s10]]   ;;  %s14771_s22 = smov 5  }
   0x4   :  { %s14849_s17 = sld [smem:[%s16885_s0 + %s14769_s14]]   ;;  %s14772_s26 = smov 6  }
   0x5   :  { %s14854_s21 = sld [smem:[%s16885_s0 + %s14770_s18]]   ;;  %s14773_s30 = smov 7  }
   0x6   :  { %s14859_s25 = sld [smem:[%s16885_s0 + %s14771_s22]]   ;;  %s14774_s4 = smov 8  }
   0x7   :  { %16917 = sst [smem:[#allocation53_spill]] %s14834_s5  ;;  %s14775_s10 = smov 9  }
   0x8   :  { %16918 = sst [smem:[#allocation54_spill]] %s14839_s9  ;;  %s14776_s15 = smov 10  }
   0x9   :  { %16919 = sst [smem:[#allocation55_spill]] %s14844_s13  ;;  %s14777_s20 = smov 11  }
   0xa   :  { %16920 = sst [smem:[#allocation56_spill]] %s14849_s17  ;;  %s14779_s1 = smov 13  }
   0xb   :  { %s14864_s29 = sld [smem:[%s16885_s0 + %s14772_s26]]   ;;  %s14778_s26 = smov 12  }
   0xc   :  { %s14869_s3 = sld [smem:[%s16885_s0 + %s14773_s30]]   ;;  %s14780_s7 = smov 14  }
   0xd   :  { %s14874_s8 = sld [smem:[%s16885_s0 + %s14774_s4]]   ;;  %s14782_s22 = smov 16  }
   0xe   :  { %s14879_s14 = sld [smem:[%s16885_s0 + %s14775_s10]]   ;;  %s14783_s28 = smov 17  }
   0xf   :  { %s14884_s19 = sld [smem:[%s16885_s0 + %s14776_s15]]   ;;  %s14781_s15 = smov 15  }
  0x10   :  { %s14889_s24 = sld [smem:[%s16885_s0 + %s14777_s20]]  }
  0x11   :  { %s14894_s30 = sld [smem:[%s16885_s0 + %s14778_s26]]  }
  0x12   :  { %16921 = sst [smem:[#allocation57_spill]] %s14869_s3 }
  0x13   :  { %16922 = sst [smem:[#allocation58_spill]] %s14874_s8 }
  0x14   :  { %16923 = sst [smem:[#allocation59_spill]] %s14879_s14 }
  0x15   :  { %s14899_s6 = sld [smem:[%s16885_s0 + %s14779_s1]]  }
  0x16   :  { %16924 = sst [smem:[#allocation60_spill]] %s14889_s24 }
  0x17   :  { %s14904_s12 = sld [smem:[%s16885_s0 + %s14780_s7]]   ;;  %s14784_s7 = smov 18  }
  0x18   :  { %s14909_s20 = sld [smem:[%s16885_s0 + %s14781_s15]]   ;;  %s14785_s15 = smov 19  }
  0x19   :  { %s14914_s27 = sld [smem:[%s16885_s0 + %s14782_s22]]   ;;  %s14786_s22 = smov 20  }
  0x1a   :  { %s14919_s4 = sld [smem:[%s16885_s0 + %s14783_s28]]   ;;  %s14787_s28 = smov 21  }
  0x1b   :  { %16925 = sst [smem:[#allocation61_spill]] %s14899_s6 }
  0x1c   :  { %s14924_s14 = sld [smem:[%s16885_s0 + %s14784_s7]]   ;;  %s14788_s7 = smov 22  }
  0x1d   :  { %16926 = sst [smem:[#allocation62_spill]] %s14904_s12 }
  0x1e   :  { %16927 = sst [smem:[#allocation63_spill]] %s14909_s20 }
  0x1f   :  { %16928 = sst [smem:[#allocation64_spill]] %s14914_s27 }
  0x20   :  { %16929 = sst [smem:[#allocation65_spill]] %s14919_s4 }
  0x21   :  { %s14929_s20 = sld [smem:[%s16885_s0 + %s14785_s15]]   ;;  %s14789_s15 = smov 23  }
  0x22   :  { %16930 = sst [smem:[#allocation66_spill]] %s14924_s14 }
  0x23   :  { %s14934_s9 = sld [smem:[%s16885_s0 + %s14786_s22]]   ;;  %s14790_s22 = smov 24  }
  0x24   :  { %s14939_s5 = sld [smem:[%s16885_s0 + %s14787_s28]]   ;;  %s14791_s28 = smov 25  }
  0x25   :  { %s14944_s14 = sld [smem:[%s16885_s0 + %s14788_s7]]   ;;  %s14792_s7 = smov 26  }
  0x26   :  { %s14949_s27 = sld [smem:[%s16885_s0 + %s14789_s15]]   ;;  %s14793_s15 = smov 27  }
  0x27   :  { %s14959_s6 = sld [smem:[%s16885_s0 + %s14791_s28]]   ;;  %s14795_s28 = smov 29  }
  0x29   :  { %16931 = sst [smem:[#allocation67_spill]] %s14934_s9 }
  0x2a   :  { %16932 = sst [smem:[#allocation68_spill]] %s14939_s5 }
  0x2b   :  { %16933 = sst [smem:[#allocation69_spill]] %s14944_s14 }
  0x2c   :  { %16934 = sst [smem:[#allocation70_spill]] %s14949_s27 }
  0x2d   :  { %s14954_s9 = sld [smem:[%s16885_s0 + %s14790_s22]]   ;;  %s14794_s22 = smov 28  }
  0x2e   :  { %16936 = sst [smem:[#allocation72_spill]] %s14959_s6 }
  0x2f   :  { %s14964_s14 = sld [smem:[%s16885_s0 + %s14792_s7]]   ;;  %s14796_s7 = smov 30  }
  0x30   :  { %s14969_s27 = sld [smem:[%s16885_s0 + %s14793_s15]]  }
  0x31   :  { %s14974_s24 = sld [smem:[%s16885_s0 + %s14794_s22]]  }
  0x32   :  { %s14979_s6 = sld [smem:[%s16885_s0 + %s14795_s28]]  }
  0x33   :  { %16935 = sst [smem:[#allocation71_spill]] %s14954_s9 }
  0x34   :  { %s14984_s8 = sld [smem:[%s16885_s0 + %s14796_s7]]  }
  0x35   :  { %66 = vsyncpa [#allocation3], 0 }
  0x36   :  { %67 = vsyncpa [#allocation5], 0 }
  0x37   :  { %68 = vsyncpa [#allocation8], 0 }
  0x38   :  { %69 = vsyncpa [#allocation11], 0 }
  0x39   :  { %70 = vsyncpa [#allocation14], 0 }
  0x3a   :  { %71 = vsyncpa [#allocation17], 0 }
  0x3b   :  { %72 = vsyncpa [#allocation20], 0 }
  0x3c   :  { %73 = vsyncpa [#allocation23], 0 }
  0x3d   :  { %74 = vsyncpa [#allocation26], 0 }
  0x3e   :  { %75 = vsyncpa [#allocation29], 0 }
  0x3f   :  { %76 = vsyncpa [#allocation32], 0 }
  0x40   :  { %77 = vsyncpa [#allocation35], 0 }
  0x41   :  { %78 = vsyncpa [#allocation38], 0  ;;  %s14986_s15 = smov 0  }
  0x42 LB: > { %s16937_s13 = sld [smem:[#allocation55_spill]]  ;;  %s14992_s0 = sadd.s32 4294967295, %s14765_s15   ;;  %s14765_s15 = sphi %s14986_s15, %s84_s15  }
  0x43   : > { %s16938_s12 = sld [smem:[#allocation62_spill]]  ;;  %p10292_p0 = scmp.ge.s32.totalorder %s14765_s15, 1 }
  0x44   : > { %s16939_s9 = sld [smem:[#allocation71_spill]]  ;;  %p750_p1 = scmp.lt.s32.totalorder %s14765_s15, 3 }
  0x45   : > { %s16940_s5 = sld [smem:[#allocation68_spill]] }
  0x46   : > { %s16941_s4 = sld [smem:[#allocation65_spill]]  ;;  %p14996_p2 = pnand %p10292_p0, %p750_p1 }
  0x47   : > { %s16942_s3 = sld [smem:[#allocation57_spill]]  ;;  %p13847_p3 = scmp.eq.s32.totalorder (!%p14996_p2), %s14992_s0, 0 }
  0x48   : > { %s16943_s17 = sld [smem:[#allocation56_spill]]  ;;  %754 = sbr.rel (%p14996_p2) target bundleno = 407 (0x197), region = 12 }
  0x49   : > { %s14797_s22 = smov (!%p14996_p2), [#allocation4]  }
  0x4a   : > { %s778_s23 = sshll.u32 (!%p14996_p2), %s14797_s22, 4  ;;  %s779_s23 = int_to_ptr.vmem [resolvable:$true] %s778_s23 }
  0x4e   : > { %s776_s18 = sshll.u32 %s16943_s17, 4  ;;  %s14013_s1 = scalar_lea.hbm %s16943_s17, 288  ;;  %s777_s18 = int_to_ptr.hbm [resolvable:$true] %s776_s18 }
  0x4f   : > { %s14007_s26 = sshra.s32 %s777_s18, 4  ;;  %s14008_s26 = int_to_ptr.hbm [resolvable:$true] %s14007_s26 }
  0x50   : > { %s14009_s28 = scalar_lea.hbm %s14008_s26, 288  ;;  %p14014_p7 = scmp.lt.s32.totalorder %s14008_s26, %s16943_s17 }
  0x51   : > { %p14010_p4 = scmp.ne.s32.totalorder %s14008_s26, %s14009_s28  ;;  %p14015_p8 = scmp.lt.s32.totalorder %s14013_s1, %s14009_s28 }
  0x53   : > { %p14011_p5 = pnand %p14010_p4, %p13847_p3  ;;  %p14016_p9 = por %p14015_p8, %p14014_p7 }
  0x55   : > { %p14012_p6 = pneg %p14011_p5 }
  0x57   : > { %p14017_p10 = pnand %p14016_p9, %p14012_p6 }
  0x59   : > { %14020 = shalt.err (!%p14017_p10)
}
  0x5a   : > { %s16899_s2 = smov 64   ;;  %s16901_s7 = smov 4  }
  0x5b   : > { %13750 = dma.hbm_to_vmem [thread:$0]  (%p13847_p3), %s777_s18, 4608, %s779_s23, [#allocation5], %s16899_s2, %s16899_s2, %s16901_s7  }
  0x5c   : > { %s802_s10 = sshll.u32 %s14859_s25, 4  ;;  %s14800_s11 = smov [#allocation7]   ;;  %s803_s10 = int_to_ptr.hbm [resolvable:$true] %s802_s10 }
  0x5d   : > { %s804_s22 = sshll.u32 %s14800_s11, 4  ;;  %s828_s26 = sshll.u32 %s16942_s3, 4  ;;  %s805_s22 = int_to_ptr.vmem [resolvable:$true] %s804_s22  ;;  %s829_s26 = int_to_ptr.hbm [resolvable:$true] %s828_s26 }
  0x5e   : > { %s14035_s28 = sshra.s32 %s803_s10, 4  ;;  %s14041_s17 = scalar_lea.hbm %s14859_s25, 64  ;;  %s14036_s28 = int_to_ptr.hbm [resolvable:$true] %s14035_s28 }
  0x5f   : > { %s14037_s1 = scalar_lea.hbm %s14036_s28, 64  ;;  %p14042_p0 = scmp.lt.s32.totalorder %s14036_s28, %s14859_s25 }
  0x60   : > { %p14038_p11 = scmp.ne.s32.totalorder %s14036_s28, %s14037_s1  ;;  %p14043_p1 = scmp.lt.s32.totalorder %s14041_s17, %s14037_s1 }
  0x62   : > { %p14039_p12 = pnand %p14038_p11, %p13847_p3  ;;  %p14044_p4 = por %p14043_p1, %p14042_p0 }
  0x64   : > { %p14040_p13 = pneg %p14039_p12 }
  0x66   : > { %p14045_p5 = pnand %p14044_p4, %p14040_p13 }
  0x68   : > { %14048 = shalt.err (!%p14045_p5)
}
  0x69   : > { %s16903_s18 = smov 128   ;;  %s16905_s23 = smov 8  }
  0x6a   : > { %13754 = dma.hbm_to_vmem [thread:$0]  (%p13847_p3), %s803_s10, 1024, %s805_s22, [#allocation8], %s16903_s18, %s16903_s18, %s16905_s23  }
  0x6b   : > { %s14803_s11 = smov [#allocation10]   ;;  %s858_s28 = sshll.u32 %s14884_s19, 4  ;;  %s15025_s28 = int_to_ptr.hbm [resolvable:$true] %s858_s28 }
  0x6c   : > { %s830_s2 = sshll.u32 %s14803_s11, 4  ;;  %s14063_s17 = sshra.s32 %s829_s26, 4  ;;  %s831_s2 = int_to_ptr.vmem [resolvable:$true] %s830_s2  ;;  %s14064_s17 = int_to_ptr.hbm [resolvable:$true] %s14063_s17 }
  0x6d   : > { %s14065_s1 = scalar_lea.hbm %s14064_s17, 128  ;;  %s14069_s7 = scalar_lea.hbm %s16942_s3, 128 }
  0x6e   : > { %p14066_p6 = scmp.ne.s32.totalorder %s14064_s17, %s14065_s1  ;;  %p14070_p9 = scmp.lt.s32.totalorder %s14064_s17, %s16942_s3 }
  0x6f   : > { %p14071_p10 = scmp.lt.s32.totalorder %s14069_s7, %s14065_s1 }
  0x70   : > { %p14067_p7 = pnand %p14066_p6, %p13847_p3 }
  0x71   : > { %p14072_p11 = por %p14071_p10, %p14070_p9 }
  0x72   : > { %p14068_p8 = pneg %p14067_p7 }
  0x74   : > { %p14073_p12 = pnand %p14072_p11, %p14068_p8 }
  0x76   : > { %14076 = shalt.err (!%p14073_p12)
}
  0x77   : > { %13758 = dma.hbm_to_vmem [thread:$0]  (%p13847_p3), %s829_s26, 2048, %s831_s2, [#allocation11], %s16903_s18, %s16903_s18, %s16905_s23  }
  0x78   : > { %s884_s10 = sshll.u32 %s14894_s30, 4  ;;  %s14804_s22 = smov [#allocation13]   ;;  %s15037_s10 = int_to_ptr.hbm [resolvable:$true] %s884_s10 }
  0x79   : > { %s860_s11 = sshll.u32 %s14804_s22, 4  ;;  %s14091_s7 = sshra.s32 %s15025_s28, 4  ;;  %s861_s11 = int_to_ptr.vmem [resolvable:$true] %s860_s11  ;;  %s14092_s7 = int_to_ptr.hbm [resolvable:$true] %s14091_s7 }
  0x7a   : > { %s14093_s17 = scalar_lea.hbm %s14092_s7, 1  ;;  %s14097_s1 = scalar_lea.hbm %s14884_s19, 1 }
  0x7b   : > { %p14094_p13 = scmp.ne.s32.totalorder %s14092_s7, %s14093_s17  ;;  %p14098_p4 = scmp.lt.s32.totalorder %s14092_s7, %s14884_s19 }
  0x7c   : > { %p14099_p5 = scmp.lt.s32.totalorder %s14097_s1, %s14093_s17 }
  0x7d   : > { %p14095_p0 = pnand %p14094_p13, %p13847_p3 }
  0x7e   : > { %p14100_p6 = por %p14099_p5, %p14098_p4 }
  0x7f   : > { %p14096_p1 = pneg %p14095_p0 }
  0x81   : > { %p14101_p7 = pnand %p14100_p6, %p14096_p1 }
  0x83   : > { %14104 = shalt.err (!%p14101_p7)
}
  0x84   : > { %13762 = dma.hbm_to_vmem [thread:$0]  (%p13847_p3), %s15025_s28, 16, %s861_s11, [#allocation14]  }
  0x85   : > { %s14805_s2 = smov [#allocation16]   ;;  %s910_s22 = sshll.u32 %s16938_s12, 4  ;;  %s15048_s22 = int_to_ptr.hbm [resolvable:$true] %s910_s22 }
  0x86   : > { %s886_s26 = sshll.u32 %s14805_s2, 4  ;;  %s14119_s7 = sshra.s32 %s15037_s10, 4  ;;  %s887_s26 = int_to_ptr.vmem [resolvable:$true] %s886_s26  ;;  %s14120_s7 = int_to_ptr.hbm [resolvable:$true] %s14119_s7 }
  0x87   : > { %s14121_s17 = scalar_lea.hbm %s14120_s7, 1  ;;  %s14125_s1 = scalar_lea.hbm %s14894_s30, 1 }
  0x88   : > { %p14122_p8 = scmp.ne.s32.totalorder %s14120_s7, %s14121_s17  ;;  %p14126_p11 = scmp.lt.s32.totalorder %s14120_s7, %s14894_s30 }
  0x89   : > { %p14127_p12 = scmp.lt.s32.totalorder %s14125_s1, %s14121_s17 }
  0x8a   : > { %p14123_p9 = pnand %p14122_p8, %p13847_p3 }
  0x8b   : > { %p14128_p13 = por %p14127_p12, %p14126_p11 }
  0x8c   : > { %p14124_p10 = pneg %p14123_p9 }
  0x8e   : > { %p14129_p0 = pnand %p14128_p13, %p14124_p10 }
  0x90   : > { %14132 = shalt.err (!%p14129_p0)
}
  0x91   : > { %13766 = dma.hbm_to_vmem [thread:$0]  (%p13847_p3), %s15037_s10, 16, %s887_s26, [#allocation17]  }
  0x92   : > { %s936_s28 = sshll.u32 %s16941_s4, 4  ;;  %s14806_s11 = smov [#allocation19]   ;;  %s15059_s28 = int_to_ptr.hbm [resolvable:$true] %s936_s28 }
  0x93   : > { %s912_s2 = sshll.u32 %s14806_s11, 4  ;;  %s14147_s7 = sshra.s32 %s15048_s22, 4  ;;  %s913_s2 = int_to_ptr.vmem [resolvable:$true] %s912_s2  ;;  %s14148_s7 = int_to_ptr.hbm [resolvable:$true] %s14147_s7 }
  0x94   : > { %s14149_s17 = scalar_lea.hbm %s14148_s7, 2  ;;  %s14153_s1 = scalar_lea.hbm %s16938_s12, 2 }
  0x95   : > { %p14150_p1 = scmp.ne.s32.totalorder %s14148_s7, %s14149_s17  ;;  %p14154_p6 = scmp.lt.s32.totalorder %s14148_s7, %s16938_s12 }
  0x96   : > { %p14155_p7 = scmp.lt.s32.totalorder %s14153_s1, %s14149_s17 }
  0x97   : > { %p14151_p4 = pnand %p14150_p1, %p13847_p3 }
  0x98   : > { %p14156_p8 = por %p14155_p7, %p14154_p6 }
  0x99   : > { %p14152_p5 = pneg %p14151_p4 }
  0x9b   : > { %p14157_p9 = pnand %p14156_p8, %p14152_p5 }
  0x9d   : > { %14160 = shalt.err (!%p14157_p9)
}
  0x9e   : > { %13770 = dma.hbm_to_vmem [thread:$0]  (%p13847_p3), %s15048_s22, 32, %s913_s2, [#allocation20]  }
  0x9f   : > { %s14807_s10 = smov [#allocation22]   ;;  %s962_s11 = sshll.u32 %s14929_s20, 4  ;;  %s15070_s11 = int_to_ptr.hbm [resolvable:$true] %s962_s11 }
  0xa0   : > { %s938_s26 = sshll.u32 %s14807_s10, 4  ;;  %s14175_s7 = sshra.s32 %s15059_s28, 4  ;;  %s939_s26 = int_to_ptr.vmem [resolvable:$true] %s938_s26  ;;  %s14176_s7 = int_to_ptr.hbm [resolvable:$true] %s14175_s7 }
  0xa1   : > { %s14177_s17 = scalar_lea.hbm %s14176_s7, 288  ;;  %s14181_s1 = scalar_lea.hbm %s16941_s4, 288 }
  0xa2   : > { %p14178_p10 = scmp.ne.s32.totalorder %s14176_s7, %s14177_s17  ;;  %p14182_p13 = scmp.lt.s32.totalorder %s14176_s7, %s16941_s4 }
  0xa3   : > { %p14183_p0 = scmp.lt.s32.totalorder %s14181_s1, %s14177_s17 }
  0xa4   : > { %p14179_p11 = pnand %p14178_p10, %p13847_p3 }
  0xa5   : > { %p14184_p1 = por %p14183_p0, %p14182_p13 }
  0xa6   : > { %p14180_p12 = pneg %p14179_p11 }
  0xa8   : > { %p14185_p4 = pnand %p14184_p1, %p14180_p12 }
  0xaa   : > { %14188 = shalt.err (!%p14185_p4)
}
  0xab   : > { %s16945_s22 = smov 4   ;;  %s16946_s2 = smov 64  }
  0xac   : > { %13774 = dma.hbm_to_vmem [thread:$0]  (%p13847_p3), %s15059_s28, 4608, %s939_s26, [#allocation23], %s16946_s2, %s16946_s2, %s16945_s22  }
  0xad   : > { %s988_s10 = sshll.u32 %s16940_s5, 4  ;;  %s14808_s18 = smov [#allocation25]   ;;  %s15084_s10 = int_to_ptr.hbm [resolvable:$true] %s988_s10 }
  0xae   : > { %s964_s23 = sshll.u32 %s14808_s18, 4  ;;  %s14203_s7 = sshra.s32 %s15070_s11, 4  ;;  %s965_s23 = int_to_ptr.vmem [resolvable:$true] %s964_s23  ;;  %s14204_s7 = int_to_ptr.hbm [resolvable:$true] %s14203_s7 }
  0xaf   : > { %s14205_s17 = scalar_lea.hbm %s14204_s7, 64  ;;  %s14209_s1 = scalar_lea.hbm %s14929_s20, 64 }
  0xb0   : > { %p14206_p5 = scmp.ne.s32.totalorder %s14204_s7, %s14205_s17  ;;  %p14210_p8 = scmp.lt.s32.totalorder %s14204_s7, %s14929_s20 }
  0xb1   : > { %p14211_p9 = scmp.lt.s32.totalorder %s14209_s1, %s14205_s17 }
  0xb2   : > { %p14207_p6 = pnand %p14206_p5, %p13847_p3 }
  0xb3   : > { %p14212_p10 = por %p14211_p9, %p14210_p8 }
  0xb4   : > { %p14208_p7 = pneg %p14207_p6 }
  0xb6   : > { %p14213_p11 = pnand %p14212_p10, %p14208_p7 }
  0xb8   : > { %14216 = shalt.err (!%p14213_p11)
}
  0xb9   : > { %s16947_s28 = smov 8   ;;  %s16948_s18 = smov 128  }
  0xba   : > { %13778 = dma.hbm_to_vmem [thread:$0]  (%p13847_p3), %s15070_s11, 1024, %s965_s23, [#allocation26], %s16948_s18, %s16948_s18, %s16947_s28  }
  0xbb   : > { %s14809_s26 = smov [#allocation28]   ;;  %s1018_s4 = sshll.u32 %s16939_s9, 4  ;;  %s15098_s4 = int_to_ptr.hbm [resolvable:$true] %s1018_s4 }
  0xbc   : > { %s990_s3 = sshll.u32 %s14809_s26, 4  ;;  %s14231_s7 = sshra.s32 %s15084_s10, 4  ;;  %s991_s3 = int_to_ptr.vmem [resolvable:$true] %s990_s3  ;;  %s14232_s7 = int_to_ptr.hbm [resolvable:$true] %s14231_s7 }
  0xbd   : > { %s14233_s17 = scalar_lea.hbm %s14232_s7, 2304  ;;  %s14237_s1 = scalar_lea.hbm %s16940_s5, 2304 }
  0xbe   : > { %p14234_p12 = scmp.ne.s32.totalorder %s14232_s7, %s14233_s17  ;;  %p14238_p1 = scmp.lt.s32.totalorder %s14232_s7, %s16940_s5 }
  0xbf   : > { %p14239_p4 = scmp.lt.s32.totalorder %s14237_s1, %s14233_s17 }
  0xc0   : > { %p14235_p13 = pnand %p14234_p12, %p13847_p3 }
  0xc1   : > { %p14240_p5 = por %p14239_p4, %p14238_p1 }
  0xc2   : > { %p14236_p0 = pneg %p14235_p13 }
  0xc4   : > { %p14241_p6 = pnand %p14240_p5, %p14236_p0 }
  0xc6   : > { %14244 = shalt.err (!%p14241_p6)
}
  0xc7   : > { %13782 = dma.hbm_to_vmem [thread:$0]  (%p13847_p3), %s15084_s10, 36864, %s991_s3, [#allocation29], %s16948_s18, %s16948_s18, %s16947_s28  }
  0xc8   : > { %s1043_s23 = sshll.u32 %s14964_s14, 4  ;;  %s14810_s11 = smov [#allocation31]   ;;  %s15112_s23 = int_to_ptr.hbm [resolvable:$true] %s1043_s23 }
  0xc9   : > { %s1020_s26 = sshll.u32 %s14810_s11, 4  ;;  %s14259_s7 = sshra.s32 %s15098_s4, 4  ;;  %s1021_s26 = int_to_ptr.vmem [resolvable:$true] %s1020_s26  ;;  %s14260_s7 = int_to_ptr.hbm [resolvable:$true] %s14259_s7 }
  0xca   : > { %s14261_s17 = scalar_lea.hbm %s14260_s7, 1  ;;  %s14265_s1 = scalar_lea.hbm %s16939_s9, 1 }
  0xcb   : > { %p14262_p7 = scmp.ne.s32.totalorder %s14260_s7, %s14261_s17  ;;  %p14266_p10 = scmp.lt.s32.totalorder %s14260_s7, %s16939_s9 }
  0xcc   : > { %p14267_p11 = scmp.lt.s32.totalorder %s14265_s1, %s14261_s17 }
  0xcd   : > { %p14263_p8 = pnand %p14262_p7, %p13847_p3 }
  0xce   : > { %p14268_p12 = por %p14267_p11, %p14266_p10 }
  0xcf   : > { %p14264_p9 = pneg %p14263_p8 }
  0xd1   : > { %p14269_p13 = pnand %p14268_p12, %p14264_p9 }
  0xd3   : > { %14272 = shalt.err (!%p14269_p13)
}
  0xd4   : > { %13786 = dma.hbm_to_vmem [thread:$0]  (%p13847_p3), %s15098_s4, 16, %s1021_s26, [#allocation32]  }
  0xd5   : > { %s14811_s3 = smov [#allocation34]   ;;  %s1071_s11 = sshll.u32 %s14974_s24, 4  ;;  %s15123_s11 = int_to_ptr.hbm [resolvable:$true] %s1071_s11 }
  0xd6   : > { %s1045_s10 = sshll.u32 %s14811_s3, 4  ;;  %s14287_s7 = sshra.s32 %s15112_s23, 4  ;;  %s1046_s10 = int_to_ptr.vmem [resolvable:$true] %s1045_s10  ;;  %s14288_s7 = int_to_ptr.hbm [resolvable:$true] %s14287_s7 }
  0xd7   : > { %s14289_s17 = scalar_lea.hbm %s14288_s7, 64  ;;  %s14293_s1 = scalar_lea.hbm %s14964_s14, 64 }
  0xd8   : > { %p14290_p0 = scmp.ne.s32.totalorder %s14288_s7, %s14289_s17  ;;  %p14294_p5 = scmp.lt.s32.totalorder %s14288_s7, %s14964_s14 }
  0xd9   : > { %p14295_p6 = scmp.lt.s32.totalorder %s14293_s1, %s14289_s17 }
  0xda   : > { %p14291_p1 = pnand %p14290_p0, %p13847_p3 }
  0xdb   : > { %p14296_p7 = por %p14295_p6, %p14294_p5 }
  0xdc   : > { %p14292_p4 = pneg %p14291_p1 }
  0xde   : > { %p14297_p8 = pnand %p14296_p7, %p14292_p4 }
  0xe0   : > { %14300 = shalt.err (!%p14297_p8)
}
  0xe1   : > { %13790 = dma.hbm_to_vmem [thread:$0]  (%p13847_p3), %s15112_s23, 1024, %s1046_s10, [#allocation35], %s16948_s18, %s16948_s18, %s16947_s28  }
  0xe2   : > { %s14812_s4 = smov [#allocation37]   ;;  %s765_s3 = sshll.u32 %s16937_s13, 4  ;;  %s15137_s3 = int_to_ptr.hbm [resolvable:$true] %s765_s3 }
  0xe3   : > { %s1073_s26 = sshll.u32 %s14812_s4, 4  ;;  %s14315_s7 = sshra.s32 %s15123_s11, 4  ;;  %s1074_s26 = int_to_ptr.vmem [resolvable:$true] %s1073_s26  ;;  %s14316_s7 = int_to_ptr.hbm [resolvable:$true] %s14315_s7 }
  0xe4   : > { %s14317_s17 = scalar_lea.hbm %s14316_s7, 72  ;;  %s14321_s1 = scalar_lea.hbm %s14974_s24, 72 }
  0xe5   : > { %p14318_p9 = scmp.ne.s32.totalorder %s14316_s7, %s14317_s17  ;;  %p14322_p12 = scmp.lt.s32.totalorder %s14316_s7, %s14974_s24 }
  0xe6   : > { %p14323_p13 = scmp.lt.s32.totalorder %s14321_s1, %s14317_s17 }
  0xe7   : > { %p14319_p10 = pnand %p14318_p9, %p13847_p3 }
  0xe8   : > { %p14324_p0 = por %p14323_p13, %p14322_p12 }
  0xe9   : > { %p14320_p11 = pneg %p14319_p10 }
  0xeb   : > { %p14325_p1 = pnand %p14324_p0, %p14320_p11 }
  0xed   : > { %14328 = shalt.err (!%p14325_p1)
}
  0xee   : > { %13794 = dma.hbm_to_vmem [thread:$0]  (%p13847_p3), %s15123_s11, 1152, %s1074_s26, [#allocation38], %s16946_s2, %s16946_s2, %s16945_s22  }
  0xef   : > { %s791_s23 = sshll.u32 %s14854_s21, 4  ;;  %s14813_s10 = smov [#allocation2]   ;;  %s15151_s23 = int_to_ptr.hbm [resolvable:$true] %s791_s23 }
  0xf0   : > { %s767_s4 = sshll.u32 %s14813_s10, 4  ;;  %s14343_s7 = sshra.s32 %s15137_s3, 4  ;;  %s768_s4 = int_to_ptr.vmem [resolvable:$true] %s767_s4  ;;  %s14344_s7 = int_to_ptr.hbm [resolvable:$true] %s14343_s7 }
  0xf1   : > { %s14345_s17 = scalar_lea.hbm %s14344_s7, 1  ;;  %s14349_s1 = scalar_lea.hbm %s16937_s13, 1 }
  0xf2   : > { %p14346_p4 = scmp.ne.s32.totalorder %s14344_s7, %s14345_s17  ;;  %p14350_p7 = scmp.lt.s32.totalorder %s14344_s7, %s16937_s13 }
  0xf3   : > { %p14351_p8 = scmp.lt.s32.totalorder %s14349_s1, %s14345_s17 }
  0xf4   : > { %p14347_p5 = pnand %p14346_p4, %p13847_p3 }
  0xf5   : > { %p14352_p9 = por %p14351_p8, %p14350_p7 }
  0xf6   : > { %p14348_p6 = pneg %p14347_p5 }
  0xf8   : > { %p14353_p10 = pnand %p14352_p9, %p14348_p6 }
  0xfa   : > { %14356 = shalt.err (!%p14353_p10)
}
  0xfb   : > { %13748 = dma.hbm_to_vmem [thread:$0]  (%p13847_p3), %s15137_s3, 16, %s768_s4, [#allocation3]  }
  0xfc   : > { %s14814_s11 = smov [#allocation6]   ;;  %s817_s10 = sshll.u32 %s14864_s29, 4  ;;  %s15162_s10 = int_to_ptr.hbm [resolvable:$true] %s817_s10 }
  0xfd   : > { %s793_s26 = sshll.u32 %s14814_s11, 4  ;;  %s14371_s7 = sshra.s32 %s15151_s23, 4  ;;  %s794_s26 = int_to_ptr.vmem [resolvable:$true] %s793_s26  ;;  %s14372_s7 = int_to_ptr.hbm [resolvable:$true] %s14371_s7 }
  0xfe   : > { %s14373_s17 = scalar_lea.hbm %s14372_s7, 1  ;;  %s14377_s1 = scalar_lea.hbm %s14854_s21, 1 }
  0xff   : > { %p14374_p11 = scmp.ne.s32.totalorder %s14372_s7, %s14373_s17  ;;  %p14378_p0 = scmp.lt.s32.totalorder %s14372_s7, %s14854_s21 }
 0x100   : > { %p14379_p1 = scmp.lt.s32.totalorder %s14377_s1, %s14373_s17 }
 0x101   : > { %p14375_p12 = pnand %p14374_p11, %p13847_p3 }
 0x102   : > { %p14380_p4 = por %p14379_p1, %p14378_p0 }
 0x103   : > { %p14376_p13 = pneg %p14375_p12 }
 0x105   : > { %p14381_p5 = pnand %p14380_p4, %p14376_p13 }
 0x107   : > { %14384 = shalt.err (!%p14381_p5)
}
 0x108   : > { %s16949_s3 = sld [smem:[#allocation58_spill]]  ;;  %s14815_s11 = smov [#allocation9]  }
 0x109   : > { %13752 = dma.hbm_to_vmem [thread:$0]  (%p13847_p3), %s15151_s23, 16, %s794_s26, [#allocation5]  }
 0x10a   : > { %s819_s5 = sshll.u32 %s14815_s11, 4  ;;  %s14399_s7 = sshra.s32 %s15162_s10, 4  ;;  %s820_s5 = int_to_ptr.vmem [resolvable:$true] %s819_s5  ;;  %s14400_s7 = int_to_ptr.hbm [resolvable:$true] %s14399_s7 }
 0x10b   : > { %s14401_s17 = scalar_lea.hbm %s14400_s7, 2  ;;  %s14405_s1 = scalar_lea.hbm %s14864_s29, 2 }
 0x10c   : > { %p14402_p6 = scmp.ne.s32.totalorder %s14400_s7, %s14401_s17  ;;  %p14406_p9 = scmp.lt.s32.totalorder %s14400_s7, %s14864_s29 }
 0x10d   : > { %p14407_p10 = scmp.lt.s32.totalorder %s14405_s1, %s14401_s17 }
 0x10e   : > { %s843_s4 = sshll.u32 %s16949_s3, 4  ;;  %p14403_p7 = pnand %p14402_p6, %p13847_p3  ;;  %s15173_s4 = int_to_ptr.hbm [resolvable:$true] %s843_s4 }
 0x10f   : > { %p14408_p11 = por %p14407_p10, %p14406_p9 }
 0x110   : > { %p14404_p8 = pneg %p14403_p7 }
 0x112   : > { %p14409_p12 = pnand %p14408_p11, %p14404_p8 }
 0x114   : > { %14412 = shalt.err (!%p14409_p12)
}
 0x115   : > { %s16950_s23 = sld [smem:[#allocation60_spill]]  ;;  %s14816_s26 = smov [#allocation12]  }
 0x116   : > { %13756 = dma.hbm_to_vmem [thread:$0]  (%p13847_p3), %s15162_s10, 32, %s820_s5, [#allocation8]  }
 0x117   : > { %s845_s11 = sshll.u32 %s14816_s26, 4  ;;  %s14427_s7 = sshra.s32 %s15173_s4, 4  ;;  %s846_s11 = int_to_ptr.vmem [resolvable:$true] %s845_s11  ;;  %s14428_s7 = int_to_ptr.hbm [resolvable:$true] %s14427_s7 }
 0x118   : > { %s14429_s17 = scalar_lea.hbm %s14428_s7, 2  ;;  %s14433_s1 = scalar_lea.hbm %s16949_s3, 2 }
 0x119   : > { %p14430_p13 = scmp.ne.s32.totalorder %s14428_s7, %s14429_s17  ;;  %p14434_p4 = scmp.lt.s32.totalorder %s14428_s7, %s16949_s3 }
 0x11a   : > { %p14435_p5 = scmp.lt.s32.totalorder %s14433_s1, %s14429_s17 }
 0x11b   : > { %s869_s9 = sshll.u32 %s16950_s23, 4  ;;  %p14431_p0 = pnand %p14430_p13, %p13847_p3  ;;  %s15184_s9 = int_to_ptr.hbm [resolvable:$true] %s869_s9 }
 0x11c   : > { %p14436_p6 = por %p14435_p5, %p14434_p4 }
 0x11d   : > { %p14432_p1 = pneg %p14431_p0 }
 0x11f   : > { %p14437_p7 = pnand %p14436_p6, %p14432_p1 }
 0x121   : > { %14440 = shalt.err (!%p14437_p7)
}
 0x122   : > { %s16951_s5 = sld [smem:[#allocation61_spill]]  ;;  %s14817_s26 = smov [#allocation15]  }
 0x123   : > { %13760 = dma.hbm_to_vmem [thread:$0]  (%p13847_p3), %s15173_s4, 32, %s846_s11, [#allocation11]  }
 0x124   : > { %s871_s12 = sshll.u32 %s14817_s26, 4  ;;  %s14455_s7 = sshra.s32 %s15184_s9, 4  ;;  %s872_s12 = int_to_ptr.vmem [resolvable:$true] %s871_s12  ;;  %s14456_s7 = int_to_ptr.hbm [resolvable:$true] %s14455_s7 }
 0x125   : > { %s14457_s17 = scalar_lea.hbm %s14456_s7, 288  ;;  %s14461_s1 = scalar_lea.hbm %s16950_s23, 288 }
 0x126   : > { %p14458_p8 = scmp.ne.s32.totalorder %s14456_s7, %s14457_s17  ;;  %p14462_p11 = scmp.lt.s32.totalorder %s14456_s7, %s16950_s23 }
 0x127   : > { %p14463_p12 = scmp.lt.s32.totalorder %s14461_s1, %s14457_s17 }
 0x128   : > { %s895_s10 = sshll.u32 %s16951_s5, 4  ;;  %p14459_p9 = pnand %p14458_p8, %p13847_p3  ;;  %s15195_s10 = int_to_ptr.hbm [resolvable:$true] %s895_s10 }
 0x129   : > { %p14464_p13 = por %p14463_p12, %p14462_p11 }
 0x12a   : > { %p14460_p10 = pneg %p14459_p9 }
 0x12c   : > { %p14465_p0 = pnand %p14464_p13, %p14460_p10 }
 0x12e   : > { %14468 = shalt.err (!%p14465_p0)
}
 0x12f   : > { %s16952_s4 = sld [smem:[#allocation64_spill]]  ;;  %s14818_s11 = smov [#allocation18]  }
 0x130   : > { %13764 = dma.hbm_to_vmem [thread:$0]  (%p13847_p3), %s15184_s9, 4608, %s872_s12, [#allocation14], %s16946_s2, %s16946_s2, %s16945_s22  }
 0x131   : > { %s897_s26 = sshll.u32 %s14818_s11, 4  ;;  %s14483_s7 = sshra.s32 %s15195_s10, 4  ;;  %s898_s26 = int_to_ptr.vmem [resolvable:$true] %s897_s26  ;;  %s14484_s7 = int_to_ptr.hbm [resolvable:$true] %s14483_s7 }
 0x132   : > { %s14485_s17 = scalar_lea.hbm %s14484_s7, 64  ;;  %s14489_s1 = scalar_lea.hbm %s16951_s5, 64 }
 0x133   : > { %p14486_p1 = scmp.ne.s32.totalorder %s14484_s7, %s14485_s17  ;;  %p14490_p6 = scmp.lt.s32.totalorder %s14484_s7, %s16951_s5 }
 0x134   : > { %p14491_p7 = scmp.lt.s32.totalorder %s14489_s1, %s14485_s17 }
 0x135   : > { %s925_s3 = sshll.u32 %s16952_s4, 4  ;;  %p14487_p4 = pnand %p14486_p1, %p13847_p3  ;;  %s15209_s3 = int_to_ptr.hbm [resolvable:$true] %s925_s3 }
 0x136   : > { %p14492_p8 = por %p14491_p7, %p14490_p6 }
 0x137   : > { %p14488_p5 = pneg %p14487_p4 }
 0x139   : > { %p14493_p9 = pnand %p14492_p8, %p14488_p5 }
 0x13b   : > { %14496 = shalt.err (!%p14493_p9)
}
 0x13c   : > { %s16953_s9 = sld [smem:[#allocation66_spill]]  ;;  %s14819_s11 = smov [#allocation21]  }
 0x13d   : > { %13768 = dma.hbm_to_vmem [thread:$0]  (%p13847_p3), %s15195_s10, 1024, %s898_s26, [#allocation17], %s16948_s18, %s16948_s18, %s16947_s28  }
 0x13e   : > { %s927_s13 = sshll.u32 %s14819_s11, 4  ;;  %s14511_s7 = sshra.s32 %s15209_s3, 4  ;;  %s928_s13 = int_to_ptr.vmem [resolvable:$true] %s927_s13  ;;  %s14512_s7 = int_to_ptr.hbm [resolvable:$true] %s14511_s7 }
 0x13f   : > { %s14513_s17 = scalar_lea.hbm %s14512_s7, 1  ;;  %s14517_s1 = scalar_lea.hbm %s16952_s4, 1 }
 0x140   : > { %p14514_p10 = scmp.ne.s32.totalorder %s14512_s7, %s14513_s17  ;;  %p14518_p13 = scmp.lt.s32.totalorder %s14512_s7, %s16952_s4 }
 0x141   : > { %p14519_p0 = scmp.lt.s32.totalorder %s14517_s1, %s14513_s17 }
 0x142   : > { %s951_s12 = sshll.u32 %s16953_s9, 4  ;;  %p14515_p11 = pnand %p14514_p10, %p13847_p3  ;;  %s15223_s12 = int_to_ptr.hbm [resolvable:$true] %s951_s12 }
 0x143   : > { %p14520_p1 = por %p14519_p0, %p14518_p13 }
 0x144   : > { %p14516_p12 = pneg %p14515_p11 }
 0x146   : > { %p14521_p4 = pnand %p14520_p1, %p14516_p12 }
 0x148   : > { %14524 = shalt.err (!%p14521_p4)
}
 0x149   : > { %s16954_s10 = sld [smem:[#allocation67_spill]]  ;;  %s14820_s26 = smov [#allocation24]  }
 0x14a   : > { %13772 = dma.hbm_to_vmem [thread:$0]  (%p13847_p3), %s15209_s3, 16, %s928_s13, [#allocation20]  }
 0x14b   : > { %s953_s11 = sshll.u32 %s14820_s26, 4  ;;  %s14539_s7 = sshra.s32 %s15223_s12, 4  ;;  %s954_s11 = int_to_ptr.vmem [resolvable:$true] %s953_s11  ;;  %s14540_s7 = int_to_ptr.hbm [resolvable:$true] %s14539_s7 }
 0x14c   : > { %s14541_s17 = scalar_lea.hbm %s14540_s7, 1  ;;  %s14545_s1 = scalar_lea.hbm %s16953_s9, 1 }
 0x14d   : > { %p14542_p5 = scmp.ne.s32.totalorder %s14540_s7, %s14541_s17  ;;  %p14546_p8 = scmp.lt.s32.totalorder %s14540_s7, %s16953_s9 }
 0x14e   : > { %p14547_p9 = scmp.lt.s32.totalorder %s14545_s1, %s14541_s17 }
 0x14f   : > { %s977_s5 = sshll.u32 %s16954_s10, 4  ;;  %p14543_p6 = pnand %p14542_p5, %p13847_p3  ;;  %s15234_s5 = int_to_ptr.hbm [resolvable:$true] %s977_s5 }
 0x150   : > { %p14548_p10 = por %p14547_p9, %p14546_p8 }
 0x151   : > { %p14544_p7 = pneg %p14543_p6 }
 0x153   : > { %p14549_p11 = pnand %p14548_p10, %p14544_p7 }
 0x155   : > { %14552 = shalt.err (!%p14549_p11)
}
 0x156   : > { %s16955_s13 = sld [smem:[#allocation69_spill]]  ;;  %s14821_s26 = smov [#allocation27]  }
 0x157   : > { %13776 = dma.hbm_to_vmem [thread:$0]  (%p13847_p3), %s15223_s12, 16, %s954_s11, [#allocation23]  }
 0x158   : > { %s979_s4 = sshll.u32 %s14821_s26, 4  ;;  %s14567_s7 = sshra.s32 %s15234_s5, 4  ;;  %s980_s4 = int_to_ptr.vmem [resolvable:$true] %s979_s4  ;;  %s14568_s7 = int_to_ptr.hbm [resolvable:$true] %s14567_s7 }
 0x159   : > { %s14569_s17 = scalar_lea.hbm %s14568_s7, 2  ;;  %s14573_s1 = scalar_lea.hbm %s16954_s10, 2 }
 0x15a   : > { %p14570_p12 = scmp.ne.s32.totalorder %s14568_s7, %s14569_s17  ;;  %p14574_p1 = scmp.lt.s32.totalorder %s14568_s7, %s16954_s10 }
 0x15b   : > { %p14575_p4 = scmp.lt.s32.totalorder %s14573_s1, %s14569_s17 }
 0x15c   : > { %s1003_s3 = sshll.u32 %s16955_s13, 4  ;;  %p14571_p13 = pnand %p14570_p12, %p13847_p3  ;;  %s15245_s3 = int_to_ptr.hbm [resolvable:$true] %s1003_s3 }
 0x15d   : > { %p14576_p5 = por %p14575_p4, %p14574_p1 }
 0x15e   : > { %p14572_p0 = pneg %p14571_p13 }
 0x160   : > { %p14577_p6 = pnand %p14576_p5, %p14572_p0 }
 0x162   : > { %14580 = shalt.err (!%p14577_p6)
}
 0x163   : > { %s16956_s12 = sld [smem:[#allocation72_spill]]  ;;  %s14822_s11 = smov [#allocation30]  }
 0x164   : > { %13780 = dma.hbm_to_vmem [thread:$0]  (%p13847_p3), %s15234_s5, 32, %s980_s4, [#allocation26]  }
 0x165   : > { %s1005_s26 = sshll.u32 %s14822_s11, 4  ;;  %s14595_s7 = sshra.s32 %s15245_s3, 4  ;;  %s1006_s26 = int_to_ptr.vmem [resolvable:$true] %s1005_s26  ;;  %s14596_s7 = int_to_ptr.hbm [resolvable:$true] %s14595_s7 }
 0x166   : > { %s14597_s17 = scalar_lea.hbm %s14596_s7, 2  ;;  %s14601_s1 = scalar_lea.hbm %s16955_s13, 2 }
 0x167   : > { %p14598_p7 = scmp.ne.s32.totalorder %s14596_s7, %s14597_s17  ;;  %p14602_p10 = scmp.lt.s32.totalorder %s14596_s7, %s16955_s13 }
 0x168   : > { %p14603_p11 = scmp.lt.s32.totalorder %s14601_s1, %s14597_s17 }
 0x169   : > { %s1029_s9 = sshll.u32 %s16956_s12, 4  ;;  %p14599_p8 = pnand %p14598_p7, %p13847_p3  ;;  %s15256_s9 = int_to_ptr.hbm [resolvable:$true] %s1029_s9 }
 0x16a   : > { %p14604_p12 = por %p14603_p11, %p14602_p10 }
 0x16b   : > { %p14600_p9 = pneg %p14599_p8 }
 0x16d   : > { %p14605_p13 = pnand %p14604_p12, %p14600_p9 }
 0x16f   : > { %14608 = shalt.err (!%p14605_p13)
}
 0x170   : > { %13784 = dma.hbm_to_vmem [thread:$0]  (%p13847_p3), %s15245_s3, 32, %s1006_s26, [#allocation29]  }
 0x171   : > { %s1057_s5 = sshll.u32 %s14969_s27, 4  ;;  %s14823_s4 = smov [#allocation33]   ;;  %s15267_s5 = int_to_ptr.hbm [resolvable:$true] %s1057_s5 }
 0x172   : > { %s1031_s11 = sshll.u32 %s14823_s4, 4  ;;  %s14623_s7 = sshra.s32 %s15256_s9, 4  ;;  %s1032_s11 = int_to_ptr.vmem [resolvable:$true] %s1031_s11  ;;  %s14624_s7 = int_to_ptr.hbm [resolvable:$true] %s14623_s7 }
 0x173   : > { %s14625_s17 = scalar_lea.hbm %s14624_s7, 576  ;;  %s14629_s1 = scalar_lea.hbm %s16956_s12, 576 }
 0x174   : > { %p14626_p0 = scmp.ne.s32.totalorder %s14624_s7, %s14625_s17  ;;  %p14630_p5 = scmp.lt.s32.totalorder %s14624_s7, %s16956_s12 }
 0x175   : > { %p14631_p6 = scmp.lt.s32.totalorder %s14629_s1, %s14625_s17 }
 0x176   : > { %p14627_p1 = pnand %p14626_p0, %p13847_p3 }
 0x177   : > { %p14632_p7 = por %p14631_p6, %p14630_p5 }
 0x178   : > { %p14628_p4 = pneg %p14627_p1 }
 0x17a   : > { %p14633_p8 = pnand %p14632_p7, %p14628_p4 }
 0x17c   : > { %14636 = shalt.err (!%p14633_p8)
}
 0x17d   : > { %13788 = dma.hbm_to_vmem [thread:$0]  (%p13847_p3), %s15256_s9, 9216, %s1032_s11, [#allocation32], %s16948_s18, %s16948_s18, %s16947_s28  }
 0x17e   : > { %s14824_s3 = smov [#allocation36]   ;;  %s1086_s4 = sshll.u32 %s14979_s6, 4  ;;  %s1087_s4 = int_to_ptr.hbm [resolvable:$true] %s1086_s4 }
 0x17f   : > { %s1059_s26 = sshll.u32 %s14824_s3, 4  ;;  %s14651_s7 = sshra.s32 %s15267_s5, 4  ;;  %s1060_s26 = int_to_ptr.vmem [resolvable:$true] %s1059_s26  ;;  %s14652_s7 = int_to_ptr.hbm [resolvable:$true] %s14651_s7 }
 0x180   : > { %s14653_s17 = scalar_lea.hbm %s14652_s7, 288  ;;  %s14657_s1 = scalar_lea.hbm %s14969_s27, 288 }
 0x181   : > { %p14654_p9 = scmp.ne.s32.totalorder %s14652_s7, %s14653_s17  ;;  %p14658_p12 = scmp.lt.s32.totalorder %s14652_s7, %s14969_s27 }
 0x182   : > { %p14659_p13 = scmp.lt.s32.totalorder %s14657_s1, %s14653_s17 }
 0x183   : > { %p14655_p10 = pnand %p14654_p9, %p13847_p3 }
 0x184   : > { %p14660_p0 = por %p14659_p13, %p14658_p12 }
 0x185   : > { %p14656_p11 = pneg %p14655_p10 }
 0x187   : > { %p14661_p1 = pnand %p14660_p0, %p14656_p11 }
 0x189   : > { %14664 = shalt.err (!%p14661_p1)
}
 0x18a   : > { %13792 = dma.hbm_to_vmem [thread:$0]  (%p13847_p3), %s15267_s5, 4608, %s1060_s26, [#allocation35], %s16946_s2, %s16946_s2, %s16945_s22  }
 0x18b   : > { %s14825_s28 = smov [#allocation39]   ;;  %s14679_s9 = sshra.s32 %s1087_s4, 4  ;;  %s14680_s9 = int_to_ptr.hbm [resolvable:$true] %s14679_s9 }
 0x18c   : > { %s1088_s18 = sshll.u32 %s14825_s28, 4  ;;  %s14681_s11 = scalar_lea.hbm %s14680_s9, 2  ;;  %s1089_s18 = int_to_ptr.vmem [resolvable:$true] %s1088_s18 }
 0x18d   : > { %p14682_p4 = scmp.ne.s32.totalorder %s14680_s9, %s14681_s11  ;;  %s14685_s3 = scalar_lea.hbm %s14979_s6, 2 }
 0x18e   : > { %p14686_p7 = scmp.lt.s32.totalorder %s14680_s9, %s14979_s6  ;;  %p14687_p8 = scmp.lt.s32.totalorder %s14685_s3, %s14681_s11 }
 0x18f   : > { %p14683_p5 = pnand %p14682_p4, %p13847_p3 }
 0x190   : > { %p14688_p9 = por %p14687_p8, %p14686_p7 }
 0x191   : > { %p14684_p6 = pneg %p14683_p5 }
 0x193   : > { %p14689_p10 = pnand %p14688_p9, %p14684_p6 }
 0x195   : > { %14692 = shalt.err (!%p14689_p10)
}
 0x196   : > { %13796 = dma.hbm_to_vmem [thread:$0]  (%p13847_p3), %s1087_s4, 32, %s1089_s18, [#allocation38]  }
 0x197 PF: > { %1110 = sbr.rel (%p14996_p2) target bundleno = 5829 (0x16c5), region = 140 }
 0x19c   : > { %p13872_p11 = scmp.eq.s32.totalorder %s14992_s0, 0 }
 0x19e   : > { %14712 = dma.done.wait (%p13872_p11), [#allocation3], 16  }
 0x19f   : > { %14714 = vsyncadd (%p13872_p11), [#allocation3], 4294967280 }
 0x1a0   : > { %14716 = dma.done.wait (%p13872_p11), [#allocation5], 4624  }
 0x1a1   : > { %14718 = vsyncadd (%p13872_p11), [#allocation5], 4294962672 }
 0x1a2   : > { %14720 = dma.done.wait (%p13872_p11), [#allocation8], 1056  }
 0x1a3   : > { %14722 = vsyncadd (%p13872_p11), [#allocation8], 4294966240 }
 0x1a4   : > { %14724 = dma.done.wait (%p13872_p11), [#allocation11], 2080  }
 0x1a5   : > { %14726 = vsyncadd (%p13872_p11), [#allocation11], 4294965216 }
 0x1a6   : > { %14728 = dma.done.wait (%p13872_p11), [#allocation14], 4624  }
 0x1a7   : > { %14730 = vsyncadd (%p13872_p11), [#allocation14], 4294962672 }
 0x1a8   : > { %14732 = dma.done.wait (%p13872_p11), [#allocation17], 1040  }
 0x1a9   : > { %14734 = vsyncadd (%p13872_p11), [#allocation17], 4294966256 }
 0x1aa   : > { %14736 = dma.done.wait (%p13872_p11), [#allocation20], 48  }
 0x1ab   : > { %14738 = vsyncadd (%p13872_p11), [#allocation20], 4294967248 }
 0x1ac   : > { %14740 = dma.done.wait (%p13872_p11), [#allocation23], 4624  }
 0x1ad   : > { %14742 = vsyncadd (%p13872_p11), [#allocation23], 4294962672 }
 0x1ae   : > { %14744 = dma.done.wait (%p13872_p11), [#allocation26], 1056  }
 0x1af   : > { %14746 = vsyncadd (%p13872_p11), [#allocation26], 4294966240 }
 0x1b0   : > { %14748 = dma.done.wait (%p13872_p11), [#allocation29], 36896  }
 0x1b1   : > { %14750 = vsyncadd (%p13872_p11), [#allocation29], 4294930400 }
 0x1b2   : > { %14752 = dma.done.wait (%p13872_p11), [#allocation32], 9232  }
 0x1b3   : > { %14754 = vsyncadd (%p13872_p11), [#allocation32], 4294958064 }
 0x1b4   : > { %14756 = dma.done.wait (%p13872_p11), [#allocation35], 5632  }
 0x1b5   : > { %14758 = vsyncadd (%p13872_p11), [#allocation35], 4294961664 }
 0x1b6   : > { %14760 = dma.done.wait (%p13872_p11), [#allocation38], 1184  }
 0x1b7   : > { %14762 = vsyncadd (%p13872_p11), [#allocation38], 4294966112  ;;  %s16957_s16 = sld [smem:[#allocation53_spill]]  ;;  %s10345_s22 = sshll.u32 %s14992_s0, 5  ;;  %v10350_v16 = vld [vmem:[#allocation34] sm:$0xf] }
 0x1b8   : > { %p1309_p2 = scmp.lt.s32.totalorder %s10345_s22, 63  ;;  %s16958_s26 = sld [smem:[#allocation54_spill]]  ;;  %v13123_v17 = vld [vmem:[#allocation34 + $0x4] sm:$0xf0]  ;;  %v13122_v18 = vld [vmem:[#allocation34 + $0x4] sm:$0xf] }
 0x1b9   : > { %v10352_v19 = vld [vmem:[#allocation34 + $0x8] sm:$0xf0]  ;;  %v10351_v20 = vor.u32 %v13123_v17, %v10350_v16  ;;  %v10358_v25 = vld [vmem:[#allocation34 + $0x10] sm:$0xf]  ;;  %v13125_v26 = vld [vmem:[#allocation34 + $0x14] sm:$0xf0] }
 0x1ba   : > { %s16981_s22 = smov (!%p1309_p2, %s10345_s22), 63  ;;  %v10355_v21 = vor.u32 %v13122_v18, %v10352_v19  ;;  %v13124_v27 = vld [vmem:[#allocation34 + $0x14] sm:$0xf]  ;;  %v10360_v28 = vld [vmem:[#allocation34 + $0x18] sm:$0xf0]  ;;  %v10359_v30 = vor.u32 %v13125_v26, %v10358_v25  ;;  %vm2184_vm0 = vcmask 523264  }
 0x1bb   : > { %s10346_s2 = sshll.u32 %s16981_s22, 2  ;;  %v10363_v31 = vor.u32 %v13124_v27, %v10360_v28  ;;  %v10366_v35 = vld [vmem:[#allocation34 + $0x20] sm:$0xf]  ;;  %v13127_v36 = vld [vmem:[#allocation34 + $0x24] sm:$0xf0]  ;;  %s16968_s4 = sld [smem:[#allocation59_spill]] }
 0x1bc   : > { %v13126_v37 = vld [vmem:[#allocation34 + $0x24] sm:$0xf]  ;;  %v10368_v38 = vld [vmem:[#allocation34 + $0x28] sm:$0xf0]  ;;  %v10367_v40 = vor.u32 %v13127_v36, %v10366_v35  ;;  %v10374_v42 = vld [vmem:[#allocation34 + $0x30] sm:$0xf] }
 0x1bd   : > { %s1312_s5 = scalar_lea.vmem %s16957_s16, %s10346_s2  ;;  %v10371_v41 = vor.u32 %v13126_v37, %v10368_v38  ;;  %v13129_v43 = vld [vmem:[#allocation34 + $0x34] sm:$0xf0]  ;;  %v13128_v44 = vld [vmem:[#allocation34 + $0x34] sm:$0xf]  ;;  %v10376_v45 = vld [vmem:[#allocation34 + $0x38] sm:$0xf0] }
 0x1be   : > { %v15355_v0 = vld [vmem:[%s1312_s5 + $0x38] sm:$0xff]  ;;  %v15361_v2 = vld [vmem:[%s1312_s5 + $0x30] sm:$0xff]  ;;  %v15367_v4 = vld [vmem:[%s1312_s5 + $0x28] sm:$0xff]  ;;  %v10375_v46 = vor.u32 %v13129_v43, %v10374_v42  ;;  %v10379_v47 = vor.u32 %v13128_v44, %v10376_v45  ;;  %s16978_s7 = sld [smem:[#allocation63_spill]]  ;;  %vm9775_vm1 = vcmask 130048   ;;  %p1314_p3 = scmp.lt.s32.totalorder %s14992_s0, 1 }
 0x1bf   : > { %v15357_v1 = vld [vmem:[%s1312_s5 + $0x78] sm:$0xff]  ;;  %1495 = vmatpush.bf16.msra.mxu0 %v15355_v0  ;;  %v15363_v3 = vld [vmem:[%s1312_s5 + $0x70] sm:$0xff]  ;;  %v15369_v5 = vld [vmem:[%s1312_s5 + $0x68] sm:$0xff]  ;;  %s16979_s17 = sld [smem:[#allocation70_spill]]  ;;  %vm9965_vm2 = vcmask 142336  }
 0x1c0   : > { %1524 = vmatpush.bf16.msra.mxu1 %v15357_v1  ;;  %v15373_v6 = vld [vmem:[%s1312_s5 + $0x20] sm:$0xff]  ;;  %v15379_v8 = vld [vmem:[%s1312_s5 + $0x18] sm:$0xff]  ;;  %v15385_v10 = vld [vmem:[%s1312_s5 + $0x10] sm:$0xff]  ;;  %s16983_s0 = smov (!%p1314_p3, %s14992_s0), 1 }
 0x1c1   : > { %v15375_v7 = vld [vmem:[%s1312_s5 + $0x60] sm:$0xff]  ;;  %v15381_v9 = vld [vmem:[%s1312_s5 + $0x58] sm:$0xff]  ;;  %v15387_v11 = vld [vmem:[%s1312_s5 + $0x50] sm:$0xff]  ;;  %s10347_s1 = sshll.u32 %s16983_s0, 2 }
 0x1c2   : > { %v15391_v12 = vld [vmem:[%s1312_s5 + $0x8] sm:$0xff]  ;;  %v13106_v14 = vld [vmem:[%s1312_s5] sm:$0xff]  ;;  %v13153_v22 = vld [vmem:[%s16958_s26 + $0x38] sm:$0xff]  ;;  %s1317_s28 = scalar_lea.vmem %s14984_s8, %s10347_s1 }
 0x1c3   : > { %1496 = vmatpush.bf16.msra.mxu0 %v15361_v2  ;;  %v15393_v13 = vld [vmem:[%s1312_s5 + $0x48] sm:$0xff]  ;;  %v15395_v15 = vld [vmem:[%s1312_s5 + $0x40] sm:$0xff]  ;;  %v13152_v23 = vld [vmem:[%s16958_s26 + $0x30] sm:$0xff] }
 0x1c4   : > { %1525 = vmatpush.bf16.msra.mxu1 %v15363_v3  ;;  %v13151_v24 = vld [vmem:[%s16958_s26 + $0x28] sm:$0xff]  ;;  %v13150_v29 = vld [vmem:[%s16958_s26 + $0x20] sm:$0xff]  ;;  %v13149_v32 = vld [vmem:[%s16958_s26 + $0x18] sm:$0xff] }
 0x1c5   : > { %v13148_v33 = vld [vmem:[%s16958_s26 + $0x10] sm:$0xff]  ;;  %v13147_v34 = vld [vmem:[%s16958_s26 + $0x8] sm:$0xff]  ;;  %v13146_v39 = vld [vmem:[%s16958_s26] sm:$0xff] }
 0x1c6   : > { %v10502_v48 = vld [vmem:[#allocation10 + $0x70] sm:$0xf]  ;;  %v13145_v49 = vld [vmem:[#allocation10 + $0x74] sm:$0xf0]  ;;  %v13144_v50 = vld [vmem:[#allocation10 + $0x74] sm:$0xf] }
 0x1c7   : > { %1497 = vmatpush.bf16.msra.mxu0 %v15367_v4  ;;  %v10503_v51 = vor.u32 %v13145_v49, %v10502_v48  ;;  %v10504_v52 = vld [vmem:[#allocation10 + $0x78] sm:$0xf0]  ;;  %v10494_v53 = vld [vmem:[#allocation10 + $0x60] sm:$0xf]  ;;  %v13143_v54 = vld [vmem:[#allocation10 + $0x64] sm:$0xf0] }
 0x1c8   : > { %1526 = vmatpush.bf16.msra.mxu1 %v15369_v5  ;;  %v10507_v55 = vor.u32 %v13144_v50, %v10504_v52  ;;  %v13142_v56 = vld [vmem:[#allocation10 + $0x64] sm:$0xf]  ;;  %v10496_v57 = vld [vmem:[#allocation10 + $0x68] sm:$0xf0]  ;;  %v10495_v58 = vor.u32 %v13143_v54, %v10494_v53  ;;  %v10486_v60 = vld [vmem:[#allocation10 + $0x50] sm:$0xf] }
 0x1c9   : > { %1659 = vmatpush.bf16.msra.mxu2 %v10503_v51  ;;  %v10499_v59 = vor.u32 %v13142_v56, %v10496_v57  ;;  %v13141_v61 = vld [vmem:[#allocation10 + $0x54] sm:$0xf0]  ;;  %v13140_v62 = vld [vmem:[#allocation10 + $0x54] sm:$0xf]  ;;  %v10478_v16 = vld [vmem:[#allocation10 + $0x40] sm:$0xf] }
 0x1ca   : > { %1688 = vmatpush.bf16.msra.mxu3 %v10507_v55  ;;  %v10487_v63 = vor.u32 %v13141_v61, %v10486_v60  ;;  %v13139_v17 = vld [vmem:[#allocation10 + $0x44] sm:$0xf0]  ;;  %v13138_v19 = vld [vmem:[#allocation10 + $0x44] sm:$0xf]  ;;  %v13136_v25 = vld [vmem:[#allocation10 + $0x34] sm:$0xf] }
 0x1cb   : > { %1498 = vmatpush.bf16.msra.mxu0 %v15373_v6  ;;  %v10472_v26 = vld [vmem:[#allocation10 + $0x38] sm:$0xf0]  ;;  %v10462_v28 = vld [vmem:[#allocation10 + $0x20] sm:$0xf]  ;;  %v13133_v35 = vld [vmem:[#allocation10 + $0x14] sm:$0xf0] }
 0x1cc   : > { %1527 = vmatpush.bf16.msra.mxu1 %v15375_v7  ;;  %v10475_v27 = vor.u32 %v13136_v25, %v10472_v26  ;;  %v13132_v36 = vld [vmem:[#allocation10 + $0x14] sm:$0xf]  ;;  %v10456_v38 = vld [vmem:[#allocation10 + $0x18] sm:$0xf0]  ;;  %v13130_v42 = vld [vmem:[#allocation10 + $0x4] sm:$0xf] }
 0x1cd   : > { %1660 = vmatpush.bf16.msra.mxu2 %v10495_v58  ;;  %v10448_v44 = vld [vmem:[#allocation10 + $0x8] sm:$0xf0] }
 0x1ce   : > { %1689 = vmatpush.bf16.msra.mxu3 %v10499_v59  ;;  %v10451_v45 = vor.u32 %v13130_v42, %v10448_v44 }
 0x1cf   : > { %1499 = vmatpush.bf16.msra.mxu0 %v15379_v8 }
 0x1d0   : > { %1528 = vmatpush.bf16.msra.mxu1 %v15381_v9 }
 0x1d1   : > { %1661 = vmatpush.bf16.msra.mxu2 %v10487_v63 }
 0x1d3   : > { %1500 = vmatpush.bf16.msra.mxu0 %v15385_v10 }
 0x1d4   : > { %1529 = vmatpush.bf16.msra.mxu1 %v15387_v11 }
 0x1d7   : > { %1501 = vmatpush.bf16.msra.mxu0 %v15391_v12 }
 0x1d8   : > { %1530 = vmatpush.bf16.msra.mxu1 %v15393_v13 }
 0x1db   : > { %1502 = vmatpush.bf16.msra.mxu0 %v13106_v14 }
 0x1dc   : > { %1531 = vmatpush.bf16.msra.mxu1 %v15395_v15 }
 0x1de   : > { %1503 = vmatmul.bf16.vlgmr.msra.gmra.mxu0 %v10351_v20  ;;  %v10480_v20 = vld [vmem:[#allocation10 + $0x48] sm:$0xf0] }
 0x1df   : > { %1532 = vmatmul.bf16.vlgmr.msra.gmra.mxu1 %v10355_v21  ;;  %1785 = vmatpush.bf16.msrb.mxu0 %v13153_v22  ;;  %v10479_v21 = vor.u32 %v13139_v17, %v10478_v16  ;;  %v10483_v22 = vor.u32 %v13138_v19, %v10480_v20 }
 0x1e1   : > { %1662 = vmatpush.bf16.msra.mxu2 %v10479_v21 }
 0x1e3   : > { %1786 = vmatpush.bf16.msrb.mxu0 %v13152_v23  ;;  %v10470_v23 = vld [vmem:[#allocation10 + $0x30] sm:$0xf] }
 0x1e7   : > { %1787 = vmatpush.bf16.msrb.mxu0 %v13151_v24  ;;  %v13137_v24 = vld [vmem:[#allocation10 + $0x34] sm:$0xf0] }
 0x1eb   : > { %1788 = vmatpush.bf16.msrb.mxu0 %v13150_v29  ;;  %v13135_v29 = vld [vmem:[#allocation10 + $0x24] sm:$0xf0] }
 0x1ee   : > { %1508 = vmatmul.bf16.gmra.mxu0 %v10359_v30  ;;  %v13134_v30 = vld [vmem:[#allocation10 + $0x24] sm:$0xf] }
 0x1ef   : > { %1537 = vmatmul.bf16.gmra.mxu1 %v10363_v31  ;;  %1789 = vmatpush.bf16.msrb.mxu0 %v13149_v32  ;;  %v10463_v31 = vor.u32 %v13135_v29, %v10462_v28  ;;  %v10464_v32 = vld [vmem:[#allocation10 + $0x28] sm:$0xf0] }
 0x1f3   : > { %1790 = vmatpush.bf16.msrb.mxu0 %v13148_v33  ;;  %v10467_v33 = vor.u32 %v13134_v30, %v10464_v32 }
 0x1f7   : > { %1791 = vmatpush.bf16.msrb.mxu0 %v13147_v34  ;;  %v10454_v34 = vld [vmem:[#allocation10 + $0x10] sm:$0xf] }
 0x1f8   : > { %v10455_v37 = vor.u32 %v13133_v35, %v10454_v34 }
 0x1fb   : > { %1792 = vmatpush.bf16.msrb.mxu0 %v13146_v39  ;;  %v10459_v39 = vor.u32 %v13132_v36, %v10456_v38 }
 0x1fe   : > { %1513 = vmatmul.bf16.gmra.mxu0 %v10367_v40  ;;  %v10446_v40 = vld [vmem:[#allocation10] sm:$0xf] }
 0x1ff   : > { %1542 = vmatmul.bf16.gmra.mxu1 %v10371_v41  ;;  %v13131_v41 = vld [vmem:[#allocation10 + $0x4] sm:$0xf0] }
 0x200   : > { %v10447_v43 = vor.u32 %v13131_v41, %v10446_v40 }
 0x20e   : > { %1518 = vmatmul.bf16.gmra.mxu0 %v10375_v46 }
 0x20f   : > { %1547 = vmatmul.bf16.gmra.mxu1 %v10379_v47 }
 0x21e   : > { %1793 = vmatmul.bf16.vlgmr.msrb.gmra.mxu0 %v13106_v14  ;;  %v10488_v14 = vld [vmem:[#allocation10 + $0x58] sm:$0xf0] }
 0x21f   : > { %v10491_v18 = vor.u32 %v13140_v62, %v10488_v14 }
 0x221   : > { %1690 = vmatpush.bf16.msra.mxu3 %v10491_v18 }
 0x225   : > { %1691 = vmatpush.bf16.msra.mxu3 %v10483_v22 }
 0x229   : > { %1692 = vmatpush.bf16.msra.mxu3 %v10475_v27 }
 0x22d   : > { %1693 = vmatpush.bf16.msra.mxu3 %v10467_v33 }
 0x22e   : > { %1798 = vmatmul.bf16.gmra.mxu0 %v15391_v12  ;;  %v10471_v12 = vor.u32 %v13137_v24, %v10470_v23 }
 0x230   : > { %1663 = vmatpush.bf16.msra.mxu2 %v10471_v12 }
 0x231   : > { %1694 = vmatpush.bf16.msra.mxu3 %v10459_v39 }
 0x234   : > { %1664 = vmatpush.bf16.msra.mxu2 %v10463_v31 }
 0x235   : > { %1695 = vmatpush.bf16.msra.mxu3 %v10451_v45 }
 0x238   : > { %1665 = vmatpush.bf16.msra.mxu2 %v10455_v37 }
 0x23c   : > { %1666 = vmatpush.bf16.msra.mxu2 %v10447_v43 }
 0x23e   : > { %1803 = vmatmul.bf16.gmra.mxu0 %v15385_v10 }
 0x24e   : > { %1808 = vmatmul.bf16.gmra.mxu0 %v15379_v8 }
 0x25b   : > { %v1504_v10 = vpop.f32.mrf.mxu0 }
 0x25c   : > { %v1533_v46 = vpop.f32.mrf.mxu1 }
 0x25d   : > { %v1534_v49 = vadd.f32 %v1533_v46, %v1504_v10 }
 0x25e   : > { %1813 = vmatmul.bf16.gmra.mxu0 %v15373_v6 }
 0x263   : > { %v1506_v47 = vpop.f32.mrf.mxu0 }
 0x264   : > { %v1535_v48 = vpop.f32.mrf.mxu1 }
 0x265   : > { %v1536_v50 = vadd.f32 %v1535_v48, %v1506_v47 }
 0x267   : > { %v1553_v51 = vpack.c.bf16 %v1536_v50, %v1534_v49 }
 0x269   : > { %1667 = vmatmul.bf16.vlgmr.msra.gmra.mxu2 %v1553_v51  ;;  %1696 = vmatmul.bf16.vlgmr.msra.gmra.mxu3 %v1553_v51 }
 0x26b   : > { %v1509_v52 = vpop.f32.mrf.mxu0 }
 0x26c   : > { %v1538_v53 = vpop.f32.mrf.mxu1 }
 0x26d   : > { %v1539_v56 = vadd.f32 %v1538_v53, %v1509_v52 }
 0x26e   : > { %1818 = vmatmul.bf16.gmra.mxu0 %v15367_v4 }
 0x273   : > { %v1511_v54 = vpop.f32.mrf.mxu0 }
 0x274   : > { %v1540_v55 = vpop.f32.mrf.mxu1 }
 0x275   : > { %v1541_v57 = vadd.f32 %v1540_v55, %v1511_v54 }
 0x277   : > { %v1554_v8 = vpack.c.bf16 %v1541_v57, %v1539_v56 }
 0x279   : > { %1672 = vmatmul.bf16.gmra.mxu2 %v1554_v8  ;;  %1701 = vmatmul.bf16.gmra.mxu3 %v1554_v8 }
 0x27b   : > { %v1514_v58 = vpop.f32.mrf.mxu0 }
 0x27c   : > { %v1543_v6 = vpop.f32.mrf.mxu1 }
 0x27d   : > { %v1544_v61 = vadd.f32 %v1543_v6, %v1514_v58 }
 0x27e   : > { %1823 = vmatmul.bf16.gmra.mxu0 %v15361_v2  ;;  %v15415_v2 = vld [vmem:[#allocation2] ss:$0 sm:$0xff] }
 0x283   : > { %v1516_v59 = vpop.f32.mrf.mxu0 }
 0x284   : > { %v1545_v60 = vpop.f32.mrf.mxu1 }
 0x285   : > { %v1546_v62 = vadd.f32 %v1545_v60, %v1516_v59 }
 0x287   : > { %v1555_v63 = vpack.c.bf16 %v1546_v62, %v1544_v61 }
 0x289   : > { %1677 = vmatmul.bf16.gmra.mxu2 %v1555_v63  ;;  %1706 = vmatmul.bf16.gmra.mxu3 %v1555_v63 }
 0x28b   : > { %v1519_v14 = vpop.f32.mrf.mxu0 }
 0x28c   : > { %v1548_v4 = vpop.f32.mrf.mxu1 }
 0x28d   : > { %v1549_v18 = vadd.f32 %v1548_v4, %v1519_v14 }
 0x28e   : > { %1828 = vmatmul.bf16.gmra.mxu0 %v15355_v0 }
 0x293   : > { %v1521_v16 = vpop.f32.mrf.mxu0 }
 0x294   : > { %v1550_v17 = vpop.f32.mrf.mxu1 }
 0x295   : > { %v1551_v19 = vadd.f32 %v1550_v17, %v1521_v16 }
 0x297   : > { %v1556_v20 = vpack.c.bf16 %v1551_v19, %v1549_v18 }
 0x299   : > { %1682 = vmatmul.bf16.gmra.mxu2 %v1556_v20  ;;  %1711 = vmatmul.bf16.gmra.mxu3 %v1556_v20 }
 0x29b   : > { %v1794_v21 = vpop.f32.mrf.mxu0 }
 0x29c   : > { %v1795_v22 = vadd.f32 %v15415_v2, %v1794_v21  ;;  %v10542_v21 = vld [vmem:[#allocation33] sm:$0xf] }
 0x29e   : > { %1833 = vmatmul.bf16.gmra.mxu0 %v15395_v15  ;;  %v1874_v25 = vmax.f32 %v1795_v22, 0.0  ;;  %v13155_v22 = vld [vmem:[#allocation33 + $0x4] sm:$0xf0] }
 0x2a3   : > { %v1796_v23 = vpop.f32.mrf.mxu0 }
 0x2a4   : > { %v1797_v24 = vadd.f32 %v15415_v2, %v1796_v23  ;;  %v10543_v23 = vor.u32 %v13155_v22, %v10542_v21 }
 0x2a6   : > { %v1875_v26 = vmax.f32 %v1797_v24, 0.0 }
 0x2a8   : > { %v15420_v0 = vpack.c.bf16 %v1875_v26, %v1874_v25  ;;  %v10550_v26 = vld [vmem:[#allocation33 + $0x10] sm:$0xf] }
 0x2ab   : > { %v1799_v12 = vpop.f32.mrf.mxu0 }
 0x2ac   : > { %v1800_v27 = vadd.f32 %v15415_v2, %v1799_v12  ;;  %v13157_v12 = vld [vmem:[#allocation33 + $0x14] sm:$0xf0] }
 0x2ae   : > { %1838 = vmatmul.bf16.gmra.mxu0 %v15393_v13  ;;  %v1876_v30 = vmax.f32 %v1800_v27, 0.0  ;;  %v10551_v27 = vor.u32 %v13157_v12, %v10550_v26 }
 0x2b3   : > { %v1801_v28 = vpop.f32.mrf.mxu0 }
 0x2b4   : > { %v1802_v29 = vadd.f32 %v15415_v2, %v1801_v28  ;;  %v10750_v28 = vld [vmem:[#allocation33 + $0x100] sm:$0xf] }
 0x2b6   : > { %v1877_v31 = vmax.f32 %v1802_v29, 0.0  ;;  %v13203_v29 = vld [vmem:[#allocation33 + $0x104] sm:$0xf0] }
 0x2b8   : > { %v15425_v15 = vpack.c.bf16 %v1877_v31, %v1876_v30  ;;  %v10751_v31 = vor.u32 %v13203_v29, %v10750_v28 }
 0x2bb   : > { %v1804_v32 = vpop.f32.mrf.mxu0 }
 0x2bc   : > { %v1805_v33 = vadd.f32 %v15415_v2, %v1804_v32 }
 0x2be   : > { %1843 = vmatmul.bf16.gmra.mxu0 %v15387_v11  ;;  %v1878_v36 = vmax.f32 %v1805_v33, 0.0  ;;  %v10558_v33 = vld [vmem:[#allocation33 + $0x20] sm:$0xf] }
 0x2c3   : > { %v1806_v34 = vpop.f32.mrf.mxu0 }
 0x2c4   : > { %v1807_v35 = vadd.f32 %v15415_v2, %v1806_v34  ;;  %v13159_v34 = vld [vmem:[#allocation33 + $0x24] sm:$0xf0] }
 0x2c6   : > { %v1879_v37 = vmax.f32 %v1807_v35, 0.0  ;;  %v10559_v35 = vor.u32 %v13159_v34, %v10558_v33 }
 0x2c8   : > { %v15430_v13 = vpack.c.bf16 %v1879_v37, %v1878_v36  ;;  %v10758_v36 = vld [vmem:[#allocation33 + $0x110] sm:$0xf]  ;;  %v13205_v37 = vld [vmem:[#allocation33 + $0x114] sm:$0xf0] }
 0x2cb   : > { %v1809_v38 = vpop.f32.mrf.mxu0 }
 0x2cc   : > { %v1810_v39 = vadd.f32 %v15415_v2, %v1809_v38 }
 0x2ce   : > { %1848 = vmatmul.bf16.gmra.mxu0 %v15381_v9  ;;  %v1880_v42 = vmax.f32 %v1810_v39, 0.0  ;;  %v10759_v39 = vor.u32 %v13205_v37, %v10758_v36 }
 0x2d3   : > { %v1811_v40 = vpop.f32.mrf.mxu0 }
 0x2d4   : > { %v1812_v41 = vadd.f32 %v15415_v2, %v1811_v40 }
 0x2d6   : > { %v1881_v43 = vmax.f32 %v1812_v41, 0.0  ;;  %v10566_v41 = vld [vmem:[#allocation33 + $0x30] sm:$0xf] }
 0x2d8   : > { %v15435_v11 = vpack.c.bf16 %v1881_v43, %v1880_v42  ;;  %v13161_v42 = vld [vmem:[#allocation33 + $0x34] sm:$0xf0] }
 0x2d9   : > { %v10567_v43 = vor.u32 %v13161_v42, %v10566_v41 }
 0x2db   : > { %v1814_v44 = vpop.f32.mrf.mxu0 }
 0x2dc   : > { %v1815_v59 = vadd.f32 %v15415_v2, %v1814_v44  ;;  %v10766_v44 = vld [vmem:[#allocation33 + $0x120] sm:$0xf] }
 0x2de   : > { %1853 = vmatmul.bf16.gmra.mxu0 %v15375_v7  ;;  %v1882_v63 = vmax.f32 %v1815_v59, 0.0 }
 0x2e3   : > { %v1816_v45 = vpop.f32.mrf.mxu0 }
 0x2e4   : > { %v1817_v8 = vadd.f32 %v15415_v2, %v1816_v45  ;;  %v13207_v45 = vld [vmem:[#allocation33 + $0x124] sm:$0xf0] }
 0x2e6   : > { %v1883_v61 = vmax.f32 %v1817_v8, 0.0 }
 0x2e8   : > { %v15468_v4 = vpack.c.bf16 %v1883_v61, %v1882_v63  ;;  %v13169_v61 = vld [vmem:[#allocation33 + $0x54] sm:$0xf0] }
 0x2eb   : > { %v1819_v10 = vpop.f32.mrf.mxu0 }
 0x2ee   : > { %1858 = vmatmul.bf16.gmra.mxu0 %v15369_v5 }
 0x2f3   : > { %v1821_v46 = vpop.f32.mrf.mxu0 }
 0x2f4   : > { %v1822_v5 = vadd.f32 %v15415_v2, %v1821_v46  ;;  %v10767_v46 = vor.u32 %v13207_v45, %v10766_v44 }
 0x2f6   : > { %v1885_v58 = vmax.f32 %v1822_v5, 0.0 }
 0x2fb   : > { %v1824_v47 = vpop.f32.mrf.mxu0 }
 0x2fc   : > { %v1825_v7 = vadd.f32 %v15415_v2, %v1824_v47  ;;  %v10574_v47 = vld [vmem:[#allocation33 + $0x40] sm:$0xf] }
 0x2fe   : > { %1863 = vmatmul.bf16.gmra.mxu0 %v15363_v3  ;;  %v1820_v3 = vadd.f32 %v15415_v2, %v1819_v10  ;;  %v1886_v57 = vmax.f32 %v1825_v7, 0.0 }
 0x300   : > { %v1884_v60 = vmax.f32 %v1820_v3, 0.0 }
 0x302   : > { %v15461_v62 = vpack.c.bf16 %v1885_v58, %v1884_v60  ;;  %v10582_v60 = vld [vmem:[#allocation33 + $0x50] sm:$0xf] }
 0x303   : > { %v1826_v9 = vpop.f32.mrf.mxu0  ;;  %v10583_v22 = vor.u32 %v13169_v61, %v10582_v60  ;;  %v13174_v60 = vld [vmem:[#allocation4 + $0x20] sm:$0xff] }
 0x304   : > { %v1827_v51 = vadd.f32 %v15415_v2, %v1826_v9  ;;  %v13167_v9 = vld [vmem:[#allocation33 + $0x44] sm:$0xf0] }
 0x305   : > { %v13234_v61 = vld [vmem:[#allocation4 + $0xc0] sm:$0xff] }
 0x306   : > { %v1887_v55 = vmax.f32 %v1827_v51, 0.0  ;;  %v10774_v51 = vld [vmem:[#allocation33 + $0x130] sm:$0xf] }
 0x308   : > { %v15455_v6 = vpack.c.bf16 %v1887_v55, %v1886_v57 }
 0x30b   : > { %v1829_v48 = vpop.f32.mrf.mxu0 }
 0x30c   : > { %v1830_v49 = vadd.f32 %v15415_v2, %v1829_v48  ;;  %v10575_v48 = vor.u32 %v13167_v9, %v10574_v47  ;;  %v13154_v47 = vld [vmem:[#allocation33 + $0x4] sm:$0xf] }
 0x30d   : > { %v13166_v9 = vld [vmem:[#allocation33 + $0x44] sm:$0xf] }
 0x30e   : > { %1868 = vmatmul.bf16.gmra.mxu0 %v15357_v1  ;;  %v1888_v53 = vmax.f32 %v1830_v49, 0.0 }
 0x313   : > { %v1831_v50 = vpop.f32.mrf.mxu0 }
 0x314   : > { %v1832_v52 = vadd.f32 %v15415_v2, %v1831_v50 }
 0x316   : > { %v1889_v54 = vmax.f32 %v1832_v52, 0.0  ;;  %v13209_v52 = vld [vmem:[#allocation33 + $0x134] sm:$0xf0] }
 0x318   : > { %v15446_v56 = vpack.c.bf16 %v1889_v54, %v1888_v53  ;;  %v10775_v53 = vor.u32 %v13209_v52, %v10774_v51  ;;  %v13237_v51 = vld [vmem:[#allocation4 + $0xd8] sm:$0xff] }
 0x31a   : > { %1970 = vmatpush.bf16.msrb.mxu1 %v15446_v56  ;;  %2089 = vmatpush.bf16.msrb.mxu3 %v15446_v56 }
 0x31b   : > { %2726 = vmatpush.bf16.msra.mxu0 %v15446_v56  ;;  %v15452_v1 = vpop.f32.mrf.mxu0 }
 0x31c   : > { %v1835_v44 = vadd.f32 %v15415_v2, %v15452_v1  ;;  %v13214_v1 = vld [vmem:[#allocation33 + $0x144] sm:$0xf] }
 0x31e   : > { %1971 = vmatpush.bf16.msrb.mxu1 %v15455_v6  ;;  %2090 = vmatpush.bf16.msrb.mxu3 %v15455_v6 }
 0x31f   : > { %2727 = vmatpush.bf16.msra.mxu0 %v15455_v6 }
 0x322   : > { %1972 = vmatpush.bf16.msrb.mxu1 %v15461_v62  ;;  %2091 = vmatpush.bf16.msrb.mxu3 %v15461_v62 }
 0x323   : > { %2728 = vmatpush.bf16.msra.mxu0 %v15461_v62  ;;  %v15466_v14 = vpop.f32.mrf.mxu0 }
 0x324   : > { %v1837_v42 = vadd.f32 %v15415_v2, %v15466_v14  ;;  %v10544_v14 = vld [vmem:[#allocation33 + $0x8] sm:$0xf0] }
 0x325   : > { %v10547_v52 = vor.u32 %v13154_v47, %v10544_v14 }
 0x326   : > { %1973 = vmatpush.bf16.msrb.mxu1 %v15468_v4  ;;  %2092 = vmatpush.bf16.msrb.mxu3 %v15468_v4 }
 0x327   : > { %2729 = vmatpush.bf16.msra.mxu0 %v15468_v4 }
 0x32a   : > { %1974 = vmatpush.bf16.msrb.mxu1 %v15435_v11  ;;  %2093 = vmatpush.bf16.msrb.mxu3 %v15435_v11 }
 0x32b   : > { %2730 = vmatpush.bf16.msra.mxu0 %v15435_v11  ;;  %v15476_v16 = vpop.f32.mrf.mxu0 }
 0x32e   : > { %1975 = vmatpush.bf16.msrb.mxu1 %v15430_v13  ;;  %2094 = vmatpush.bf16.msrb.mxu3 %v15430_v13 }
 0x32f   : > { %2731 = vmatpush.bf16.msra.mxu0 %v15430_v13 }
 0x332   : > { %1976 = vmatpush.bf16.msrb.mxu1 %v15425_v15  ;;  %2095 = vmatpush.bf16.msrb.mxu3 %v15425_v15 }
 0x333   : > { %2732 = vmatpush.bf16.msra.mxu0 %v15425_v15  ;;  %v15484_v17 = vpop.f32.mrf.mxu0 }
 0x336   : > { %1977 = vmatpush.bf16.msrb.mxu1 %v15420_v0  ;;  %2096 = vmatpush.bf16.msrb.mxu3 %v15420_v0 }
 0x337   : > { %2733 = vmatpush.bf16.msra.mxu0 %v15420_v0 }
 0x339   : > { %1978 = vmatmul.bf16.vlgmr.msrb.gmra.mxu1 %v10543_v23  ;;  %2097 = vmatmul.bf16.vlgmr.msrb.gmra.mxu3 %v10575_v48  ;;  %v10576_v48 = vld [vmem:[#allocation33 + $0x48] sm:$0xf0] }
 0x33a   : > { %2734 = vmatmul.bf16.vlgmr.msra.gmra.mxu0 %v10751_v31 }
 0x33b   : > { %v15489_v18 = vpop.f32.mrf.mxu0 }
 0x343   : > { %v15491_v19 = vpop.f32.mrf.mxu0 }
 0x349   : > { %1983 = vmatmul.bf16.gmra.mxu1 %v10551_v27  ;;  %2102 = vmatmul.bf16.gmra.mxu3 %v10583_v22  ;;  %v13168_v22 = vld [vmem:[#allocation33 + $0x54] sm:$0xf] }
 0x34a   : > { %2739 = vmatmul.bf16.gmra.mxu0 %v10759_v39  ;;  %v13171_v39 = vld [vmem:[#allocation33 + $0x64] sm:$0xf0] }
 0x34b   : > { %v15493_v20 = vpop.f32.mrf.mxu0 }
 0x353   : > { %v15495_v24 = vpop.f32.mrf.mxu0 }
 0x354   : > { %v1852_v29 = vadd.f32 %v15415_v2, %v15495_v24  ;;  %v1845_v24 = vadd.f32 %v15415_v2, %v15489_v18 }
 0x356   : > { %v1897_v34 = vmax.f32 %v1852_v29, 0.0  ;;  %v1894_v41 = vmax.f32 %v1845_v24, 0.0  ;;  %v10560_v29 = vld [vmem:[#allocation33 + $0x28] sm:$0xf0]  ;;  %v13160_v24 = vld [vmem:[#allocation33 + $0x34] sm:$0xf] }
 0x359   : > { %1988 = vmatmul.bf16.gmra.mxu1 %v10559_v35 }
 0x35a   : > { %2744 = vmatmul.bf16.gmra.mxu0 %v10767_v46  ;;  %v1890_v46 = vmax.f32 %v1835_v44, 0.0  ;;  %v10646_v44 = vld [vmem:[#allocation33 + $0x80] sm:$0xf] }
 0x35b   : > { %v1854_v25 = vpop.f32.mrf.mxu0 }
 0x35c   : > { %v1855_v27 = vadd.f32 %v15415_v2, %v1854_v25  ;;  %v1847_v25 = vadd.f32 %v15415_v2, %v15491_v19  ;;  %v10590_v19 = vld [vmem:[#allocation33 + $0x60] sm:$0xf] }
 0x35d   : > { %v10591_v18 = vor.u32 %v13171_v39, %v10590_v19 }
 0x35e   : > { %v1898_v33 = vmax.f32 %v1855_v27, 0.0  ;;  %v1895_v37 = vmax.f32 %v1847_v25, 0.0 }
 0x35f   : > { %2107 = vmatmul.bf16.gmra.mxu3 %v10591_v18  ;;  %v15598_v18 = vpop.f32.mrf.mxu2 }
 0x363   : > { %v1856_v30 = vpop.f32.mrf.mxu0 }
 0x364   : > { %v1857_v23 = vadd.f32 %v15415_v2, %v1856_v30  ;;  %v1850_v30 = vadd.f32 %v15415_v2, %v15493_v20  ;;  %v1842_v20 = vadd.f32 %v15415_v2, %v15484_v17 }
 0x366   : > { %v1899_v31 = vmax.f32 %v1857_v23, 0.0  ;;  %v1896_v36 = vmax.f32 %v1850_v30, 0.0  ;;  %v1893_v17 = vmax.f32 %v1842_v20, 0.0  ;;  %v10584_v23 = vld [vmem:[#allocation33 + $0x58] sm:$0xf0] }
 0x367   : > { %v10587_v27 = vor.u32 %v13168_v22, %v10584_v23  ;;  %v10592_v30 = vld [vmem:[#allocation33 + $0x68] sm:$0xf0]  ;;  %v13172_v20 = vld [vmem:[#allocation33 + $0x74] sm:$0xf]  ;;  %v10670_v23 = vld [vmem:[#allocation33 + $0xb0] sm:$0xf] }
 0x368   : > { %v15526_v35 = vpack.c.bf16 %v1899_v31, %v1898_v33  ;;  %v13170_v31 = vld [vmem:[#allocation33 + $0x64] sm:$0xf] }
 0x369   : > { %1993 = vmatmul.bf16.gmra.mxu1 %v10567_v43  ;;  %v15544_v43 = vpack.c.bf16 %v1895_v37, %v1894_v41  ;;  %v10595_v25 = vor.u32 %v13170_v31, %v10592_v30  ;;  %v10600_v37 = vld [vmem:[#allocation33 + $0x78] sm:$0xf0] }
 0x36a   : > { %2749 = vmatmul.bf16.gmra.mxu0 %v10775_v53 }
 0x36b   : > { %v1859_v32 = vpop.f32.mrf.mxu0 }
 0x36c   : > { %v1860_v63 = vadd.f32 %v15415_v2, %v1859_v32 }
 0x36e   : > { %v1900_v28 = vmax.f32 %v1860_v63, 0.0  ;;  %v13156_v63 = vld [vmem:[#allocation33 + $0x14] sm:$0xf] }
 0x373   : > { %v1861_v38 = vpop.f32.mrf.mxu0 }
 0x374   : > { %v1862_v8 = vadd.f32 %v15415_v2, %v1861_v38  ;;  %v15535_v38 = vpack.c.bf16 %v1897_v34, %v1896_v36  ;;  %v15583_v34 = vpop.f32.mrf.mxu3  ;;  %v10568_v36 = vld [vmem:[#allocation33 + $0x38] sm:$0xf0] }
 0x375   : > { %v10571_v39 = vor.u32 %v13160_v24, %v10568_v36  ;;  %v10698_v24 = vld [vmem:[#allocation33 + $0xc0] sm:$0xf]  ;;  %v13191_v36 = vld [vmem:[#allocation33 + $0xc4] sm:$0xf0] }
 0x376   : > { %v1901_v26 = vmax.f32 %v1862_v8, 0.0 }
 0x378   : > { %v15517_v32 = vpack.c.bf16 %v1901_v26, %v1900_v28  ;;  %v13158_v28 = vld [vmem:[#allocation33 + $0x24] sm:$0xf] }
 0x379   : > { %v10563_v33 = vor.u32 %v13158_v28, %v10560_v29  ;;  %v13162_v28 = vld [vmem:[#allocation4] sm:$0xff] }
 0x37b   : > { %v1864_v40 = vpop.f32.mrf.mxu0 }
 0x37c   : > { %v1865_v55 = vadd.f32 %v15415_v2, %v1864_v40  ;;  %v1840_v40 = vadd.f32 %v15415_v2, %v15476_v16  ;;  %v1891_v16 = vmax.f32 %v1837_v42, 0.0  ;;  %v15592_v19 = vpop.f32.mrf.mxu3 }
 0x37e   : > { %v1902_v21 = vmax.f32 %v1865_v55, 0.0  ;;  %v1892_v45 = vmax.f32 %v1840_v40, 0.0  ;;  %v10598_v55 = vld [vmem:[#allocation33 + $0x70] sm:$0xf]  ;;  %v10603_v40 = vor.u32 %v13172_v20, %v10600_v37  ;;  %v10699_v37 = vor.u32 %v13191_v36, %v10698_v24  ;;  %v13195_v24 = vld [vmem:[#allocation33 + $0xe4] sm:$0xf0] }
 0x383   : > { %v1866_v10 = vpop.f32.mrf.mxu0 }
 0x384   : > { %v1867_v54 = vadd.f32 %v15415_v2, %v1866_v10  ;;  %v15551_v10 = vpack.c.bf16 %v1893_v17, %v1892_v45  ;;  %v15600_v42 = vpop.f32.mrf.mxu3  ;;  %v13179_v45 = vld [vmem:[#allocation33 + $0x84] sm:$0xf0] }
 0x386   : > { %v1903_v58 = vmax.f32 %v1867_v54, 0.0  ;;  %v13176_v54 = vld [vmem:[#allocation4 + $0x30] sm:$0xff] }
 0x388   : > { %v15509_v12 = vpack.c.bf16 %v1903_v58, %v1902_v21  ;;  %v13235_v58 = vld [vmem:[#allocation4 + $0xc8] sm:$0xff]  ;;  %v10552_v21 = vld [vmem:[#allocation33 + $0x18] sm:$0xf0] }
 0x389   : > { %v10555_v26 = vor.u32 %v13156_v63, %v10552_v21  ;;  %v13163_v21 = vld [vmem:[#allocation4 + $0x8] sm:$0xff] }
 0x38b   : > { %v1869_v49 = vpop.f32.mrf.mxu0 }
 0x38c   : > { %v1870_v50 = vadd.f32 %v15415_v2, %v1869_v49  ;;  %v10804_v49 = vld [vmem:[#allocation33 + $0x148] sm:$0xf0]  ;;  %v15607_v47 = vpop.f32.mrf.mxu3 }
 0x38d   : > { %v10807_v53 = vor.u32 %v13214_v1, %v10804_v49  ;;  %v13181_v1 = vld [vmem:[#allocation33 + $0x94] sm:$0xf0] }
 0x38e   : > { %v1904_v3 = vmax.f32 %v1870_v50, 0.0  ;;  %v15556_v50 = vpack.c.bf16 %v1891_v16, %v1890_v46  ;;  %v10647_v16 = vor.u32 %v13179_v45, %v10646_v44  ;;  %v15605_v46 = vpop.f32.mrf.mxu2 }
 0x393   : > { %v1871_v7 = vpop.f32.mrf.mxu0 }
 0x394   : > { %v1872_v5 = vadd.f32 %v15415_v2, %v1871_v7  ;;  %v13177_v2 = vld [vmem:[#allocation4 + $0x38] sm:$0xff]  ;;  %v10579_v7 = vor.u32 %v13166_v9, %v10576_v48  ;;  %v15615_v48 = vpop.f32.mrf.mxu3 }
 0x395   : > { %16959 = vst [vmem:[#allocation73_spill] sm:$0xff] %v15615_v48 }
 0x396   : > { %v1905_v57 = vmax.f32 %v1872_v5, 0.0  ;;  %v13236_v5 = vld [vmem:[#allocation4 + $0xd0] sm:$0xff]  ;;  %v15613_v9 = vpop.f32.mrf.mxu2 }
 0x398   : > { %v15502_v59 = vpack.c.bf16 %v1905_v57, %v1904_v3  ;;  %v13173_v3 = vld [vmem:[#allocation33 + $0x74] sm:$0xf0] }
 0x399   : > { %v13175_v57 = vld [vmem:[#allocation4 + $0x28] sm:$0xff]  ;;  %v10599_v8 = vor.u32 %v13173_v3, %v10598_v55 }
 0x39a   : > { %1999 = vmatpush.bf16.msrb.mxu2 %v15502_v59  ;;  %2118 = vmatpush.bf16.msra.mxu1 %v15502_v59 }
 0x39b   : > { %2948 = vmatpush.bf16.msrb.mxu0 %v15502_v59  ;;  %2112 = vmatmul.bf16.gmra.mxu3 %v10599_v8 }
 0x39e   : > { %2000 = vmatpush.bf16.msrb.mxu2 %v15509_v12  ;;  %2119 = vmatpush.bf16.msra.mxu1 %v15509_v12 }
 0x39f   : > { %2949 = vmatpush.bf16.msrb.mxu0 %v15509_v12 }
 0x3a2   : > { %2001 = vmatpush.bf16.msrb.mxu2 %v15517_v32  ;;  %2120 = vmatpush.bf16.msra.mxu1 %v15517_v32 }
 0x3a3   : > { %2950 = vmatpush.bf16.msrb.mxu0 %v15517_v32 }
 0x3a6   : > { %2002 = vmatpush.bf16.msrb.mxu2 %v15526_v35  ;;  %2121 = vmatpush.bf16.msra.mxu1 %v15526_v35 }
 0x3a7   : > { %2951 = vmatpush.bf16.msrb.mxu0 %v15526_v35 }
 0x3aa   : > { %2003 = vmatpush.bf16.msrb.mxu2 %v15535_v38  ;;  %2122 = vmatpush.bf16.msra.mxu1 %v15535_v38 }
 0x3ab   : > { %2952 = vmatpush.bf16.msrb.mxu0 %v15535_v38 }
 0x3ae   : > { %2004 = vmatpush.bf16.msrb.mxu2 %v15544_v43  ;;  %2123 = vmatpush.bf16.msra.mxu1 %v15544_v43 }
 0x3af   : > { %2953 = vmatpush.bf16.msrb.mxu0 %v15544_v43 }
 0x3b2   : > { %2005 = vmatpush.bf16.msrb.mxu2 %v15551_v10  ;;  %2124 = vmatpush.bf16.msra.mxu1 %v15551_v10 }
 0x3b3   : > { %2954 = vmatpush.bf16.msrb.mxu0 %v15551_v10 }
 0x3b6   : > { %2006 = vmatpush.bf16.msrb.mxu2 %v15556_v50  ;;  %2125 = vmatpush.bf16.msra.mxu1 %v15556_v50  ;;  %v15594_v41 = vpop.f32.mrf.mxu1 }
 0x3b7   : > { %2955 = vmatpush.bf16.msrb.mxu0 %v15556_v50 }
 0x3b9   : > { %2007 = vmatmul.bf16.vlgmr.msrb.gmra.mxu2 %v10547_v52  ;;  %2126 = vmatmul.bf16.vlgmr.msra.gmra.mxu1 %v10579_v7  ;;  %v15621_v52 = vpop.f32.mrf.mxu2  ;;  %v15624_v7 = vpop.f32.mrf.mxu3 }
 0x3ba   : > { %2201 = vmatpush.bf16.msra.mxu2 %v13177_v2  ;;  %2340 = vmatpush.bf16.msrb.mxu1 %v15446_v56  ;;  %v10654_v2 = vld [vmem:[#allocation33 + $0x90] sm:$0xf]  ;;  %16960 = vst [vmem:[#allocation74_spill] sm:$0xff] %v15621_v52 }
 0x3bb   : > { %3223 = vmatpush.bf16.msra.mxu0 %v13237_v51  ;;  %v10655_v51 = vor.u32 %v13181_v1, %v10654_v2  ;;  %16961 = vst [vmem:[#allocation75_spill] sm:$0xff] %v15624_v7 }
 0x3bc   : > { %2956 = vmatmul.bf16.vlgmr.msrb.gmra.mxu0 %v10807_v53 }
 0x3be   : > { %2202 = vmatpush.bf16.msra.mxu2 %v13176_v54  ;;  %2341 = vmatpush.bf16.msrb.mxu1 %v15455_v6  ;;  %v15603_v17 = vpop.f32.mrf.mxu1  ;;  %v10662_v54 = vld [vmem:[#allocation33 + $0xa0] sm:$0xf] }
 0x3bf   : > { %3224 = vmatpush.bf16.msra.mxu0 %v13236_v5  ;;  %v13183_v5 = vld [vmem:[#allocation33 + $0xa4] sm:$0xf0] }
 0x3c0   : > { %v10663_v3 = vor.u32 %v13183_v5, %v10662_v54  ;;  %v13193_v54 = vld [vmem:[#allocation33 + $0xd4] sm:$0xf0] }
 0x3c1   : > { %v15630_v55 = vpop.f32.mrf.mxu2 }
 0x3c2   : > { %2203 = vmatpush.bf16.msra.mxu2 %v13175_v57  ;;  %2342 = vmatpush.bf16.msrb.mxu1 %v15461_v62  ;;  %16962 = vst [vmem:[#allocation76_spill] sm:$0xff] %v15630_v55  ;;  %v15632_v57 = vpop.f32.mrf.mxu3 }
 0x3c3   : > { %3225 = vmatpush.bf16.msra.mxu0 %v13235_v58  ;;  %16963 = vst [vmem:[#allocation77_spill] sm:$0xff] %v15632_v57  ;;  %v13165_v58 = vld [vmem:[#allocation4 + $0x18] sm:$0xff] }
 0x3c4   : > { %2266 = vmatpush.bf16.msra.mxu3 %v13165_v58 }
 0x3c6   : > { %2204 = vmatpush.bf16.msra.mxu2 %v13174_v60  ;;  %2343 = vmatpush.bf16.msrb.mxu1 %v15468_v4  ;;  %v15610_v14 = vpop.f32.mrf.mxu1  ;;  %v13164_v60 = vld [vmem:[#allocation4 + $0x10] sm:$0xff] }
 0x3c7   : > { %3226 = vmatpush.bf16.msra.mxu0 %v13234_v61 }
 0x3c8   : > { %2267 = vmatpush.bf16.msra.mxu3 %v13164_v60 }
 0x3c9   : > { %2012 = vmatmul.bf16.gmra.mxu2 %v10555_v26  ;;  %2131 = vmatmul.bf16.gmra.mxu1 %v10587_v27  ;;  %v15637_v61 = vpop.f32.mrf.mxu2  ;;  %v13185_v26 = vld [vmem:[#allocation33 + $0xb4] sm:$0xf0] }
 0x3ca   : > { %2369 = vmatpush.bf16.msrb.mxu2 %v15502_v59  ;;  %2344 = vmatpush.bf16.msrb.mxu1 %v15435_v11  ;;  %16964 = vst [vmem:[#allocation78_spill] sm:$0xff] %v15637_v61  ;;  %v15639_v63 = vpop.f32.mrf.mxu3  ;;  %v10671_v27 = vor.u32 %v13185_v26, %v10670_v23 }
 0x3cb   : > { %3498 = vmatpush.bf16.msrb.mxu0 %v15446_v56  ;;  %16965 = vst [vmem:[#allocation79_spill] sm:$0xff] %v15639_v63  ;;  %v13198_v63 = vld [vmem:[#allocation4 + $0x60] sm:$0xff] }
 0x3cc   : > { %2268 = vmatpush.bf16.msra.mxu3 %v13163_v21 }
 0x3ce   : > { %2370 = vmatpush.bf16.msrb.mxu2 %v15509_v12  ;;  %2345 = vmatpush.bf16.msrb.mxu1 %v15430_v13  ;;  %v15618_v49 = vpop.f32.mrf.mxu1 }
 0x3cf   : > { %3499 = vmatpush.bf16.msrb.mxu0 %v15455_v6 }
 0x3d0   : > { %2269 = vmatpush.bf16.msra.mxu3 %v13162_v28 }
 0x3d1   : > { %v15643_v29 = vpop.f32.mrf.mxu2 }
 0x3d2   : > { %2371 = vmatpush.bf16.msrb.mxu2 %v15517_v32  ;;  %2346 = vmatpush.bf16.msrb.mxu1 %v15425_v15  ;;  %16966 = vst [vmem:[#allocation80_spill] sm:$0xff] %v15643_v29  ;;  %v2098_v31 = vpop.f32.mrf.mxu3  ;;  %v2735_v29 = vpop.f32.mrf.mxu0 }
 0x3d3   : > { %3500 = vmatpush.bf16.msrb.mxu0 %v15461_v62 }
 0x3d6   : > { %2372 = vmatpush.bf16.msrb.mxu2 %v15526_v35  ;;  %2347 = vmatpush.bf16.msrb.mxu1 %v15420_v0  ;;  %v15627_v53 = vpop.f32.mrf.mxu1 }
 0x3d7   : > { %3501 = vmatpush.bf16.msrb.mxu0 %v15468_v4 }
 0x3d9   : > { %2017 = vmatmul.bf16.gmra.mxu2 %v10563_v33  ;;  %2136 = vmatmul.bf16.gmra.mxu1 %v10595_v25  ;;  %v15647_v33 = vpop.f32.mrf.mxu2 }
 0x3da   : > { %2373 = vmatpush.bf16.msrb.mxu2 %v15535_v38  ;;  %2533 = vmatpush.bf16.msra.mxu1 %v15446_v56  ;;  %16967 = vst [vmem:[#allocation81_spill] sm:$0xff] %v15647_v33  ;;  %v2100_v25 = vpop.f32.mrf.mxu3 }
 0x3db   : > { %3502 = vmatpush.bf16.msrb.mxu0 %v15435_v11 }
 0x3de   : > { %2374 = vmatpush.bf16.msrb.mxu2 %v15544_v43  ;;  %2534 = vmatpush.bf16.msra.mxu1 %v15455_v6  ;;  %v15635_v8 = vpop.f32.mrf.mxu1 }
 0x3df   : > { %3503 = vmatpush.bf16.msrb.mxu0 %v15430_v13 }
 0x3e2   : > { %2375 = vmatpush.bf16.msrb.mxu2 %v15551_v10  ;;  %2535 = vmatpush.bf16.msra.mxu1 %v15461_v62 }
 0x3e3   : > { %3504 = vmatpush.bf16.msrb.mxu0 %v15425_v15 }
 0x3e6   : > { %2376 = vmatpush.bf16.msrb.mxu2 %v15556_v50  ;;  %2536 = vmatpush.bf16.msra.mxu1 %v15468_v4  ;;  %v15641_v22 = vpop.f32.mrf.mxu1 }
 0x3e7   : > { %3505 = vmatpush.bf16.msrb.mxu0 %v15420_v0 }
 0x3e9   : > { %2022 = vmatmul.bf16.gmra.mxu2 %v10571_v39  ;;  %2141 = vmatmul.bf16.gmra.mxu1 %v10603_v40  ;;  %v2103_v40 = vpop.f32.mrf.mxu3 }
 0x3ea   : > { %2537 = vmatpush.bf16.msra.mxu1 %v15435_v11 }
 0x3ee   : > { %2538 = vmatpush.bf16.msra.mxu1 %v15430_v13  ;;  %v15645_v30 = vpop.f32.mrf.mxu1 }
 0x3f1   : > { %v2105_v23 = vpop.f32.mrf.mxu3 }
 0x3f2   : > { %2539 = vmatpush.bf16.msra.mxu1 %v15425_v15 }
 0x3f6   : > { %2540 = vmatpush.bf16.msra.mxu1 %v15420_v0 }
 0x3f9   : > { %2348 = vmatmul.bf16.vlgmr.msrb.gmra.mxu1 %v10647_v16  ;;  %v2108_v28 = vpop.f32.mrf.mxu3 }
 0x3fa   : > { %2755 = vmatpush.bf16.msrb.mxu1 %v15502_v59 }
 0x3fe   : > { %2756 = vmatpush.bf16.msrb.mxu1 %v15509_v12 }
 0x402   : > { %2757 = vmatpush.bf16.msrb.mxu1 %v15517_v32 }
 0x406   : > { %2758 = vmatpush.bf16.msrb.mxu1 %v15526_v35 }
 0x409   : > { %2353 = vmatmul.bf16.gmra.mxu1 %v10655_v51  ;;  %v10706_v51 = vld [vmem:[#allocation33 + $0xd0] sm:$0xf] }
 0x40a   : > { %2759 = vmatpush.bf16.msrb.mxu1 %v15535_v38  ;;  %v10707_v21 = vor.u32 %v13193_v54, %v10706_v51  ;;  %v13197_v54 = vld [vmem:[#allocation33 + $0xf4] sm:$0xf0] }
 0x40e   : > { %2760 = vmatpush.bf16.msrb.mxu1 %v15544_v43 }
 0x412   : > { %2761 = vmatpush.bf16.msrb.mxu1 %v15551_v10 }
 0x416   : > { %2762 = vmatpush.bf16.msrb.mxu1 %v15556_v50 }
 0x419   : > { %2358 = vmatmul.bf16.gmra.mxu1 %v10663_v3 }
 0x429   : > { %2363 = vmatmul.bf16.gmra.mxu1 %v10671_v27 }
 0x436   : > { %v2127_v20 = vpop.f32.mrf.mxu1 }
 0x437   : > { %v2128_v45 = vadd.f32 %v2127_v20, %v2098_v31 }
 0x439   : > { %2541 = vmatmul.bf16.vlgmr.msra.gmra.mxu1 %v10699_v37 }
 0x43a   : > { %13739 = vmatpush.bf16.msra.mxu1 %v15502_v59 }
 0x43c   : > { %v2008_v39 = vpop.f32.mrf.mxu2 }
 0x43d   : > { %v2009_v5 = vadd.f32 %v2008_v39, %v15594_v41 }
 0x43e   : > { %v2129_v44 = vpop.f32.mrf.mxu1  ;;  %13740 = vmatpush.bf16.msra.mxu1 %v15509_v12 }
 0x43f   : > { %v2130_v16 = vadd.f32 %v2129_v44, %v2100_v25  ;;  %v10714_v25 = vld [vmem:[#allocation33 + $0xe0] sm:$0xf] }
 0x440   : > { %v10715_v39 = vor.u32 %v13195_v24, %v10714_v25  ;;  %v13202_v24 = vld [vmem:[#allocation33 + $0x104] sm:$0xf] }
 0x441   : > { %v2147_v2 = vpack.c.bf16 %v2130_v16, %v2128_v45  ;;  %v2110_v45 = vpop.f32.mrf.mxu3 }
 0x442   : > { %13741 = vmatpush.bf16.msra.mxu1 %v15517_v32 }
 0x443   : > { %10620 = vmatmul.msk.bf16.vlgmr.msra.gmra.mxu2 %vm2184_vm0, %v2147_v2 }
 0x444   : > { %2562 = vmatpush.bf16.msra.mxu2 %v15502_v59  ;;  %v2010_v1 = vpop.f32.mrf.mxu2 }
 0x445   : > { %v2011_v3 = vadd.f32 %v2010_v1, %v15603_v17 }
 0x446   : > { %v2132_v60 = vpop.f32.mrf.mxu1  ;;  %13742 = vmatpush.bf16.msra.mxu1 %v15526_v35 }
 0x447   : > { %v2028_v58 = vpack.c.bf16 %v2011_v3, %v2009_v5  ;;  %v2133_v41 = vadd.f32 %v2132_v60, %v2103_v40 }
 0x448   : > { %2563 = vmatpush.bf16.msra.mxu2 %v15509_v12 }
 0x449   : > { %10640 = vmatmul.msk.bf16.vlgmr.msra.gmra.mxu3 %vm2184_vm0, %v2028_v58  ;;  %2546 = vmatmul.bf16.gmra.mxu1 %v10707_v21  ;;  %v2113_v58 = vpop.f32.mrf.mxu3 }
 0x44a   : > { %13743 = vmatpush.bf16.msra.mxu1 %v15535_v38 }
 0x44c   : > { %2564 = vmatpush.bf16.msra.mxu2 %v15517_v32  ;;  %v2013_v26 = vpop.f32.mrf.mxu2 }
 0x44d   : > { %v2014_v20 = vadd.f32 %v2013_v26, %v15610_v14 }
 0x44e   : > { %v2134_v27 = vpop.f32.mrf.mxu1  ;;  %13744 = vmatpush.bf16.msra.mxu1 %v15544_v43 }
 0x44f   : > { %v2135_v17 = vadd.f32 %v2134_v27, %v2105_v23 }
 0x450   : > { %2565 = vmatpush.bf16.msra.mxu2 %v15526_v35 }
 0x451   : > { %v2148_v31 = vpack.c.bf16 %v2135_v17, %v2133_v41  ;;  %v2115_v41 = vpop.f32.mrf.mxu3 }
 0x452   : > { %13745 = vmatpush.bf16.msra.mxu1 %v15551_v10 }
 0x453   : > { %10621 = vmatmul.msk.bf16.gmra.mxu2 %vm2184_vm0, %v2148_v31 }
 0x454   : > { %2566 = vmatpush.bf16.msra.mxu2 %v15535_v38  ;;  %v2015_v36 = vpop.f32.mrf.mxu2 }
 0x455   : > { %v2016_v37 = vadd.f32 %v2015_v36, %v15618_v49  ;;  %v10722_v49 = vld [vmem:[#allocation33 + $0xf0] sm:$0xf]  ;;  %v10752_v36 = vld [vmem:[#allocation33 + $0x108] sm:$0xf0] }
 0x456   : > { %13746 = vmatpush.bf16.msra.mxu1 %v15556_v50  ;;  %v2137_v44 = vpop.f32.mrf.mxu1  ;;  %v10723_v21 = vor.u32 %v13197_v54, %v10722_v49  ;;  %v10656_v54 = vld [vmem:[#allocation33 + $0x98] sm:$0xf0] }
 0x457   : > { %v2029_v40 = vpack.c.bf16 %v2016_v37, %v2014_v20  ;;  %v2138_v1 = vadd.f32 %v2137_v44, %v2108_v28  ;;  %v10755_v37 = vor.u32 %v13202_v24, %v10752_v36  ;;  %v13178_v44 = vld [vmem:[#allocation33 + $0x84] sm:$0xf]  ;;  %v13211_v24 = vld [vmem:[#allocation4 + $0x88] sm:$0xff] }
 0x458   : > { %2567 = vmatpush.bf16.msra.mxu2 %v15544_v43 }
 0x459   : > { %10641 = vmatmul.msk.bf16.gmra.mxu3 %vm2184_vm0, %v2029_v40  ;;  %2551 = vmatmul.bf16.gmra.mxu1 %v10715_v39 }
 0x45c   : > { %2568 = vmatpush.bf16.msra.mxu2 %v15551_v10  ;;  %v2018_v16 = vpop.f32.mrf.mxu2 }
 0x45d   : > { %v2019_v3 = vadd.f32 %v2018_v16, %v15627_v53 }
 0x45e   : > { %v2139_v2 = vpop.f32.mrf.mxu1 }
 0x45f   : > { %v2140_v51 = vadd.f32 %v2139_v2, %v2110_v45  ;;  %v10648_v45 = vld [vmem:[#allocation33 + $0x88] sm:$0xf0] }
 0x460   : > { %2569 = vmatpush.bf16.msra.mxu2 %v15556_v50  ;;  %v10651_v2 = vor.u32 %v13178_v44, %v10648_v45  ;;  %v13184_v45 = vld [vmem:[#allocation33 + $0xb4] sm:$0xf] }
 0x461   : > { %v2149_v14 = vpack.c.bf16 %v2140_v51, %v2138_v1  ;;  %v13204_v1 = vld [vmem:[#allocation33 + $0x114] sm:$0xf]  ;;  %v10760_v51 = vld [vmem:[#allocation33 + $0x118] sm:$0xf0] }
 0x463   : > { %10622 = vmatmul.msk.bf16.gmra.mxu2 %vm2184_vm0, %v2149_v14  ;;  %v10763_v14 = vor.u32 %v13204_v1, %v10760_v51 }
 0x464   : > { %v2020_v5 = vpop.f32.mrf.mxu2 }
 0x465   : > { %v2021_v60 = vadd.f32 %v2020_v5, %v15635_v8 }
 0x466   : > { %v2142_v26 = vpop.f32.mrf.mxu1 }
 0x467   : > { %v2030_v23 = vpack.c.bf16 %v2021_v60, %v2019_v3  ;;  %v2143_v28 = vadd.f32 %v2142_v26, %v2113_v58  ;;  %v13224_v3 = vld [vmem:[#allocation4 + $0xb0] sm:$0xff]  ;;  %v13206_v60 = vld [vmem:[#allocation33 + $0x124] sm:$0xf] }
 0x469   : > { %10642 = vmatmul.msk.bf16.gmra.mxu3 %vm2184_vm0, %v2030_v23  ;;  %2556 = vmatmul.bf16.gmra.mxu1 %v10723_v21  ;;  %v10768_v21 = vld [vmem:[#allocation33 + $0x128] sm:$0xf0]  ;;  %v13223_v23 = vld [vmem:[#allocation4 + $0xa8] sm:$0xff] }
 0x46a   : > { %v10771_v26 = vor.u32 %v13206_v60, %v10768_v21 }
 0x46c   : > { %v2023_v27 = vpop.f32.mrf.mxu2 }
 0x46d   : > { %v2024_v20 = vadd.f32 %v2023_v27, %v15641_v22  ;;  %v13225_v22 = vld [vmem:[#allocation4 + $0xb8] sm:$0xff] }
 0x46e   : > { %v2144_v17 = vpop.f32.mrf.mxu1  ;;  %v13213_v27 = vld [vmem:[#allocation4 + $0x98] sm:$0xff] }
 0x46f   : > { %v2145_v31 = vadd.f32 %v2144_v17, %v2115_v41  ;;  %v13222_v17 = vld [vmem:[#allocation4 + $0xa0] sm:$0xff] }
 0x471   : > { %v2150_v25 = vpack.c.bf16 %v2145_v31, %v2143_v28  ;;  %v13212_v28 = vld [vmem:[#allocation4 + $0x90] sm:$0xff]  ;;  %v13182_v31 = vld [vmem:[#allocation33 + $0xa4] sm:$0xf] }
 0x473   : > { %10623 = vmatmul.msk.bf16.gmra.mxu2 %vm2184_vm0, %v2150_v25  ;;  %v10664_v25 = vld [vmem:[#allocation33 + $0xa8] sm:$0xf0] }
 0x474   : > { %v2025_v53 = vpop.f32.mrf.mxu2 }
 0x475   : > { %v2026_v8 = vadd.f32 %v2025_v53, %v15645_v30  ;;  %v13180_v30 = vld [vmem:[#allocation33 + $0x94] sm:$0xf]  ;;  %v10667_v53 = vor.u32 %v13182_v31, %v10664_v25  ;;  %v10708_v25 = vld [vmem:[#allocation33 + $0xd8] sm:$0xf0] }
 0x476   : > { %v15680_v40 = vpop.f32.mrf.mxu1  ;;  %v10659_v58 = vor.u32 %v13180_v30, %v10656_v54  ;;  %v13192_v31 = vld [vmem:[#allocation33 + $0xd4] sm:$0xf] }
 0x477   : > { %v2031_v39 = vpack.c.bf16 %v2026_v8, %v2024_v20  ;;  %v13210_v20 = vld [vmem:[#allocation4 + $0x80] sm:$0xff]  ;;  %v13208_v8 = vld [vmem:[#allocation33 + $0x134] sm:$0xf] }
 0x479   : > { %10643 = vmatmul.msk.bf16.gmra.mxu3 %vm2184_vm0, %v2031_v39  ;;  %2763 = vmatmul.bf16.vlgmr.msrb.gmra.mxu1 %v10755_v37  ;;  %v10776_v37 = vld [vmem:[#allocation33 + $0x138] sm:$0xf0] }
 0x47a   : > { %3030 = vmatpush.bf16.msrb.mxu1 %v13225_v22  ;;  %v10779_v39 = vor.u32 %v13208_v8, %v10776_v37  ;;  %v10828_v22 = vld [vmem:[#allocation33 + $0x178] sm:$0xf0] }
 0x47e   : > { %v15683_v16 = vpop.f32.mrf.mxu1  ;;  %3031 = vmatpush.bf16.msrb.mxu1 %v13224_v3  ;;  %v13190_v3 = vld [vmem:[#allocation33 + $0xc4] sm:$0xf] }
 0x482   : > { %3032 = vmatpush.bf16.msrb.mxu1 %v13223_v23 }
 0x483   : > { %2377 = vmatmul.bf16.vlgmr.msrb.gmra.mxu2 %v10651_v2  ;;  %v10672_v2 = vld [vmem:[#allocation33 + $0xb8] sm:$0xf0] }
 0x484   : > { %2837 = vmatpush.bf16.msrb.mxu2 %v13213_v27  ;;  %v10675_v51 = vor.u32 %v13184_v45, %v10672_v2 }
 0x486   : > { %v15685_v49 = vpop.f32.mrf.mxu1  ;;  %3033 = vmatpush.bf16.msrb.mxu1 %v13222_v17 }
 0x488   : > { %2838 = vmatpush.bf16.msrb.mxu2 %v13212_v28 }
 0x489   : > { %2768 = vmatmul.bf16.gmra.mxu1 %v10763_v14  ;;  %v13220_v14 = vld [vmem:[#allocation33 + $0x174] sm:$0xf] }
 0x48a   : > { %v10831_v30 = vor.u32 %v13220_v14, %v10828_v22  ;;  %v10716_v14 = vld [vmem:[#allocation33 + $0xe8] sm:$0xf0]  ;;  %v13188_v22 = vld [vmem:[#allocation4 + $0x50] sm:$0xff] }
 0x48c   : > { %2839 = vmatpush.bf16.msrb.mxu2 %v13211_v24 }
 0x48e   : > { %v15687_v5 = vpop.f32.mrf.mxu1 }
 0x490   : > { %2840 = vmatpush.bf16.msrb.mxu2 %v13210_v20 }
 0x493   : > { %2382 = vmatmul.bf16.gmra.mxu2 %v10659_v58  ;;  %v10700_v58 = vld [vmem:[#allocation33 + $0xc8] sm:$0xf0] }
 0x494   : > { %v10703_v21 = vor.u32 %v13190_v3, %v10700_v58 }
 0x496   : > { %v15689_v41 = vpop.f32.mrf.mxu1 }
 0x499   : > { %2773 = vmatmul.bf16.gmra.mxu1 %v10771_v26 }
 0x49e   : > { %v15691_v36 = vpop.f32.mrf.mxu1 }
 0x4a3   : > { %2387 = vmatmul.bf16.gmra.mxu2 %v10667_v53  ;;  %v10711_v53 = vor.u32 %v13192_v31, %v10708_v25  ;;  %v13201_v31 = vld [vmem:[#allocation4 + $0x78] sm:$0xff] }
 0x4a6   : > { %v15693_v44 = vpop.f32.mrf.mxu1 }
 0x4a9   : > { %2778 = vmatmul.bf16.gmra.mxu1 %v10779_v39  ;;  %v13189_v39 = vld [vmem:[#allocation4 + $0x58] sm:$0xff] }
 0x4aa   : > { %2451 = vmatpush.bf16.msrb.mxu3 %v13189_v39 }
 0x4ae   : > { %v15695_v1 = vpop.f32.mrf.mxu1  ;;  %2452 = vmatpush.bf16.msrb.mxu3 %v13188_v22  ;;  %v13199_v22 = vld [vmem:[#allocation4 + $0x68] sm:$0xff] }
 0x4b3   : > { %2392 = vmatmul.bf16.gmra.mxu2 %v10675_v51  ;;  %v13194_v51 = vld [vmem:[#allocation33 + $0xe4] sm:$0xf] }
 0x4b4   : > { %v10719_v58 = vor.u32 %v13194_v51, %v10716_v14  ;;  %v13196_v51 = vld [vmem:[#allocation33 + $0xf4] sm:$0xf]  ;;  %v10724_v14 = vld [vmem:[#allocation33 + $0xf8] sm:$0xf0] }
 0x4b6   : > { %v15697_v54 = vpop.f32.mrf.mxu1 }
 0x4b9   : > { %2971 = vmatmul.bf16.vlgmr.msra.gmra.mxu1 %v10831_v30 }
 0x4ba   : > { %3305 = vmatpush.bf16.msra.mxu1 %v15446_v56 }
 0x4be   : > { %3306 = vmatpush.bf16.msra.mxu1 %v15455_v6  ;;  %v15701_v60 = vpop.f32.mrf.mxu1 }
 0x4c2   : > { %3307 = vmatpush.bf16.msra.mxu1 %v15461_v62 }
 0x4c3   : > { %2570 = vmatmul.bf16.vlgmr.msra.gmra.mxu2 %v10703_v21  ;;  %v13187_v21 = vld [vmem:[#allocation4 + $0x48] sm:$0xff] }
 0x4c4   : > { %3112 = vmatpush.bf16.msra.mxu2 %v15446_v56  ;;  %2453 = vmatpush.bf16.msrb.mxu3 %v13187_v21  ;;  %v10727_v21 = vor.u32 %v13196_v51, %v10724_v14 }
 0x4c6   : > { %v2206_v23 = vpop.f32.mrf.mxu2  ;;  %3308 = vmatpush.bf16.msra.mxu1 %v15468_v4  ;;  %v15706_v26 = vpop.f32.mrf.mxu1 }
 0x4c8   : > { %3113 = vmatpush.bf16.msra.mxu2 %v15455_v6 }
 0x4ca   : > { %3309 = vmatpush.bf16.msra.mxu1 %v15435_v11 }
 0x4cc   : > { %v2271_v27 = vpop.f32.mrf.mxu3  ;;  %3114 = vmatpush.bf16.msra.mxu2 %v15461_v62 }
 0x4cd   : > { %v15710_v17 = vadd.f32 %v2271_v27, %v2206_v23  ;;  %v13186_v27 = vld [vmem:[#allocation4 + $0x40] sm:$0xff] }
 0x4ce   : > { %v15713_v28 = vpop.f32.mrf.mxu2  ;;  %3310 = vmatpush.bf16.msra.mxu1 %v15430_v13  ;;  %v15716_v24 = vpop.f32.mrf.mxu1  ;;  %2454 = vmatpush.bf16.msrb.mxu3 %v13186_v27 }
 0x4d0   : > { %3115 = vmatpush.bf16.msra.mxu2 %v15468_v4 }
 0x4d2   : > { %3311 = vmatpush.bf16.msra.mxu1 %v15425_v15  ;;  %2644 = vmatpush.bf16.msra.mxu3 %v13201_v31 }
 0x4d3   : > { %2575 = vmatmul.bf16.gmra.mxu2 %v10711_v53 }
 0x4d4   : > { %v15720_v20 = vpop.f32.mrf.mxu3  ;;  %3116 = vmatpush.bf16.msra.mxu2 %v15435_v11 }
 0x4d6   : > { %v2211_v8 = vpop.f32.mrf.mxu2  ;;  %3312 = vmatpush.bf16.msra.mxu1 %v15420_v0  ;;  %v15724_v37 = vpop.f32.mrf.mxu1 }
 0x4d8   : > { %3117 = vmatpush.bf16.msra.mxu2 %v15430_v13 }
 0x4dc   : > { %v2276_v45 = vpop.f32.mrf.mxu3  ;;  %3118 = vmatpush.bf16.msra.mxu2 %v15425_v15 }
 0x4dd   : > { %v15728_v2 = vadd.f32 %v2276_v45, %v2211_v8  ;;  %v13200_v8 = vld [vmem:[#allocation4 + $0x70] sm:$0xff] }
 0x4de   : > { %v15730_v30 = vpop.f32.mrf.mxu2  ;;  %v15732_v3 = vpop.f32.mrf.mxu1  ;;  %2645 = vmatpush.bf16.msra.mxu3 %v13200_v8 }
 0x4e0   : > { %3119 = vmatpush.bf16.msra.mxu2 %v15420_v0 }
 0x4e2   : > { %2646 = vmatpush.bf16.msra.mxu3 %v13199_v22 }
 0x4e3   : > { %2580 = vmatmul.bf16.gmra.mxu2 %v10719_v58 }
 0x4e4   : > { %v15735_v23 = vpop.f32.mrf.mxu3 }
 0x4e6   : > { %v2216_v25 = vpop.f32.mrf.mxu2  ;;  %v15737_v53 = vpop.f32.mrf.mxu1  ;;  %2647 = vmatpush.bf16.msra.mxu3 %v13198_v63 }
 0x4ec   : > { %v2281_v39 = vpop.f32.mrf.mxu3 }
 0x4ed   : > { %v15739_v45 = vadd.f32 %v2281_v39, %v2216_v25  ;;  %v2737_v39 = vpop.f32.mrf.mxu0 }
 0x4ee   : > { %v15741_v33 = vpop.f32.mrf.mxu2  ;;  %v15743_v58 = vpop.f32.mrf.mxu1 }
 0x4f3   : > { %2585 = vmatmul.bf16.gmra.mxu2 %v10727_v21 }
 0x4f4   : > { %v15745_v57 = vpop.f32.mrf.mxu3 }
 0x4f6   : > { %v2221_v27 = vpop.f32.mrf.mxu2  ;;  %v2764_v31 = vpop.f32.mrf.mxu1 }
 0x4f7   : > { %v2765_v61 = vadd.f32 %v2764_v31, %v2735_v29 }
 0x4fc   : > { %v2286_v8 = vpop.f32.mrf.mxu3 }
 0x4fd   : > { %v15747_v25 = vadd.f32 %v2286_v8, %v2221_v27 }
 0x4fe   : > { %v15749_v7 = vpop.f32.mrf.mxu2  ;;  %v2766_v55 = vpop.f32.mrf.mxu1 }
 0x4ff   : > { %v2767_v48 = vadd.f32 %v2766_v55, %v2737_v39 }
 0x501   : > { %v2784_v52 = vpack.c.bf16 %v2767_v48, %v2765_v61 }
 0x503   : > { %10796 = vmatmul.msk.bf16.vlgmr.msrb.gmra.mxu2 %vm2184_vm0, %v2784_v52 }
 0x504   : > { %3334 = vmatpush.bf16.msrb.mxu2 %v15502_v59 }
 0x506   : > { %v2378_v51 = vpop.f32.mrf.mxu2  ;;  %v2769_v21 = vpop.f32.mrf.mxu1 }
 0x507   : > { %v2379_v14 = vadd.f32 %v2378_v51, %v15680_v40 }
 0x508   : > { %3335 = vmatpush.bf16.msrb.mxu2 %v15509_v12 }
 0x50c   : > { %3336 = vmatpush.bf16.msrb.mxu2 %v15517_v32 }
 0x50e   : > { %v2380_v63 = vpop.f32.mrf.mxu2  ;;  %v2771_v39 = vpop.f32.mrf.mxu1 }
 0x50f   : > { %v2381_v22 = vadd.f32 %v2380_v63, %v15683_v16 }
 0x510   : > { %3337 = vmatpush.bf16.msrb.mxu2 %v15526_v35 }
 0x511   : > { %v2398_v29 = vpack.c.bf16 %v2381_v22, %v2379_v14 }
 0x513   : > { %10692 = vmatmul.msk.bf16.vlgmr.msrb.gmra.mxu3 %vm2184_vm0, %v2398_v29 }
 0x514   : > { %2919 = vmatpush.bf16.msrb.mxu3 %v15446_v56  ;;  %3338 = vmatpush.bf16.msrb.mxu2 %v15535_v38 }
 0x516   : > { %v2383_v48 = vpop.f32.mrf.mxu2  ;;  %v2774_v63 = vpop.f32.mrf.mxu1 }
 0x517   : > { %v2384_v55 = vadd.f32 %v2383_v48, %v15685_v49 }
 0x518   : > { %2920 = vmatpush.bf16.msrb.mxu3 %v15455_v6  ;;  %3339 = vmatpush.bf16.msrb.mxu2 %v15544_v43 }
 0x51c   : > { %2921 = vmatpush.bf16.msrb.mxu3 %v15461_v62  ;;  %3340 = vmatpush.bf16.msrb.mxu2 %v15551_v10 }
 0x51e   : > { %v2385_v52 = vpop.f32.mrf.mxu2 }
 0x51f   : > { %v2386_v61 = vadd.f32 %v2385_v52, %v15687_v5  ;;  %v2740_v5 = vpop.f32.mrf.mxu0  ;;  %v2776_v52 = vpop.f32.mrf.mxu1 }
 0x520   : > { %2922 = vmatpush.bf16.msrb.mxu3 %v15468_v4  ;;  %3341 = vmatpush.bf16.msrb.mxu2 %v15556_v50  ;;  %v2770_v31 = vadd.f32 %v2769_v21, %v2740_v5 }
 0x521   : > { %v2399_v56 = vpack.c.bf16 %v2386_v61, %v2384_v55 }
 0x523   : > { %10693 = vmatmul.msk.bf16.gmra.mxu3 %vm2184_vm0, %v2399_v56 }
 0x524   : > { %2923 = vmatpush.bf16.msrb.mxu3 %v15435_v11 }
 0x526   : > { %v2388_v6 = vpop.f32.mrf.mxu2 }
 0x527   : > { %v2389_v40 = vadd.f32 %v2388_v6, %v15689_v41  ;;  %v2742_v8 = vpop.f32.mrf.mxu0 }
 0x528   : > { %2924 = vmatpush.bf16.msrb.mxu3 %v15430_v13  ;;  %v2772_v41 = vadd.f32 %v2771_v39, %v2742_v8 }
 0x52c   : > { %2925 = vmatpush.bf16.msrb.mxu3 %v15425_v15 }
 0x52e   : > { %v2390_v62 = vpop.f32.mrf.mxu2 }
 0x52f   : > { %v2391_v16 = vadd.f32 %v2390_v62, %v15691_v36  ;;  %v2785_v36 = vpack.c.bf16 %v2772_v41, %v2770_v31  ;;  %v2745_v51 = vpop.f32.mrf.mxu0  ;;  %v2779_v62 = vpop.f32.mrf.mxu1 }
 0x530   : > { %2926 = vmatpush.bf16.msrb.mxu3 %v15420_v0  ;;  %v2775_v29 = vadd.f32 %v2774_v63, %v2745_v51 }
 0x531   : > { %v2400_v4 = vpack.c.bf16 %v2391_v16, %v2389_v40  ;;  %10797 = vmatmul.msk.bf16.gmra.mxu2 %vm2184_vm0, %v2785_v36  ;;  %v13216_v36 = vld [vmem:[#allocation33 + $0x154] sm:$0xf] }
 0x533   : > { %10694 = vmatmul.msk.bf16.gmra.mxu3 %vm2184_vm0, %v2400_v4 }
 0x536   : > { %v2393_v49 = vpop.f32.mrf.mxu2 }
 0x537   : > { %v2394_v11 = vadd.f32 %v2393_v49, %v15693_v44  ;;  %v2747_v48 = vpop.f32.mrf.mxu0  ;;  %v2781_v5 = vpop.f32.mrf.mxu1 }
 0x538   : > { %v2777_v55 = vadd.f32 %v2776_v52, %v2747_v48  ;;  %v10810_v48 = vld [vmem:[#allocation33 + $0x150] sm:$0xf]  ;;  %v13217_v52 = vld [vmem:[#allocation33 + $0x154] sm:$0xf0] }
 0x53a   : > { %v2786_v61 = vpack.c.bf16 %v2777_v55, %v2775_v29  ;;  %v10820_v29 = vld [vmem:[#allocation33 + $0x168] sm:$0xf0]  ;;  %v2274_v55 = vadd.f32 %v15720_v20, %v15713_v28  ;;  %v10862_v20 = vld [vmem:[#allocation33 + $0x190] sm:$0xf] }
 0x53e   : > { %v2395_v27 = vpop.f32.mrf.mxu2 }
 0x53f   : > { %v2396_v13 = vadd.f32 %v2395_v27, %v15695_v1  ;;  %v2750_v6 = vpop.f32.mrf.mxu0 }
 0x540   : > { %v2780_v16 = vadd.f32 %v2779_v62, %v2750_v6  ;;  %v10811_v6 = vor.u32 %v13217_v52, %v10810_v48  ;;  %v10864_v48 = vld [vmem:[#allocation33 + $0x198] sm:$0xf0] }
 0x541   : > { %v2401_v15 = vpack.c.bf16 %v2396_v13, %v2394_v11  ;;  %10798 = vmatmul.msk.bf16.gmra.mxu2 %vm2184_vm0, %v2786_v61 }
 0x543   : > { %10695 = vmatmul.msk.bf16.gmra.mxu3 %vm2184_vm0, %v2401_v15 }
 0x546   : > { %v2571_v0 = vpop.f32.mrf.mxu2 }
 0x547   : > { %v2572_v22 = vadd.f32 %v2571_v0, %v15697_v54  ;;  %v2752_v49 = vpop.f32.mrf.mxu0  ;;  %v10812_v0 = vld [vmem:[#allocation33 + $0x158] sm:$0xf0] }
 0x548   : > { %v2782_v21 = vadd.f32 %v2781_v5, %v2752_v49  ;;  %v10815_v51 = vor.u32 %v13216_v36, %v10812_v0  ;;  %v13219_v49 = vld [vmem:[#allocation33 + $0x164] sm:$0xf0]  ;;  %v13226_v0 = vld [vmem:[#allocation33 + $0x184] sm:$0xf] }
 0x54a   : > { %v2787_v27 = vpack.c.bf16 %v2782_v21, %v2780_v16  ;;  %2961 = vmatmul.bf16.gmra.mxu0 %v10815_v51  ;;  %v10856_v51 = vld [vmem:[#allocation33 + $0x188] sm:$0xf0] }
 0x54e   : > { %v2573_v14 = vpop.f32.mrf.mxu2 }
 0x54f   : > { %v2574_v44 = vadd.f32 %v2573_v14, %v15701_v60  ;;  %v15803_v14 = vpop.f32.mrf.mxu3 }
 0x551   : > { %v2591_v1 = vpack.c.bf16 %v2574_v44, %v2572_v22  ;;  %10799 = vmatmul.msk.bf16.gmra.mxu2 %vm2184_vm0, %v2787_v27  ;;  %v13218_v44 = vld [vmem:[#allocation33 + $0x164] sm:$0xf]  ;;  %v13229_v27 = vld [vmem:[#allocation33 + $0x194] sm:$0xf0] }
 0x553   : > { %10744 = vmatmul.msk.bf16.vlgmr.msra.gmra.mxu3 %vm2184_vm0, %v2591_v1  ;;  %v10823_v1 = vor.u32 %v13218_v44, %v10820_v29  ;;  %v10878_v29 = vld [vmem:[#allocation33 + $0x1b0] sm:$0xf] }
 0x554   : > { %3141 = vmatpush.bf16.msra.mxu3 %v15502_v59 }
 0x556   : > { %v2576_v56 = vpop.f32.mrf.mxu2 }
 0x557   : > { %v2577_v60 = vadd.f32 %v2576_v56, %v15706_v26 }
 0x558   : > { %3142 = vmatpush.bf16.msra.mxu3 %v15509_v12 }
 0x55a   : > { %2966 = vmatmul.bf16.gmra.mxu0 %v10823_v1  ;;  %v13233_v1 = vld [vmem:[#allocation33 + $0x1b4] sm:$0xf0] }
 0x55c   : > { %3143 = vmatpush.bf16.msra.mxu3 %v15517_v32 }
 0x55e   : > { %v2578_v54 = vpop.f32.mrf.mxu2 }
 0x55f   : > { %v2579_v40 = vadd.f32 %v2578_v54, %v15716_v24 }
 0x560   : > { %3144 = vmatpush.bf16.msra.mxu3 %v15526_v35 }
 0x561   : > { %v2592_v4 = vpack.c.bf16 %v2579_v40, %v2577_v60  ;;  %v10854_v60 = vld [vmem:[#allocation33 + $0x180] sm:$0xf]  ;;  %v13227_v40 = vld [vmem:[#allocation33 + $0x184] sm:$0xf0] }
 0x562   : > { %v10855_v16 = vor.u32 %v13227_v40, %v10854_v60 }
 0x563   : > { %10745 = vmatmul.msk.bf16.gmra.mxu3 %vm2184_vm0, %v2592_v4  ;;  %v10818_v4 = vld [vmem:[#allocation33 + $0x160] sm:$0xf] }
 0x564   : > { %3145 = vmatpush.bf16.msra.mxu3 %v15535_v38  ;;  %3120 = vmatmul.bf16.vlgmr.msra.gmra.mxu2 %v10855_v16  ;;  %v10819_v5 = vor.u32 %v13219_v49, %v10818_v4  ;;  %v10872_v16 = vld [vmem:[#allocation33 + $0x1a8] sm:$0xf0] }
 0x566   : > { %v2581_v11 = vpop.f32.mrf.mxu2 }
 0x567   : > { %v2582_v24 = vadd.f32 %v2581_v11, %v15724_v37  ;;  %v10802_v37 = vld [vmem:[#allocation33 + $0x140] sm:$0xf]  ;;  %v10863_v11 = vor.u32 %v13229_v27, %v10862_v20 }
 0x568   : > { %3146 = vmatpush.bf16.msra.mxu3 %v15544_v43 }
 0x56c   : > { %3147 = vmatpush.bf16.msra.mxu3 %v15551_v10 }
 0x56e   : > { %v2583_v26 = vpop.f32.mrf.mxu2 }
 0x56f   : > { %v2584_v13 = vadd.f32 %v2583_v26, %v15732_v3  ;;  %v13215_v3 = vld [vmem:[#allocation33 + $0x144] sm:$0xf0]  ;;  %v10826_v26 = vld [vmem:[#allocation33 + $0x170] sm:$0xf] }
 0x570   : > { %3148 = vmatpush.bf16.msra.mxu3 %v15556_v50  ;;  %v10803_v22 = vor.u32 %v13215_v3, %v10802_v37 }
 0x571   : > { %v2593_v31 = vpack.c.bf16 %v2584_v13, %v2582_v24  ;;  %v13221_v24 = vld [vmem:[#allocation33 + $0x174] sm:$0xf0] }
 0x572   : > { %v10827_v13 = vor.u32 %v13221_v24, %v10826_v26  ;;  %v13232_v26 = vld [vmem:[#allocation33 + $0x1b4] sm:$0xf]  ;;  %v10880_v24 = vld [vmem:[#allocation33 + $0x1b8] sm:$0xf0] }
 0x573   : > { %10746 = vmatmul.msk.bf16.gmra.mxu3 %vm2184_vm0, %v2593_v31 }
 0x574   : > { %3125 = vmatmul.bf16.gmra.mxu2 %v10863_v11 }
 0x576   : > { %v2586_v15 = vpop.f32.mrf.mxu2 }
 0x577   : > { %v2587_v39 = vadd.f32 %v2586_v15, %v15737_v53 }
 0x57e   : > { %v2588_v8 = vpop.f32.mrf.mxu2 }
 0x57f   : > { %v2589_v41 = vadd.f32 %v2588_v8, %v15743_v58  ;;  %v10870_v8 = vld [vmem:[#allocation33 + $0x1a0] sm:$0xf] }
 0x581   : > { %v2594_v63 = vpack.c.bf16 %v2589_v41, %v2587_v39  ;;  %v13231_v39 = vld [vmem:[#allocation33 + $0x1a4] sm:$0xf0] }
 0x582   : > { %v10871_v36 = vor.u32 %v13231_v39, %v10870_v8 }
 0x583   : > { %10747 = vmatmul.msk.bf16.gmra.mxu3 %vm2184_vm0, %v2594_v63  ;;  %v10859_v63 = vor.u32 %v13226_v0, %v10856_v51 }
 0x584   : > { %3130 = vmatmul.bf16.gmra.mxu2 %v10871_v36  ;;  %v2957_v36 = vpop.f32.mrf.mxu0 }
 0x586   : > { %v2842_v41 = vpop.f32.mrf.mxu2 }
 0x58e   : > { %v15819_v37 = vpop.f32.mrf.mxu2 }
 0x593   : > { %2927 = vmatmul.bf16.vlgmr.msrb.gmra.mxu3 %v10803_v22 }
 0x596   : > { %v2456_v53 = vpop.f32.mrf.mxu3 }
 0x597   : > { %v2476_v58 = vadd.f32 %v2456_v53, %v15710_v17  ;;  %v13228_v53 = vld [vmem:[#allocation33 + $0x194] sm:$0xf] }
 0x59e   : > { %v2458_v61 = vpop.f32.mrf.mxu3 }
 0x59f   : > { %v15808_v56 = vadd.f32 %v2458_v61, %v2274_v55  ;;  %v10867_v61 = vor.u32 %v13228_v53, %v10864_v48 }
 0x5a3   : > { %2932 = vmatmul.bf16.gmra.mxu3 %v10811_v6 }
 0x5a6   : > { %v2461_v62 = vpop.f32.mrf.mxu3 }
 0x5a7   : > { %v2478_v54 = vadd.f32 %v2461_v62, %v15728_v2 }
 0x5ae   : > { %v15811_v17 = vpop.f32.mrf.mxu3 }
 0x5b3   : > { %2937 = vmatmul.bf16.gmra.mxu3 %v10819_v5 }
 0x5b4   : > { %v2847_v55 = vpop.f32.mrf.mxu2 }
 0x5b6   : > { %v2466_v21 = vpop.f32.mrf.mxu3 }
 0x5b7   : > { %v2480_v28 = vadd.f32 %v2466_v21, %v15739_v45 }
 0x5bc   : > { %v15825_v60 = vpop.f32.mrf.mxu2 }
 0x5be   : > { %v15814_v2 = vpop.f32.mrf.mxu3 }
 0x5c3   : > { %2942 = vmatmul.bf16.gmra.mxu3 %v10827_v13  ;;  %v10883_v13 = vor.u32 %v13232_v26, %v10880_v24  ;;  %v13240_v26 = vld [vmem:[#allocation33 + $0x1d4] sm:$0xf]  ;;  %v10916_v24 = vld [vmem:[#allocation33 + $0x1d8] sm:$0xf0] }
 0x5c4   : > { %v2852_v5 = vpop.f32.mrf.mxu2 }
 0x5c6   : > { %v2471_v31 = vpop.f32.mrf.mxu3 }
 0x5c7   : > { %v2482_v15 = vadd.f32 %v2471_v31, %v15747_v25  ;;  %v10879_v25 = vor.u32 %v13233_v1, %v10878_v29 }
 0x5c9   : > { %3135 = vmatmul.bf16.gmra.mxu2 %v10879_v25 }
 0x5cc   : > { %v15833_v11 = vpop.f32.mrf.mxu2 }
 0x5ce   : > { %v15817_v45 = vpop.f32.mrf.mxu3 }
 0x5d3   : > { %3149 = vmatmul.bf16.vlgmr.msra.gmra.mxu3 %v10859_v63 }
 0x5d4   : > { %v2857_v8 = vpop.f32.mrf.mxu2 }
 0x5d6   : > { %v2649_v3 = vpop.f32.mrf.mxu3 }
 0x5d7   : > { %v2669_v22 = vadd.f32 %v2649_v3, %v2476_v58  ;;  %v13230_v58 = vld [vmem:[#allocation33 + $0x1a4] sm:$0xf] }
 0x5d8   : > { %v10875_v49 = vor.u32 %v13230_v58, %v10872_v16  ;;  %v13238_v58 = vld [vmem:[#allocation33 + $0x1c4] sm:$0xf] }
 0x5d9   : > { %v15821_v44 = vadd.f32 %v2842_v41, %v2669_v22 }
 0x5de   : > { %v15823_v52 = vpop.f32.mrf.mxu3 }
 0x5e3   : > { %3154 = vmatmul.bf16.gmra.mxu3 %v10867_v61 }
 0x5e6   : > { %v2654_v6 = vpop.f32.mrf.mxu3 }
 0x5e7   : > { %v2671_v62 = vadd.f32 %v2654_v6, %v2478_v54 }
 0x5e9   : > { %v15827_v40 = vadd.f32 %v2847_v55, %v2671_v62 }
 0x5ee   : > { %v15829_v4 = vpop.f32.mrf.mxu3 }
 0x5f3   : > { %3159 = vmatmul.bf16.gmra.mxu3 %v10875_v49 }
 0x5f6   : > { %v2659_v21 = vpop.f32.mrf.mxu3 }
 0x5f7   : > { %v2673_v20 = vadd.f32 %v2659_v21, %v2480_v28  ;;  %v2959_v28 = vpop.f32.mrf.mxu0 }
 0x5f9   : > { %v15831_v27 = vadd.f32 %v2852_v5, %v2673_v20 }
 0x5fe   : > { %v15835_v54 = vpop.f32.mrf.mxu3 }
 0x5ff   : > { %v2962_v29 = vpop.f32.mrf.mxu0 }
 0x603   : > { %3164 = vmatmul.bf16.gmra.mxu3 %v10883_v13  ;;  %v10919_v13 = vor.u32 %v13240_v26, %v10916_v24 }
 0x606   : > { %v2664_v31 = vpop.f32.mrf.mxu3 }
 0x607   : > { %v2675_v39 = vadd.f32 %v2664_v31, %v2482_v15  ;;  %v2964_v15 = vpop.f32.mrf.mxu0 }
 0x609   : > { %v15837_v41 = vadd.f32 %v2857_v8, %v2675_v39 }
 0x60e   : > { %v15839_v0 = vpop.f32.mrf.mxu3 }
 0x60f   : > { %v2967_v6 = vpop.f32.mrf.mxu0 }
 0x616   : > { %v2928_v51 = vpop.f32.mrf.mxu3 }
 0x617   : > { %v2958_v3 = vadd.f32 %v2957_v36, %v2928_v51 }
 0x61e   : > { %v2930_v63 = vpop.f32.mrf.mxu3 }
 0x61f   : > { %v2960_v22 = vadd.f32 %v2959_v28, %v2930_v63  ;;  %v10924_v63 = vld [vmem:[#allocation33 + $0x1e8] sm:$0xf0] }
 0x621   : > { %v2977_v1 = vpack.c.bf16 %v2960_v22, %v2958_v3 }
 0x623   : > { %10848 = vmatmul.msk.bf16.vlgmr.msrb.gmra.mxu1 %vm2184_vm0, %v2977_v1  ;;  %v13239_v1 = vld [vmem:[#allocation33 + $0x1c4] sm:$0xf0] }
 0x624   : > { %3527 = vmatpush.bf16.msrb.mxu1 %v15502_v59  ;;  %v10908_v59 = vld [vmem:[#allocation33 + $0x1c8] sm:$0xf0] }
 0x626   : > { %v2933_v25 = vpop.f32.mrf.mxu3 }
 0x627   : > { %v2963_v48 = vadd.f32 %v2962_v29, %v2933_v25  ;;  %v10906_v29 = vld [vmem:[#allocation33 + $0x1c0] sm:$0xf] }
 0x628   : > { %3528 = vmatpush.bf16.msrb.mxu1 %v15509_v12  ;;  %v10911_v12 = vor.u32 %v13238_v58, %v10908_v59  ;;  %v10932_v58 = vld [vmem:[#allocation33 + $0x1f8] sm:$0xf0] }
 0x62a   : > { %3342 = vmatmul.bf16.vlgmr.msrb.gmra.mxu2 %v10911_v12  ;;  %v10914_v12 = vld [vmem:[#allocation33 + $0x1d0] sm:$0xf] }
 0x62c   : > { %3529 = vmatpush.bf16.msrb.mxu1 %v15517_v32  ;;  %v2969_v32 = vpop.f32.mrf.mxu0 }
 0x62e   : > { %v2935_v53 = vpop.f32.mrf.mxu3 }
 0x62f   : > { %v2965_v55 = vadd.f32 %v2964_v15, %v2935_v53 }
 0x630   : > { %3530 = vmatpush.bf16.msrb.mxu1 %v15526_v35  ;;  %v15850_v35 = vpop.f32.mrf.mxu2 }
 0x631   : > { %v2978_v61 = vpack.c.bf16 %v2965_v55, %v2963_v48  ;;  %v10907_v48 = vor.u32 %v13239_v1, %v10906_v29 }
 0x633   : > { %10849 = vmatmul.msk.bf16.gmra.mxu1 %vm2184_vm0, %v2978_v61 }
 0x634   : > { %3531 = vmatpush.bf16.msrb.mxu1 %v15535_v38  ;;  %v2972_v38 = vpop.f32.mrf.mxu1 }
 0x636   : > { %v2938_v62 = vpop.f32.mrf.mxu3 }
 0x637   : > { %v2968_v49 = vadd.f32 %v2967_v6, %v2938_v62  ;;  %v13244_v62 = vld [vmem:[#allocation33 + $0x1f4] sm:$0xf] }
 0x638   : > { %3532 = vmatpush.bf16.msrb.mxu1 %v15544_v43  ;;  %v3121_v43 = vpop.f32.mrf.mxu2  ;;  %v10935_v59 = vor.u32 %v13244_v62, %v10932_v58 }
 0x63a   : > { %3347 = vmatmul.bf16.gmra.mxu2 %v10919_v13  ;;  %v13243_v13 = vld [vmem:[#allocation33 + $0x1e4] sm:$0xf0] }
 0x63c   : > { %3533 = vmatpush.bf16.msrb.mxu1 %v15551_v10  ;;  %v2974_v31 = vpop.f32.mrf.mxu1 }
 0x63e   : > { %v2940_v16 = vpop.f32.mrf.mxu3 }
 0x63f   : > { %v2970_v5 = vadd.f32 %v2969_v32, %v2940_v16  ;;  %v13241_v32 = vld [vmem:[#allocation33 + $0x1d4] sm:$0xf0] }
 0x640   : > { %3534 = vmatpush.bf16.msrb.mxu1 %v15556_v50  ;;  %v3123_v51 = vpop.f32.mrf.mxu2  ;;  %v13242_v50 = vld [vmem:[#allocation33 + $0x1e4] sm:$0xf] }
 0x641   : > { %v2979_v21 = vpack.c.bf16 %v2970_v5, %v2968_v49  ;;  %v10927_v3 = vor.u32 %v13242_v50, %v10924_v63  ;;  %v10930_v50 = vld [vmem:[#allocation33 + $0x1f0] sm:$0xf]  ;;  %v13245_v63 = vld [vmem:[#allocation33 + $0x1f4] sm:$0xf0] }
 0x643   : > { %10850 = vmatmul.msk.bf16.gmra.mxu1 %vm2184_vm0, %v2979_v21  ;;  %v10915_v21 = vor.u32 %v13241_v32, %v10914_v12  ;;  %v10966_v32 = vld [vmem:[#allocation33 + $0x210] sm:$0xf] }
 0x646   : > { %v2943_v20 = vpop.f32.mrf.mxu3 }
 0x647   : > { %v2973_v8 = vadd.f32 %v2972_v38, %v2943_v20 }
 0x648   : > { %v3126_v22 = vpop.f32.mrf.mxu2 }
 0x64a   : > { %3352 = vmatmul.bf16.gmra.mxu2 %v10927_v3 }
 0x64e   : > { %v2945_v10 = vpop.f32.mrf.mxu3 }
 0x64f   : > { %v2975_v39 = vadd.f32 %v2974_v31, %v2945_v10 }
 0x650   : > { %v3128_v61 = vpop.f32.mrf.mxu2 }
 0x651   : > { %v2980_v36 = vpack.c.bf16 %v2975_v39, %v2973_v8 }
 0x653   : > { %10851 = vmatmul.msk.bf16.gmra.mxu1 %vm2184_vm0, %v2980_v36 }
 0x656   : > { %v3150_v28 = vpop.f32.mrf.mxu3 }
 0x657   : > { %v3151_v15 = vadd.f32 %v3150_v28, %v3121_v43  ;;  %v10922_v43 = vld [vmem:[#allocation33 + $0x1e0] sm:$0xf] }
 0x658   : > { %v3131_v38 = vpop.f32.mrf.mxu2  ;;  %v10923_v39 = vor.u32 %v13243_v13, %v10922_v43  ;;  %v13249_v43 = vld [vmem:[#allocation4 + $0xf8] sm:$0xff] }
 0x659   : > { %v10974_v13 = vld [vmem:[#allocation33 + $0x220] sm:$0xf]  ;;  %3416 = vmatpush.bf16.msrb.mxu3 %v13249_v43 }
 0x65a   : > { %3357 = vmatmul.bf16.gmra.mxu2 %v10935_v59 }
 0x65e   : > { %v3152_v25 = vpop.f32.mrf.mxu3 }
 0x65f   : > { %v3153_v53 = vadd.f32 %v3152_v25, %v3123_v51  ;;  %v10931_v25 = vor.u32 %v13245_v63, %v10930_v50  ;;  %v13246_v63 = vld [vmem:[#allocation4 + $0xe0] sm:$0xff] }
 0x660   : > { %v3133_v24 = vpop.f32.mrf.mxu2 }
 0x661   : > { %v3170_v55 = vpack.c.bf16 %v3153_v53, %v3151_v15  ;;  %v10958_v53 = vld [vmem:[#allocation33 + $0x200] sm:$0xf] }
 0x663   : > { %10900 = vmatmul.msk.bf16.vlgmr.msra.gmra.mxu0 %vm2184_vm0, %v3170_v55  ;;  %3313 = vmatmul.bf16.vlgmr.msra.gmra.mxu1 %v10907_v48  ;;  %v13251_v48 = vld [vmem:[#allocation33 + $0x204] sm:$0xf0]  ;;  %v13250_v55 = vld [vmem:[#allocation33 + $0x204] sm:$0xf] }
 0x666   : > { %v3155_v6 = vpop.f32.mrf.mxu3 }
 0x667   : > { %v3156_v49 = vadd.f32 %v3155_v6, %v3126_v22  ;;  %v10959_v6 = vor.u32 %v13251_v48, %v10958_v53 }
 0x668   : > { %v3136_v51 = vpop.f32.mrf.mxu2 }
 0x66e   : > { %v3157_v16 = vpop.f32.mrf.mxu3 }
 0x66f   : > { %v3158_v5 = vadd.f32 %v3157_v16, %v3128_v61  ;;  %v10960_v61 = vld [vmem:[#allocation33 + $0x208] sm:$0xf0]  ;;  %v13253_v16 = vld [vmem:[#allocation33 + $0x214] sm:$0xf0] }
 0x670   : > { %v3138_v3 = vpop.f32.mrf.mxu2  ;;  %v10963_v62 = vor.u32 %v13250_v55, %v10960_v61 }
 0x671   : > { %v3171_v20 = vpack.c.bf16 %v3158_v5, %v3156_v49  ;;  %v13252_v49 = vld [vmem:[#allocation33 + $0x214] sm:$0xf]  ;;  %v10968_v5 = vld [vmem:[#allocation33 + $0x218] sm:$0xf0] }
 0x673   : > { %10901 = vmatmul.msk.bf16.gmra.mxu0 %vm2184_vm0, %v3171_v20  ;;  %3318 = vmatmul.bf16.gmra.mxu1 %v10915_v21  ;;  %v10967_v21 = vor.u32 %v13253_v16, %v10966_v32 }
 0x676   : > { %v3160_v26 = vpop.f32.mrf.mxu3 }
 0x677   : > { %v3161_v10 = vadd.f32 %v3160_v26, %v3131_v38  ;;  %v10971_v38 = vor.u32 %v13252_v49, %v10968_v5 }
 0x67e   : > { %v3162_v31 = vpop.f32.mrf.mxu3 }
 0x67f   : > { %v3163_v8 = vadd.f32 %v3162_v31, %v3133_v24  ;;  %v13254_v31 = vld [vmem:[#allocation33 + $0x224] sm:$0xf] }
 0x681   : > { %v3172_v36 = vpack.c.bf16 %v3163_v8, %v3161_v10  ;;  %v10976_v10 = vld [vmem:[#allocation33 + $0x228] sm:$0xf0] }
 0x683   : > { %10902 = vmatmul.msk.bf16.gmra.mxu0 %vm2184_vm0, %v3172_v36  ;;  %3323 = vmatmul.bf16.gmra.mxu1 %v10923_v39  ;;  %v10979_v39 = vor.u32 %v13254_v31, %v10976_v10 }
 0x686   : > { %v3165_v28 = vpop.f32.mrf.mxu3 }
 0x687   : > { %v3166_v29 = vadd.f32 %v3165_v28, %v3136_v51  ;;  %v13248_v28 = vld [vmem:[#allocation4 + $0xf0] sm:$0xff] }
 0x688   : > { %3417 = vmatpush.bf16.msrb.mxu3 %v13248_v28 }
 0x68e   : > { %v3167_v22 = vpop.f32.mrf.mxu3 }
 0x68f   : > { %v3168_v1 = vadd.f32 %v3167_v22, %v3138_v3  ;;  %v10982_v3 = vld [vmem:[#allocation33 + $0x230] sm:$0xf]  ;;  %v13257_v22 = vld [vmem:[#allocation33 + $0x234] sm:$0xf0] }
 0x691   : > { %v3173_v15 = vpack.c.bf16 %v3168_v1, %v3166_v29  ;;  %v13256_v29 = vld [vmem:[#allocation33 + $0x234] sm:$0xf]  ;;  %v10984_v1 = vld [vmem:[#allocation33 + $0x238] sm:$0xf0] }
 0x693   : > { %10903 = vmatmul.msk.bf16.gmra.mxu0 %vm2184_vm0, %v3173_v15  ;;  %3328 = vmatmul.bf16.gmra.mxu1 %v10931_v25  ;;  %v10983_v25 = vor.u32 %v13257_v22, %v10982_v3  ;;  %v10987_v15 = vor.u32 %v13256_v29, %v10984_v1  ;;  %v13260_v3 = vld [vmem:[#allocation4 + $0x110] sm:$0xff] }
 0x6a0   : > { %v3035_v58 = vpop.f32.mrf.mxu1 }
 0x6a1   : > { %v3055_v59 = vadd.f32 %v3035_v58, %v15821_v44  ;;  %v13255_v44 = vld [vmem:[#allocation33 + $0x224] sm:$0xf0] }
 0x6a2   : > { %v10975_v8 = vor.u32 %v13255_v44, %v10974_v13 }
 0x6a3   : > { %3506 = vmatmul.bf16.vlgmr.msrb.gmra.mxu0 %v10959_v6  ;;  %3535 = vmatmul.bf16.vlgmr.msrb.gmra.mxu1 %v10963_v62 }
 0x6a8   : > { %v15860_v12 = vpop.f32.mrf.mxu1 }
 0x6ad   : > { %v3343_v53 = vpop.f32.mrf.mxu2 }
 0x6b0   : > { %v3040_v20 = vpop.f32.mrf.mxu1 }
 0x6b1   : > { %v3057_v26 = vadd.f32 %v3040_v20, %v15827_v40  ;;  %v13247_v40 = vld [vmem:[#allocation4 + $0xe8] sm:$0xff] }
 0x6b2   : > { %3418 = vmatpush.bf16.msrb.mxu3 %v13247_v40 }
 0x6b3   : > { %3511 = vmatmul.bf16.gmra.mxu0 %v10967_v21  ;;  %3540 = vmatmul.bf16.gmra.mxu1 %v10971_v38 }
 0x6b5   : > { %v3345_v61 = vpop.f32.mrf.mxu2 }
 0x6b6   : > { %3419 = vmatpush.bf16.msrb.mxu3 %v13246_v63 }
 0x6b8   : > { %v15863_v24 = vpop.f32.mrf.mxu1 }
 0x6bd   : > { %v3348_v32 = vpop.f32.mrf.mxu2 }
 0x6c0   : > { %v3045_v36 = vpop.f32.mrf.mxu1 }
 0x6c1   : > { %v3059_v51 = vadd.f32 %v3045_v36, %v15831_v27  ;;  %v13261_v36 = vld [vmem:[#allocation4 + $0x118] sm:$0xff] }
 0x6c2   : > { %3609 = vmatpush.bf16.msra.mxu2 %v13261_v36 }
 0x6c3   : > { %3516 = vmatmul.bf16.gmra.mxu0 %v10975_v8  ;;  %3545 = vmatmul.bf16.gmra.mxu1 %v10979_v39 }
 0x6c5   : > { %v3350_v20 = vpop.f32.mrf.mxu2 }
 0x6c6   : > { %3610 = vmatpush.bf16.msra.mxu2 %v13260_v3 }
 0x6c8   : > { %v15866_v50 = vpop.f32.mrf.mxu1 }
 0x6cd   : > { %v3353_v44 = vpop.f32.mrf.mxu2 }
 0x6d0   : > { %v3050_v48 = vpop.f32.mrf.mxu1 }
 0x6d1   : > { %v3061_v27 = vadd.f32 %v3050_v48, %v15837_v41 }
 0x6d3   : > { %3521 = vmatmul.bf16.gmra.mxu0 %v10983_v25  ;;  %3550 = vmatmul.bf16.gmra.mxu1 %v10987_v15 }
 0x6d5   : > { %v3355_v22 = vpop.f32.mrf.mxu2 }
 0x6d8   : > { %v15869_v55 = vpop.f32.mrf.mxu1 }
 0x6e0   : > { %v3228_v6 = vpop.f32.mrf.mxu0  ;;  %v3314_v62 = vpop.f32.mrf.mxu1 }
 0x6e1   : > { %v15871_v58 = vadd.f32 %v3228_v6, %v3055_v59  ;;  %v3344_v5 = vadd.f32 %v3343_v53, %v3314_v62  ;;  %v13258_v53 = vld [vmem:[#allocation4 + $0x100] sm:$0xff] }
 0x6e8   : > { %v15873_v16 = vpop.f32.mrf.mxu0  ;;  %v3316_v49 = vpop.f32.mrf.mxu1 }
 0x6e9   : > { %v3346_v21 = vadd.f32 %v3345_v61, %v3316_v49  ;;  %v3358_v61 = vpop.f32.mrf.mxu2 }
 0x6eb   : > { %v3363_v38 = vpack.c.bf16 %v3346_v21, %v3344_v5 }
 0x6ed   : > { %10952 = vmatmul.msk.bf16.vlgmr.msrb.gmra.mxu3 %vm2184_vm0, %v3363_v38 }
 0x6f0   : > { %v3233_v41 = vpop.f32.mrf.mxu0  ;;  %v3319_v43 = vpop.f32.mrf.mxu1 }
 0x6f1   : > { %v15876_v13 = vadd.f32 %v3233_v41, %v3057_v26  ;;  %v3349_v59 = vadd.f32 %v3348_v32, %v3319_v43  ;;  %v13259_v26 = vld [vmem:[#allocation4 + $0x108] sm:$0xff]  ;;  %v3360_v32 = vpop.f32.mrf.mxu2 }
 0x6f2   : > { %3611 = vmatpush.bf16.msra.mxu2 %v13259_v26 }
 0x6f6   : > { %3612 = vmatpush.bf16.msra.mxu2 %v13258_v53 }
 0x6f8   : > { %v15878_v31 = vpop.f32.mrf.mxu0  ;;  %v3321_v10 = vpop.f32.mrf.mxu1 }
 0x6f9   : > { %v3351_v8 = vadd.f32 %v3350_v20, %v3321_v10 }
 0x6fb   : > { %v3364_v39 = vpack.c.bf16 %v3351_v8, %v3349_v59 }
 0x6fd   : > { %10953 = vmatmul.msk.bf16.gmra.mxu3 %vm2184_vm0, %v3364_v39 }
 0x700   : > { %v3238_v28 = vpop.f32.mrf.mxu0  ;;  %v3324_v40 = vpop.f32.mrf.mxu1 }
 0x701   : > { %v15881_v63 = vadd.f32 %v3238_v28, %v3059_v51  ;;  %v3354_v25 = vadd.f32 %v3353_v44, %v3324_v40 }
 0x708   : > { %v15883_v29 = vpop.f32.mrf.mxu0  ;;  %v3326_v1 = vpop.f32.mrf.mxu1 }
 0x709   : > { %v3356_v15 = vadd.f32 %v3355_v22, %v3326_v1 }
 0x70b   : > { %v3365_v48 = vpack.c.bf16 %v3356_v15, %v3354_v25 }
 0x70d   : > { %10954 = vmatmul.msk.bf16.gmra.mxu3 %vm2184_vm0, %v3365_v48 }
 0x710   : > { %v3243_v6 = vpop.f32.mrf.mxu0  ;;  %v3329_v62 = vpop.f32.mrf.mxu1 }
 0x711   : > { %v15886_v51 = vadd.f32 %v3243_v6, %v3061_v27  ;;  %v3359_v21 = vadd.f32 %v3358_v61, %v3329_v62 }
 0x718   : > { %v15888_v49 = vpop.f32.mrf.mxu0  ;;  %v3331_v5 = vpop.f32.mrf.mxu1 }
 0x719   : > { %v3361_v38 = vadd.f32 %v3360_v32, %v3331_v5 }
 0x71b   : > { %v3366_v20 = vpack.c.bf16 %v3361_v38, %v3359_v21 }
 0x71d   : > { %10955 = vmatmul.msk.bf16.gmra.mxu3 %vm2184_vm0, %v3366_v20 }
 0x720   : > { %v3507_v41 = vpop.f32.mrf.mxu0  ;;  %v3536_v43 = vpop.f32.mrf.mxu1 }
 0x721   : > { %v3537_v59 = vadd.f32 %v3536_v43, %v3507_v41  ;;  %v11034_v43 = vld [vmem:[#allocation7 + $0x30] sm:$0xf] }
 0x728   : > { %v3509_v44 = vpop.f32.mrf.mxu0  ;;  %v3538_v10 = vpop.f32.mrf.mxu1 }
 0x729   : > { %v3539_v8 = vadd.f32 %v3538_v10, %v3509_v44  ;;  %v13269_v44 = vld [vmem:[#allocation7 + $0x34] sm:$0xf0]  ;;  %v13268_v10 = vld [vmem:[#allocation7 + $0x34] sm:$0xf] }
 0x72b   : > { %v3556_v39 = vpack.c.bf16 %v3539_v8, %v3537_v59  ;;  %v11035_v59 = vor.u32 %v13269_v44, %v11034_v43  ;;  %v11036_v8 = vld [vmem:[#allocation7 + $0x38] sm:$0xf0] }
 0x72d   : > { %11004 = vmatmul.msk.bf16.vlgmr.msra.gmra.mxu2 %vm2184_vm0, %v3556_v39  ;;  %v11039_v39 = vor.u32 %v13268_v10, %v11036_v8  ;;  %3736 = vmatpush.bf16.msra.mxu3 %v11035_v59 }
 0x72f   : > { %3765 = vmatpush.bf16.msra.mxu0 %v11039_v39 }
 0x730   : > { %v3512_v27 = vpop.f32.mrf.mxu0  ;;  %v3541_v36 = vpop.f32.mrf.mxu1 }
 0x731   : > { %v3542_v3 = vadd.f32 %v3541_v36, %v3512_v27  ;;  %v11026_v27 = vld [vmem:[#allocation7 + $0x20] sm:$0xf]  ;;  %v13267_v36 = vld [vmem:[#allocation7 + $0x24] sm:$0xf0] }
 0x738   : > { %v3514_v28 = vpop.f32.mrf.mxu0  ;;  %v3543_v40 = vpop.f32.mrf.mxu1 }
 0x739   : > { %v3544_v22 = vadd.f32 %v3543_v40, %v3514_v28  ;;  %v13266_v28 = vld [vmem:[#allocation7 + $0x24] sm:$0xf]  ;;  %v11027_v40 = vor.u32 %v13267_v36, %v11026_v27  ;;  %v15901_v36 = vld [vmem:[#allocation6] ss:$0 sm:$0xff] }
 0x73b   : > { %v3557_v26 = vpack.c.bf16 %v3544_v22, %v3542_v3  ;;  %v11028_v3 = vld [vmem:[#allocation7 + $0x28] sm:$0xf0]  ;;  %3737 = vmatpush.bf16.msra.mxu3 %v11027_v40 }
 0x73c   : > { %v11031_v22 = vor.u32 %v13266_v28, %v11028_v3  ;;  %v2279_v3 = vadd.f32 %v15735_v23, %v15730_v30 }
 0x73d   : > { %11005 = vmatmul.msk.bf16.gmra.mxu2 %vm2184_vm0, %v3557_v26  ;;  %v11018_v26 = vld [vmem:[#allocation7 + $0x10] sm:$0xf] }
 0x73e   : > { %3766 = vmatpush.bf16.msra.mxu0 %v11031_v22 }
 0x740   : > { %v3517_v1 = vpop.f32.mrf.mxu0  ;;  %v3546_v25 = vpop.f32.mrf.mxu1 }
 0x741   : > { %v3547_v48 = vadd.f32 %v3546_v25, %v3517_v1  ;;  %v13265_v1 = vld [vmem:[#allocation7 + $0x14] sm:$0xf0]  ;;  %v13264_v25 = vld [vmem:[#allocation7 + $0x14] sm:$0xf] }
 0x748   : > { %v3519_v15 = vpop.f32.mrf.mxu0  ;;  %v3548_v53 = vpop.f32.mrf.mxu1 }
 0x749   : > { %v3549_v61 = vadd.f32 %v3548_v53, %v3519_v15  ;;  %v11019_v15 = vor.u32 %v13265_v1, %v11018_v26  ;;  %v11020_v53 = vld [vmem:[#allocation7 + $0x18] sm:$0xf0] }
 0x74b   : > { %v3558_v6 = vpack.c.bf16 %v3549_v61, %v3547_v48  ;;  %v11023_v48 = vor.u32 %v13264_v25, %v11020_v53  ;;  %3738 = vmatpush.bf16.msra.mxu3 %v11019_v15  ;;  %v11010_v61 = vld [vmem:[#allocation7] sm:$0xf] }
 0x74d   : > { %11006 = vmatmul.msk.bf16.gmra.mxu2 %vm2184_vm0, %v3558_v6  ;;  %3767 = vmatpush.bf16.msra.mxu0 %v11023_v48  ;;  %v13263_v6 = vld [vmem:[#allocation7 + $0x4] sm:$0xf0] }
 0x750   : > { %v3522_v62 = vpop.f32.mrf.mxu0  ;;  %v3551_v32 = vpop.f32.mrf.mxu1 }
 0x751   : > { %v3552_v38 = vadd.f32 %v3551_v32, %v3522_v62  ;;  %v13262_v62 = vld [vmem:[#allocation7 + $0x4] sm:$0xf]  ;;  %v11011_v32 = vor.u32 %v13263_v6, %v11010_v61  ;;  %v2284_v6 = vadd.f32 %v15745_v57, %v15741_v33  ;;  %v13277_v57 = vld [vmem:[%s16968_s4 + $0x38] sm:$0xff] }
 0x752   : > { %v13285_v33 = vld [vmem:[%s16968_s4 + $0x78] sm:$0xff]  ;;  %4018 = vmatpush.bf16.msra.mxu1 %v13277_v57 }
 0x753   : > { %3739 = vmatpush.bf16.msra.mxu3 %v11011_v32  ;;  %v2481_v32 = vadd.f32 %v15814_v2, %v2284_v6  ;;  %4047 = vmatpush.bf16.msrb.mxu2 %v13285_v33  ;;  %v13270_v6 = vld [vmem:[%s16968_s4] sm:$0xff] }
 0x758   : > { %v3524_v5 = vpop.f32.mrf.mxu0  ;;  %v3553_v21 = vpop.f32.mrf.mxu1 }
 0x759   : > { %v3554_v20 = vadd.f32 %v3553_v21, %v3524_v5  ;;  %v11012_v5 = vld [vmem:[#allocation7 + $0x8] sm:$0xf0] }
 0x75b   : > { %v3559_v41 = vpack.c.bf16 %v3554_v20, %v3552_v38  ;;  %v11015_v38 = vor.u32 %v13262_v62, %v11012_v5 }
 0x75d   : > { %11007 = vmatmul.msk.bf16.gmra.mxu2 %vm2184_vm0, %v3559_v41  ;;  %3768 = vmatpush.bf16.msra.mxu0 %v11015_v38  ;;  %v2670_v41 = vadd.f32 %v15823_v52, %v15808_v56 }
 0x75f   : > { %v2863_v44 = vadd.f32 %v15819_v37, %v2670_v41  ;;  %v2479_v37 = vadd.f32 %v15811_v17, %v2279_v3 }
 0x761   : > { %v3056_v59 = vadd.f32 %v15860_v12, %v2863_v44 }
 0x763   : > { %v3249_v39 = vadd.f32 %v15873_v16, %v3056_v59 }
 0x770   : > { %v3421_v21 = vpop.f32.mrf.mxu3 }
 0x771   : > { %v3441_v8 = vadd.f32 %v3421_v21, %v15871_v58  ;;  %v2672_v58 = vadd.f32 %v15829_v4, %v2479_v37 }
 0x773   : > { %v2865_v15 = vadd.f32 %v15825_v60, %v2672_v58 }
 0x775   : > { %v3058_v30 = vadd.f32 %v15863_v24, %v2865_v15  ;;  %v13283_v15 = vld [vmem:[%s16968_s4 + $0x68] sm:$0xff] }
 0x777   : > { %v3251_v17 = vadd.f32 %v15878_v31, %v3058_v30  ;;  %v13282_v30 = vld [vmem:[%s16968_s4 + $0x60] sm:$0xff] }
 0x778   : > { %v3423_v20 = vpop.f32.mrf.mxu3 }
 0x779   : > { %v3442_v28 = vadd.f32 %v3423_v20, %v3249_v39 }
 0x780   : > { %v3426_v10 = vpop.f32.mrf.mxu3 }
 0x781   : > { %v3443_v23 = vadd.f32 %v3426_v10, %v15876_v13  ;;  %v2674_v13 = vadd.f32 %v15835_v54, %v2481_v32  ;;  %v1573_v32 = vld [vmem:[#allocation12] sm:$0x3] }
 0x783   : > { %v2867_v41 = vadd.f32 %v15833_v11, %v2674_v13  ;;  %v2289_v11 = vadd.f32 %v15803_v14, %v15749_v7 }
 0x788   : > { %v3428_v12 = vpop.f32.mrf.mxu3 }
 0x789   : > { %v3444_v61 = vadd.f32 %v3428_v12, %v3251_v17  ;;  %v13281_v17 = vld [vmem:[%s16968_s4 + $0x58] sm:$0xff] }
 0x790   : > { %v3431_v48 = vpop.f32.mrf.mxu3 }
 0x791   : > { %v3445_v2 = vadd.f32 %v3431_v48, %v15881_v63  ;;  %v13280_v48 = vld [vmem:[%s16968_s4 + $0x50] sm:$0xff] }
 0x798   : > { %v3433_v38 = vpop.f32.mrf.mxu3 }
 0x7b0   : > { %v3614_v43 = vpop.f32.mrf.mxu2 }
 0x7b1   : > { %v3634_v27 = vadd.f32 %v3614_v43, %v3441_v8  ;;  %v3060_v43 = vadd.f32 %v15866_v50, %v2867_v41 }
 0x7b3   : > { %v3646_v56 = vadd.f32 %v15901_v36, %v3634_v27  ;;  %v3253_v54 = vadd.f32 %v15883_v29, %v3060_v43  ;;  %v3436_v27 = vpop.f32.mrf.mxu3 }
 0x7b4   : > { %v3447_v14 = vadd.f32 %v3436_v27, %v15886_v51  ;;  %v13276_v51 = vld [vmem:[%s16968_s4 + $0x30] sm:$0xff] }
 0x7b5   : > { %v3654_v26 = vmax.f32 %v3646_v56, 0.0  ;;  %v3446_v10 = vadd.f32 %v3433_v38, %v3253_v54  ;;  %4019 = vmatpush.bf16.msra.mxu1 %v13276_v51  ;;  %v16969_v51 = vld [vmem:[#allocation74_spill] sm:$0xff] }
 0x7b8   : > { %v3616_v40 = vpop.f32.mrf.mxu2 }
 0x7b9   : > { %v3635_v52 = vadd.f32 %v3616_v40, %v3442_v28  ;;  %v2483_v28 = vadd.f32 %v15817_v45, %v2289_v11 }
 0x7bb   : > { %v3647_v22 = vadd.f32 %v15901_v36, %v3635_v52  ;;  %v2676_v63 = vadd.f32 %v15839_v0, %v2483_v28  ;;  %v3438_v45 = vpop.f32.mrf.mxu3 }
 0x7bd   : > { %v3655_v16 = vmax.f32 %v3647_v22, 0.0  ;;  %v2869_v52 = vadd.f32 %v15850_v35, %v2676_v63 }
 0x7bf   : > { %v3662_v1 = vpack.c.bf16 %v3655_v16, %v3654_v26  ;;  %v3062_v7 = vadd.f32 %v15869_v55, %v2869_v52 }
 0x7c0   : > { %v3619_v25 = vpop.f32.mrf.mxu2 }
 0x7c1   : > { %11040 = vmatmul.msk.bf16.vlgmr.msra.gmra.mxu3 %vm2184_vm0, %v3662_v1  ;;  %11044 = vmatmul.msk.bf16.vlgmr.msra.gmra.mxu0 %vm2184_vm0, %v3662_v1  ;;  %v3636_v53 = vadd.f32 %v3619_v25, %v3443_v23  ;;  %v3255_v37 = vadd.f32 %v15888_v49, %v3062_v7  ;;  %v13284_v49 = vld [vmem:[%s16968_s4 + $0x70] sm:$0xff]  ;;  %v13275_v25 = vld [vmem:[%s16968_s4 + $0x28] sm:$0xff]  ;;  %v13273_v23 = vld [vmem:[%s16968_s4 + $0x18] sm:$0xff] }
 0x7c2   : > { %4048 = vmatpush.bf16.msrb.mxu2 %v13284_v49  ;;  %4020 = vmatpush.bf16.msra.mxu1 %v13275_v25 }
 0x7c3   : > { %v3648_v60 = vadd.f32 %v15901_v36, %v3636_v53  ;;  %v3448_v22 = vadd.f32 %v3438_v45, %v3255_v37  ;;  %v13272_v53 = vld [vmem:[%s16968_s4 + $0x10] sm:$0xff] }
 0x7c5   : > { %v3656_v5 = vmax.f32 %v3648_v60, 0.0  ;;  %v13278_v60 = vld [vmem:[%s16968_s4 + $0x40] sm:$0xff] }
 0x7c6   : > { %4049 = vmatpush.bf16.msrb.mxu2 %v13283_v15 }
 0x7c8   : > { %v3621_v4 = vpop.f32.mrf.mxu2 }
 0x7c9   : > { %v3637_v62 = vadd.f32 %v3621_v4, %v3444_v61  ;;  %v13271_v61 = vld [vmem:[%s16968_s4 + $0x8] sm:$0xff] }
 0x7ca   : > { %4050 = vmatpush.bf16.msrb.mxu2 %v13282_v30  ;;  %v13279_v4 = vld [vmem:[%s16968_s4 + $0x48] sm:$0xff] }
 0x7cb   : > { %v3649_v24 = vadd.f32 %v15901_v36, %v3637_v62  ;;  %v3674_v62 = vld [vmem:[#allocation9] sm:$0x3] }
 0x7cc   : > { %v15966_v38 = vperm.slane %v3674_v62, 0 }
 0x7cd   : > { %v3657_v31 = vmax.f32 %v3649_v24, 0.0  ;;  %v15959_v24 = vperm.slane %v3674_v62, 1 }
 0x7ce   : > { %4051 = vmatpush.bf16.msrb.mxu2 %v13281_v17 }
 0x7cf   : > { %v3663_v21 = vpack.c.bf16 %v3657_v31, %v3656_v5  ;;  %v15961_v5 = vperm.slane %v1573_v32, 1  ;;  %v15963_v31 = vperm.slane %v1573_v32, 0 }
 0x7d0   : > { %v3624_v20 = vpop.f32.mrf.mxu2 }
 0x7d1   : > { %11041 = vmatmul.msk.bf16.gmra.mxu3 %vm2184_vm0, %v3663_v21  ;;  %11045 = vmatmul.msk.bf16.gmra.mxu0 %vm2184_vm0, %v3663_v21  ;;  %v3638_v44 = vadd.f32 %v3624_v20, %v3445_v2  ;;  %v1698_v20 = vadd.f32 %v15583_v34, %v15961_v5  ;;  %v1669_v57 = vadd.f32 %v15598_v18, %v15963_v31 }
 0x7d2   : > { %4052 = vmatpush.bf16.msrb.mxu2 %v13280_v48  ;;  %v1700_v11 = vadd.f32 %v15592_v19, %v15961_v5  ;;  %v1671_v34 = vadd.f32 %v15605_v46, %v15963_v31  ;;  %v1674_v19 = vadd.f32 %v15613_v9, %v15963_v31  ;;  %v1676_v49 = vadd.f32 %v16969_v51, %v15963_v31  ;;  %v16970_v48 = vld [vmem:[#allocation73_spill] sm:$0xff] }
 0x7d3   : > { %v3650_v8 = vadd.f32 %v15901_v36, %v3638_v44 }
 0x7d5   : > { %v3658_v40 = vmax.f32 %v3650_v8, 0.0 }
 0x7d6   : > { %4053 = vmatpush.bf16.msrb.mxu2 %v13279_v4 }
 0x7d8   : > { %v3626_v59 = vpop.f32.mrf.mxu2 }
 0x7d9   : > { %v3639_v39 = vadd.f32 %v3626_v59, %v3446_v10 }
 0x7da   : > { %4054 = vmatpush.bf16.msrb.mxu2 %v13278_v60 }
 0x7db   : > { %v3651_v50 = vadd.f32 %v15901_v36, %v3639_v39 }
 0x7dd   : > { %v3659_v3 = vmax.f32 %v3651_v50, 0.0 }
 0x7df   : > { %v3664_v56 = vpack.c.bf16 %v3659_v3, %v3658_v40 }
 0x7e0   : > { %v3629_v29 = vpop.f32.mrf.mxu2 }
 0x7e1   : > { %11042 = vmatmul.msk.bf16.gmra.mxu3 %vm2184_vm0, %v3664_v56  ;;  %11046 = vmatmul.msk.bf16.gmra.mxu0 %vm2184_vm0, %v3664_v56  ;;  %v3640_v0 = vadd.f32 %v3629_v29, %v3447_v14  ;;  %v1703_v56 = vadd.f32 %v15600_v42, %v15961_v5 }
 0x7e3   : > { %v3652_v35 = vadd.f32 %v15901_v36, %v3640_v0 }
 0x7e5   : > { %v3660_v16 = vmax.f32 %v3652_v35, 0.0 }
 0x7e8   : > { %v3631_v12 = vpop.f32.mrf.mxu2 }
 0x7e9   : > { %v3641_v58 = vadd.f32 %v3631_v12, %v3448_v22 }
 0x7eb   : > { %v3653_v26 = vadd.f32 %v15901_v36, %v3641_v58  ;;  %v13274_v36 = vld [vmem:[%s16968_s4 + $0x20] sm:$0xff] }
 0x7ec   : > { %4021 = vmatpush.bf16.msra.mxu1 %v13274_v36 }
 0x7ed   : > { %v3661_v55 = vmax.f32 %v3653_v26, 0.0 }
 0x7ef   : > { %v3665_v1 = vpack.c.bf16 %v3661_v55, %v3660_v16  ;;  %v1705_v16 = vadd.f32 %v15607_v47, %v15961_v5  ;;  %v16971_v47 = vld [vmem:[#allocation76_spill] sm:$0xff] }
 0x7f0   : > { %4022 = vmatpush.bf16.msra.mxu1 %v13273_v23 }
 0x7f1   : > { %11043 = vmatmul.msk.bf16.gmra.mxu3 %vm2184_vm0, %v3665_v1  ;;  %11047 = vmatmul.msk.bf16.gmra.mxu0 %vm2184_vm0, %v3665_v1 }
 0x7f4   : > { %4023 = vmatpush.bf16.msra.mxu1 %v13272_v53 }
 0x7f8   : > { %4024 = vmatpush.bf16.msra.mxu1 %v13271_v61  ;;  %v1708_v61 = vadd.f32 %v16970_v48, %v15961_v5 }
 0x7fc   : > { %4025 = vmatpush.bf16.msra.mxu1 %v13270_v6  ;;  %v1679_v6 = vadd.f32 %v16971_v47, %v15963_v31 }
 0x83e   : > { %v3770_v13 = vpop.f32.mrf.mxu0 }
 0x83f   : > { %v3771_v21 = vadd.f32 %v3770_v13, %v15959_v24 }
 0x841   : > { %v3791_v33 = vadd.f32 %v3771_v21, %v1698_v20 }
 0x843   : > { %v3807_v44 = vmax.f32 %v3791_v33, 0.0 }
 0x844   : > { %v3741_v41 = vpop.f32.mrf.mxu3 }
 0x845   : > { %v3742_v43 = vadd.f32 %v3741_v41, %v15966_v38 }
 0x846   : > { %v3772_v2 = vpop.f32.mrf.mxu0 }
 0x847   : > { %v3790_v54 = vadd.f32 %v3742_v43, %v1669_v57  ;;  %v3773_v59 = vadd.f32 %v3772_v2, %v15959_v24 }
 0x849   : > { %v3806_v10 = vmax.f32 %v3790_v54, 0.0  ;;  %v3793_v27 = vadd.f32 %v3773_v59, %v1700_v11  ;;  %v16972_v59 = vld [vmem:[#allocation75_spill] sm:$0xff] }
 0x84a   : > { %v1710_v11 = vadd.f32 %v16972_v59, %v15961_v5 }
 0x84b   : > { %v15976_v8 = vpack.c.bf16 %v3807_v44, %v3806_v10  ;;  %v3809_v63 = vmax.f32 %v3793_v27, 0.0  ;;  %v16973_v27 = vld [vmem:[#allocation78_spill] sm:$0xff] }
 0x84c   : > { %v3743_v39 = vpop.f32.mrf.mxu3 }
 0x84d   : > { %v3744_v18 = vadd.f32 %v3743_v39, %v15966_v38  ;;  %v3890_v52 = vunpack.c.l.b16 %v15976_v8  ;;  %v3891_v46 = vunpack.c.h.b16 %v15976_v8 }
 0x84e   : > { %v3775_v28 = vpop.f32.mrf.mxu0 }
 0x84f   : > { %v3792_v50 = vadd.f32 %v3744_v18, %v1671_v34  ;;  %v3776_v3 = vadd.f32 %v3775_v28, %v15959_v24  ;;  %v1681_v18 = vadd.f32 %v16973_v27, %v15963_v31  ;;  %v13299_v27 = vld [vmem:[#allocation15 + $0x28] sm:$0xff] }
 0x851   : > { %v3808_v40 = vmax.f32 %v3792_v50, 0.0  ;;  %v3795_v14 = vadd.f32 %v3776_v3, %v1703_v56 }
 0x853   : > { %v15984_v29 = vpack.c.bf16 %v3809_v63, %v3808_v40  ;;  %v3811_v58 = vmax.f32 %v3795_v14, 0.0  ;;  %v16975_v14 = vld [vmem:[#allocation80_spill] sm:$0xff] }
 0x854   : > { %v3746_v7 = vpop.f32.mrf.mxu3 }
 0x855   : > { %v3747_v45 = vadd.f32 %v3746_v7, %v15966_v38  ;;  %v3892_v37 = vunpack.c.l.b16 %v15984_v29  ;;  %v3893_v0 = vunpack.c.h.b16 %v15984_v29 }
 0x856   : > { %v3777_v22 = vpop.f32.mrf.mxu0 }
 0x857   : > { %v3794_v12 = vadd.f32 %v3747_v45, %v1674_v19  ;;  %v3906_v42 = vpack.c.b16 %v3892_v37, %v3890_v52  ;;  %v3907_v35 = vpack.c.b16 %v3893_v0, %v3891_v46  ;;  %v3778_v9 = vadd.f32 %v3777_v22, %v15959_v24  ;;  %v16974_v52 = vld [vmem:[#allocation77_spill] sm:$0xff] }
 0x858   : > { %v1713_v46 = vadd.f32 %v16974_v52, %v15961_v5  ;;  %v1684_v45 = vadd.f32 %v16975_v14, %v15963_v31 }
 0x859   : > { %v3810_v26 = vmax.f32 %v3794_v12, 0.0  ;;  %4026 = vmatmul.bf16.vlgmr.msra.gmra.mxu1 %v3906_v42  ;;  %4055 = vmatmul.bf16.vlgmr.msrb.gmra.mxu2 %v3907_v35  ;;  %v3797_v25 = vadd.f32 %v3778_v9, %v1705_v16 }
 0x85b   : > { %v15996_v55 = vpack.c.bf16 %v3811_v58, %v3810_v26  ;;  %v3813_v23 = vmax.f32 %v3797_v25, 0.0 }
 0x85c   : > { %v3748_v1 = vpop.f32.mrf.mxu3 }
 0x85d   : > { %v3749_v15 = vadd.f32 %v3748_v1, %v15966_v38  ;;  %v3894_v62 = vunpack.c.l.b16 %v15996_v55  ;;  %v3895_v32 = vunpack.c.h.b16 %v15996_v55 }
 0x85e   : > { %v3780_v36 = vpop.f32.mrf.mxu0 }
 0x85f   : > { %v3796_v30 = vadd.f32 %v3749_v15, %v1676_v49  ;;  %v3781_v53 = vadd.f32 %v3780_v36, %v15959_v24  ;;  %v16976_v15 = vld [vmem:[#allocation79_spill] sm:$0xff] }
 0x860   : > { %v1715_v36 = vadd.f32 %v16976_v15, %v15961_v5 }
 0x861   : > { %v3812_v17 = vmax.f32 %v3796_v30, 0.0  ;;  %v3799_v13 = vadd.f32 %v3781_v53, %v1708_v61 }
 0x863   : > { %v16004_v4 = vpack.c.bf16 %v3813_v23, %v3812_v17  ;;  %v3815_v54 = vmax.f32 %v3799_v13, 0.0  ;;  %v16977_v17 = vld [vmem:[#allocation81_spill] sm:$0xff] }
 0x864   : > { %v3751_v60 = vpop.f32.mrf.mxu3  ;;  %v1686_v53 = vadd.f32 %v16977_v17, %v15963_v31 }
 0x865   : > { %v3752_v21 = vadd.f32 %v3751_v60, %v15966_v38  ;;  %v3896_v20 = vunpack.c.l.b16 %v16004_v4  ;;  %v3897_v41 = vunpack.c.h.b16 %v16004_v4 }
 0x866   : > { %v3782_v57 = vpop.f32.mrf.mxu0 }
 0x867   : > { %v3798_v33 = vadd.f32 %v3752_v21, %v1679_v6  ;;  %v3908_v43 = vpack.c.b16 %v3896_v20, %v3894_v62  ;;  %v3909_v2 = vpack.c.b16 %v3897_v41, %v3895_v32  ;;  %v3783_v10 = vadd.f32 %v3782_v57, %v15959_v24  ;;  %v13966_v41 = vld [vmem:[#allocation13] ss:$0 sm:$0xff] }
 0x869   : > { %v3814_v44 = vmax.f32 %v3798_v33, 0.0  ;;  %4031 = vmatmul.bf16.gmra.mxu1 %v3908_v43  ;;  %4060 = vmatmul.bf16.gmra.mxu2 %v3909_v2  ;;  %v3801_v28 = vadd.f32 %v3783_v10, %v1710_v11  ;;  %v13301_v10 = vld [vmem:[#allocation15 + $0x38] sm:$0xff]  ;;  %v13300_v11 = vld [vmem:[#allocation15 + $0x30] sm:$0xff] }
 0x86a   : > { %4292 = vmatpush.bf16.msrb.mxu1 %v13301_v10  ;;  %v13318_v10 = vld [vmem:[#allocation36 + $0x80] sm:$0xff] }
 0x86b   : > { %v16016_v39 = vpack.c.bf16 %v3815_v54, %v3814_v44  ;;  %v3817_v3 = vmax.f32 %v3801_v28, 0.0  ;;  %v13298_v28 = vld [vmem:[#allocation15 + $0x20] sm:$0xff] }
 0x86c   : > { %v3753_v34 = vpop.f32.mrf.mxu3 }
 0x86d   : > { %v3754_v50 = vadd.f32 %v3753_v34, %v15966_v38  ;;  %v3898_v0 = vunpack.c.l.b16 %v16016_v39  ;;  %v3899_v22 = vunpack.c.h.b16 %v16016_v39 }
 0x86e   : > { %v3785_v63 = vpop.f32.mrf.mxu0  ;;  %4293 = vmatpush.bf16.msrb.mxu1 %v13300_v11 }
 0x86f   : > { %v3800_v40 = vadd.f32 %v3754_v50, %v1681_v18  ;;  %v3786_v19 = vadd.f32 %v3785_v63, %v15959_v24 }
 0x871   : > { %v3816_v56 = vmax.f32 %v3800_v40, 0.0  ;;  %v3803_v12 = vadd.f32 %v3786_v19, %v1713_v46 }
 0x872   : > { %4294 = vmatpush.bf16.msrb.mxu1 %v13299_v27 }
 0x873   : > { %v16024_v7 = vpack.c.bf16 %v3817_v3, %v3816_v56  ;;  %v3819_v51 = vmax.f32 %v3803_v12, 0.0 }
 0x874   : > { %v3756_v37 = vpop.f32.mrf.mxu3 }
 0x875   : > { %v3757_v42 = vadd.f32 %v3756_v37, %v15966_v38  ;;  %v3900_v35 = vunpack.c.l.b16 %v16024_v7  ;;  %v3901_v58 = vunpack.c.h.b16 %v16024_v7 }
 0x876   : > { %v3787_v26 = vpop.f32.mrf.mxu0  ;;  %4295 = vmatpush.bf16.msrb.mxu1 %v13298_v28 }
 0x877   : > { %v3802_v9 = vadd.f32 %v3757_v42, %v1684_v45  ;;  %v3910_v16 = vpack.c.b16 %v3900_v35, %v3898_v0  ;;  %v3911_v1 = vpack.c.b16 %v3901_v58, %v3899_v22  ;;  %v3788_v25 = vadd.f32 %v3787_v26, %v15959_v24 }
 0x879   : > { %v3818_v49 = vmax.f32 %v3802_v9, 0.0  ;;  %4036 = vmatmul.bf16.gmra.mxu1 %v3910_v16  ;;  %4065 = vmatmul.bf16.gmra.mxu2 %v3911_v1  ;;  %v3805_v48 = vadd.f32 %v3788_v25, %v1715_v36 }
 0x87b   : > { %v16036_v30 = vpack.c.bf16 %v3819_v51, %v3818_v49  ;;  %v3821_v6 = vmax.f32 %v3805_v48, 0.0 }
 0x87c   : > { %v3758_v23 = vpop.f32.mrf.mxu3 }
 0x87d   : > { %v3759_v61 = vadd.f32 %v3758_v23, %v15966_v38  ;;  %v3902_v24 = vunpack.c.l.b16 %v16036_v30  ;;  %v3903_v5 = vunpack.c.h.b16 %v16036_v30 }
 0x87f   : > { %v3804_v47 = vadd.f32 %v3759_v61, %v1686_v53 }
 0x881   : > { %v3820_v60 = vmax.f32 %v3804_v47, 0.0 }
 0x883   : > { %v16041_v62 = vpack.c.bf16 %v3821_v6, %v3820_v60  ;;  %v13286_v60 = vld [vmem:[#allocation36] sm:$0xff] }
 0x885   : > { %v3904_v32 = vunpack.c.l.b16 %v16041_v62  ;;  %v3905_v13 = vunpack.c.h.b16 %v16041_v62 }
 0x887   : > { %v3912_v21 = vpack.c.b16 %v3904_v32, %v3902_v24  ;;  %v3913_v20 = vpack.c.b16 %v3905_v13, %v3903_v5  ;;  %v13294_v24 = vld [vmem:[#allocation36 + $0x20] sm:$0xff]  ;;  %v13287_v32 = vld [vmem:[#allocation36 + $0x8] sm:$0xff]  ;;  %v13288_v13 = vld [vmem:[#allocation36 + $0x10] sm:$0xff] }
 0x888   : > { %v13295_v5 = vld [vmem:[#allocation36 + $0x28] sm:$0xff] }
 0x889   : > { %4041 = vmatmul.bf16.gmra.mxu1 %v3912_v21  ;;  %4070 = vmatmul.bf16.gmra.mxu2 %v3913_v20  ;;  %v13296_v21 = vld [vmem:[#allocation36 + $0x30] sm:$0xff]  ;;  %v13289_v20 = vld [vmem:[#allocation36 + $0x18] sm:$0xff] }
 0x8d6   : > { %v4027_v31 = vpop.f32.mrf.mxu1 }
 0x8d7   : > { %v4028_v38 = vadd.f32 %v13966_v41, %v4027_v31  ;;  %v13297_v31 = vld [vmem:[#allocation36 + $0x38] sm:$0xff] }
 0x8dc   : > { %v4056_v57 = vpop.f32.mrf.mxu2 }
 0x8dd   : > { %v4057_v33 = vadd.f32 %v4056_v57, %v4028_v38  ;;  %v13303_v38 = vld [vmem:[#allocation36 + $0x48] sm:$0xff]  ;;  %v13304_v57 = vld [vmem:[#allocation36 + $0x50] sm:$0xff] }
 0x8de   : > { %v4029_v43 = vpop.f32.mrf.mxu1 }
 0x8df   : > { %v4030_v49 = vadd.f32 %v13966_v41, %v4029_v43  ;;  %v4076_v47 = vmax.f32 %v4057_v33, 0.0  ;;  %v13293_v33 = vld [vmem:[#allocation15 + $0x18] sm:$0xff]  ;;  %v13292_v43 = vld [vmem:[#allocation15 + $0x10] sm:$0xff] }
 0x8e0   : > { %4357 = vmatpush.bf16.msra.mxu2 %v13293_v33  ;;  %v13326_v33 = vld [vmem:[#allocation36 + $0xa0] sm:$0xff] }
 0x8e4   : > { %v4058_v2 = vpop.f32.mrf.mxu2  ;;  %4358 = vmatpush.bf16.msra.mxu2 %v13292_v43 }
 0x8e5   : > { %v4059_v36 = vadd.f32 %v4058_v2, %v4030_v49  ;;  %v13291_v2 = vld [vmem:[#allocation15 + $0x8] sm:$0xff]  ;;  %v13320_v49 = vld [vmem:[#allocation36 + $0x90] sm:$0xff] }
 0x8e6   : > { %v4032_v54 = vpop.f32.mrf.mxu1 }
 0x8e7   : > { %v4033_v9 = vadd.f32 %v13966_v41, %v4032_v54  ;;  %v4077_v48 = vmax.f32 %v4059_v36, 0.0  ;;  %v13290_v54 = vld [vmem:[#allocation15] sm:$0xff] }
 0x8e8   : > { %4359 = vmatpush.bf16.msra.mxu2 %v13291_v2  ;;  %v13337_v2 = vld [vmem:[#allocation36 + $0xd8] sm:$0xff] }
 0x8e9   : > { %v16062_v6 = vpack.c.bf16 %v4077_v48, %v4076_v47 }
 0x8ec   : > { %v4061_v44 = vpop.f32.mrf.mxu2  ;;  %4360 = vmatpush.bf16.msra.mxu2 %v13290_v54 }
 0x8ed   : > { %v4062_v25 = vadd.f32 %v4061_v44, %v4033_v9  ;;  %v13305_v44 = vld [vmem:[#allocation36 + $0x58] sm:$0xff] }
 0x8ee   : > { %v4034_v59 = vpop.f32.mrf.mxu1 }
 0x8ef   : > { %v4035_v42 = vadd.f32 %v13966_v41, %v4034_v59  ;;  %v4078_v53 = vmax.f32 %v4062_v25, 0.0 }
 0x8f4   : > { %v4063_v34 = vpop.f32.mrf.mxu2 }
 0x8f5   : > { %v4064_v16 = vadd.f32 %v4063_v34, %v4035_v42  ;;  %v13306_v42 = vld [vmem:[#allocation15 + $0x40] sm:$0xff] }
 0x8f6   : > { %v4037_v18 = vpop.f32.mrf.mxu1 }
 0x8f7   : > { %v4038_v0 = vadd.f32 %v13966_v41, %v4037_v18  ;;  %v4079_v23 = vmax.f32 %v4064_v16, 0.0 }
 0x8f9   : > { %v16057_v61 = vpack.c.bf16 %v4079_v23, %v4078_v53  ;;  %v13310_v23 = vld [vmem:[#allocation36 + $0x60] sm:$0xff]  ;;  %v13321_v53 = vld [vmem:[#allocation36 + $0x98] sm:$0xff] }
 0x8fc   : > { %v4066_v50 = vpop.f32.mrf.mxu2 }
 0x8fd   : > { %v4067_v35 = vadd.f32 %v4066_v50, %v4038_v0 }
 0x8fe   : > { %v4039_v63 = vpop.f32.mrf.mxu1 }
 0x8ff   : > { %v4040_v46 = vadd.f32 %v13966_v41, %v4039_v63  ;;  %v4080_v15 = vmax.f32 %v4067_v35, 0.0 }
 0x904   : > { %v4068_v40 = vpop.f32.mrf.mxu2 }
 0x905   : > { %v4069_v22 = vadd.f32 %v4068_v40, %v4040_v46  ;;  %v13309_v46 = vld [vmem:[#allocation15 + $0x58] sm:$0xff] }
 0x906   : > { %v4042_v3 = vpop.f32.mrf.mxu1 }
 0x907   : > { %v4043_v52 = vadd.f32 %v13966_v41, %v4042_v3  ;;  %v4081_v1 = vmax.f32 %v4069_v22, 0.0 }
 0x909   : > { %v16052_v17 = vpack.c.bf16 %v4081_v1, %v4080_v15 }
 0x90c   : > { %v4071_v56 = vpop.f32.mrf.mxu2 }
 0x90d   : > { %v4072_v14 = vadd.f32 %v4071_v56, %v4043_v52 }
 0x90e   : > { %v4044_v19 = vpop.f32.mrf.mxu1 }
 0x90f   : > { %v4045_v45 = vadd.f32 %v13966_v41, %v4044_v19  ;;  %v4082_v58 = vmax.f32 %v4072_v14, 0.0  ;;  %v13302_v41 = vld [vmem:[#allocation36 + $0x40] sm:$0xff] }
 0x910   : > { %v13308_v14 = vld [vmem:[#allocation15 + $0x50] sm:$0xff] }
 0x914   : > { %v4073_v37 = vpop.f32.mrf.mxu2 }
 0x915   : > { %v4074_v12 = vadd.f32 %v4073_v37, %v4045_v45  ;;  %v13307_v37 = vld [vmem:[#allocation15 + $0x48] sm:$0xff] }
 0x917   : > { %v4083_v26 = vmax.f32 %v4074_v12, 0.0  ;;  %v13319_v12 = vld [vmem:[#allocation36 + $0x88] sm:$0xff] }
 0x919   : > { %v16047_v51 = vpack.c.bf16 %v4083_v26, %v4082_v58 }
 0x91b   : > { %4132 = vmatpush.bf16.msrb.mxu3 %v16047_v51  ;;  %4214 = vmatpush.bf16.msrb.mxu0 %v16047_v51 }
 0x91c   : > { %4583 = vmatpush.bf16.msra.mxu1 %v16047_v51 }
 0x91f   : > { %4133 = vmatpush.bf16.msrb.mxu3 %v16052_v17  ;;  %4215 = vmatpush.bf16.msrb.mxu0 %v16052_v17 }
 0x920   : > { %4584 = vmatpush.bf16.msra.mxu1 %v16052_v17 }
 0x923   : > { %4134 = vmatpush.bf16.msrb.mxu3 %v16057_v61  ;;  %4216 = vmatpush.bf16.msrb.mxu0 %v16057_v61 }
 0x924   : > { %4585 = vmatpush.bf16.msra.mxu1 %v16057_v61 }
 0x927   : > { %4135 = vmatpush.bf16.msrb.mxu3 %v16062_v6  ;;  %4217 = vmatpush.bf16.msrb.mxu0 %v16062_v6 }
 0x928   : > { %4586 = vmatpush.bf16.msra.mxu1 %v16062_v6 }
 0x92a   : > { %11128 = vmatmul.msk.bf16.vlgmr.msrb.gmra.mxu3 %vm2184_vm0, %v13286_v60  ;;  %11148 = vmatmul.msk.bf16.vlgmr.msrb.gmra.mxu0 %vm2184_vm0, %v13294_v24  ;;  %v13311_v24 = vld [vmem:[#allocation36 + $0x68] sm:$0xff] }
 0x92b   : > { %4427 = vmatpush.bf16.msra.mxu3 %v16047_v51  ;;  %4505 = vmatpush.bf16.msra.mxu0 %v13309_v46  ;;  %v13316_v46 = vld [vmem:[#allocation15 + $0x70] sm:$0xff] }
 0x92f   : > { %4428 = vmatpush.bf16.msra.mxu3 %v16052_v17  ;;  %4506 = vmatpush.bf16.msra.mxu0 %v13308_v14  ;;  %v13322_v14 = vld [vmem:[#allocation15 + $0x80] sm:$0xff] }
 0x933   : > { %4429 = vmatpush.bf16.msra.mxu3 %v16057_v61  ;;  %4507 = vmatpush.bf16.msra.mxu0 %v13307_v37 }
 0x937   : > { %4430 = vmatpush.bf16.msra.mxu3 %v16062_v6  ;;  %4508 = vmatpush.bf16.msra.mxu0 %v13306_v42  ;;  %v13351_v42 = vld [vmem:[#allocation36 + $0x108] sm:$0xff] }
 0x93a   : > { %11129 = vmatmul.msk.bf16.gmra.mxu3 %vm2184_vm0, %v13287_v32  ;;  %11149 = vmatmul.msk.bf16.gmra.mxu0 %vm2184_vm0, %v13295_v5  ;;  %v13334_v32 = vld [vmem:[#allocation36 + $0xc0] sm:$0xff] }
 0x93b   : > { %4739 = vmatpush.bf16.msrb.mxu3 %v16047_v51 }
 0x93f   : > { %4740 = vmatpush.bf16.msrb.mxu3 %v16052_v17 }
 0x943   : > { %4741 = vmatpush.bf16.msrb.mxu3 %v16057_v61 }
 0x947   : > { %4742 = vmatpush.bf16.msrb.mxu3 %v16062_v6 }
 0x94a   : > { %11130 = vmatmul.msk.bf16.gmra.mxu3 %vm2184_vm0, %v13288_v13  ;;  %11150 = vmatmul.msk.bf16.gmra.mxu0 %vm2184_vm0, %v13296_v21  ;;  %v13312_v21 = vld [vmem:[#allocation36 + $0x70] sm:$0xff] }
 0x95a   : > { %11131 = vmatmul.msk.bf16.gmra.mxu3 %vm2184_vm0, %v13289_v20  ;;  %11151 = vmatmul.msk.bf16.gmra.mxu0 %vm2184_vm0, %v13297_v31  ;;  %v13313_v31 = vld [vmem:[#allocation36 + $0x78] sm:$0xff] }
 0x96a   : > { %11208 = vmatmul.msk.bf16.vlgmr.msra.gmra.mxu3 %vm2184_vm0, %v13302_v41  ;;  %v13336_v41 = vld [vmem:[#allocation36 + $0xd0] sm:$0xff] }
 0x96b   : > { %5051 = vmatpush.bf16.msra.mxu3 %v16047_v51 }
 0x96f   : > { %5052 = vmatpush.bf16.msra.mxu3 %v16052_v17 }
 0x973   : > { %5053 = vmatpush.bf16.msra.mxu3 %v16057_v61 }
 0x977   : > { %5054 = vmatpush.bf16.msra.mxu3 %v16062_v6 }
 0x97a   : > { %11209 = vmatmul.msk.bf16.gmra.mxu3 %vm2184_vm0, %v13303_v38 }
 0x98a   : > { %11210 = vmatmul.msk.bf16.gmra.mxu3 %vm2184_vm0, %v13304_v57 }
 0x99a   : > { %11211 = vmatmul.msk.bf16.gmra.mxu3 %vm2184_vm0, %v13305_v44 }
 0x9a7   : > { %v4219_v59 = vpop.f32.mrf.mxu0 }
 0x9aa   : > { %11288 = vmatmul.msk.bf16.vlgmr.msrb.gmra.mxu3 %vm2184_vm0, %v13318_v10 }
 0x9ab   : > { %5363 = vmatpush.bf16.msrb.mxu3 %v16047_v51 }
 0x9ad   : > { %v4137_v11 = vpop.f32.mrf.mxu3 }
 0x9af   : > { %5364 = vmatpush.bf16.msrb.mxu3 %v16052_v17  ;;  %v4221_v34 = vpop.f32.mrf.mxu0 }
 0x9b0   : > { %v4239_v27 = vpack.c.bf16 %v4221_v34, %v4219_v59  ;;  %v13327_v59 = vld [vmem:[#allocation36 + $0xa8] sm:$0xff] }
 0x9b1   : > { %v13325_v34 = vld [vmem:[#allocation15 + $0x98] sm:$0xff] }
 0x9b2   : > { %11168 = vmatmul.msk.bf16.vlgmr.msrb.gmra.mxu1 %vm2184_vm0, %v4239_v27  ;;  %4817 = vmatpush.bf16.msrb.mxu0 %v13325_v34 }
 0x9b3   : > { %4895 = vmatpush.bf16.msrb.mxu1 %v16047_v51  ;;  %5365 = vmatpush.bf16.msrb.mxu3 %v16057_v61 }
 0x9b5   : > { %v4139_v18 = vpop.f32.mrf.mxu3 }
 0x9b6   : > { %v4157_v28 = vpack.c.bf16 %v4139_v18, %v4137_v11  ;;  %v13350_v18 = vld [vmem:[#allocation36 + $0x100] sm:$0xff] }
 0x9b7   : > { %4896 = vmatpush.bf16.msrb.mxu1 %v16052_v17  ;;  %5366 = vmatpush.bf16.msrb.mxu3 %v16062_v6  ;;  %v4224_v50 = vpop.f32.mrf.mxu0 }
 0x9b8   : > { %11188 = vmatmul.msk.bf16.vlgmr.msra.gmra.mxu2 %vm2184_vm0, %v4157_v28  ;;  %v13324_v28 = vld [vmem:[#allocation15 + $0x90] sm:$0xff] }
 0x9b9   : > { %4818 = vmatpush.bf16.msrb.mxu0 %v13324_v28  ;;  %v13339_v28 = vld [vmem:[#allocation15 + $0xc8] sm:$0xff] }
 0x9ba   : > { %11289 = vmatmul.msk.bf16.gmra.mxu3 %vm2184_vm0, %v13319_v12 }
 0x9bb   : > { %4897 = vmatpush.bf16.msrb.mxu1 %v16057_v61 }
 0x9bd   : > { %v4142_v63 = vpop.f32.mrf.mxu3 }
 0x9bf   : > { %4898 = vmatpush.bf16.msrb.mxu1 %v16062_v6  ;;  %v4226_v40 = vpop.f32.mrf.mxu0 }
 0x9c0   : > { %v4240_v3 = vpack.c.bf16 %v4226_v40, %v4224_v50  ;;  %v13317_v40 = vld [vmem:[#allocation15 + $0x78] sm:$0xff] }
 0x9c1   : > { %4661 = vmatpush.bf16.msrb.mxu2 %v13317_v40  ;;  %v13344_v40 = vld [vmem:[#allocation36 + $0xf0] sm:$0xff] }
 0x9c2   : > { %11169 = vmatmul.msk.bf16.gmra.mxu1 %vm2184_vm0, %v4240_v3  ;;  %v13323_v3 = vld [vmem:[#allocation15 + $0x88] sm:$0xff] }
 0x9c3   : > { %4819 = vmatpush.bf16.msrb.mxu0 %v13323_v3  ;;  %v13332_v3 = vld [vmem:[#allocation15 + $0xb0] sm:$0xff] }
 0x9c5   : > { %v4144_v56 = vpop.f32.mrf.mxu3  ;;  %4662 = vmatpush.bf16.msrb.mxu2 %v13316_v46  ;;  %v13331_v46 = vld [vmem:[#allocation15 + $0xa8] sm:$0xff] }
 0x9c6   : > { %v4158_v19 = vpack.c.bf16 %v4144_v56, %v4142_v63 }
 0x9c7   : > { %v4229_v52 = vpop.f32.mrf.mxu0  ;;  %4820 = vmatpush.bf16.msrb.mxu0 %v13322_v14 }
 0x9c8   : > { %11189 = vmatmul.msk.bf16.gmra.mxu2 %vm2184_vm0, %v4158_v19 }
 0x9ca   : > { %11290 = vmatmul.msk.bf16.gmra.mxu3 %vm2184_vm0, %v13320_v49 }
 0x9cd   : > { %v4147_v45 = vpop.f32.mrf.mxu3 }
 0x9cf   : > { %v4231_v0 = vpop.f32.mrf.mxu0 }
 0x9d0   : > { %v4241_v22 = vpack.c.bf16 %v4231_v0, %v4229_v52  ;;  %v13328_v52 = vld [vmem:[#allocation36 + $0xb0] sm:$0xff] }
 0x9d2   : > { %11170 = vmatmul.msk.bf16.gmra.mxu1 %vm2184_vm0, %v4241_v22  ;;  %v13315_v22 = vld [vmem:[#allocation15 + $0x68] sm:$0xff] }
 0x9d3   : > { %4663 = vmatpush.bf16.msrb.mxu2 %v13315_v22 }
 0x9d5   : > { %v4149_v35 = vpop.f32.mrf.mxu3 }
 0x9d6   : > { %v4159_v58 = vpack.c.bf16 %v4149_v35, %v4147_v45  ;;  %v13314_v35 = vld [vmem:[#allocation15 + $0x60] sm:$0xff] }
 0x9d7   : > { %v4234_v26 = vpop.f32.mrf.mxu0  ;;  %4664 = vmatpush.bf16.msrb.mxu2 %v13314_v35 }
 0x9d8   : > { %11190 = vmatmul.msk.bf16.gmra.mxu2 %vm2184_vm0, %v4159_v58 }
 0x9da   : > { %11291 = vmatmul.msk.bf16.gmra.mxu3 %vm2184_vm0, %v13321_v53 }
 0x9dd   : > { %v4152_v9 = vpop.f32.mrf.mxu3 }
 0x9df   : > { %v4236_v16 = vpop.f32.mrf.mxu0 }
 0x9e0   : > { %v4242_v1 = vpack.c.bf16 %v4236_v16, %v4234_v26 }
 0x9e2   : > { %11171 = vmatmul.msk.bf16.gmra.mxu1 %vm2184_vm0, %v4242_v1  ;;  %v13329_v1 = vld [vmem:[#allocation36 + $0xb8] sm:$0xff] }
 0x9e5   : > { %v4154_v25 = vpop.f32.mrf.mxu3 }
 0x9e6   : > { %v4160_v15 = vpack.c.bf16 %v4154_v25, %v4152_v9 }
 0x9e8   : > { %11191 = vmatmul.msk.bf16.gmra.mxu2 %vm2184_vm0, %v4160_v15 }
 0x9ea   : > { %11368 = vmatmul.msk.bf16.vlgmr.msra.gmra.mxu3 %vm2184_vm0, %v13334_v32 }
 0x9ed   : > { %v4432_v36 = vpop.f32.mrf.mxu3 }
 0x9f2   : > { %11248 = vmatmul.msk.bf16.vlgmr.msra.gmra.mxu1 %vm2184_vm0, %v13310_v23 }
 0x9f3   : > { %5207 = vmatpush.bf16.msra.mxu1 %v16047_v51 }
 0x9f5   : > { %v4434_v48 = vpop.f32.mrf.mxu3 }
 0x9f6   : > { %v4452_v47 = vpack.c.bf16 %v4434_v48, %v4432_v36  ;;  %v13352_v36 = vld [vmem:[#allocation36 + $0x110] sm:$0xff] }
 0x9f7   : > { %5208 = vmatpush.bf16.msra.mxu1 %v16052_v17  ;;  %v13335_v17 = vld [vmem:[#allocation36 + $0xc8] sm:$0xff] }
 0x9f8   : > { %11228 = vmatmul.msk.bf16.vlgmr.msra.gmra.mxu0 %vm2184_vm0, %v4452_v47 }
 0x9fa   : > { %11369 = vmatmul.msk.bf16.gmra.mxu3 %vm2184_vm0, %v13335_v17 }
 0x9fb   : > { %5209 = vmatpush.bf16.msra.mxu1 %v16057_v61 }
 0x9fd   : > { %v4437_v60 = vpop.f32.mrf.mxu3 }
 0x9ff   : > { %5210 = vmatpush.bf16.msra.mxu1 %v16062_v6 }
 0xa02   : > { %11249 = vmatmul.msk.bf16.gmra.mxu1 %vm2184_vm0, %v13311_v24  ;;  %v13342_v24 = vld [vmem:[#allocation36 + $0xe0] sm:$0xff] }
 0xa05   : > { %v4439_v5 = vpop.f32.mrf.mxu3 }
 0xa06   : > { %v4453_v51 = vpack.c.bf16 %v4439_v5, %v4437_v60 }
 0xa08   : > { %11229 = vmatmul.msk.bf16.gmra.mxu0 %vm2184_vm0, %v4453_v51 }
 0xa0a   : > { %11370 = vmatmul.msk.bf16.gmra.mxu3 %vm2184_vm0, %v13336_v41  ;;  %v13343_v41 = vld [vmem:[#allocation36 + $0xe8] sm:$0xff] }
 0xa0d   : > { %v4442_v13 = vpop.f32.mrf.mxu3 }
 0xa12   : > { %11250 = vmatmul.msk.bf16.gmra.mxu1 %vm2184_vm0, %v13312_v21 }
 0xa15   : > { %v4444_v20 = vpop.f32.mrf.mxu3 }
 0xa16   : > { %v4454_v61 = vpack.c.bf16 %v4444_v20, %v4442_v13  ;;  %v13353_v13 = vld [vmem:[#allocation36 + $0x118] sm:$0xff] }
 0xa18   : > { %11230 = vmatmul.msk.bf16.gmra.mxu0 %vm2184_vm0, %v4454_v61 }
 0xa1a   : > { %11371 = vmatmul.msk.bf16.gmra.mxu3 %vm2184_vm0, %v13337_v2 }
 0xa1d   : > { %v4447_v6 = vpop.f32.mrf.mxu3 }
 0xa22   : > { %11251 = vmatmul.msk.bf16.gmra.mxu1 %vm2184_vm0, %v13313_v31 }
 0xa25   : > { %v4449_v38 = vpop.f32.mrf.mxu3 }
 0xa26   : > { %v4455_v57 = vpack.c.bf16 %v4449_v38, %v4447_v6 }
 0xa28   : > { %11231 = vmatmul.msk.bf16.gmra.mxu0 %vm2184_vm0, %v4455_v57 }
 0xa2a   : > { %11448 = vmatmul.msk.bf16.vlgmr.msrb.gmra.mxu3 %vm2184_vm0, %v13350_v18  ;;  %v13333_v18 = vld [vmem:[#allocation15 + $0xb8] sm:$0xff] }
 0xa2b   : > { %4973 = vmatpush.bf16.msra.mxu2 %v13333_v18 }
 0xa2d   : > { %v4744_v63 = vpop.f32.mrf.mxu3 }
 0xa2f   : > { %v4297_v43 = vpop.f32.mrf.mxu1  ;;  %4974 = vmatpush.bf16.msra.mxu2 %v13332_v3 }
 0xa32   : > { %11328 = vmatmul.msk.bf16.vlgmr.msrb.gmra.mxu1 %vm2184_vm0, %v13326_v33 }
 0xa33   : > { %4975 = vmatpush.bf16.msra.mxu2 %v13331_v46 }
 0xa35   : > { %v4746_v37 = vpop.f32.mrf.mxu3 }
 0xa36   : > { %v4764_v0 = vpack.c.bf16 %v4746_v37, %v4744_v63 }
 0xa37   : > { %v16128_v54 = vpop.f32.mrf.mxu1 }
 0xa38   : > { %11308 = vmatmul.msk.bf16.vlgmr.msrb.gmra.mxu0 %vm2184_vm0, %v4764_v0  ;;  %v13330_v0 = vld [vmem:[#allocation15 + $0xa0] sm:$0xff] }
 0xa39   : > { %4976 = vmatpush.bf16.msra.mxu2 %v13330_v0 }
 0xa3a   : > { %11449 = vmatmul.msk.bf16.gmra.mxu3 %vm2184_vm0, %v13351_v42 }
 0xa3b   : > { %v4362_v44 = vpop.f32.mrf.mxu2 }
 0xa3c   : > { %v4363_v10 = vadd.f32 %v4362_v44, %v4297_v43  ;;  %v13341_v43 = vld [vmem:[#allocation15 + $0xd8] sm:$0xff] }
 0xa3d   : > { %v4749_v26 = vpop.f32.mrf.mxu3  ;;  %5129 = vmatpush.bf16.msra.mxu0 %v13341_v43 }
 0xa3f   : > { %v4302_v11 = vpop.f32.mrf.mxu1 }
 0xa42   : > { %11329 = vmatmul.msk.bf16.gmra.mxu1 %vm2184_vm0, %v13327_v59 }
 0xa43   : > { %v16131_v27 = vpop.f32.mrf.mxu2 }
 0xa45   : > { %v4751_v25 = vpop.f32.mrf.mxu3 }
 0xa46   : > { %v4765_v15 = vpack.c.bf16 %v4751_v25, %v4749_v26 }
 0xa47   : > { %v16134_v50 = vpop.f32.mrf.mxu1 }
 0xa48   : > { %11309 = vmatmul.msk.bf16.gmra.mxu0 %vm2184_vm0, %v4765_v15 }
 0xa4a   : > { %11450 = vmatmul.msk.bf16.gmra.mxu3 %vm2184_vm0, %v13352_v36 }
 0xa4b   : > { %v4367_v56 = vpop.f32.mrf.mxu2 }
 0xa4c   : > { %v4368_v19 = vadd.f32 %v4367_v56, %v4302_v11  ;;  %v13338_v56 = vld [vmem:[#allocation15 + $0xc0] sm:$0xff] }
 0xa4d   : > { %v4754_v48 = vpop.f32.mrf.mxu3 }
 0xa4f   : > { %v4307_v45 = vpop.f32.mrf.mxu1 }
 0xa52   : > { %11330 = vmatmul.msk.bf16.gmra.mxu1 %vm2184_vm0, %v13328_v52 }
 0xa53   : > { %v16137_v12 = vpop.f32.mrf.mxu2 }
 0xa55   : > { %v4756_v5 = vpop.f32.mrf.mxu3 }
 0xa56   : > { %v4766_v51 = vpack.c.bf16 %v4756_v5, %v4754_v48 }
 0xa57   : > { %v16141_v58 = vpop.f32.mrf.mxu1 }
 0xa58   : > { %11310 = vmatmul.msk.bf16.gmra.mxu0 %vm2184_vm0, %v4766_v51 }
 0xa5a   : > { %11451 = vmatmul.msk.bf16.gmra.mxu3 %vm2184_vm0, %v13353_v13 }
 0xa5b   : > { %v4372_v9 = vpop.f32.mrf.mxu2 }
 0xa5c   : > { %v16143_v16 = vadd.f32 %v4372_v9, %v4307_v45  ;;  %v13345_v9 = vld [vmem:[#allocation36 + $0xf8] sm:$0xff] }
 0xa5d   : > { %v4759_v6 = vpop.f32.mrf.mxu3 }
 0xa5f   : > { %v4312_v49 = vpop.f32.mrf.mxu1 }
 0xa62   : > { %11331 = vmatmul.msk.bf16.gmra.mxu1 %vm2184_vm0, %v13329_v1 }
 0xa63   : > { %v16146_v23 = vpop.f32.mrf.mxu2 }
 0xa65   : > { %v4761_v57 = vpop.f32.mrf.mxu3 }
 0xa66   : > { %v4767_v33 = vpack.c.bf16 %v4761_v57, %v4759_v6 }
 0xa67   : > { %v16150_v53 = vpop.f32.mrf.mxu1 }
 0xa68   : > { %11311 = vmatmul.msk.bf16.gmra.mxu0 %vm2184_vm0, %v4767_v33 }
 0xa6b   : > { %v4377_v47 = vpop.f32.mrf.mxu2 }
 0xa6c   : > { %v16152_v60 = vadd.f32 %v4377_v47, %v4312_v49 }
 0xa6d   : > { %v5056_v34 = vpop.f32.mrf.mxu3 }
 0xa6f   : > { %v4588_v32 = vpop.f32.mrf.mxu1 }
 0xa72   : > { %11408 = vmatmul.msk.bf16.vlgmr.msra.gmra.mxu1 %vm2184_vm0, %v13342_v24 }
 0xa75   : > { %v4510_v21 = vpop.f32.mrf.mxu0 }
 0xa76   : > { %v16157_v17 = vadd.f32 %v4510_v21, %v4363_v10  ;;  %v13340_v10 = vld [vmem:[#allocation15 + $0xd0] sm:$0xff] }
 0xa77   : > { %v4590_v20 = vpop.f32.mrf.mxu1  ;;  %5130 = vmatpush.bf16.msra.mxu0 %v13340_v10  ;;  %v13355_v10 = vld [vmem:[#allocation15 + $0x108] sm:$0xff] }
 0xa78   : > { %v4608_v61 = vpack.c.bf16 %v4590_v20, %v4588_v32 }
 0xa7a   : > { %11268 = vmatmul.msk.bf16.vlgmr.msrb.gmra.mxu2 %vm2184_vm0, %v4608_v61  ;;  %v13357_v61 = vld [vmem:[#allocation15 + $0x118] sm:$0xff] }
 0xa7b   : > { %5131 = vmatpush.bf16.msra.mxu0 %v13339_v28  ;;  %v13347_v28 = vld [vmem:[#allocation15 + $0xe8] sm:$0xff] }
 0xa7d   : > { %v16160_v31 = vpop.f32.mrf.mxu0 }
 0xa7f   : > { %v4593_v38 = vpop.f32.mrf.mxu1  ;;  %5132 = vmatpush.bf16.msra.mxu0 %v13338_v56  ;;  %v13346_v56 = vld [vmem:[#allocation15 + $0xe0] sm:$0xff] }
 0xa82   : > { %11409 = vmatmul.msk.bf16.gmra.mxu1 %vm2184_vm0, %v13343_v41  ;;  %v13356_v41 = vld [vmem:[#allocation15 + $0x110] sm:$0xff] }
 0xa83   : > { %5441 = vmatpush.bf16.msrb.mxu0 %v13357_v61 }
 0xa85   : > { %v4515_v2 = vpop.f32.mrf.mxu0 }
 0xa86   : > { %v16164_v44 = vadd.f32 %v4515_v2, %v4368_v19  ;;  %v5058_v19 = vpop.f32.mrf.mxu3  ;;  %v13349_v2 = vld [vmem:[#allocation15 + $0xf8] sm:$0xff] }
 0xa87   : > { %v4595_v59 = vpop.f32.mrf.mxu1  ;;  %v5076_v14 = vpack.c.bf16 %v5058_v19, %v5056_v34  ;;  %5442 = vmatpush.bf16.msrb.mxu0 %v13356_v41  ;;  %5285 = vmatpush.bf16.msrb.mxu2 %v13349_v2 }
 0xa88   : > { %v4609_v11 = vpack.c.bf16 %v4595_v59, %v4593_v38  ;;  %v13348_v59 = vld [vmem:[#allocation15 + $0xf0] sm:$0xff] }
 0xa89   : > { %11388 = vmatmul.msk.bf16.vlgmr.msra.gmra.mxu0 %vm2184_vm0, %v5076_v14 }
 0xa8a   : > { %11269 = vmatmul.msk.bf16.gmra.mxu2 %vm2184_vm0, %v4609_v11  ;;  %v13354_v11 = vld [vmem:[#allocation15 + $0x100] sm:$0xff] }
 0xa8b   : > { %5443 = vmatpush.bf16.msrb.mxu0 %v13355_v10  ;;  %5286 = vmatpush.bf16.msrb.mxu2 %v13348_v59 }
 0xa8d   : > { %v16167_v63 = vpop.f32.mrf.mxu0 }
 0xa8e   : > { %v5061_v35 = vpop.f32.mrf.mxu3 }
 0xa8f   : > { %v4598_v52 = vpop.f32.mrf.mxu1  ;;  %5444 = vmatpush.bf16.msrb.mxu0 %v13354_v11  ;;  %5287 = vmatpush.bf16.msrb.mxu2 %v13347_v28 }
 0xa92   : > { %11410 = vmatmul.msk.bf16.gmra.mxu1 %vm2184_vm0, %v13344_v40 }
 0xa93   : > { %5288 = vmatpush.bf16.msrb.mxu2 %v13346_v56 }
 0xa95   : > { %v4520_v45 = vpop.f32.mrf.mxu0 }
 0xa96   : > { %v16172_v37 = vadd.f32 %v4520_v45, %v16143_v16  ;;  %v5063_v49 = vpop.f32.mrf.mxu3 }
 0xa97   : > { %v4600_v22 = vpop.f32.mrf.mxu1  ;;  %v5077_v25 = vpack.c.bf16 %v5063_v49, %v5061_v35 }
 0xa98   : > { %v4610_v42 = vpack.c.bf16 %v4600_v22, %v4598_v52 }
 0xa99   : > { %11389 = vmatmul.msk.bf16.gmra.mxu0 %vm2184_vm0, %v5077_v25 }
 0xa9a   : > { %11270 = vmatmul.msk.bf16.gmra.mxu2 %vm2184_vm0, %v4610_v42 }
 0xa9d   : > { %v16175_v26 = vpop.f32.mrf.mxu0 }
 0xa9e   : > { %v5066_v47 = vpop.f32.mrf.mxu3 }
 0xa9f   : > { %v4603_v1 = vpop.f32.mrf.mxu1 }
 0xaa2   : > { %11411 = vmatmul.msk.bf16.gmra.mxu1 %vm2184_vm0, %v13345_v9 }
 0xaa5   : > { %v4525_v15 = vpop.f32.mrf.mxu0 }
 0xaa6   : > { %v16180_v16 = vadd.f32 %v4525_v15, %v16152_v60  ;;  %v5068_v32 = vpop.f32.mrf.mxu3 }
 0xaa7   : > { %v4605_v36 = vpop.f32.mrf.mxu1  ;;  %v5078_v5 = vpack.c.bf16 %v5068_v32, %v5066_v47 }
 0xaa8   : > { %v4611_v48 = vpack.c.bf16 %v4605_v36, %v4603_v1 }
 0xaa9   : > { %11390 = vmatmul.msk.bf16.gmra.mxu0 %vm2184_vm0, %v5078_v5 }
 0xaaa   : > { %11271 = vmatmul.msk.bf16.gmra.mxu2 %vm2184_vm0, %v4611_v48  ;;  %v16198_v48 = vpop.f32.mrf.mxu2 }
 0xaad   : > { %v16186_v43 = vpop.f32.mrf.mxu0 }
 0xaae   : > { %v5071_v21 = vpop.f32.mrf.mxu3 }
 0xaaf   : > { %v4900_v24 = vpop.f32.mrf.mxu1 }
 0xab5   : > { %v4822_v40 = vpop.f32.mrf.mxu0 }
 0xab6   : > { %v5073_v6 = vpop.f32.mrf.mxu3 }
 0xab7   : > { %v4902_v51 = vpop.f32.mrf.mxu1  ;;  %v5079_v60 = vpack.c.bf16 %v5073_v6, %v5071_v21 }
 0xab8   : > { %v4920_v13 = vpack.c.bf16 %v4902_v51, %v4900_v24 }
 0xab9   : > { %11391 = vmatmul.msk.bf16.gmra.mxu0 %vm2184_vm0, %v5079_v60 }
 0xaba   : > { %11348 = vmatmul.msk.bf16.vlgmr.msra.gmra.mxu2 %vm2184_vm0, %v4920_v13 }
 0xabd   : > { %v16191_v14 = vpop.f32.mrf.mxu0 }
 0xabe   : > { %v5368_v33 = vpop.f32.mrf.mxu3 }
 0xabf   : > { %v4905_v20 = vpop.f32.mrf.mxu1 }
 0xac5   : > { %v4827_v42 = vpop.f32.mrf.mxu0 }
 0xac6   : > { %v5370_v18 = vpop.f32.mrf.mxu3 }
 0xac7   : > { %v4907_v38 = vpop.f32.mrf.mxu1  ;;  %v5388_v3 = vpack.c.bf16 %v5370_v18, %v5368_v33 }
 0xac8   : > { %v4921_v57 = vpack.c.bf16 %v4907_v38, %v4905_v20 }
 0xac9   : > { %11468 = vmatmul.msk.bf16.vlgmr.msrb.gmra.mxu0 %vm2184_vm0, %v5388_v3 }
 0xaca   : > { %11349 = vmatmul.msk.bf16.gmra.mxu2 %vm2184_vm0, %v4921_v57 }
 0xacd   : > { %v16195_v25 = vpop.f32.mrf.mxu0 }
 0xace   : > { %v5373_v46 = vpop.f32.mrf.mxu3 }
 0xacf   : > { %v4910_v34 = vpop.f32.mrf.mxu1 }
 0xad5   : > { %v4832_v5 = vpop.f32.mrf.mxu0 }
 0xad6   : > { %v5375_v0 = vpop.f32.mrf.mxu3 }
 0xad7   : > { %v4912_v52 = vpop.f32.mrf.mxu1  ;;  %v5389_v22 = vpack.c.bf16 %v5375_v0, %v5373_v46 }
 0xad8   : > { %v4922_v19 = vpack.c.bf16 %v4912_v52, %v4910_v34 }
 0xad9   : > { %11469 = vmatmul.msk.bf16.gmra.mxu0 %vm2184_vm0, %v5389_v22 }
 0xada   : > { %11350 = vmatmul.msk.bf16.gmra.mxu2 %vm2184_vm0, %v4922_v19 }
 0xadd   : > { %v16202_v60 = vpop.f32.mrf.mxu0 }
 0xade   : > { %v5378_v1 = vpop.f32.mrf.mxu3 }
 0xadf   : > { %v4915_v45 = vpop.f32.mrf.mxu1 }
 0xae5   : > { %v4837_v2 = vpop.f32.mrf.mxu0 }
 0xae6   : > { %v5380_v15 = vpop.f32.mrf.mxu3 }
 0xae7   : > { %v4917_v35 = vpop.f32.mrf.mxu1  ;;  %v5390_v36 = vpack.c.bf16 %v5380_v15, %v5378_v1 }
 0xae8   : > { %v4923_v9 = vpack.c.bf16 %v4917_v35, %v4915_v45 }
 0xae9   : > { %11470 = vmatmul.msk.bf16.gmra.mxu0 %vm2184_vm0, %v5390_v36 }
 0xaea   : > { %11351 = vmatmul.msk.bf16.gmra.mxu2 %vm2184_vm0, %v4923_v9 }
 0xaed   : > { %v16211_v18 = vpop.f32.mrf.mxu0 }
 0xaee   : > { %v5383_v32 = vpop.f32.mrf.mxu3 }
 0xaef   : > { %v5212_v49 = vpop.f32.mrf.mxu1 }
 0xaf6   : > { %v5385_v20 = vpop.f32.mrf.mxu3 }
 0xaf7   : > { %v5214_v47 = vpop.f32.mrf.mxu1  ;;  %v5391_v6 = vpack.c.bf16 %v5385_v20, %v5383_v32 }
 0xaf8   : > { %v5232_v24 = vpack.c.bf16 %v5214_v47, %v5212_v49 }
 0xaf9   : > { %11471 = vmatmul.msk.bf16.gmra.mxu0 %vm2184_vm0, %v5391_v6 }
 0xafa   : > { %11428 = vmatmul.msk.bf16.vlgmr.msrb.gmra.mxu2 %vm2184_vm0, %v5232_v24 }
 0xafd   : > { %v4666_v51 = vpop.f32.mrf.mxu2 }
 0xafe   : > { %v4686_v13 = vadd.f32 %v4666_v51, %v16157_v17 }
 0xaff   : > { %v5217_v21 = vpop.f32.mrf.mxu1 }
 0xb00   : > { %v4842_v61 = vadd.f32 %v4822_v40, %v4686_v13 }
 0xb05   : > { %v16205_v41 = vpop.f32.mrf.mxu2 }
 0xb06   : > { %v5134_v19 = vpop.f32.mrf.mxu0 }
 0xb07   : > { %v5219_v38 = vpop.f32.mrf.mxu1 }
 0xb08   : > { %v5233_v57 = vpack.c.bf16 %v5219_v38, %v5217_v21  ;;  %v11498_v38 = vld [vmem:[#allocation18 + $0x30] sm:$0xf] }
 0xb0a   : > { %11429 = vmatmul.msk.bf16.gmra.mxu2 %vm2184_vm0, %v5233_v57  ;;  %v13365_v57 = vld [vmem:[#allocation18 + $0x34] sm:$0xf0] }
 0xb0d   : > { %v4671_v33 = vpop.f32.mrf.mxu2 }
 0xb0e   : > { %v4688_v10 = vadd.f32 %v4671_v33, %v16164_v44  ;;  %v16218_v0 = vpop.f32.mrf.mxu0  ;;  %v13364_v33 = vld [vmem:[#allocation18 + $0x34] sm:$0xf] }
 0xb0f   : > { %v5222_v59 = vpop.f32.mrf.mxu1 }
 0xb10   : > { %v4844_v17 = vadd.f32 %v4827_v42, %v4688_v10 }
 0xb15   : > { %v16209_v11 = vpop.f32.mrf.mxu2 }
 0xb16   : > { %v5139_v1 = vpop.f32.mrf.mxu0 }
 0xb17   : > { %v5224_v34 = vpop.f32.mrf.mxu1 }
 0xb18   : > { %v5234_v28 = vpack.c.bf16 %v5224_v34, %v5222_v59  ;;  %v13363_v34 = vld [vmem:[#allocation18 + $0x24] sm:$0xf0] }
 0xb1a   : > { %11430 = vmatmul.msk.bf16.gmra.mxu2 %vm2184_vm0, %v5234_v28  ;;  %v13362_v28 = vld [vmem:[#allocation18 + $0x24] sm:$0xf] }
 0xb1d   : > { %v4676_v40 = vpop.f32.mrf.mxu2 }
 0xb1e   : > { %v4690_v3 = vadd.f32 %v4676_v40, %v16172_v37  ;;  %v16223_v15 = vpop.f32.mrf.mxu0 }
 0xb1f   : > { %v5227_v56 = vpop.f32.mrf.mxu1 }
 0xb20   : > { %v4846_v52 = vadd.f32 %v4832_v5, %v4690_v3  ;;  %v11492_v3 = vld [vmem:[#allocation18 + $0x28] sm:$0xf0] }
 0xb25   : > { %v16215_v46 = vpop.f32.mrf.mxu2 }
 0xb26   : > { %v5144_v24 = vpop.f32.mrf.mxu0 }
 0xb27   : > { %v5229_v45 = vpop.f32.mrf.mxu1 }
 0xb28   : > { %v5235_v44 = vpack.c.bf16 %v5229_v45, %v5227_v56  ;;  %v11482_v45 = vld [vmem:[#allocation18 + $0x10] sm:$0xf] }
 0xb2a   : > { %11431 = vmatmul.msk.bf16.gmra.mxu2 %vm2184_vm0, %v5235_v44  ;;  %v13361_v44 = vld [vmem:[#allocation18 + $0x14] sm:$0xf0] }
 0xb2d   : > { %v4681_v22 = vpop.f32.mrf.mxu2 }
 0xb2e   : > { %v4692_v42 = vadd.f32 %v4681_v22, %v16180_v16  ;;  %v16227_v13 = vpop.f32.mrf.mxu0  ;;  %v13360_v22 = vld [vmem:[#allocation18 + $0x14] sm:$0xf] }
 0xb30   : > { %v4848_v35 = vadd.f32 %v4837_v2, %v4692_v42  ;;  %v11500_v2 = vld [vmem:[#allocation18 + $0x38] sm:$0xf0]  ;;  %v11483_v42 = vor.u32 %v13361_v44, %v11482_v45 }
 0xb31   : > { %v11503_v59 = vor.u32 %v13364_v33, %v11500_v2  ;;  %v16246_v44 = vld [vmem:[#allocation16] ss:$0 sm:$0xff] }
 0xb33   : > { %5597 = vmatpush.bf16.msra.mxu2 %v11503_v59  ;;  %v4365_v59 = vadd.f32 %v16131_v27, %v16128_v54  ;;  %v4370_v54 = vadd.f32 %v16137_v12, %v16134_v50 }
 0xb35   : > { %v16221_v9 = vpop.f32.mrf.mxu2 }
 0xb36   : > { %v5149_v20 = vpop.f32.mrf.mxu0 }
 0xb3d   : > { %v4978_v49 = vpop.f32.mrf.mxu2 }
 0xb3e   : > { %v4998_v37 = vadd.f32 %v4978_v49, %v4842_v61  ;;  %v11499_v61 = vor.u32 %v13365_v57, %v11498_v38 }
 0xb40   : > { %v5154_v36 = vadd.f32 %v5134_v19, %v4998_v37  ;;  %5568 = vmatpush.bf16.msrb.mxu1 %v11499_v61  ;;  %v11495_v19 = vor.u32 %v13362_v28, %v11492_v3  ;;  %v11474_v37 = vld [vmem:[#allocation18] sm:$0xf] }
 0xb42   : > { %5598 = vmatpush.bf16.msra.mxu2 %v11495_v19 }
 0xb45   : > { %v4980_v47 = vpop.f32.mrf.mxu2 }
 0xb4d   : > { %v4983_v32 = vpop.f32.mrf.mxu2 }
 0xb4e   : > { %v5000_v5 = vadd.f32 %v4983_v32, %v4844_v17  ;;  %v11490_v17 = vld [vmem:[#allocation18 + $0x20] sm:$0xf]  ;;  %v13358_v32 = vld [vmem:[#allocation18 + $0x4] sm:$0xf] }
 0xb4f   : > { %v11491_v40 = vor.u32 %v13363_v34, %v11490_v17  ;;  %v4531_v17 = vadd.f32 %v16160_v31, %v4365_v59  ;;  %v4533_v31 = vadd.f32 %v16167_v63, %v4370_v54 }
 0xb50   : > { %v16225_v51 = vadd.f32 %v5139_v1, %v5000_v5  ;;  %v11484_v1 = vld [vmem:[#allocation18 + $0x18] sm:$0xf0] }
 0xb51   : > { %5569 = vmatpush.bf16.msrb.mxu1 %v11491_v40  ;;  %v11487_v49 = vor.u32 %v13360_v22, %v11484_v1  ;;  %v4687_v34 = vadd.f32 %v16205_v41, %v4531_v17 }
 0xb53   : > { %5599 = vmatpush.bf16.msra.mxu2 %v11487_v49  ;;  %v4843_v3 = vadd.f32 %v16191_v14, %v4687_v34  ;;  %v4689_v14 = vadd.f32 %v16209_v11, %v4533_v31 }
 0xb55   : > { %v16229_v21 = vpop.f32.mrf.mxu2  ;;  %5570 = vmatpush.bf16.msrb.mxu1 %v11483_v42  ;;  %v4999_v19 = vadd.f32 %v4980_v47, %v4843_v3 }
 0xb5d   : > { %v4988_v16 = vpop.f32.mrf.mxu2 }
 0xb5e   : > { %v5002_v6 = vadd.f32 %v4988_v16, %v4846_v52  ;;  %v16235_v52 = vpop.f32.mrf.mxu0  ;;  %v11476_v16 = vld [vmem:[#allocation18 + $0x8] sm:$0xf0] }
 0xb5f   : > { %v11479_v38 = vor.u32 %v13358_v32, %v11476_v16  ;;  %v4375_v16 = vadd.f32 %v16146_v23, %v16141_v58 }
 0xb60   : > { %v16231_v10 = vadd.f32 %v5144_v24, %v5002_v6  ;;  %v13359_v24 = vld [vmem:[#allocation18 + $0x4] sm:$0xf0] }
 0xb61   : > { %v11475_v5 = vor.u32 %v13359_v24, %v11474_v37  ;;  %5600 = vmatpush.bf16.msra.mxu2 %v11479_v38 }
 0xb63   : > { %5571 = vmatpush.bf16.msrb.mxu1 %v11475_v5 }
 0xb65   : > { %v16233_v56 = vpop.f32.mrf.mxu2 }
 0xb66   : > { %v5446_v61 = vpop.f32.mrf.mxu0 }
 0xb6d   : > { %v4993_v6 = vpop.f32.mrf.mxu2 }
 0xb6e   : > { %v5004_v57 = vadd.f32 %v4993_v6, %v4848_v35  ;;  %v5448_v28 = vpop.f32.mrf.mxu0 }
 0xb70   : > { %v16237_v33 = vadd.f32 %v5149_v20, %v5004_v57  ;;  %v5155_v20 = vadd.f32 %v16218_v0, %v4999_v19  ;;  %v4845_v0 = vadd.f32 %v16195_v25, %v4689_v14  ;;  %v4535_v25 = vadd.f32 %v16175_v26, %v4375_v16  ;;  %v13373_v26 = vld [vmem:[%s16978_s7 + $0x38] sm:$0xff]  ;;  %v13376_v16 = vld [vmem:[%s16978_s7 + $0x50] sm:$0xff] }
 0xb71   : > { %5850 = vmatpush.bf16.msra.mxu3 %v13373_v26 }
 0xb72   : > { %v5001_v5 = vadd.f32 %v16229_v21, %v4845_v0  ;;  %v4691_v57 = vadd.f32 %v16215_v46, %v4535_v25  ;;  %v13375_v25 = vld [vmem:[%s16978_s7 + $0x48] sm:$0xff] }
 0xb74   : > { %v5157_v63 = vadd.f32 %v16223_v15, %v5001_v5  ;;  %v4847_v34 = vadd.f32 %v16202_v60, %v4691_v57  ;;  %v4380_v60 = vadd.f32 %v16198_v48, %v16150_v53  ;;  %v13379_v5 = vld [vmem:[%s16978_s7 + $0x68] sm:$0xff] }
 0xb75   : > { %v16239_v2 = vpop.f32.mrf.mxu2  ;;  %v5506_v57 = vld [vmem:[#allocation19] sm:$0x3] }
 0xb76   : > { %v5451_v22 = vpop.f32.mrf.mxu0  ;;  %v5003_v58 = vadd.f32 %v16233_v56, %v4847_v34  ;;  %v4537_v56 = vadd.f32 %v16186_v43, %v4380_v60 }
 0xb78   : > { %v5159_v19 = vadd.f32 %v16227_v13, %v5003_v58 }
 0xb7d   : > { %v5290_v40 = vpop.f32.mrf.mxu2 }
 0xb7e   : > { %v5310_v35 = vadd.f32 %v5290_v40, %v5154_v36  ;;  %v5453_v32 = vpop.f32.mrf.mxu0  ;;  %v13381_v40 = vld [vmem:[%s16978_s7 + $0x78] sm:$0xff] }
 0xb7f   : > { %5879 = vmatpush.bf16.msra.mxu0 %v13381_v40 }
 0xb80   : > { %v5466_v45 = vadd.f32 %v5446_v61, %v5310_v35 }
 0xb82   : > { %v5478_v41 = vadd.f32 %v16246_v44, %v5466_v45 }
 0xb84   : > { %v5486_v47 = vmax.f32 %v5478_v41, 0.0 }
 0xb85   : > { %v5292_v42 = vpop.f32.mrf.mxu2 }
 0xb86   : > { %v5311_v27 = vadd.f32 %v5292_v42, %v5155_v20 }
 0xb88   : > { %v5467_v1 = vadd.f32 %v5448_v28, %v5311_v27 }
 0xb8a   : > { %v5479_v36 = vadd.f32 %v16246_v44, %v5467_v1 }
 0xb8c   : > { %v5487_v49 = vmax.f32 %v5479_v36, 0.0 }
 0xb8d   : > { %v5295_v37 = vpop.f32.mrf.mxu2 }
 0xb8e   : > { %v5494_v24 = vpack.c.bf16 %v5487_v49, %v5486_v47  ;;  %v5312_v50 = vadd.f32 %v5295_v37, %v16225_v51  ;;  %v5456_v51 = vpop.f32.mrf.mxu0 }
 0xb90   : > { %11504 = vmatmul.msk.bf16.vlgmr.msrb.gmra.mxu1 %vm2184_vm0, %v5494_v24  ;;  %11508 = vmatmul.msk.bf16.vlgmr.msra.gmra.mxu2 %vm2184_vm0, %v5494_v24  ;;  %v5468_v12 = vadd.f32 %v5451_v22, %v5312_v50  ;;  %v4693_v22 = vadd.f32 %v16221_v9, %v4537_v56  ;;  %v13380_v24 = vld [vmem:[%s16978_s7 + $0x70] sm:$0xff]  ;;  %v13378_v50 = vld [vmem:[%s16978_s7 + $0x60] sm:$0xff] }
 0xb91   : > { %5880 = vmatpush.bf16.msra.mxu0 %v13380_v24  ;;  %v3837_v24 = vunpack.c.h.bf16 %v16004_v4 }
 0xb92   : > { %v5480_v21 = vadd.f32 %v16246_v44, %v5468_v12  ;;  %v4849_v13 = vadd.f32 %v16211_v18, %v4693_v22  ;;  %v13369_v12 = vld [vmem:[%s16978_s7 + $0x18] sm:$0xff] }
 0xb94   : > { %v5488_v59 = vmax.f32 %v5480_v21, 0.0  ;;  %v5005_v14 = vadd.f32 %v16239_v2, %v4849_v13  ;;  %v13366_v21 = vld [vmem:[%s16978_s7] sm:$0xff] }
 0xb95   : > { %v5297_v11 = vpop.f32.mrf.mxu2  ;;  %5881 = vmatpush.bf16.msra.mxu0 %v13379_v5 }
 0xb96   : > { %v5313_v6 = vadd.f32 %v5297_v11, %v5157_v63  ;;  %v5458_v46 = vpop.f32.mrf.mxu0  ;;  %v5161_v48 = vadd.f32 %v16235_v52, %v5005_v14  ;;  %v13372_v52 = vld [vmem:[%s16978_s7 + $0x30] sm:$0xff]  ;;  %v13377_v63 = vld [vmem:[%s16978_s7 + $0x58] sm:$0xff] }
 0xb97   : > { %5851 = vmatpush.bf16.msra.mxu3 %v13372_v52  ;;  %v13368_v11 = vld [vmem:[%s16978_s7 + $0x10] sm:$0xff] }
 0xb98   : > { %v5469_v38 = vadd.f32 %v5453_v32, %v5313_v6  ;;  %v13371_v32 = vld [vmem:[%s16978_s7 + $0x28] sm:$0xff] }
 0xb99   : > { %5882 = vmatpush.bf16.msra.mxu0 %v13378_v50  ;;  %v13367_v6 = vld [vmem:[%s16978_s7 + $0x8] sm:$0xff] }
 0xb9a   : > { %v5481_v61 = vadd.f32 %v16246_v44, %v5469_v38  ;;  %v13374_v38 = vld [vmem:[%s16978_s7 + $0x40] sm:$0xff] }
 0xb9b   : > { %5852 = vmatpush.bf16.msra.mxu3 %v13371_v32 }
 0xb9c   : > { %v5489_v17 = vmax.f32 %v5481_v61, 0.0  ;;  %v16305_v61 = vperm.slane %v5506_v57, 1 }
 0xb9d   : > { %v5300_v15 = vpop.f32.mrf.mxu2  ;;  %5883 = vmatpush.bf16.msra.mxu0 %v13377_v63 }
 0xb9e   : > { %v5495_v28 = vpack.c.bf16 %v5489_v17, %v5488_v59  ;;  %v5314_v23 = vadd.f32 %v5300_v15, %v16231_v10  ;;  %v5461_v31 = vpop.f32.mrf.mxu0  ;;  %v16307_v59 = vperm.slane %v5506_v57, 0  ;;  %v3839_v57 = vunpack.c.h.bf16 %v16016_v39 }
 0xba0   : > { %11505 = vmatmul.msk.bf16.gmra.mxu1 %vm2184_vm0, %v5495_v28  ;;  %11509 = vmatmul.msk.bf16.gmra.mxu2 %vm2184_vm0, %v5495_v28  ;;  %v5470_v3 = vadd.f32 %v5456_v51, %v5314_v23  ;;  %v3831_v28 = vunpack.c.h.bf16 %v15976_v8  ;;  %v3830_v23 = vunpack.c.l.bf16 %v15976_v8 }
 0xba1   : > { %5884 = vmatpush.bf16.msra.mxu0 %v13376_v16 }
 0xba2   : > { %v5482_v10 = vadd.f32 %v16246_v44, %v5470_v3  ;;  %v3832_v3 = vunpack.c.l.bf16 %v15984_v29 }
 0xba4   : > { %v5490_v54 = vmax.f32 %v5482_v10, 0.0 }
 0xba5   : > { %v5302_v35 = vpop.f32.mrf.mxu2  ;;  %5885 = vmatpush.bf16.msra.mxu0 %v13375_v25 }
 0xba6   : > { %v5315_v45 = vadd.f32 %v5302_v35, %v5159_v19  ;;  %v5463_v47 = vpop.f32.mrf.mxu0 }
 0xba8   : > { %v5471_v20 = vadd.f32 %v5458_v46, %v5315_v45  ;;  %v3833_v45 = vunpack.c.h.bf16 %v15984_v29 }
 0xba9   : > { %5886 = vmatpush.bf16.msra.mxu0 %v13374_v38 }
 0xbaa   : > { %v5483_v42 = vadd.f32 %v16246_v44, %v5471_v20 }
 0xbac   : > { %v5491_v27 = vmax.f32 %v5483_v42, 0.0 }
 0xbad   : > { %v5305_v41 = vpop.f32.mrf.mxu2 }
 0xbae   : > { %v5496_v1 = vpack.c.bf16 %v5491_v27, %v5490_v54  ;;  %v5316_v53 = vadd.f32 %v5305_v41, %v16237_v33 }
 0xbb0   : > { %11506 = vmatmul.msk.bf16.gmra.mxu1 %vm2184_vm0, %v5496_v1  ;;  %11510 = vmatmul.msk.bf16.gmra.mxu2 %vm2184_vm0, %v5496_v1  ;;  %v5472_v43 = vadd.f32 %v5461_v31, %v5316_v53 }
 0xbb2   : > { %v5484_v18 = vadd.f32 %v16246_v44, %v5472_v43  ;;  %v3835_v43 = vunpack.c.h.bf16 %v15996_v55 }
 0xbb4   : > { %v5492_v49 = vmax.f32 %v5484_v18, 0.0 }
 0xbb5   : > { %v5307_v9 = vpop.f32.mrf.mxu2 }
 0xbb6   : > { %v5317_v36 = vadd.f32 %v5307_v9, %v5161_v48 }
 0xbb8   : > { %v5473_v2 = vadd.f32 %v5463_v47, %v5317_v36  ;;  %v3834_v47 = vunpack.c.l.bf16 %v15996_v55 }
 0xbba   : > { %v5485_v33 = vadd.f32 %v16246_v44, %v5473_v2  ;;  %v13370_v44 = vld [vmem:[%s16978_s7 + $0x20] sm:$0xff] }
 0xbbb   : > { %5853 = vmatpush.bf16.msra.mxu3 %v13370_v44 }
 0xbbc   : > { %v5493_v37 = vmax.f32 %v5485_v33, 0.0 }
 0xbbe   : > { %v5497_v0 = vpack.c.bf16 %v5493_v37, %v5492_v49  ;;  %v3836_v49 = vunpack.c.l.bf16 %v16004_v4 }
 0xbbf   : > { %5854 = vmatpush.bf16.msra.mxu3 %v13369_v12 }
 0xbc0   : > { %11507 = vmatmul.msk.bf16.gmra.mxu1 %vm2184_vm0, %v5497_v0  ;;  %11511 = vmatmul.msk.bf16.gmra.mxu2 %vm2184_vm0, %v5497_v0 }
 0xbc3   : > { %5855 = vmatpush.bf16.msra.mxu3 %v13368_v11 }
 0xbc7   : > { %5856 = vmatpush.bf16.msra.mxu3 %v13367_v6 }
 0xbcb   : > { %5857 = vmatpush.bf16.msra.mxu3 %v13366_v21 }
 0xc0d   : > { %v5573_v51 = vpop.f32.mrf.mxu1 }
 0xc0e   : > { %v5574_v34 = vadd.f32 %v5573_v51, %v16307_v59 }
 0xc10   : > { %v5622_v46 = vadd.f32 %v5574_v34, %v3830_v23 }
 0xc12   : > { %v5638_v10 = vmax.f32 %v5622_v46, 0.0 }
 0xc13   : > { %v5602_v17 = vpop.f32.mrf.mxu2 }
 0xc14   : > { %v5603_v15 = vadd.f32 %v5602_v17, %v16305_v61 }
 0xc15   : > { %v5575_v58 = vpop.f32.mrf.mxu1 }
 0xc16   : > { %v5623_v26 = vadd.f32 %v5603_v15, %v3831_v28  ;;  %v5576_v40 = vadd.f32 %v5575_v58, %v16307_v59  ;;  %v3838_v28 = vunpack.c.l.bf16 %v16016_v39 }
 0xc18   : > { %v5639_v19 = vmax.f32 %v5623_v26, 0.0  ;;  %v5624_v60 = vadd.f32 %v5576_v40, %v3832_v3  ;;  %v3840_v40 = vunpack.c.l.bf16 %v16024_v7 }
 0xc1a   : > { %v16317_v42 = vpack.c.bf16 %v5639_v19, %v5638_v10  ;;  %v5640_v54 = vmax.f32 %v5624_v60, 0.0 }
 0xc1b   : > { %v5604_v35 = vpop.f32.mrf.mxu2 }
 0xc1c   : > { %v5605_v56 = vadd.f32 %v5604_v35, %v16305_v61  ;;  %v5722_v31 = vunpack.c.l.b16 %v16317_v42  ;;  %v5723_v13 = vunpack.c.h.b16 %v16317_v42  ;;  %v3841_v35 = vunpack.c.h.bf16 %v16024_v7 }
 0xc1d   : > { %v5578_v20 = vpop.f32.mrf.mxu1 }
 0xc1e   : > { %v5625_v22 = vadd.f32 %v5605_v56, %v3833_v45  ;;  %v5579_v53 = vadd.f32 %v5578_v20, %v16307_v59 }
 0xc20   : > { %v5641_v8 = vmax.f32 %v5625_v22, 0.0  ;;  %v5626_v33 = vadd.f32 %v5579_v53, %v3834_v47  ;;  %v3843_v53 = vunpack.c.h.bf16 %v16036_v30 }
 0xc22   : > { %v16319_v27 = vpack.c.bf16 %v5641_v8, %v5640_v54  ;;  %v5642_v5 = vmax.f32 %v5626_v33, 0.0 }
 0xc23   : > { %v5607_v41 = vpop.f32.mrf.mxu2 }
 0xc24   : > { %v5608_v1 = vadd.f32 %v5607_v41, %v16305_v61  ;;  %v5724_v29 = vunpack.c.l.b16 %v16319_v27  ;;  %v5725_v14 = vunpack.c.h.b16 %v16319_v27 }
 0xc25   : > { %v5580_v48 = vpop.f32.mrf.mxu1 }
 0xc26   : > { %v5738_v9 = vpack.c.b16 %v5724_v29, %v5722_v31  ;;  %v5739_v36 = vpack.c.b16 %v5725_v14, %v5723_v13  ;;  %v5627_v18 = vadd.f32 %v5608_v1, %v3835_v43  ;;  %v5581_v2 = vadd.f32 %v5580_v48, %v16307_v59 }
 0xc28   : > { %5858 = vmatmul.bf16.vlgmr.msra.gmra.mxu3 %v5738_v9  ;;  %5887 = vmatmul.bf16.vlgmr.msra.gmra.mxu0 %v5739_v36  ;;  %v5643_v37 = vmax.f32 %v5627_v18, 0.0  ;;  %v5628_v52 = vadd.f32 %v5581_v2, %v3836_v49  ;;  %v3842_v9 = vunpack.c.l.bf16 %v16036_v30  ;;  %v3844_v2 = vunpack.c.l.bf16 %v16041_v62 }
 0xc2a   : > { %v16333_v12 = vpack.c.bf16 %v5643_v37, %v5642_v5  ;;  %v5644_v55 = vmax.f32 %v5628_v52, 0.0 }
 0xc2b   : > { %v5609_v0 = vpop.f32.mrf.mxu2 }
 0xc2c   : > { %v5610_v32 = vadd.f32 %v5609_v0, %v16305_v61  ;;  %v5726_v6 = vunpack.c.l.b16 %v16333_v12  ;;  %v5727_v4 = vunpack.c.h.b16 %v16333_v12  ;;  %v3845_v0 = vunpack.c.h.bf16 %v16041_v62 }
 0xc2d   : > { %v5583_v44 = vpop.f32.mrf.mxu1 }
 0xc2e   : > { %v5629_v50 = vadd.f32 %v5610_v32, %v3837_v24  ;;  %v5584_v51 = vadd.f32 %v5583_v44, %v16307_v59 }
 0xc30   : > { %v5645_v63 = vmax.f32 %v5629_v50, 0.0  ;;  %v5630_v26 = vadd.f32 %v5584_v51, %v3838_v28  ;;  %v13389_v28 = vld [vmem:[#allocation22 + $0x38] sm:$0xff] }
 0xc31   : > { %6043 = vmatpush.bf16.msrb.mxu3 %v13389_v28  ;;  %v13983_v28 = vld [vmem:[#allocation36 + $0x80] sm:$0xff] }
 0xc32   : > { %v16335_v11 = vpack.c.bf16 %v5645_v63, %v5644_v55  ;;  %v5646_v45 = vmax.f32 %v5630_v26, 0.0  ;;  %v13387_v26 = vld [vmem:[#allocation22 + $0x28] sm:$0xff] }
 0xc33   : > { %v5612_v16 = vpop.f32.mrf.mxu2 }
 0xc34   : > { %v5613_v25 = vadd.f32 %v5612_v16, %v16305_v61  ;;  %v5728_v21 = vunpack.c.l.b16 %v16335_v11  ;;  %v5729_v38 = vunpack.c.h.b16 %v16335_v11 }
 0xc35   : > { %v5585_v17 = vpop.f32.mrf.mxu1 }
 0xc36   : > { %v5740_v15 = vpack.c.b16 %v5728_v21, %v5726_v6  ;;  %v5741_v34 = vpack.c.b16 %v5729_v38, %v5727_v4  ;;  %v5631_v58 = vadd.f32 %v5613_v25, %v3839_v57  ;;  %v5586_v23 = vadd.f32 %v5585_v17, %v16307_v59  ;;  %v13968_v25 = vld [vmem:[#allocation21] ss:$0 sm:$0xff] }
 0xc38   : > { %5863 = vmatmul.bf16.gmra.mxu3 %v5740_v15  ;;  %5892 = vmatmul.bf16.gmra.mxu0 %v5741_v34  ;;  %v5647_v46 = vmax.f32 %v5631_v58, 0.0  ;;  %v5632_v19 = vadd.f32 %v5586_v23, %v3840_v40  ;;  %v13388_v58 = vld [vmem:[#allocation22 + $0x30] sm:$0xff] }
 0xc39   : > { %6044 = vmatpush.bf16.msrb.mxu3 %v13388_v58 }
 0xc3a   : > { %v16349_v20 = vpack.c.bf16 %v5647_v46, %v5646_v45  ;;  %v5648_v39 = vmax.f32 %v5632_v19, 0.0  ;;  %v13386_v46 = vld [vmem:[#allocation22 + $0x20] sm:$0xff] }
 0xc3b   : > { %v5614_v3 = vpop.f32.mrf.mxu2 }
 0xc3c   : > { %v5615_v60 = vadd.f32 %v5614_v3, %v16305_v61  ;;  %v5730_v31 = vunpack.c.l.b16 %v16349_v20  ;;  %v5731_v7 = vunpack.c.h.b16 %v16349_v20 }
 0xc3d   : > { %v5588_v56 = vpop.f32.mrf.mxu1  ;;  %6045 = vmatpush.bf16.msrb.mxu3 %v13387_v26 }
 0xc3e   : > { %v5633_v10 = vadd.f32 %v5615_v60, %v3841_v35  ;;  %v5589_v14 = vadd.f32 %v5588_v56, %v16307_v59 }
 0xc40   : > { %v5649_v22 = vmax.f32 %v5633_v10, 0.0  ;;  %v5634_v18 = vadd.f32 %v5589_v14, %v3842_v9 }
 0xc41   : > { %6046 = vmatpush.bf16.msrb.mxu3 %v13386_v46 }
 0xc42   : > { %v16351_v54 = vpack.c.bf16 %v5649_v22, %v5648_v39  ;;  %v5650_v24 = vmax.f32 %v5634_v18, 0.0 }
 0xc43   : > { %v5617_v8 = vpop.f32.mrf.mxu2 }
 0xc44   : > { %v5618_v41 = vadd.f32 %v5617_v8, %v16305_v61  ;;  %v5732_v13 = vunpack.c.l.b16 %v16351_v54  ;;  %v5733_v1 = vunpack.c.h.b16 %v16351_v54 }
 0xc45   : > { %v5590_v29 = vpop.f32.mrf.mxu1 }
 0xc46   : > { %v5742_v43 = vpack.c.b16 %v5732_v13, %v5730_v31  ;;  %v5743_v48 = vpack.c.b16 %v5733_v1, %v5731_v7  ;;  %v5635_v36 = vadd.f32 %v5618_v41, %v3843_v53  ;;  %v5591_v47 = vadd.f32 %v5590_v29, %v16307_v59 }
 0xc48   : > { %5868 = vmatmul.bf16.gmra.mxu3 %v5742_v43  ;;  %5897 = vmatmul.bf16.gmra.mxu0 %v5743_v48  ;;  %v5651_v49 = vmax.f32 %v5635_v36, 0.0  ;;  %v5636_v37 = vadd.f32 %v5591_v47, %v3844_v2 }
 0xc4a   : > { %v16365_v5 = vpack.c.bf16 %v5651_v49, %v5650_v24  ;;  %v5652_v30 = vmax.f32 %v5636_v37, 0.0 }
 0xc4b   : > { %v5619_v33 = vpop.f32.mrf.mxu2 }
 0xc4c   : > { %v5620_v52 = vadd.f32 %v5619_v33, %v16305_v61  ;;  %v5734_v59 = vunpack.c.l.b16 %v16365_v5  ;;  %v5735_v63 = vunpack.c.h.b16 %v16365_v5 }
 0xc4e   : > { %v5637_v32 = vadd.f32 %v5620_v52, %v3845_v0 }
 0xc50   : > { %v5653_v44 = vmax.f32 %v5637_v32, 0.0 }
 0xc52   : > { %v16367_v50 = vpack.c.bf16 %v5653_v44, %v5652_v30  ;;  %v13971_v44 = vld [vmem:[#allocation36] sm:$0xff] }
 0xc54   : > { %v5736_v55 = vunpack.c.l.b16 %v16367_v50  ;;  %v5737_v16 = vunpack.c.h.b16 %v16367_v50 }
 0xc56   : > { %v5744_v6 = vpack.c.b16 %v5736_v55, %v5734_v59  ;;  %v5745_v62 = vpack.c.b16 %v5737_v16, %v5735_v63  ;;  %v13972_v59 = vld [vmem:[#allocation36 + $0x20] sm:$0xff]  ;;  %v13973_v55 = vld [vmem:[#allocation36 + $0x8] sm:$0xff]  ;;  %v13975_v16 = vld [vmem:[#allocation36 + $0x10] sm:$0xff] }
 0xc57   : > { %v13974_v63 = vld [vmem:[#allocation36 + $0x28] sm:$0xff] }
 0xc58   : > { %5873 = vmatmul.bf16.gmra.mxu3 %v5744_v6  ;;  %5902 = vmatmul.bf16.gmra.mxu0 %v5745_v62  ;;  %v13976_v6 = vld [vmem:[#allocation36 + $0x30] sm:$0xff]  ;;  %v13977_v62 = vld [vmem:[#allocation36 + $0x18] sm:$0xff] }
 0xca5   : > { %v5888_v61 = vpop.f32.mrf.mxu0 }
 0xcab   : > { %v5859_v21 = vpop.f32.mrf.mxu3 }
 0xcac   : > { %v5860_v4 = vadd.f32 %v13968_v25, %v5859_v21  ;;  %v13980_v21 = vld [vmem:[#allocation36 + $0x48] sm:$0xff] }
 0xcad   : > { %v5890_v38 = vpop.f32.mrf.mxu0 }
 0xcae   : > { %v5889_v51 = vadd.f32 %v5888_v61, %v5860_v4  ;;  %v13978_v61 = vld [vmem:[#allocation36 + $0x38] sm:$0xff]  ;;  %v13981_v4 = vld [vmem:[#allocation36 + $0x50] sm:$0xff] }
 0xcb0   : > { %v5908_v32 = vmax.f32 %v5889_v51, 0.0  ;;  %v13384_v51 = vld [vmem:[#allocation22 + $0x10] sm:$0xff] }
 0xcb3   : > { %v5861_v57 = vpop.f32.mrf.mxu3 }
 0xcb4   : > { %v5862_v48 = vadd.f32 %v13968_v25, %v5861_v57  ;;  %v13383_v57 = vld [vmem:[#allocation22 + $0x8] sm:$0xff] }
 0xcb5   : > { %v5893_v17 = vpop.f32.mrf.mxu0 }
 0xcb6   : > { %v5891_v33 = vadd.f32 %v5890_v38, %v5862_v48  ;;  %v13385_v38 = vld [vmem:[#allocation22 + $0x18] sm:$0xff]  ;;  %v13986_v48 = vld [vmem:[#allocation36 + $0x98] sm:$0xff] }
 0xcb7   : > { %6108 = vmatpush.bf16.msrb.mxu0 %v13385_v38  ;;  %v13994_v38 = vld [vmem:[#allocation36 + $0x78] sm:$0xff] }
 0xcb8   : > { %v5909_v52 = vmax.f32 %v5891_v33, 0.0 }
 0xcba   : > { %v16388_v30 = vpack.c.bf16 %v5909_v52, %v5908_v32 }
 0xcbb   : > { %v5864_v15 = vpop.f32.mrf.mxu3  ;;  %6109 = vmatpush.bf16.msrb.mxu0 %v13384_v51  ;;  %v13995_v51 = vld [vmem:[#allocation36 + $0x100] sm:$0xff] }
 0xcbc   : > { %v5865_v29 = vadd.f32 %v13968_v25, %v5864_v15  ;;  %v13982_v15 = vld [vmem:[#allocation36 + $0x58] sm:$0xff] }
 0xcbd   : > { %v5895_v34 = vpop.f32.mrf.mxu0 }
 0xcbe   : > { %v5894_v18 = vadd.f32 %v5893_v17, %v5865_v29  ;;  %v13382_v17 = vld [vmem:[#allocation22] sm:$0xff] }
 0xcbf   : > { %6110 = vmatpush.bf16.msrb.mxu0 %v13383_v57 }
 0xcc0   : > { %v5910_v0 = vmax.f32 %v5894_v18, 0.0 }
 0xcc3   : > { %v5866_v23 = vpop.f32.mrf.mxu3  ;;  %6111 = vmatpush.bf16.msrb.mxu0 %v13382_v17 }
 0xcc4   : > { %v5867_v13 = vadd.f32 %v13968_v25, %v5866_v23 }
 0xcc5   : > { %v5898_v40 = vpop.f32.mrf.mxu0 }
 0xcc6   : > { %v5896_v9 = vadd.f32 %v5895_v34, %v5867_v13 }
 0xcc8   : > { %v5911_v49 = vmax.f32 %v5896_v9, 0.0 }
 0xcca   : > { %v16383_v24 = vpack.c.bf16 %v5911_v49, %v5910_v0  ;;  %v13987_v0 = vld [vmem:[#allocation36 + $0xc0] sm:$0xff] }
 0xccb   : > { %v5869_v3 = vpop.f32.mrf.mxu3 }
 0xccc   : > { %v5870_v22 = vadd.f32 %v13968_v25, %v5869_v3 }
 0xccd   : > { %v5900_v19 = vpop.f32.mrf.mxu0 }
 0xcce   : > { %v5899_v14 = vadd.f32 %v5898_v40, %v5870_v22  ;;  %v13392_v22 = vld [vmem:[#allocation22 + $0x50] sm:$0xff] }
 0xcd0   : > { %v5912_v2 = vmax.f32 %v5899_v14, 0.0 }
 0xcd3   : > { %v5871_v35 = vpop.f32.mrf.mxu3 }
 0xcd4   : > { %v5872_v10 = vadd.f32 %v13968_v25, %v5871_v35 }
 0xcd5   : > { %v5903_v60 = vpop.f32.mrf.mxu0 }
 0xcd6   : > { %v5901_v7 = vadd.f32 %v5900_v19, %v5872_v10  ;;  %v13984_v19 = vld [vmem:[#allocation36 + $0x88] sm:$0xff] }
 0xcd8   : > { %v5913_v36 = vmax.f32 %v5901_v7, 0.0  ;;  %v13390_v7 = vld [vmem:[#allocation22 + $0x40] sm:$0xff] }
 0xcda   : > { %v16378_v37 = vpack.c.bf16 %v5913_v36, %v5912_v2 }
 0xcdb   : > { %v5874_v45 = vpop.f32.mrf.mxu3 }
 0xcdc   : > { %v5875_v56 = vadd.f32 %v13968_v25, %v5874_v45 }
 0xcdd   : > { %v5905_v41 = vpop.f32.mrf.mxu0 }
 0xcde   : > { %v5904_v8 = vadd.f32 %v5903_v60, %v5875_v56  ;;  %v13393_v56 = vld [vmem:[#allocation22 + $0x58] sm:$0xff] }
 0xce0   : > { %v5914_v53 = vmax.f32 %v5904_v8, 0.0 }
 0xce3   : > { %v5876_v39 = vpop.f32.mrf.mxu3 }
 0xce4   : > { %v5877_v31 = vadd.f32 %v13968_v25, %v5876_v39  ;;  %v13979_v25 = vld [vmem:[#allocation36 + $0x40] sm:$0xff] }
 0xce6   : > { %v5906_v1 = vadd.f32 %v5905_v41, %v5877_v31  ;;  %v13391_v31 = vld [vmem:[#allocation22 + $0x48] sm:$0xff]  ;;  %v13985_v41 = vld [vmem:[#allocation36 + $0x90] sm:$0xff] }
 0xce8   : > { %v5915_v43 = vmax.f32 %v5906_v1, 0.0 }
 0xcea   : > { %v16373_v47 = vpack.c.bf16 %v5915_v43, %v5914_v53 }
 0xcec   : > { %5924 = vmatpush.bf16.msra.mxu1 %v16373_v47  ;;  %5965 = vmatpush.bf16.msrb.mxu2 %v16373_v47 }
 0xced   : > { %6252 = vmatpush.bf16.msra.mxu3 %v16373_v47 }
 0xcf0   : > { %5925 = vmatpush.bf16.msra.mxu1 %v16378_v37  ;;  %5966 = vmatpush.bf16.msrb.mxu2 %v16378_v37 }
 0xcf1   : > { %6253 = vmatpush.bf16.msra.mxu3 %v16378_v37 }
 0xcf4   : > { %5926 = vmatpush.bf16.msra.mxu1 %v16383_v24  ;;  %5967 = vmatpush.bf16.msrb.mxu2 %v16383_v24 }
 0xcf5   : > { %6254 = vmatpush.bf16.msra.mxu3 %v16383_v24 }
 0xcf8   : > { %5927 = vmatpush.bf16.msra.mxu1 %v16388_v30  ;;  %5968 = vmatpush.bf16.msrb.mxu2 %v16388_v30 }
 0xcf9   : > { %6255 = vmatpush.bf16.msra.mxu3 %v16388_v30 }
 0xcfb   : > { %11576 = vmatmul.msk.bf16.vlgmr.msra.gmra.mxu1 %vm2184_vm0, %v13971_v44  ;;  %11580 = vmatmul.msk.bf16.vlgmr.msrb.gmra.mxu2 %vm2184_vm0, %v13972_v59  ;;  %v13988_v59 = vld [vmem:[#allocation36 + $0x60] sm:$0xff] }
 0xcfc   : > { %6137 = vmatpush.bf16.msrb.mxu1 %v16373_v47  ;;  %6215 = vmatpush.bf16.msra.mxu2 %v13393_v56 }
 0xd00   : > { %6138 = vmatpush.bf16.msrb.mxu1 %v16378_v37  ;;  %6216 = vmatpush.bf16.msra.mxu2 %v13392_v22  ;;  %v13398_v22 = vld [vmem:[#allocation22 + $0x80] sm:$0xff] }
 0xd04   : > { %6139 = vmatpush.bf16.msrb.mxu1 %v16383_v24  ;;  %6217 = vmatpush.bf16.msra.mxu2 %v13391_v31 }
 0xd08   : > { %6140 = vmatpush.bf16.msrb.mxu1 %v16388_v30  ;;  %6218 = vmatpush.bf16.msra.mxu2 %v13390_v7 }
 0xd0b   : > { %11577 = vmatmul.msk.bf16.gmra.mxu1 %vm2184_vm0, %v13973_v55  ;;  %11581 = vmatmul.msk.bf16.gmra.mxu2 %vm2184_vm0, %v13974_v63  ;;  %v13989_v55 = vld [vmem:[#allocation36 + $0xc8] sm:$0xff] }
 0xd0c   : > { %6367 = vmatpush.bf16.msra.mxu1 %v16373_v47 }
 0xd10   : > { %6368 = vmatpush.bf16.msra.mxu1 %v16378_v37 }
 0xd14   : > { %6369 = vmatpush.bf16.msra.mxu1 %v16383_v24 }
 0xd18   : > { %6370 = vmatpush.bf16.msra.mxu1 %v16388_v30 }
 0xd1b   : > { %11578 = vmatmul.msk.bf16.gmra.mxu1 %vm2184_vm0, %v13975_v16  ;;  %11582 = vmatmul.msk.bf16.gmra.mxu2 %vm2184_vm0, %v13976_v6 }
 0xd2b   : > { %11579 = vmatmul.msk.bf16.gmra.mxu1 %vm2184_vm0, %v13977_v62  ;;  %11583 = vmatmul.msk.bf16.gmra.mxu2 %vm2184_vm0, %v13978_v61  ;;  %v13990_v62 = vld [vmem:[#allocation36 + $0x68] sm:$0xff]  ;;  %v13991_v61 = vld [vmem:[#allocation36 + $0xd0] sm:$0xff] }
 0xd3b   : > { %11624 = vmatmul.msk.bf16.vlgmr.msrb.gmra.mxu1 %vm2184_vm0, %v13979_v25 }
 0xd3c   : > { %6597 = vmatpush.bf16.msrb.mxu1 %v16373_v47 }
 0xd40   : > { %6598 = vmatpush.bf16.msrb.mxu1 %v16378_v37 }
 0xd44   : > { %6599 = vmatpush.bf16.msrb.mxu1 %v16383_v24 }
 0xd48   : > { %6600 = vmatpush.bf16.msrb.mxu1 %v16388_v30 }
 0xd4b   : > { %11625 = vmatmul.msk.bf16.gmra.mxu1 %vm2184_vm0, %v13980_v21  ;;  %v13992_v21 = vld [vmem:[#allocation36 + $0x70] sm:$0xff] }
 0xd5b   : > { %11626 = vmatmul.msk.bf16.gmra.mxu1 %vm2184_vm0, %v13981_v4 }
 0xd6b   : > { %11627 = vmatmul.msk.bf16.gmra.mxu1 %vm2184_vm0, %v13982_v15  ;;  %v13996_v15 = vld [vmem:[#allocation36 + $0xa0] sm:$0xff] }
 0xd78   : > { %v5929_v34 = vpop.f32.mrf.mxu1 }
 0xd7b   : > { %11672 = vmatmul.msk.bf16.vlgmr.msra.gmra.mxu1 %vm2184_vm0, %v13983_v28 }
 0xd7c   : > { %6827 = vmatpush.bf16.msra.mxu1 %v16373_v47 }
 0xd7e   : > { %v5970_v58 = vpop.f32.mrf.mxu2 }
 0xd80   : > { %6828 = vmatpush.bf16.msra.mxu1 %v16378_v37  ;;  %v5931_v23 = vpop.f32.mrf.mxu1 }
 0xd81   : > { %v5949_v26 = vpack.c.bf16 %v5931_v23, %v5929_v34  ;;  %v13997_v34 = vld [vmem:[#allocation36 + $0x108] sm:$0xff] }
 0xd83   : > { %11620 = vmatmul.msk.bf16.vlgmr.msrb.gmra.mxu0 %vm2184_vm0, %v5949_v26  ;;  %v13401_v26 = vld [vmem:[#allocation22 + $0x98] sm:$0xff] }
 0xd84   : > { %6829 = vmatpush.bf16.msra.mxu1 %v16383_v24  ;;  %6445 = vmatpush.bf16.msrb.mxu2 %v13401_v26 }
 0xd86   : > { %v5972_v40 = vpop.f32.mrf.mxu2 }
 0xd87   : > { %v5990_v46 = vpack.c.bf16 %v5972_v40, %v5970_v58 }
 0xd88   : > { %6830 = vmatpush.bf16.msra.mxu1 %v16388_v30  ;;  %v5934_v3 = vpop.f32.mrf.mxu1 }
 0xd89   : > { %11600 = vmatmul.msk.bf16.vlgmr.msrb.gmra.mxu3 %vm2184_vm0, %v5990_v46 }
 0xd8a   : > { %6482 = vmatpush.bf16.msrb.mxu3 %v16373_v47 }
 0xd8b   : > { %11673 = vmatmul.msk.bf16.gmra.mxu1 %vm2184_vm0, %v13984_v19  ;;  %v13998_v19 = vld [vmem:[#allocation36 + $0xa8] sm:$0xff] }
 0xd8e   : > { %6483 = vmatpush.bf16.msrb.mxu3 %v16378_v37  ;;  %v5975_v35 = vpop.f32.mrf.mxu2 }
 0xd90   : > { %v5936_v60 = vpop.f32.mrf.mxu1 }
 0xd91   : > { %v5950_v45 = vpack.c.bf16 %v5936_v60, %v5934_v3  ;;  %v13400_v3 = vld [vmem:[#allocation22 + $0x90] sm:$0xff]  ;;  %v13999_v60 = vld [vmem:[#allocation36 + $0x110] sm:$0xff] }
 0xd92   : > { %6484 = vmatpush.bf16.msrb.mxu3 %v16383_v24  ;;  %6446 = vmatpush.bf16.msrb.mxu2 %v13400_v3 }
 0xd93   : > { %11621 = vmatmul.msk.bf16.gmra.mxu0 %vm2184_vm0, %v5950_v45 }
 0xd96   : > { %6485 = vmatpush.bf16.msrb.mxu3 %v16388_v30  ;;  %v5977_v10 = vpop.f32.mrf.mxu2 }
 0xd97   : > { %v5991_v39 = vpack.c.bf16 %v5977_v10, %v5975_v35  ;;  %v13399_v35 = vld [vmem:[#allocation22 + $0x88] sm:$0xff] }
 0xd98   : > { %v5939_v8 = vpop.f32.mrf.mxu1  ;;  %6447 = vmatpush.bf16.msrb.mxu2 %v13399_v35 }
 0xd99   : > { %11601 = vmatmul.msk.bf16.gmra.mxu3 %vm2184_vm0, %v5991_v39 }
 0xd9b   : > { %11674 = vmatmul.msk.bf16.gmra.mxu1 %vm2184_vm0, %v13985_v41 }
 0xd9c   : > { %6448 = vmatpush.bf16.msrb.mxu2 %v13398_v22  ;;  %v14005_v22 = vld [vmem:[#allocation36 + $0xf0] sm:$0xff] }
 0xd9e   : > { %v5980_v13 = vpop.f32.mrf.mxu2 }
 0xda0   : > { %v5941_v1 = vpop.f32.mrf.mxu1 }
 0xda1   : > { %v5951_v29 = vpack.c.bf16 %v5941_v1, %v5939_v8  ;;  %v14000_v1 = vld [vmem:[#allocation36 + $0xb0] sm:$0xff] }
 0xda3   : > { %11622 = vmatmul.msk.bf16.gmra.mxu0 %vm2184_vm0, %v5951_v29  ;;  %v13396_v29 = vld [vmem:[#allocation22 + $0x70] sm:$0xff] }
 0xda6   : > { %v5982_v14 = vpop.f32.mrf.mxu2 }
 0xda7   : > { %v5992_v53 = vpack.c.bf16 %v5982_v14, %v5980_v13  ;;  %v13397_v13 = vld [vmem:[#allocation22 + $0x78] sm:$0xff]  ;;  %v14001_v14 = vld [vmem:[#allocation36 + $0x118] sm:$0xff] }
 0xda8   : > { %v5944_v43 = vpop.f32.mrf.mxu1  ;;  %6330 = vmatpush.bf16.msra.mxu0 %v13397_v13  ;;  %v13403_v13 = vld [vmem:[#allocation22 + $0xa8] sm:$0xff] }
 0xda9   : > { %11602 = vmatmul.msk.bf16.gmra.mxu3 %vm2184_vm0, %v5992_v53 }
 0xdab   : > { %11675 = vmatmul.msk.bf16.gmra.mxu1 %vm2184_vm0, %v13986_v48  ;;  %v13395_v48 = vld [vmem:[#allocation22 + $0x68] sm:$0xff] }
 0xdac   : > { %6331 = vmatpush.bf16.msra.mxu0 %v13396_v29 }
 0xdae   : > { %v5985_v9 = vpop.f32.mrf.mxu2 }
 0xdb0   : > { %v5946_v36 = vpop.f32.mrf.mxu1  ;;  %6332 = vmatpush.bf16.msra.mxu0 %v13395_v48 }
 0xdb1   : > { %v5952_v18 = vpack.c.bf16 %v5946_v36, %v5944_v43 }
 0xdb3   : > { %11623 = vmatmul.msk.bf16.gmra.mxu0 %vm2184_vm0, %v5952_v18 }
 0xdb6   : > { %v5987_v2 = vpop.f32.mrf.mxu2 }
 0xdb7   : > { %v5993_v33 = vpack.c.bf16 %v5987_v2, %v5985_v9  ;;  %v13394_v2 = vld [vmem:[#allocation22 + $0x60] sm:$0xff] }
 0xdb8   : > { %v6142_v49 = vpop.f32.mrf.mxu1  ;;  %6333 = vmatpush.bf16.msra.mxu0 %v13394_v2  ;;  %v14006_v2 = vld [vmem:[#allocation36 + $0xf8] sm:$0xff] }
 0xdb9   : > { %11603 = vmatmul.msk.bf16.gmra.mxu3 %vm2184_vm0, %v5993_v33 }
 0xdbb   : > { %11720 = vmatmul.msk.bf16.vlgmr.msrb.gmra.mxu1 %vm2184_vm0, %v13987_v0  ;;  %v14002_v0 = vld [vmem:[#allocation36 + $0xb8] sm:$0xff] }
 0xdc0   : > { %v6144_v52 = vpop.f32.mrf.mxu1 }
 0xdc1   : > { %v6162_v32 = vpack.c.bf16 %v6144_v52, %v6142_v49 }
 0xdc3   : > { %11644 = vmatmul.msk.bf16.vlgmr.msra.gmra.mxu2 %vm2184_vm0, %v6162_v32 }
 0xdc8   : > { %v6147_v44 = vpop.f32.mrf.mxu1 }
 0xdc9   : > { %11648 = vmatmul.msk.bf16.vlgmr.msra.gmra.mxu3 %vm2184_vm0, %v13988_v59 }
 0xdca   : > { %6712 = vmatpush.bf16.msra.mxu3 %v16373_v47 }
 0xdcb   : > { %11721 = vmatmul.msk.bf16.gmra.mxu1 %vm2184_vm0, %v13989_v55 }
 0xdce   : > { %6713 = vmatpush.bf16.msra.mxu3 %v16378_v37 }
 0xdd0   : > { %v6149_v63 = vpop.f32.mrf.mxu1 }
 0xdd1   : > { %v6163_v16 = vpack.c.bf16 %v6149_v63, %v6147_v44 }
 0xdd2   : > { %6714 = vmatpush.bf16.msra.mxu3 %v16383_v24  ;;  %v13993_v24 = vld [vmem:[#allocation36 + $0xd8] sm:$0xff] }
 0xdd3   : > { %11645 = vmatmul.msk.bf16.gmra.mxu2 %vm2184_vm0, %v6163_v16 }
 0xdd6   : > { %6715 = vmatpush.bf16.msra.mxu3 %v16388_v30 }
 0xdd8   : > { %v6152_v6 = vpop.f32.mrf.mxu1 }
 0xdd9   : > { %11649 = vmatmul.msk.bf16.gmra.mxu3 %vm2184_vm0, %v13990_v62 }
 0xddb   : > { %11722 = vmatmul.msk.bf16.gmra.mxu1 %vm2184_vm0, %v13991_v61  ;;  %v14003_v61 = vld [vmem:[#allocation36 + $0xe0] sm:$0xff] }
 0xde0   : > { %v6154_v47 = vpop.f32.mrf.mxu1 }
 0xde1   : > { %v6164_v25 = vpack.c.bf16 %v6154_v47, %v6152_v6 }
 0xde3   : > { %11646 = vmatmul.msk.bf16.gmra.mxu2 %vm2184_vm0, %v6164_v25 }
 0xde8   : > { %v6157_v37 = vpop.f32.mrf.mxu1 }
 0xde9   : > { %11650 = vmatmul.msk.bf16.gmra.mxu3 %vm2184_vm0, %v13992_v21 }
 0xdeb   : > { %11723 = vmatmul.msk.bf16.gmra.mxu1 %vm2184_vm0, %v13993_v24  ;;  %v13409_v24 = vld [vmem:[#allocation22 + $0xd8] sm:$0xff] }
 0xdec   : > { %6675 = vmatpush.bf16.msra.mxu2 %v13409_v24  ;;  %v13416_v24 = vld [vmem:[#allocation22 + $0x110] sm:$0xff] }
 0xdf0   : > { %v6159_v4 = vpop.f32.mrf.mxu1 }
 0xdf1   : > { %v6165_v30 = vpack.c.bf16 %v6159_v4, %v6157_v37 }
 0xdf3   : > { %11647 = vmatmul.msk.bf16.gmra.mxu2 %vm2184_vm0, %v6165_v30 }
 0xdf8   : > { %v6372_v46 = vpop.f32.mrf.mxu1 }
 0xdf9   : > { %11651 = vmatmul.msk.bf16.gmra.mxu3 %vm2184_vm0, %v13994_v38 }
 0xdfb   : > { %11768 = vmatmul.msk.bf16.vlgmr.msra.gmra.mxu1 %vm2184_vm0, %v13995_v51 }
 0xe00   : > { %v6113_v57 = vpop.f32.mrf.mxu0  ;;  %v6374_v39 = vpop.f32.mrf.mxu1 }
 0xe01   : > { %v6392_v8 = vpack.c.bf16 %v6374_v39, %v6372_v46  ;;  %v13406_v46 = vld [vmem:[#allocation22 + $0xc0] sm:$0xff] }
 0xe03   : > { %11692 = vmatmul.msk.bf16.vlgmr.msrb.gmra.mxu2 %vm2184_vm0, %v6392_v8  ;;  %v13404_v8 = vld [vmem:[#allocation22 + $0xb0] sm:$0xff] }
 0xe08   : > { %v16454_v17 = vpop.f32.mrf.mxu0  ;;  %v6377_v7 = vpop.f32.mrf.mxu1 }
 0xe09   : > { %11696 = vmatmul.msk.bf16.vlgmr.msrb.gmra.mxu3 %vm2184_vm0, %v13996_v15  ;;  %v13408_v15 = vld [vmem:[#allocation22 + $0xd0] sm:$0xff] }
 0xe0a   : > { %6676 = vmatpush.bf16.msra.mxu2 %v13408_v15 }
 0xe0b   : > { %11769 = vmatmul.msk.bf16.gmra.mxu1 %vm2184_vm0, %v13997_v34  ;;  %v14004_v34 = vld [vmem:[#allocation36 + $0xe8] sm:$0xff] }
 0xe0c   : > { %v6048_v28 = vpop.f32.mrf.mxu3 }
 0xe0d   : > { %v6114_v58 = vadd.f32 %v6113_v57, %v6048_v28  ;;  %v13407_v28 = vld [vmem:[#allocation22 + $0xc8] sm:$0xff] }
 0xe0e   : > { %6677 = vmatpush.bf16.msra.mxu2 %v13407_v28 }
 0xe10   : > { %v6118_v23 = vpop.f32.mrf.mxu0  ;;  %v6379_v9 = vpop.f32.mrf.mxu1 }
 0xe11   : > { %v6393_v18 = vpack.c.bf16 %v6379_v9, %v6377_v7 }
 0xe12   : > { %6678 = vmatpush.bf16.msra.mxu2 %v13406_v46  ;;  %v13413_v46 = vld [vmem:[#allocation22 + $0xf8] sm:$0xff] }
 0xe13   : > { %11693 = vmatmul.msk.bf16.gmra.mxu2 %vm2184_vm0, %v6393_v18 }
 0xe14   : > { %v16458_v40 = vpop.f32.mrf.mxu3 }
 0xe18   : > { %v16462_v56 = vpop.f32.mrf.mxu0  ;;  %v6382_v49 = vpop.f32.mrf.mxu1 }
 0xe19   : > { %11697 = vmatmul.msk.bf16.gmra.mxu3 %vm2184_vm0, %v13998_v19 }
 0xe1b   : > { %11770 = vmatmul.msk.bf16.gmra.mxu1 %vm2184_vm0, %v13999_v60 }
 0xe1c   : > { %v6053_v45 = vpop.f32.mrf.mxu3 }
 0xe1d   : > { %v6119_v10 = vadd.f32 %v6118_v23, %v6053_v45 }
 0xe20   : > { %v6123_v41 = vpop.f32.mrf.mxu0  ;;  %v6384_v59 = vpop.f32.mrf.mxu1 }
 0xe21   : > { %v6394_v55 = vpack.c.bf16 %v6384_v59, %v6382_v49 }
 0xe23   : > { %11694 = vmatmul.msk.bf16.gmra.mxu2 %vm2184_vm0, %v6394_v55 }
 0xe24   : > { %v16464_v31 = vpop.f32.mrf.mxu3 }
 0xe28   : > { %v16469_v36 = vpop.f32.mrf.mxu0  ;;  %v6387_v62 = vpop.f32.mrf.mxu1 }
 0xe29   : > { %11698 = vmatmul.msk.bf16.gmra.mxu3 %vm2184_vm0, %v14000_v1 }
 0xe2b   : > { %11771 = vmatmul.msk.bf16.gmra.mxu1 %vm2184_vm0, %v14001_v14  ;;  %v13402_v14 = vld [vmem:[#allocation22 + $0xa0] sm:$0xff] }
 0xe2c   : > { %v6058_v53 = vpop.f32.mrf.mxu3 }
 0xe2d   : > { %v6124_v43 = vadd.f32 %v6123_v41, %v6058_v53 }
 0xe30   : > { %v6128_v52 = vpop.f32.mrf.mxu0  ;;  %v6389_v37 = vpop.f32.mrf.mxu1 }
 0xe31   : > { %v6395_v21 = vpack.c.bf16 %v6389_v37, %v6387_v62 }
 0xe33   : > { %11695 = vmatmul.msk.bf16.gmra.mxu2 %vm2184_vm0, %v6395_v21 }
 0xe34   : > { %v16471_v33 = vpop.f32.mrf.mxu3 }
 0xe38   : > { %v6602_v57 = vpop.f32.mrf.mxu1 }
 0xe39   : > { %11699 = vmatmul.msk.bf16.gmra.mxu3 %vm2184_vm0, %v14002_v0 }
 0xe3c   : > { %v6063_v32 = vpop.f32.mrf.mxu3 }
 0xe3d   : > { %v6129_v44 = vadd.f32 %v6128_v52, %v6063_v32 }
 0xe40   : > { %v6604_v26 = vpop.f32.mrf.mxu1 }
 0xe41   : > { %v6622_v3 = vpack.c.bf16 %v6604_v26, %v6602_v57 }
 0xe43   : > { %11740 = vmatmul.msk.bf16.vlgmr.msra.gmra.mxu2 %vm2184_vm0, %v6622_v3 }
 0xe44   : > { %v16475_v63 = vpop.f32.mrf.mxu3 }
 0xe46   : > { %v6220_v16 = vpop.f32.mrf.mxu2 }
 0xe47   : > { %v16478_v6 = vadd.f32 %v6220_v16, %v6114_v58 }
 0xe48   : > { %v6607_v39 = vpop.f32.mrf.mxu1 }
 0xe49   : > { %11744 = vmatmul.msk.bf16.vlgmr.msra.gmra.mxu3 %vm2184_vm0, %v14003_v61  ;;  %v13417_v61 = vld [vmem:[#allocation22 + $0x118] sm:$0xff] }
 0xe4a   : > { %6905 = vmatpush.bf16.msrb.mxu2 %v13417_v61 }
 0xe4c   : > { %v6257_v47 = vpop.f32.mrf.mxu3 }
 0xe4e   : > { %v16481_v25 = vpop.f32.mrf.mxu2  ;;  %6906 = vmatpush.bf16.msrb.mxu2 %v13416_v24 }
 0xe50   : > { %v6609_v1 = vpop.f32.mrf.mxu1 }
 0xe51   : > { %v6623_v29 = vpack.c.bf16 %v6609_v1, %v6607_v39 }
 0xe53   : > { %11741 = vmatmul.msk.bf16.gmra.mxu2 %vm2184_vm0, %v6623_v29 }
 0xe54   : > { %v6259_v4 = vpop.f32.mrf.mxu3 }
 0xe55   : > { %v6277_v30 = vpack.c.bf16 %v6259_v4, %v6257_v47  ;;  %v13415_v4 = vld [vmem:[#allocation22 + $0x108] sm:$0xff] }
 0xe56   : > { %v6225_v38 = vpop.f32.mrf.mxu2  ;;  %6907 = vmatpush.bf16.msrb.mxu2 %v13415_v4 }
 0xe57   : > { %v16484_v51 = vadd.f32 %v6225_v38, %v6119_v10  ;;  %11668 = vmatmul.msk.bf16.vlgmr.msra.gmra.mxu0 %vm2184_vm0, %v6277_v30  ;;  %v13405_v10 = vld [vmem:[#allocation22 + $0xb8] sm:$0xff]  ;;  %v13414_v38 = vld [vmem:[#allocation22 + $0x100] sm:$0xff] }
 0xe58   : > { %6560 = vmatpush.bf16.msrb.mxu0 %v13405_v10  ;;  %v6612_v18 = vpop.f32.mrf.mxu1 }
 0xe59   : > { %11745 = vmatmul.msk.bf16.gmra.mxu3 %vm2184_vm0, %v14004_v34 }
 0xe5a   : > { %6908 = vmatpush.bf16.msrb.mxu2 %v13414_v38 }
 0xe5c   : > { %v6262_v58 = vpop.f32.mrf.mxu3  ;;  %6561 = vmatpush.bf16.msrb.mxu0 %v13404_v8  ;;  %v13410_v8 = vld [vmem:[#allocation22 + $0xe0] sm:$0xff] }
 0xe5e   : > { %v16488_v23 = vpop.f32.mrf.mxu2 }
 0xe60   : > { %6562 = vmatpush.bf16.msrb.mxu0 %v13403_v13  ;;  %v6614_v0 = vpop.f32.mrf.mxu1 }
 0xe61   : > { %v6624_v52 = vpack.c.bf16 %v6614_v0, %v6612_v18  ;;  %v16518_v0 = vpop.f32.mrf.mxu0 }
 0xe63   : > { %11742 = vmatmul.msk.bf16.gmra.mxu2 %vm2184_vm0, %v6624_v52 }
 0xe64   : > { %v6264_v19 = vpop.f32.mrf.mxu3  ;;  %6563 = vmatpush.bf16.msrb.mxu0 %v13402_v14 }
 0xe65   : > { %v6278_v35 = vpack.c.bf16 %v6264_v19, %v6262_v58  ;;  %v13412_v19 = vld [vmem:[#allocation22 + $0xf0] sm:$0xff] }
 0xe66   : > { %v6230_v60 = vpop.f32.mrf.mxu2 }
 0xe67   : > { %v16491_v45 = vadd.f32 %v6230_v60, %v6124_v43  ;;  %11669 = vmatmul.msk.bf16.gmra.mxu0 %vm2184_vm0, %v6278_v35  ;;  %v13411_v60 = vld [vmem:[#allocation22 + $0xe8] sm:$0xff] }
 0xe68   : > { %v6617_v55 = vpop.f32.mrf.mxu1  ;;  %6790 = vmatpush.bf16.msra.mxu0 %v13413_v46 }
 0xe69   : > { %11746 = vmatmul.msk.bf16.gmra.mxu3 %vm2184_vm0, %v14005_v22 }
 0xe6c   : > { %v6267_v41 = vpop.f32.mrf.mxu3  ;;  %6791 = vmatpush.bf16.msra.mxu0 %v13412_v19 }
 0xe6e   : > { %v16495_v7 = vpop.f32.mrf.mxu2 }
 0xe70   : > { %v6619_v62 = vpop.f32.mrf.mxu1  ;;  %6792 = vmatpush.bf16.msra.mxu0 %v13411_v60 }
 0xe74   : > { %v6269_v53 = vpop.f32.mrf.mxu3  ;;  %6793 = vmatpush.bf16.msra.mxu0 %v13410_v8 }
 0xe75   : > { %v6279_v43 = vpack.c.bf16 %v6269_v53, %v6267_v41 }
 0xe76   : > { %v6235_v48 = vpop.f32.mrf.mxu2 }
 0xe77   : > { %v16498_v9 = vadd.f32 %v6235_v48, %v6129_v44  ;;  %11670 = vmatmul.msk.bf16.gmra.mxu0 %vm2184_vm0, %v6279_v43  ;;  %v6625_v44 = vpack.c.bf16 %v6619_v62, %v6617_v55 }
 0xe78   : > { %v6832_v21 = vpop.f32.mrf.mxu1 }
 0xe79   : > { %11747 = vmatmul.msk.bf16.gmra.mxu3 %vm2184_vm0, %v14006_v2  ;;  %11743 = vmatmul.msk.bf16.gmra.mxu2 %vm2184_vm0, %v6625_v44 }
 0xe7c   : > { %v6272_v49 = vpop.f32.mrf.mxu3 }
 0xe7e   : > { %v16506_v57 = vpop.f32.mrf.mxu2 }
 0xe80   : > { %v6834_v15 = vpop.f32.mrf.mxu1 }
 0xe81   : > { %v6852_v34 = vpack.c.bf16 %v6834_v15, %v6832_v21 }
 0xe84   : > { %v6274_v32 = vpop.f32.mrf.mxu3 }
 0xe85   : > { %v6280_v59 = vpack.c.bf16 %v6274_v32, %v6272_v49 }
 0xe86   : > { %v6450_v26 = vpop.f32.mrf.mxu2 }
 0xe87   : > { %11671 = vmatmul.msk.bf16.gmra.mxu0 %vm2184_vm0, %v6280_v59 }
 0xe88   : > { %v6837_v3 = vpop.f32.mrf.mxu1 }
 0xe89   : > { %11788 = vmatmul.msk.bf16.vlgmr.msrb.gmra.mxu2 %vm2184_vm0, %v6852_v34 }
 0xe8c   : > { %v6487_v16 = vpop.f32.mrf.mxu3 }
 0xe8e   : > { %v16510_v22 = vpop.f32.mrf.mxu2 }
 0xe90   : > { %v6839_v10 = vpop.f32.mrf.mxu1 }
 0xe91   : > { %v6853_v39 = vpack.c.bf16 %v6839_v10, %v6837_v3 }
 0xe94   : > { %v6489_v47 = vpop.f32.mrf.mxu3 }
 0xe95   : > { %v6507_v37 = vpack.c.bf16 %v6489_v47, %v6487_v16 }
 0xe96   : > { %v6455_v29 = vpop.f32.mrf.mxu2 }
 0xe97   : > { %11716 = vmatmul.msk.bf16.vlgmr.msrb.gmra.mxu0 %vm2184_vm0, %v6507_v37 }
 0xe98   : > { %v6842_v1 = vpop.f32.mrf.mxu1 }
 0xe99   : > { %11789 = vmatmul.msk.bf16.gmra.mxu2 %vm2184_vm0, %v6853_v39 }
 0xe9c   : > { %v6492_v30 = vpop.f32.mrf.mxu3 }
 0xe9e   : > { %v16515_v2 = vpop.f32.mrf.mxu2 }
 0xea0   : > { %v6844_v53 = vpop.f32.mrf.mxu1 }
 0xea1   : > { %v6854_v43 = vpack.c.bf16 %v6844_v53, %v6842_v1 }
 0xea4   : > { %v6494_v28 = vpop.f32.mrf.mxu3 }
 0xea5   : > { %v6508_v58 = vpack.c.bf16 %v6494_v28, %v6492_v30 }
 0xea6   : > { %v6460_v32 = vpop.f32.mrf.mxu2 }
 0xea7   : > { %11717 = vmatmul.msk.bf16.gmra.mxu0 %vm2184_vm0, %v6508_v58 }
 0xea8   : > { %v6847_v49 = vpop.f32.mrf.mxu1 }
 0xea9   : > { %11790 = vmatmul.msk.bf16.gmra.mxu2 %vm2184_vm0, %v6854_v43 }
 0xeac   : > { %v6497_v35 = vpop.f32.mrf.mxu3 }
 0xeae   : > { %v16523_v37 = vpop.f32.mrf.mxu2 }
 0xeb0   : > { %v6849_v59 = vpop.f32.mrf.mxu1 }
 0xeb1   : > { %v6855_v55 = vpack.c.bf16 %v6849_v59, %v6847_v49 }
 0xeb4   : > { %v6499_v41 = vpop.f32.mrf.mxu3 }
 0xeb5   : > { %v6509_v13 = vpack.c.bf16 %v6499_v41, %v6497_v35 }
 0xeb6   : > { %v6465_v4 = vpop.f32.mrf.mxu2 }
 0xeb7   : > { %11718 = vmatmul.msk.bf16.gmra.mxu0 %vm2184_vm0, %v6509_v13 }
 0xeb9   : > { %11791 = vmatmul.msk.bf16.gmra.mxu2 %vm2184_vm0, %v6855_v55 }
 0xebc   : > { %v6502_v14 = vpop.f32.mrf.mxu3 }
 0xebe   : > { %v16531_v46 = vpop.f32.mrf.mxu2 }
 0xec4   : > { %v6504_v48 = vpop.f32.mrf.mxu3 }
 0xec5   : > { %v6510_v18 = vpack.c.bf16 %v6504_v48, %v6502_v14 }
 0xec6   : > { %v6680_v10 = vpop.f32.mrf.mxu2 }
 0xec7   : > { %11719 = vmatmul.msk.bf16.gmra.mxu0 %vm2184_vm0, %v6510_v18 }
 0xecc   : > { %v6717_v52 = vpop.f32.mrf.mxu3 }
 0xece   : > { %v16537_v8 = vpop.f32.mrf.mxu2 }
 0xed4   : > { %v6335_v16 = vpop.f32.mrf.mxu0  ;;  %v6719_v62 = vpop.f32.mrf.mxu3 }
 0xed5   : > { %v6355_v44 = vadd.f32 %v6335_v16, %v16478_v6  ;;  %v6737_v61 = vpack.c.bf16 %v6719_v62, %v6717_v52 }
 0xed7   : > { %11764 = vmatmul.msk.bf16.vlgmr.msra.gmra.mxu0 %vm2184_vm0, %v6737_v61  ;;  %v6470_v47 = vadd.f32 %v6450_v26, %v6355_v44 }
 0xedc   : > { %v16525_v21 = vpop.f32.mrf.mxu0  ;;  %v6722_v24 = vpop.f32.mrf.mxu3 }
 0xee4   : > { %v6340_v30 = vpop.f32.mrf.mxu0  ;;  %v6724_v38 = vpop.f32.mrf.mxu3 }
 0xee5   : > { %v6357_v15 = vadd.f32 %v6340_v30, %v16484_v51  ;;  %v6738_v34 = vpack.c.bf16 %v6724_v38, %v6722_v24  ;;  %v13425_v30 = vld [vmem:[#allocation25 + $0x34] sm:$0xf0]  ;;  %v13424_v38 = vld [vmem:[#allocation25 + $0x34] sm:$0xf] }
 0xee7   : > { %11765 = vmatmul.msk.bf16.gmra.mxu0 %vm2184_vm0, %v6738_v34  ;;  %v6472_v28 = vadd.f32 %v6455_v29, %v6357_v15  ;;  %v11820_v15 = vld [vmem:[#allocation25 + $0x38] sm:$0xf0] }
 0xeec   : > { %v16529_v58 = vpop.f32.mrf.mxu0  ;;  %v6727_v6 = vpop.f32.mrf.mxu3 }
 0xef4   : > { %v6345_v26 = vpop.f32.mrf.mxu0  ;;  %v6729_v3 = vpop.f32.mrf.mxu3 }
 0xef5   : > { %v6359_v19 = vadd.f32 %v6345_v26, %v16491_v45  ;;  %v6739_v35 = vpack.c.bf16 %v6729_v3, %v6727_v6  ;;  %v6685_v45 = vpop.f32.mrf.mxu2  ;;  %v11823_v6 = vor.u32 %v13424_v38, %v11820_v15  ;;  %v13423_v26 = vld [vmem:[#allocation25 + $0x24] sm:$0xf0]  ;;  %v13422_v3 = vld [vmem:[#allocation25 + $0x24] sm:$0xf] }
 0xef7   : > { %11766 = vmatmul.msk.bf16.gmra.mxu0 %vm2184_vm0, %v6739_v35  ;;  %v6474_v60 = vadd.f32 %v6460_v32, %v6359_v19  ;;  %v11812_v35 = vld [vmem:[#allocation25 + $0x28] sm:$0xf0] }
 0xef8   : > { %7061 = vmatpush.bf16.msrb.mxu0 %v11823_v6  ;;  %v6116_v6 = vadd.f32 %v16454_v17, %v16458_v40  ;;  %v6121_v17 = vadd.f32 %v16462_v56, %v16464_v31 }
 0xefc   : > { %v16535_v39 = vpop.f32.mrf.mxu0  ;;  %v6732_v51 = vpop.f32.mrf.mxu3 }
 0xefd   : > { %v16543_v18 = vpop.f32.mrf.mxu2 }
 0xf04   : > { %v6350_v41 = vpop.f32.mrf.mxu0  ;;  %v6734_v13 = vpop.f32.mrf.mxu3 }
 0xf05   : > { %v6361_v1 = vadd.f32 %v6350_v41, %v16498_v9  ;;  %v6740_v29 = vpack.c.bf16 %v6734_v13, %v6732_v51  ;;  %v6690_v32 = vpop.f32.mrf.mxu2  ;;  %v11815_v51 = vor.u32 %v13422_v3, %v11812_v35  ;;  %v11802_v41 = vld [vmem:[#allocation25 + $0x10] sm:$0xf]  ;;  %v13421_v13 = vld [vmem:[#allocation25 + $0x14] sm:$0xf0] }
 0xf07   : > { %11767 = vmatmul.msk.bf16.gmra.mxu0 %vm2184_vm0, %v6740_v29  ;;  %v6476_v14 = vadd.f32 %v6465_v4, %v6361_v1  ;;  %v11818_v4 = vld [vmem:[#allocation25 + $0x30] sm:$0xf]  ;;  %v13420_v1 = vld [vmem:[#allocation25 + $0x14] sm:$0xf]  ;;  %v11803_v29 = vor.u32 %v13421_v13, %v11802_v41  ;;  %v16566_v13 = vld [vmem:[#allocation24] ss:$0 sm:$0xff] }
 0xf08   : > { %7062 = vmatpush.bf16.msrb.mxu0 %v11815_v51 }
 0xf0c   : > { %v16541_v53 = vpop.f32.mrf.mxu0 }
 0xf0d   : > { %v16547_v62 = vpop.f32.mrf.mxu2 }
 0xf14   : > { %v6565_v43 = vpop.f32.mrf.mxu0 }
 0xf15   : > { %v6585_v48 = vadd.f32 %v6565_v43, %v6470_v47  ;;  %v6695_v61 = vpop.f32.mrf.mxu2  ;;  %v11819_v47 = vor.u32 %v13425_v30, %v11818_v4 }
 0xf17   : > { %v6700_v49 = vadd.f32 %v6680_v10, %v6585_v48  ;;  %7032 = vmatpush.bf16.msrb.mxu3 %v11819_v47  ;;  %v11794_v48 = vld [vmem:[#allocation25] sm:$0xf] }
 0xf1c   : > { %v6567_v52 = vpop.f32.mrf.mxu0 }
 0xf24   : > { %v6570_v59 = vpop.f32.mrf.mxu0 }
 0xf25   : > { %v6587_v55 = vadd.f32 %v6570_v59, %v6472_v28  ;;  %v11810_v28 = vld [vmem:[#allocation25 + $0x20] sm:$0xf]  ;;  %v13418_v59 = vld [vmem:[#allocation25 + $0x4] sm:$0xf] }
 0xf26   : > { %v11811_v19 = vor.u32 %v13423_v26, %v11810_v28  ;;  %v6241_v28 = vadd.f32 %v16481_v25, %v6116_v6  ;;  %v6243_v25 = vadd.f32 %v16488_v23, %v6121_v17 }
 0xf27   : > { %v16545_v16 = vadd.f32 %v6685_v45, %v6587_v55  ;;  %v11804_v45 = vld [vmem:[#allocation25 + $0x18] sm:$0xf0] }
 0xf28   : > { %7033 = vmatpush.bf16.msrb.mxu3 %v11811_v19  ;;  %v11807_v43 = vor.u32 %v13420_v1, %v11804_v45  ;;  %v6356_v26 = vadd.f32 %v16525_v21, %v6241_v28 }
 0xf2a   : > { %7063 = vmatpush.bf16.msrb.mxu0 %v11807_v43  ;;  %v6471_v35 = vadd.f32 %v16510_v22, %v6356_v26  ;;  %v6358_v22 = vadd.f32 %v16529_v58, %v6243_v25 }
 0xf2c   : > { %v16549_v9 = vpop.f32.mrf.mxu0  ;;  %7034 = vmatpush.bf16.msrb.mxu3 %v11803_v29  ;;  %v6586_v51 = vadd.f32 %v6567_v52, %v6471_v35 }
 0xf34   : > { %v6575_v44 = vpop.f32.mrf.mxu0 }
 0xf35   : > { %v6589_v24 = vadd.f32 %v6575_v44, %v6474_v60  ;;  %v16555_v60 = vpop.f32.mrf.mxu2  ;;  %v11796_v44 = vld [vmem:[#allocation25 + $0x8] sm:$0xf0] }
 0xf36   : > { %v11799_v4 = vor.u32 %v13418_v59, %v11796_v44  ;;  %v6126_v44 = vadd.f32 %v16469_v36, %v16471_v33 }
 0xf37   : > { %v16551_v34 = vadd.f32 %v6690_v32, %v6589_v24  ;;  %v13419_v32 = vld [vmem:[#allocation25 + $0x4] sm:$0xf0] }
 0xf38   : > { %v11795_v55 = vor.u32 %v13419_v32, %v11794_v48  ;;  %7064 = vmatpush.bf16.msrb.mxu0 %v11799_v4 }
 0xf3a   : > { %7035 = vmatpush.bf16.msrb.mxu3 %v11795_v55 }
 0xf3c   : > { %v16553_v10 = vpop.f32.mrf.mxu0 }
 0xf3d   : > { %v6910_v47 = vpop.f32.mrf.mxu2 }
 0xf44   : > { %v6580_v24 = vpop.f32.mrf.mxu0 }
 0xf45   : > { %v6591_v30 = vadd.f32 %v6580_v24, %v6476_v14  ;;  %v6912_v3 = vpop.f32.mrf.mxu2 }
 0xf47   : > { %v16557_v38 = vadd.f32 %v6695_v61, %v6591_v30  ;;  %v6701_v61 = vadd.f32 %v16537_v8, %v6586_v51  ;;  %v6473_v8 = vadd.f32 %v16515_v2, %v6358_v22  ;;  %v6245_v2 = vadd.f32 %v16495_v7, %v6126_v44 }
 0xf48   : > { %v6131_v51 = vadd.f32 %v16518_v0, %v16475_v63 }
 0xf49   : > { %v6588_v55 = vadd.f32 %v16549_v9, %v6473_v8 }
 0xf4b   : > { %v6703_v23 = vadd.f32 %v16543_v18, %v6588_v55 }
 0xf4c   : > { %v16559_v15 = vpop.f32.mrf.mxu0 }
 0xf4d   : > { %v6915_v1 = vpop.f32.mrf.mxu2 }
 0xf54   : > { %v6795_v19 = vpop.f32.mrf.mxu0 }
 0xf55   : > { %v6815_v14 = vadd.f32 %v6795_v19, %v6700_v49  ;;  %v6917_v59 = vpop.f32.mrf.mxu2 }
 0xf57   : > { %v6930_v41 = vadd.f32 %v6910_v47, %v6815_v14 }
 0xf59   : > { %v6942_v21 = vadd.f32 %v16566_v13, %v6930_v41 }
 0xf5b   : > { %v6950_v52 = vmax.f32 %v6942_v21, 0.0 }
 0xf5c   : > { %v6797_v29 = vpop.f32.mrf.mxu0 }
 0xf5d   : > { %v6816_v40 = vadd.f32 %v6797_v29, %v6701_v61  ;;  %v6920_v9 = vpop.f32.mrf.mxu2 }
 0xf5f   : > { %v6931_v45 = vadd.f32 %v6912_v3, %v6816_v40 }
 0xf61   : > { %v6943_v49 = vadd.f32 %v16566_v13, %v6931_v45 }
 0xf63   : > { %v6951_v43 = vmax.f32 %v6943_v49, 0.0 }
 0xf64   : > { %v6800_v48 = vpop.f32.mrf.mxu0 }
 0xf65   : > { %v6958_v32 = vpack.c.bf16 %v6951_v43, %v6950_v52  ;;  %v6817_v56 = vadd.f32 %v6800_v48, %v16545_v16  ;;  %v6360_v16 = vadd.f32 %v16535_v39, %v6245_v2  ;;  %v6922_v33 = vpop.f32.mrf.mxu2 }
 0xf67   : > { %11824 = vmatmul.msk.bf16.vlgmr.msrb.gmra.mxu3 %vm2184_vm0, %v6958_v32  ;;  %11828 = vmatmul.msk.bf16.vlgmr.msrb.gmra.mxu0 %vm2184_vm0, %v6958_v32  ;;  %v6932_v31 = vadd.f32 %v6915_v1, %v6817_v56  ;;  %v6475_v18 = vadd.f32 %v16523_v37, %v6360_v16  ;;  %v6247_v37 = vadd.f32 %v16506_v57, %v6131_v51  ;;  %v5669_v51 = vunpack.c.h.bf16 %v16335_v11 }
 0xf69   : > { %v6944_v4 = vadd.f32 %v16566_v13, %v6932_v31  ;;  %v6590_v19 = vadd.f32 %v16553_v10, %v6475_v18 }
 0xf6b   : > { %v6952_v6 = vmax.f32 %v6944_v4, 0.0  ;;  %v6705_v39 = vadd.f32 %v16547_v62, %v6590_v19 }
 0xf6c   : > { %v6802_v58 = vpop.f32.mrf.mxu0 }
 0xf6d   : > { %v6818_v24 = vadd.f32 %v6802_v58, %v6703_v23  ;;  %v6925_v17 = vpop.f32.mrf.mxu2 }
 0xf6f   : > { %v6933_v30 = vadd.f32 %v6917_v59, %v6818_v24  ;;  %v5665_v24 = vunpack.c.h.bf16 %v16319_v27 }
 0xf71   : > { %v6945_v47 = vadd.f32 %v16566_v13, %v6933_v30 }
 0xf73   : > { %v6953_v28 = vmax.f32 %v6945_v47, 0.0 }
 0xf74   : > { %v6805_v26 = vpop.f32.mrf.mxu0 }
 0xf75   : > { %v6959_v3 = vpack.c.bf16 %v6953_v28, %v6952_v6  ;;  %v6819_v36 = vadd.f32 %v6805_v26, %v16551_v34  ;;  %v6362_v34 = vadd.f32 %v16541_v53, %v6247_v37  ;;  %v6927_v22 = vpop.f32.mrf.mxu2  ;;  %v5664_v6 = vunpack.c.l.bf16 %v16319_v27 }
 0xf77   : > { %11825 = vmatmul.msk.bf16.gmra.mxu3 %vm2184_vm0, %v6959_v3  ;;  %11829 = vmatmul.msk.bf16.gmra.mxu0 %vm2184_vm0, %v6959_v3  ;;  %v6934_v7 = vadd.f32 %v6920_v9, %v6819_v36  ;;  %v6477_v62 = vadd.f32 %v16531_v46, %v6362_v34 }
 0xf79   : > { %v6946_v41 = vadd.f32 %v16566_v13, %v6934_v7  ;;  %v6592_v21 = vadd.f32 %v16559_v15, %v6477_v62  ;;  %v5667_v7 = vunpack.c.h.bf16 %v16333_v12 }
 0xf7b   : > { %v6954_v1 = vmax.f32 %v6946_v41, 0.0  ;;  %v6707_v0 = vadd.f32 %v16555_v60, %v6592_v21  ;;  %v5663_v60 = vunpack.c.h.bf16 %v16317_v42 }
 0xf7c   : > { %v6807_v35 = vpop.f32.mrf.mxu0 }
 0xf7d   : > { %v6820_v14 = vadd.f32 %v6807_v35, %v6705_v39 }
 0xf7f   : > { %v6935_v10 = vadd.f32 %v6922_v33, %v6820_v14 }
 0xf81   : > { %v6947_v61 = vadd.f32 %v16566_v13, %v6935_v10  ;;  %v5666_v10 = vunpack.c.l.bf16 %v16333_v12  ;;  %v5671_v12 = vunpack.c.h.bf16 %v16349_v20 }
 0xf83   : > { %v6955_v29 = vmax.f32 %v6947_v61, 0.0 }
 0xf84   : > { %v6810_v40 = vpop.f32.mrf.mxu0 }
 0xf85   : > { %v6960_v25 = vpack.c.bf16 %v6955_v29, %v6954_v1  ;;  %v6821_v63 = vadd.f32 %v6810_v40, %v16557_v38  ;;  %v6970_v38 = vld [vmem:[#allocation27] sm:$0x3] }
 0xf86   : > { %v16609_v8 = vperm.slane %v6970_v38, 1  ;;  %v16613_v56 = vperm.slane %v6970_v38, 0 }
 0xf87   : > { %11826 = vmatmul.msk.bf16.gmra.mxu3 %vm2184_vm0, %v6960_v25  ;;  %11830 = vmatmul.msk.bf16.gmra.mxu0 %vm2184_vm0, %v6960_v25  ;;  %v6936_v57 = vadd.f32 %v6925_v17, %v6821_v63  ;;  %v5668_v17 = vunpack.c.l.bf16 %v16335_v11 }
 0xf89   : > { %v6948_v49 = vadd.f32 %v16566_v13, %v6936_v57 }
 0xf8b   : > { %v6956_v43 = vmax.f32 %v6948_v49, 0.0  ;;  %v5673_v49 = vunpack.c.h.bf16 %v16351_v54 }
 0xf8c   : > { %v6812_v53 = vpop.f32.mrf.mxu0 }
 0xf8d   : > { %v6822_v45 = vadd.f32 %v6812_v53, %v6707_v0 }
 0xf8f   : > { %v6937_v52 = vadd.f32 %v6927_v22, %v6822_v45 }
 0xf91   : > { %v6949_v46 = vadd.f32 %v16566_v13, %v6937_v52  ;;  %v5662_v13 = vunpack.c.l.bf16 %v16317_v42 }
 0xf93   : > { %v6957_v48 = vmax.f32 %v6949_v46, 0.0 }
 0xf95   : > { %v6961_v15 = vpack.c.bf16 %v6957_v48, %v6956_v43  ;;  %v5670_v48 = vunpack.c.l.bf16 %v16349_v20  ;;  %v5675_v20 = vunpack.c.h.bf16 %v16365_v5 }
 0xf97   : > { %11827 = vmatmul.msk.bf16.gmra.mxu3 %vm2184_vm0, %v6961_v15  ;;  %11831 = vmatmul.msk.bf16.gmra.mxu0 %vm2184_vm0, %v6961_v15 }
 0xfe4   : > { %v7066_v32 = vpop.f32.mrf.mxu0 }
 0xfe5   : > { %v7067_v59 = vadd.f32 %v7066_v32, %v16609_v8 }
 0xfe7   : > { %v7087_v55 = vadd.f32 %v7067_v59, %v5663_v60  ;;  %v5672_v59 = vunpack.c.l.bf16 %v16351_v54 }
 0xfe9   : > { %v7103_v30 = vmax.f32 %v7087_v55, 0.0 }
 0xfea   : > { %v7037_v31 = vpop.f32.mrf.mxu3 }
 0xfeb   : > { %v7038_v23 = vadd.f32 %v7037_v31, %v16613_v56 }
 0xfec   : > { %v7068_v58 = vpop.f32.mrf.mxu0 }
 0xfed   : > { %v7086_v44 = vadd.f32 %v7038_v23, %v5662_v13  ;;  %v7069_v2 = vadd.f32 %v7068_v58, %v16609_v8 }
 0xfef   : > { %v7089_v4 = vadd.f32 %v7069_v2, %v5665_v24  ;;  %v7102_v18 = vmax.f32 %v7086_v44, 0.0 }
 0xff1   : > { %v7105_v9 = vmax.f32 %v7089_v4, 0.0 }
 0xff2   : > { %v7039_v16 = vpop.f32.mrf.mxu3 }
 0xff3   : > { %v16619_v47 = vpack.c.bf16 %v7105_v9, %v7103_v30  ;;  %v7040_v28 = vadd.f32 %v7039_v16, %v16613_v56  ;;  %v5677_v9 = vunpack.c.h.bf16 %v16367_v50 }
 0xff4   : > { %v7071_v26 = vpop.f32.mrf.mxu0 }
 0xff5   : > { %v7088_v42 = vadd.f32 %v7040_v28, %v5664_v6  ;;  %v7072_v36 = vadd.f32 %v7071_v26, %v16609_v8  ;;  %v5674_v26 = vunpack.c.l.bf16 %v16365_v5  ;;  %v11902_v5 = vld [vmem:[#allocation28 + $0x170] sm:$0xf] }
 0xff7   : > { %v7104_v3 = vmax.f32 %v7088_v42, 0.0  ;;  %v7091_v35 = vadd.f32 %v7072_v36, %v5667_v7 }
 0xff9   : > { %v16623_v19 = vpack.c.bf16 %v7104_v3, %v7102_v18  ;;  %v7107_v41 = vmax.f32 %v7091_v35, 0.0 }
 0xffa   : > { %v7042_v33 = vpop.f32.mrf.mxu3 }
 0xffb   : > { %v7043_v27 = vadd.f32 %v7042_v33, %v16613_v56  ;;  %v5676_v33 = vunpack.c.l.bf16 %v16367_v50 }
 0xffc   : > { %v7073_v39 = vpop.f32.mrf.mxu0 }
 0xffd   : > { %v7074_v14 = vadd.f32 %v7073_v39, %v16609_v8  ;;  %v7090_v1 = vadd.f32 %v7043_v27, %v5666_v10  ;;  %v13473_v27 = vld [vmem:[#allocation28 + $0x164] sm:$0xf0] }
 0xffe   : > { %v13426_v10 = vld [vmem:[#allocation37] sm:$0xff] }
 0xfff   : > { %v7093_v37 = vadd.f32 %v7074_v14, %v5669_v51  ;;  %v7106_v21 = vmax.f32 %v7090_v1, 0.0  ;;  %v13475_v14 = vld [vmem:[#allocation28 + $0x174] sm:$0xf0] }
0x1000   : > { %v11903_v50 = vor.u32 %v13475_v14, %v11902_v5  ;;  %v13471_v1 = vld [vmem:[#allocation28 + $0x154] sm:$0xf0]  ;;  %v13484_v5 = vld [vmem:[#allocation28 + $0x1c4] sm:$0xf] }
0x1001   : > { %v7109_v34 = vmax.f32 %v7093_v37, 0.0  ;;  %v11966_v37 = vld [vmem:[#allocation28 + $0x1f0] sm:$0xf] }
0x1002   : > { %v7044_v61 = vpop.f32.mrf.mxu3 }
0x1003   : > { %v16631_v29 = vpack.c.bf16 %v7109_v34, %v7107_v41  ;;  %v7045_v40 = vadd.f32 %v7044_v61, %v16613_v56  ;;  %v13491_v41 = vld [vmem:[#allocation28 + $0x1f4] sm:$0xf0]  ;;  %v11886_v61 = vld [vmem:[#allocation28 + $0x150] sm:$0xf] }
0x1004   : > { %v7076_v62 = vpop.f32.mrf.mxu0 }
0x1005   : > { %v7092_v25 = vadd.f32 %v7045_v40, %v5668_v17  ;;  %v7077_v0 = vadd.f32 %v7076_v62, %v16609_v8  ;;  %v11967_v17 = vor.u32 %v13491_v41, %v11966_v37  ;;  %v11958_v40 = vld [vmem:[#allocation28 + $0x1e0] sm:$0xf]  ;;  %v13489_v62 = vld [vmem:[#allocation28 + $0x1e4] sm:$0xf0]  ;;  %v12030_v37 = vld [vmem:[#allocation28 + $0x70] sm:$0xf] }
0x1007   : > { %v7108_v63 = vmax.f32 %v7092_v25, 0.0  ;;  %v7095_v22 = vadd.f32 %v7077_v0, %v5671_v12  ;;  %v16672_v25 = vld [vmem:[#allocation37 + $0x8] sm:$0xff]  ;;  %v13469_v0 = vld [vmem:[#allocation28 + $0x144] sm:$0xf0] }
0x1008   : > { %v11950_v12 = vld [vmem:[#allocation28 + $0x1d0] sm:$0xf] }
0x1009   : > { %v16635_v57 = vpack.c.bf16 %v7108_v63, %v7106_v21  ;;  %v7111_v43 = vmax.f32 %v7095_v22, 0.0  ;;  %v11887_v21 = vor.u32 %v13471_v1, %v11886_v61  ;;  %v11878_v63 = vld [vmem:[#allocation28 + $0x140] sm:$0xf]  ;;  %v11918_v61 = vld [vmem:[#allocation28 + $0x190] sm:$0xf] }
0x100a   : > { %v7047_v53 = vpop.f32.mrf.mxu3  ;;  %v11879_v22 = vor.u32 %v13469_v0, %v11878_v63  ;;  %v13479_v1 = vld [vmem:[#allocation28 + $0x194] sm:$0xf0]  ;;  %v13482_v63 = vld [vmem:[#allocation28 + $0x1b4] sm:$0xf]  ;;  %v11936_v0 = vld [vmem:[#allocation28 + $0x1b8] sm:$0xf0] }
0x100b   : > { %v7048_v11 = vadd.f32 %v7047_v53, %v16613_v56  ;;  %v11959_v53 = vor.u32 %v13489_v62, %v11958_v40  ;;  %v13468_v40 = vld [vmem:[#allocation28 + $0x144] sm:$0xf]  ;;  %v11880_v62 = vld [vmem:[#allocation28 + $0x148] sm:$0xf0] }
0x100c   : > { %v7078_v45 = vpop.f32.mrf.mxu0 }
0x100d   : > { %v7079_v52 = vadd.f32 %v7078_v45, %v16609_v8  ;;  %v7094_v32 = vadd.f32 %v7048_v11, %v5670_v48  ;;  %v13487_v45 = vld [vmem:[#allocation28 + $0x1d4] sm:$0xf0]  ;;  %v13490_v48 = vld [vmem:[#allocation28 + $0x1f4] sm:$0xf] }
0x100e   : > { %v11951_v11 = vor.u32 %v13487_v45, %v11950_v12  ;;  %v12022_v45 = vld [vmem:[#allocation28 + $0x60] sm:$0xf] }
0x100f   : > { %v7097_v46 = vadd.f32 %v7079_v52, %v5673_v49  ;;  %v7110_v23 = vmax.f32 %v7094_v32, 0.0  ;;  %v11870_v49 = vld [vmem:[#allocation28 + $0x130] sm:$0xf]  ;;  %v13467_v52 = vld [vmem:[#allocation28 + $0x134] sm:$0xf0] }
0x1010   : > { %v11904_v32 = vld [vmem:[#allocation28 + $0x178] sm:$0xf0] }
0x1011   : > { %v7113_v15 = vmax.f32 %v7097_v46, 0.0  ;;  %v11942_v46 = vld [vmem:[#allocation28 + $0x1c0] sm:$0xf] }
0x1012   : > { %v7049_v38 = vpop.f32.mrf.mxu3 }
0x1013   : > { %v16643_v60 = vpack.c.bf16 %v7113_v15, %v7111_v43  ;;  %v7050_v55 = vadd.f32 %v7049_v38, %v16613_v56  ;;  %v13485_v43 = vld [vmem:[#allocation28 + $0x1c4] sm:$0xf0]  ;;  %v11968_v15 = vld [vmem:[#allocation28 + $0x1f8] sm:$0xf0]  ;;  %v13474_v38 = vld [vmem:[#allocation28 + $0x174] sm:$0xf] }
0x1014   : > { %v7081_v31 = vpop.f32.mrf.mxu0 }
0x1015   : > { %v7096_v13 = vadd.f32 %v7050_v55, %v5672_v59  ;;  %v7082_v24 = vadd.f32 %v7081_v31, %v16609_v8  ;;  %v11971_v59 = vor.u32 %v13490_v48, %v11968_v15  ;;  %v11871_v55 = vor.u32 %v13467_v52, %v11870_v49  ;;  %v11862_v31 = vld [vmem:[#allocation28 + $0x120] sm:$0xf]  ;;  %v13440_v52 = vld [vmem:[#allocation28 + $0x64] sm:$0xf0]  ;;  %v11872_v48 = vld [vmem:[#allocation28 + $0x138] sm:$0xf0] }
0x1016   : > { %v11883_v49 = vor.u32 %v13468_v40, %v11880_v62  ;;  %v13458_v15 = vld [vmem:[#allocation28 + $0xf4] sm:$0xf0]  ;;  %v13433_v62 = vld [vmem:[#allocation28 + $0x34] sm:$0xf] }
0x1017   : > { %v7112_v58 = vmax.f32 %v7096_v13, 0.0  ;;  %v7099_v30 = vadd.f32 %v7082_v24, %v5675_v20  ;;  %v13465_v13 = vld [vmem:[#allocation28 + $0x124] sm:$0xf0]  ;;  %v11907_v24 = vor.u32 %v13474_v38, %v11904_v32  ;;  %7474 = vmatpush.bf16.msra.mxu0 %v11971_v59  ;;  %v13488_v20 = vld [vmem:[#allocation28 + $0x1e4] sm:$0xf]  ;;  %v12023_v38 = vor.u32 %v13440_v52, %v12022_v45 }
0x1018   : > { %v13478_v45 = vld [vmem:[#allocation28 + $0x194] sm:$0xf]  ;;  %v11990_v52 = vld [vmem:[#allocation28 + $0x20] sm:$0xf] }
0x1019   : > { %v16647_v44 = vpack.c.bf16 %v7112_v58, %v7110_v23  ;;  %v7115_v28 = vmax.f32 %v7099_v30, 0.0  ;;  %v11943_v23 = vor.u32 %v13485_v43, %v11942_v46  ;;  %v11934_v58 = vld [vmem:[#allocation28 + $0x1b0] sm:$0xf]  ;;  %v13472_v30 = vld [vmem:[#allocation28 + $0x164] sm:$0xf]  ;;  %v11939_v43 = vor.u32 %v13482_v63, %v11936_v0 }
0x101a   : > { %v7052_v2 = vpop.f32.mrf.mxu3  ;;  %v13477_v46 = vld [vmem:[#allocation28 + $0x184] sm:$0xf0]  ;;  %v12078_v0 = vld [vmem:[#allocation28 + $0xd0] sm:$0xf] }
0x101b   : > { %v7053_v54 = vadd.f32 %v7052_v2, %v16613_v56  ;;  %v13483_v2 = vld [vmem:[#allocation28 + $0x1b4] sm:$0xf0] }
0x101c   : > { %v7083_v4 = vpop.f32.mrf.mxu0 }
0x101d   : > { %v7084_v16 = vadd.f32 %v7083_v4, %v16609_v8  ;;  %v7098_v3 = vadd.f32 %v7053_v54, %v5674_v26  ;;  %v11960_v4 = vld [vmem:[#allocation28 + $0x1e8] sm:$0xf0]  ;;  %v11863_v54 = vor.u32 %v13465_v13, %v11862_v31  ;;  %v13463_v26 = vld [vmem:[#allocation28 + $0x114] sm:$0xf0] }
0x101e   : > { %v13438_v31 = vld [vmem:[#allocation28 + $0x54] sm:$0xf0] }
0x101f   : > { %v7101_v6 = vadd.f32 %v7084_v16, %v5677_v9  ;;  %v7114_v35 = vmax.f32 %v7098_v3, 0.0  ;;  %v11896_v9 = vld [vmem:[#allocation28 + $0x168] sm:$0xf0]  ;;  %v11963_v16 = vor.u32 %v13488_v20, %v11960_v4  ;;  %v13462_v20 = vld [vmem:[#allocation28 + $0x114] sm:$0xf] }
0x1020   : > { %v11899_v3 = vor.u32 %v13472_v30, %v11896_v9  ;;  %v11856_v4 = vld [vmem:[#allocation28 + $0x118] sm:$0xf0]  ;;  %v13460_v9 = vld [vmem:[#allocation28 + $0x104] sm:$0xf] }
0x1021   : > { %v7117_v42 = vmax.f32 %v7101_v6, 0.0  ;;  %v13486_v6 = vld [vmem:[#allocation28 + $0x1d4] sm:$0xf]  ;;  %7475 = vmatpush.bf16.msra.mxu0 %v11963_v16  ;;  %v11859_v30 = vor.u32 %v13462_v20, %v11856_v4  ;;  %v11848_v16 = vld [vmem:[#allocation28 + $0x108] sm:$0xf0] }
0x1022   : > { %v7054_v18 = vpop.f32.mrf.mxu3  ;;  %v13457_v4 = vld [vmem:[#allocation28 + $0xf4] sm:$0xf] }
0x1023   : > { %v16655_v36 = vpack.c.bf16 %v7117_v42, %v7115_v28  ;;  %v7055_v7 = vadd.f32 %v7054_v18, %v16613_v56  ;;  %v11894_v56 = vld [vmem:[#allocation28 + $0x160] sm:$0xf]  ;;  %v11854_v28 = vld [vmem:[#allocation28 + $0x110] sm:$0xf]  ;;  %v11935_v42 = vor.u32 %v13483_v2, %v11934_v58  ;;  %v11952_v18 = vld [vmem:[#allocation28 + $0x1d8] sm:$0xf0] }
0x1024   : > { %v11895_v34 = vor.u32 %v13473_v27, %v11894_v56  ;;  %v11855_v14 = vor.u32 %v13463_v26, %v11854_v28  ;;  %v11846_v56 = vld [vmem:[#allocation28 + $0x100] sm:$0xf]  ;;  %v13461_v27 = vld [vmem:[#allocation28 + $0x104] sm:$0xf0]  ;;  %v11864_v58 = vld [vmem:[#allocation28 + $0x128] sm:$0xf0]  ;;  %v11851_v28 = vor.u32 %v13460_v9, %v11848_v16 }
0x1025   : > { %v7100_v39 = vadd.f32 %v7055_v7, %v5676_v33  ;;  %7154 = vmatpush.bf16.msra.mxu2 %v16655_v36  ;;  %v11926_v33 = vld [vmem:[#allocation28 + $0x1a0] sm:$0xf]  ;;  %v13481_v7 = vld [vmem:[#allocation28 + $0x1a4] sm:$0xf0]  ;;  %v12062_v16 = vld [vmem:[#allocation28 + $0xb0] sm:$0xf] }
0x1026   : > { %v11927_v41 = vor.u32 %v13481_v7, %v11926_v33  ;;  %v13437_v33 = vld [vmem:[#allocation28 + $0x54] sm:$0xf]  ;;  %v12016_v7 = vld [vmem:[#allocation28 + $0x58] sm:$0xf0] }
0x1027   : > { %v7116_v8 = vmax.f32 %v7100_v39, 0.0  ;;  %v11955_v39 = vor.u32 %v13486_v6, %v11952_v18  ;;  %v12032_v6 = vld [vmem:[#allocation28 + $0x78] sm:$0xf0]  ;;  %v12024_v18 = vld [vmem:[#allocation28 + $0x68] sm:$0xf0] }
0x1029   : > { %v16660_v51 = vpack.c.bf16 %v7116_v8, %v7114_v35  ;;  %7155 = vmatpush.bf16.msra.mxu2 %v16643_v60  ;;  %v13470_v35 = vld [vmem:[#allocation28 + $0x154] sm:$0xf]  ;;  %v11888_v8 = vld [vmem:[#allocation28 + $0x158] sm:$0xf0]  ;;  %7476 = vmatpush.bf16.msra.mxu0 %v11955_v39  ;;  %v12019_v39 = vor.u32 %v13437_v33, %v12016_v7  ;;  %v13455_v33 = vld [vmem:[#allocation28 + $0xe4] sm:$0xf] }
0x102a   : > { %v12088_v7 = vld [vmem:[#allocation28 + $0xe8] sm:$0xf0] }
0x102b   : > { %7140 = vmatpush.bf16.msrb.mxu1 %v16660_v51  ;;  %7213 = vmatpush.bf16.msra.mxu3 %v16660_v51 }
0x102d   : > { %7156 = vmatpush.bf16.msra.mxu2 %v16631_v29 }
0x102f   : > { %7141 = vmatpush.bf16.msrb.mxu1 %v16647_v44  ;;  %7214 = vmatpush.bf16.msra.mxu3 %v16647_v44 }
0x1031   : > { %7157 = vmatpush.bf16.msra.mxu2 %v16619_v47 }
0x1033   : > { %7142 = vmatpush.bf16.msrb.mxu1 %v16635_v57  ;;  %7215 = vmatpush.bf16.msra.mxu3 %v16635_v57 }
0x1034   : > { %11837 = vmatmul.msk.bf16.vlgmr.msra.gmra.mxu2 %vm2184_vm0, %v13426_v10 }
0x1035   : > { %7432 = vmatpush.bf16.msrb.mxu2 %v11903_v50  ;;  %v11944_v50 = vld [vmem:[#allocation28 + $0x1c8] sm:$0xf0] }
0x1037   : > { %7143 = vmatpush.bf16.msrb.mxu1 %v16623_v19  ;;  %7216 = vmatpush.bf16.msra.mxu3 %v16623_v19 }
0x1039   : > { %7433 = vmatpush.bf16.msrb.mxu2 %v11895_v34  ;;  %v13442_v34 = vld [vmem:[#allocation28 + $0x74] sm:$0xf0] }
0x103a   : > { %11836 = vmatmul.msk.bf16.vlgmr.msrb.gmra.mxu1 %vm2184_vm0, %v13426_v10  ;;  %11842 = vmatmul.msk.bf16.vlgmr.msra.gmra.mxu3 %vm2184_vm0, %v16672_v25  ;;  %v11891_v10 = vor.u32 %v13470_v35, %v11888_v8  ;;  %v12031_v12 = vor.u32 %v13442_v34, %v12030_v37  ;;  %v12006_v35 = vld [vmem:[#allocation28 + $0x40] sm:$0xf]  ;;  %v13436_v8 = vld [vmem:[#allocation28 + $0x44] sm:$0xf0]  ;;  %v11928_v34 = vld [vmem:[#allocation28 + $0x1a8] sm:$0xf0] }
0x103b   : > { %7227 = vmatpush.bf16.msra.mxu1 %v16655_v36  ;;  %7446 = vmatpush.bf16.msrb.mxu3 %v11967_v17  ;;  %v11947_v17 = vor.u32 %v13484_v5, %v11944_v50  ;;  %v13435_v5 = vld [vmem:[#allocation28 + $0x44] sm:$0xf]  ;;  %v12008_v50 = vld [vmem:[#allocation28 + $0x48] sm:$0xf0]  ;;  %v13456_v37 = vld [vmem:[#allocation28 + $0xe4] sm:$0xf0] }
0x103d   : > { %7434 = vmatpush.bf16.msrb.mxu2 %v11887_v21  ;;  %v11847_v21 = vor.u32 %v13461_v27, %v11846_v56  ;;  %7477 = vmatpush.bf16.msra.mxu0 %v11947_v17  ;;  %v12011_v56 = vor.u32 %v13435_v5, %v12008_v50  ;;  %v12086_v27 = vld [vmem:[#allocation28 + $0xe0] sm:$0xf]  ;;  %v13448_v5 = vld [vmem:[#allocation28 + $0xa4] sm:$0xf0]  ;;  %v13453_v50 = vld [vmem:[#allocation28 + $0xd4] sm:$0xf] }
0x103f   : > { %7228 = vmatpush.bf16.msra.mxu1 %v16643_v60  ;;  %7447 = vmatpush.bf16.msrb.mxu3 %v11959_v53  ;;  %v13466_v53 = vld [vmem:[#allocation28 + $0x134] sm:$0xf] }
0x1040   : > { %v11875_v59 = vor.u32 %v13466_v53, %v11872_v48  ;;  %v13454_v53 = vld [vmem:[#allocation28 + $0xd4] sm:$0xf0]  ;;  %v11992_v48 = vld [vmem:[#allocation28 + $0x28] sm:$0xf0] }
0x1041   : > { %7435 = vmatpush.bf16.msrb.mxu2 %v11879_v22  ;;  %v11919_v22 = vor.u32 %v13479_v1, %v11918_v61  ;;  %7478 = vmatpush.bf16.msra.mxu0 %v11939_v43  ;;  %v11998_v61 = vld [vmem:[#allocation28 + $0x30] sm:$0xf]  ;;  %v13434_v1 = vld [vmem:[#allocation28 + $0x34] sm:$0xf0] }
0x1042   : > { %v11999_v40 = vor.u32 %v13434_v1, %v11998_v61  ;;  %v12072_v61 = vld [vmem:[#allocation28 + $0xc8] sm:$0xf0] }
0x1043   : > { %7229 = vmatpush.bf16.msra.mxu1 %v16631_v29  ;;  %7448 = vmatpush.bf16.msrb.mxu3 %v11951_v11  ;;  %v11910_v11 = vld [vmem:[#allocation28 + $0x180] sm:$0xf] }
0x1044   : > { %v11911_v32 = vor.u32 %v13477_v46, %v11910_v11  ;;  %v13432_v11 = vld [vmem:[#allocation28 + $0x24] sm:$0xf0]  ;;  %v13431_v46 = vld [vmem:[#allocation28 + $0x24] sm:$0xf] }
0x1045   : > { %7436 = vmatpush.bf16.msrb.mxu2 %v11871_v55  ;;  %v12014_v55 = vld [vmem:[#allocation28 + $0x50] sm:$0xf]  ;;  %v11991_v43 = vor.u32 %v13432_v11, %v11990_v52  ;;  %v12048_v52 = vld [vmem:[#allocation28 + $0x98] sm:$0xf0] }
0x1047   : > { %7230 = vmatpush.bf16.msra.mxu1 %v16619_v47  ;;  %7449 = vmatpush.bf16.msrb.mxu3 %v11943_v23  ;;  %v13464_v23 = vld [vmem:[#allocation28 + $0x124] sm:$0xf] }
0x1048   : > { %v11867_v2 = vor.u32 %v13464_v23, %v11864_v58  ;;  %v13430_v23 = vld [vmem:[#allocation28 + $0x14] sm:$0xf0]  ;;  %v13429_v58 = vld [vmem:[#allocation28 + $0x14] sm:$0xf] }
0x1049   : > { %7437 = vmatpush.bf16.msrb.mxu2 %v11863_v54  ;;  %v13441_v54 = vld [vmem:[#allocation28 + $0x74] sm:$0xf] }
0x104a   : > { %11843 = vmatmul.msk.bf16.vlgmr.msra.gmra.mxu1 %vm2184_vm0, %v16672_v25  ;;  %v12094_v25 = vld [vmem:[#allocation28 + $0xf0] sm:$0xf]  ;;  %v12035_v26 = vor.u32 %v13441_v54, %v12032_v6  ;;  %v13450_v54 = vld [vmem:[#allocation28 + $0xb4] sm:$0xf0] }
0x104b   : > { %7460 = vmatpush.bf16.msrb.mxu1 %v11907_v24  ;;  %7450 = vmatpush.bf16.msrb.mxu3 %v11935_v42  ;;  %v12095_v13 = vor.u32 %v13458_v15, %v12094_v25  ;;  %v12015_v24 = vor.u32 %v13438_v31, %v12014_v55  ;;  %v13439_v42 = vld [vmem:[#allocation28 + $0x64] sm:$0xf]  ;;  %v11995_v25 = vor.u32 %v13431_v46, %v11992_v48  ;;  %v12070_v15 = vld [vmem:[#allocation28 + $0xc0] sm:$0xf]  ;;  %v11912_v55 = vld [vmem:[#allocation28 + $0x188] sm:$0xf0] }
0x104c   : > { %v11982_v31 = vld [vmem:[#allocation28 + $0x10] sm:$0xf]  ;;  %v12063_v6 = vor.u32 %v13450_v54, %v12062_v16  ;;  %v12040_v48 = vld [vmem:[#allocation28 + $0x88] sm:$0xf0] }
0x104d   : > { %7438 = vmatpush.bf16.msrb.mxu2 %v11855_v14  ;;  %v12007_v14 = vor.u32 %v13436_v8, %v12006_v35  ;;  %v12091_v35 = vor.u32 %v13455_v33, %v12088_v7  ;;  %v12054_v8 = vld [vmem:[#allocation28 + $0xa0] sm:$0xf] }
0x104f   : > { %7461 = vmatpush.bf16.msrb.mxu1 %v11899_v3  ;;  %7451 = vmatpush.bf16.msrb.mxu3 %v11927_v41  ;;  %v12027_v3 = vor.u32 %v13439_v42, %v12024_v18  ;;  %v13480_v41 = vld [vmem:[#allocation28 + $0x1a4] sm:$0xf] }
0x1050   : > { %v11931_v17 = vor.u32 %v13480_v41, %v11928_v34  ;;  %v13427_v42 = vld [vmem:[#allocation28 + $0x4] sm:$0xf]  ;;  %v13446_v41 = vld [vmem:[#allocation28 + $0x94] sm:$0xf0] }
0x1051   : > { %7439 = vmatpush.bf16.msrb.mxu2 %v11847_v21  ;;  %v12000_v21 = vld [vmem:[#allocation28 + $0x38] sm:$0xf0]  ;;  %v13451_v34 = vld [vmem:[#allocation28 + $0xc4] sm:$0xf] }
0x1052   : > { %v12003_v63 = vor.u32 %v13433_v62, %v12000_v21  ;;  %7479 = vmatpush.bf16.msra.mxu0 %v11931_v17  ;;  %v12075_v1 = vor.u32 %v13451_v34, %v12072_v61  ;;  %v12038_v17 = vld [vmem:[#allocation28 + $0x80] sm:$0xf]  ;;  %v13449_v21 = vld [vmem:[#allocation28 + $0xb4] sm:$0xf] }
0x1053   : > { %7462 = vmatpush.bf16.msrb.mxu1 %v11891_v10  ;;  %7452 = vmatpush.bf16.msrb.mxu3 %v11919_v22  ;;  %v12087_v10 = vor.u32 %v13456_v37, %v12086_v27  ;;  %v11920_v22 = vld [vmem:[#allocation28 + $0x198] sm:$0xf0]  ;;  %v12046_v37 = vld [vmem:[#allocation28 + $0x90] sm:$0xf] }
0x1055   : > { %7648 = vmatpush.bf16.msra.mxu2 %v12031_v12  ;;  %v12079_v12 = vor.u32 %v13454_v53, %v12078_v0  ;;  %v13447_v53 = vld [vmem:[#allocation28 + $0xa4] sm:$0xf] }
0x1057   : > { %7463 = vmatpush.bf16.msrb.mxu1 %v11883_v49  ;;  %7453 = vmatpush.bf16.msrb.mxu3 %v11911_v32  ;;  %v11923_v49 = vor.u32 %v13478_v45, %v11920_v22 }
0x1059   : > { %7649 = vmatpush.bf16.msra.mxu2 %v12023_v38  ;;  %7480 = vmatpush.bf16.msra.mxu0 %v11923_v49  ;;  %v13452_v38 = vld [vmem:[#allocation28 + $0xc4] sm:$0xf0]  ;;  %v13445_v49 = vld [vmem:[#allocation28 + $0x94] sm:$0xf] }
0x105a   : > { %v12071_v32 = vor.u32 %v13452_v38, %v12070_v15  ;;  %v12051_v11 = vor.u32 %v13445_v49, %v12048_v52  ;;  %v12164_v38 = vld [vmem:[#allocation28 + $0x270] sm:$0xf]  ;;  %v12166_v49 = vld [vmem:[#allocation28 + $0x278] sm:$0xf0] }
0x105b   : > { %7464 = vmatpush.bf16.msrb.mxu1 %v11875_v59  ;;  %7662 = vmatpush.bf16.msra.mxu3 %v12095_v13  ;;  %v13476_v59 = vld [vmem:[#allocation28 + $0x184] sm:$0xf] }
0x105c   : > { %v11915_v13 = vor.u32 %v13476_v59, %v11912_v55 }
0x105d   : > { %7650 = vmatpush.bf16.msra.mxu2 %v12015_v24  ;;  %v11984_v24 = vld [vmem:[#allocation28 + $0x18] sm:$0xf0] }
0x105e   : > { %v11987_v20 = vor.u32 %v13429_v58, %v11984_v24  ;;  %7481 = vmatpush.bf16.msra.mxu0 %v11915_v13  ;;  %v12156_v13 = vld [vmem:[#allocation28 + $0x260] sm:$0xf] }
0x105f   : > { %7465 = vmatpush.bf16.msrb.mxu1 %v11867_v2  ;;  %7663 = vmatpush.bf16.msra.mxu3 %v12087_v10  ;;  %v11983_v2 = vor.u32 %v13430_v23, %v11982_v31  ;;  %v12047_v10 = vor.u32 %v13446_v41, %v12046_v37  ;;  %v13506_v23 = vld [vmem:[#allocation28 + $0x264] sm:$0xf0]  ;;  %v13496_v37 = vld [vmem:[#allocation28 + $0x214] sm:$0xf0]  ;;  %v12212_v41 = vld [vmem:[#allocation28 + $0x2d0] sm:$0xf] }
0x1060   : > { %v12157_v24 = vor.u32 %v13506_v23, %v12156_v13  ;;  %v13512_v13 = vld [vmem:[#allocation28 + $0x294] sm:$0xf0] }
0x1061   : > { %7651 = vmatpush.bf16.msra.mxu2 %v12007_v14  ;;  %v12055_v14 = vor.u32 %v13448_v5, %v12054_v8  ;;  %v13498_v8 = vld [vmem:[#allocation28 + $0x224] sm:$0xf0]  ;;  %v12220_v5 = vld [vmem:[#allocation28 + $0x2e0] sm:$0xf] }
0x1063   : > { %7466 = vmatpush.bf16.msrb.mxu1 %v11859_v30  ;;  %7664 = vmatpush.bf16.msra.mxu3 %v12079_v12  ;;  %v12096_v30 = vld [vmem:[#allocation28 + $0xf8] sm:$0xf0]  ;;  %v12056_v12 = vld [vmem:[#allocation28 + $0xa8] sm:$0xf0] }
0x1064   : > { %v12099_v9 = vor.u32 %v13457_v4, %v12096_v30  ;;  %v12059_v45 = vor.u32 %v13447_v53, %v12056_v12  ;;  %v12140_v30 = vld [vmem:[#allocation28 + $0x240] sm:$0xf]  ;;  %v12196_v12 = vld [vmem:[#allocation28 + $0x2b0] sm:$0xf] }
0x1065   : > { %7652 = vmatpush.bf16.msra.mxu2 %v11999_v40  ;;  %v13444_v40 = vld [vmem:[#allocation28 + $0x84] sm:$0xf0] }
0x1066   : > { %7690 = vmatpush.bf16.msrb.mxu0 %v12099_v9  ;;  %v12039_v62 = vor.u32 %v13444_v40, %v12038_v17  ;;  %v13502_v9 = vld [vmem:[#allocation28 + $0x244] sm:$0xf0]  ;;  %v12108_v17 = vld [vmem:[#allocation28 + $0x200] sm:$0xf] }
0x1067   : > { %7467 = vmatpush.bf16.msrb.mxu1 %v11851_v28  ;;  %7665 = vmatpush.bf16.msra.mxu3 %v12071_v32  ;;  %v11974_v28 = vld [vmem:[#allocation28] sm:$0xf]  ;;  %v13508_v32 = vld [vmem:[#allocation28 + $0x274] sm:$0xf0]  ;;  %v13494_v40 = vld [vmem:[#allocation28 + $0x204] sm:$0xf0] }
0x1068   : > { %v12165_v55 = vor.u32 %v13508_v32, %v12164_v38  ;;  %v13503_v32 = vld [vmem:[#allocation28 + $0x254] sm:$0xf] }
0x1069   : > { %7653 = vmatpush.bf16.msra.mxu2 %v11991_v43  ;;  %v13443_v43 = vld [vmem:[#allocation28 + $0x84] sm:$0xf] }
0x106a   : > { %7691 = vmatpush.bf16.msrb.mxu0 %v12091_v35 }
0x106b   : > { %7676 = vmatpush.bf16.msra.mxu1 %v12035_v26  ;;  %v13428_v26 = vld [vmem:[#allocation28 + $0x4] sm:$0xf0]  ;;  %7666 = vmatpush.bf16.msra.mxu3 %v12063_v6  ;;  %v12141_v6 = vor.u32 %v13502_v9, %v12140_v30  ;;  %v12230_v30 = vld [vmem:[#allocation28 + $0x2f8] sm:$0xf0] }
0x106c   : > { %v11975_v18 = vor.u32 %v13428_v26, %v11974_v28  ;;  %v12132_v28 = vld [vmem:[#allocation28 + $0x230] sm:$0xf]  ;;  %v13500_v26 = vld [vmem:[#allocation28 + $0x234] sm:$0xf0] }
0x106d   : > { %7654 = vmatpush.bf16.msra.mxu2 %v11983_v2  ;;  %v12148_v2 = vld [vmem:[#allocation28 + $0x250] sm:$0xf]  ;;  %v12133_v33 = vor.u32 %v13500_v26, %v12132_v28  ;;  %v12222_v26 = vld [vmem:[#allocation28 + $0x2e8] sm:$0xf0] }
0x106f   : > { %7677 = vmatpush.bf16.msra.mxu1 %v12027_v3  ;;  %v11976_v3 = vld [vmem:[#allocation28 + $0x8] sm:$0xf0]  ;;  %7667 = vmatpush.bf16.msra.mxu3 %v12055_v14  ;;  %v13522_v14 = vld [vmem:[#allocation28 + $0x2e4] sm:$0xf0] }
0x1071   : > { %7655 = vmatpush.bf16.msra.mxu2 %v11975_v18  ;;  %v13524_v18 = vld [vmem:[#allocation28 + $0x2f4] sm:$0xf0] }
0x1073   : > { %7678 = vmatpush.bf16.msra.mxu1 %v12019_v39  ;;  %v11979_v39 = vor.u32 %v13427_v42, %v11976_v3  ;;  %7668 = vmatpush.bf16.msra.mxu3 %v12047_v10  ;;  %v12228_v42 = vld [vmem:[#allocation28 + $0x2f0] sm:$0xf]  ;;  %v13520_v10 = vld [vmem:[#allocation28 + $0x2d4] sm:$0xf0] }
0x1074   : > { %v12229_v7 = vor.u32 %v13524_v18, %v12228_v42  ;;  %v13499_v18 = vld [vmem:[#allocation28 + $0x234] sm:$0xf] }
0x1077   : > { %7679 = vmatpush.bf16.msra.mxu1 %v12011_v56  ;;  %v12080_v56 = vld [vmem:[#allocation28 + $0xd8] sm:$0xf0]  ;;  %7669 = vmatpush.bf16.msra.mxu3 %v12039_v62  ;;  %v12204_v62 = vld [vmem:[#allocation28 + $0x2c0] sm:$0xf] }
0x1078   : > { %v12083_v27 = vor.u32 %v13453_v50, %v12080_v56  ;;  %v12221_v56 = vor.u32 %v13522_v14, %v12220_v5  ;;  %v12126_v5 = vld [vmem:[#allocation28 + $0x228] sm:$0xf0] }
0x107a   : > { %7692 = vmatpush.bf16.msrb.mxu0 %v12083_v27  ;;  %v12116_v27 = vld [vmem:[#allocation28 + $0x210] sm:$0xf] }
0x107b   : > { %7680 = vmatpush.bf16.msra.mxu1 %v12003_v63  ;;  %v12064_v63 = vld [vmem:[#allocation28 + $0xb8] sm:$0xf0]  ;;  %v12117_v61 = vor.u32 %v13496_v37, %v12116_v27  ;;  %v13495_v37 = vld [vmem:[#allocation28 + $0x214] sm:$0xf] }
0x107c   : > { %v12067_v0 = vor.u32 %v13449_v21, %v12064_v63  ;;  %v13518_v21 = vld [vmem:[#allocation28 + $0x2c4] sm:$0xf0] }
0x107d   : > { %v12205_v53 = vor.u32 %v13518_v21, %v12204_v62  ;;  %v12298_v21 = vld [vmem:[#allocation28 + $0x370] sm:$0xf] }
0x107e   : > { %7693 = vmatpush.bf16.msrb.mxu0 %v12075_v1  ;;  %v12213_v1 = vor.u32 %v13520_v10, %v12212_v41  ;;  %v12118_v41 = vld [vmem:[#allocation28 + $0x218] sm:$0xf0] }
0x107f   : > { %7681 = vmatpush.bf16.msra.mxu1 %v11995_v25  ;;  %v12043_v25 = vor.u32 %v13443_v43, %v12040_v48  ;;  %v13492_v43 = vld [vmem:[#allocation37 + $0x10] sm:$0xff]  ;;  %v12121_v10 = vor.u32 %v13495_v37, %v12118_v41  ;;  %v12330_v37 = vld [vmem:[#allocation28 + $0x3b0] sm:$0xf] }
0x1080   : > { %v13549_v41 = vld [vmem:[#allocation28 + $0x3b4] sm:$0xf0] }
0x1082   : > { %7694 = vmatpush.bf16.msrb.mxu0 %v12067_v0  ;;  %v12109_v0 = vor.u32 %v13494_v40, %v12108_v17  ;;  %v13493_v17 = vld [vmem:[#allocation28 + $0x204] sm:$0xf]  ;;  %v12110_v40 = vld [vmem:[#allocation28 + $0x208] sm:$0xf0] }
0x1083   : > { %7682 = vmatpush.bf16.msra.mxu1 %v11987_v20  ;;  %v13504_v20 = vld [vmem:[#allocation28 + $0x254] sm:$0xf0]  ;;  %v12113_v62 = vor.u32 %v13493_v17, %v12110_v40 }
0x1084   : > { %v12149_v4 = vor.u32 %v13504_v20, %v12148_v2  ;;  %v13510_v2 = vld [vmem:[#allocation28 + $0x284] sm:$0xf0] }
0x1086   : > { %7695 = vmatpush.bf16.msrb.mxu0 %v12059_v45  ;;  %v13516_v45 = vld [vmem:[#allocation28 + $0x2b4] sm:$0xf0] }
0x1087   : > { %7683 = vmatpush.bf16.msra.mxu1 %v11979_v39  ;;  %v12124_v39 = vld [vmem:[#allocation28 + $0x220] sm:$0xf]  ;;  %v12197_v48 = vor.u32 %v13516_v45, %v12196_v12  ;;  %v12190_v12 = vld [vmem:[#allocation28 + $0x2a8] sm:$0xf0] }
0x1088   : > { %v12125_v50 = vor.u32 %v13498_v8, %v12124_v39  ;;  %v12214_v39 = vld [vmem:[#allocation28 + $0x2d8] sm:$0xf0]  ;;  %v13497_v8 = vld [vmem:[#allocation28 + $0x224] sm:$0xf] }
0x1089   : > { %v12129_v14 = vor.u32 %v13497_v8, %v12126_v5  ;;  %v12250_v5 = vld [vmem:[#allocation28 + $0x310] sm:$0xf] }
0x108a   : > { %7696 = vmatpush.bf16.msrb.mxu0 %v12051_v11  ;;  %v13505_v11 = vld [vmem:[#allocation28 + $0x264] sm:$0xf] }
0x108e   : > { %7697 = vmatpush.bf16.msrb.mxu0 %v12043_v25  ;;  %v12188_v25 = vld [vmem:[#allocation28 + $0x2a0] sm:$0xf] }
0x10b7   : > { %v7145_v22 = vpop.f32.mrf.mxu1  ;;  %v7159_v3 = vpop.f32.mrf.mxu2 }
0x10bd   : > { %v7218_v46 = vpop.f32.mrf.mxu3 }
0x10bf   : > { %v7147_v15 = vpop.f32.mrf.mxu1  ;;  %v7161_v34 = vpop.f32.mrf.mxu2 }
0x10c0   : > { %v7164_v35 = vpack.c.bf16 %v7147_v15, %v7145_v22  ;;  %v7165_v63 = vpack.c.bf16 %v7161_v34, %v7159_v3  ;;  %v13507_v22 = vld [vmem:[#allocation28 + $0x274] sm:$0xf]  ;;  %v13514_v15 = vld [vmem:[#allocation28 + $0x2a4] sm:$0xf0]  ;;  %v12134_v3 = vld [vmem:[#allocation28 + $0x238] sm:$0xf0] }
0x10c1   : > { %v12169_v52 = vor.u32 %v13507_v22, %v12166_v49  ;;  %v13515_v34 = vld [vmem:[#allocation28 + $0x2b4] sm:$0xf]  ;;  %v12290_v22 = vld [vmem:[#allocation28 + $0x360] sm:$0xf]  ;;  %v13539_v49 = vld [vmem:[#allocation28 + $0x364] sm:$0xf0] }
0x10c5   : > { %v7220_v59 = vpop.f32.mrf.mxu3 }
0x10c6   : > { %v7237_v31 = vpack.c.bf16 %v7220_v59, %v7218_v46  ;;  %v12158_v46 = vld [vmem:[#allocation28 + $0x268] sm:$0xf0]  ;;  %v12150_v59 = vld [vmem:[#allocation28 + $0x258] sm:$0xf0] }
0x10c7   : > { %v7232_v58 = vpop.f32.mrf.mxu1  ;;  %v12161_v38 = vor.u32 %v13505_v11, %v12158_v46  ;;  %v12153_v23 = vor.u32 %v13503_v32, %v12150_v59  ;;  %v13511_v11 = vld [vmem:[#allocation28 + $0x294] sm:$0xf]  ;;  %v12182_v46 = vld [vmem:[#allocation28 + $0x298] sm:$0xf0]  ;;  %v12174_v32 = vld [vmem:[#allocation28 + $0x288] sm:$0xf0] }
0x10c8   : > { %7440 = vmatmul.bf16.vlgmr.msrb.gmra.mxu2 %v7237_v31  ;;  %7468 = vmatmul.bf16.vlgmr.msrb.gmra.mxu1 %v7237_v31  ;;  %v12180_v31 = vld [vmem:[#allocation28 + $0x290] sm:$0xf] }
0x10c9   : > { %7719 = vmatpush.bf16.msrb.mxu2 %v16660_v51  ;;  %7938 = vmatpush.bf16.msrb.mxu1 %v12165_v55  ;;  %v12189_v55 = vor.u32 %v13514_v15, %v12188_v25  ;;  %v13537_v25 = vld [vmem:[#allocation28 + $0x354] sm:$0xf0] }
0x10cd   : > { %7720 = vmatpush.bf16.msrb.mxu2 %v16647_v44  ;;  %7939 = vmatpush.bf16.msrb.mxu1 %v12157_v24  ;;  %v12172_v24 = vld [vmem:[#allocation28 + $0x280] sm:$0xf] }
0x10ce   : > { %v12173_v20 = vor.u32 %v13510_v2, %v12172_v24 }
0x10cf   : > { %v7234_v16 = vpop.f32.mrf.mxu1 }
0x10d0   : > { %v7238_v54 = vpack.c.bf16 %v7234_v16, %v7232_v58  ;;  %v12181_v58 = vor.u32 %v13512_v13, %v12180_v31  ;;  %v13501_v16 = vld [vmem:[#allocation28 + $0x244] sm:$0xf]  ;;  %v13557_v31 = vld [vmem:[#allocation28 + $0x3f4] sm:$0xf0] }
0x10d1   : > { %7721 = vmatpush.bf16.msrb.mxu2 %v16635_v57  ;;  %7940 = vmatpush.bf16.msrb.mxu1 %v12149_v4  ;;  %v13523_v4 = vld [vmem:[#allocation28 + $0x2f4] sm:$0xf] }
0x10d2   : > { %7454 = vmatmul.bf16.vlgmr.msrb.gmra.mxu3 %v7238_v54  ;;  %7482 = vmatmul.bf16.vlgmr.msra.gmra.mxu0 %v7238_v54  ;;  %v12233_v9 = vor.u32 %v13523_v4, %v12230_v30  ;;  %v12142_v54 = vld [vmem:[#allocation28 + $0x248] sm:$0xf0]  ;;  %v13555_v4 = vld [vmem:[#allocation28 + $0x3e4] sm:$0xf0] }
0x10d3   : > { %7733 = vmatpush.bf16.msrb.mxu3 %v16655_v36  ;;  %v12145_v28 = vor.u32 %v13501_v16, %v12142_v54  ;;  %v13533_v16 = vld [vmem:[#allocation28 + $0x334] sm:$0xf0] }
0x10d4   : > { %7980 = vmatpush.bf16.msra.mxu0 %v12233_v9  ;;  %v12266_v9 = vld [vmem:[#allocation28 + $0x330] sm:$0xf] }
0x10d5   : > { %7722 = vmatpush.bf16.msrb.mxu2 %v16623_v19  ;;  %7941 = vmatpush.bf16.msrb.mxu1 %v12141_v6  ;;  %v13521_v6 = vld [vmem:[#allocation28 + $0x2e4] sm:$0xf]  ;;  %v12267_v54 = vor.u32 %v13533_v16, %v12266_v9  ;;  %v12292_v9 = vld [vmem:[#allocation28 + $0x368] sm:$0xf0] }
0x10d6   : > { %v12225_v42 = vor.u32 %v13521_v6, %v12222_v26  ;;  %v12346_v6 = vld [vmem:[#allocation28 + $0x3d0] sm:$0xf] }
0x10d7   : > { %7734 = vmatpush.bf16.msrb.mxu3 %v16643_v60 }
0x10d8   : > { %7656 = vmatmul.bf16.vlgmr.msra.gmra.mxu2 %v7164_v35  ;;  %7684 = vmatmul.bf16.vlgmr.msra.gmra.mxu1 %v7164_v35 }
0x10d9   : > { %7942 = vmatpush.bf16.msrb.mxu1 %v12133_v33  ;;  %7952 = vmatpush.bf16.msra.mxu2 %v12229_v7  ;;  %v12137_v33 = vor.u32 %v13499_v18, %v12134_v3  ;;  %v13519_v7 = vld [vmem:[#allocation28 + $0x2d4] sm:$0xf]  ;;  %v12258_v18 = vld [vmem:[#allocation28 + $0x320] sm:$0xf]  ;;  %v13531_v3 = vld [vmem:[#allocation28 + $0x324] sm:$0xf0] }
0x10da   : > { %7981 = vmatpush.bf16.msra.mxu0 %v12225_v42  ;;  %v12217_v35 = vor.u32 %v13519_v7, %v12214_v39  ;;  %v12338_v39 = vld [vmem:[#allocation28 + $0x3c0] sm:$0xf] }
0x10db   : > { %7735 = vmatpush.bf16.msrb.mxu3 %v16631_v29 }
0x10dd   : > { %7943 = vmatpush.bf16.msrb.mxu1 %v12125_v50  ;;  %7953 = vmatpush.bf16.msra.mxu2 %v12221_v56  ;;  %v13517_v50 = vld [vmem:[#allocation28 + $0x2c4] sm:$0xf]  ;;  %v12206_v56 = vld [vmem:[#allocation28 + $0x2c8] sm:$0xf0] }
0x10de   : > { %7982 = vmatpush.bf16.msra.mxu0 %v12217_v35  ;;  %v12209_v27 = vor.u32 %v13517_v50, %v12206_v56  ;;  %v13551_v35 = vld [vmem:[#allocation28 + $0x3c4] sm:$0xf0] }
0x10df   : > { %7736 = vmatpush.bf16.msrb.mxu3 %v16619_v47  ;;  %v12339_v8 = vor.u32 %v13551_v35, %v12338_v39 }
0x10e1   : > { %7944 = vmatpush.bf16.msrb.mxu1 %v12117_v61  ;;  %7954 = vmatpush.bf16.msra.mxu2 %v12213_v1  ;;  %v12198_v61 = vld [vmem:[#allocation28 + $0x2b8] sm:$0xf0] }
0x10e2   : > { %7670 = vmatmul.bf16.vlgmr.msra.gmra.mxu3 %v7165_v63  ;;  %7698 = vmatmul.bf16.vlgmr.msrb.gmra.mxu0 %v7165_v63  ;;  %v12201_v1 = vor.u32 %v13515_v34, %v12198_v61  ;;  %v13541_v63 = vld [vmem:[#allocation28 + $0x374] sm:$0xf0]  ;;  %v12242_v61 = vld [vmem:[#allocation28 + $0x300] sm:$0xf] }
0x10e3   : > { %7966 = vmatpush.bf16.msra.mxu3 %v12169_v52  ;;  %7983 = vmatpush.bf16.msra.mxu0 %v12209_v27  ;;  %v12291_v52 = vor.u32 %v13539_v49, %v12290_v22  ;;  %v12314_v22 = vld [vmem:[#allocation28 + $0x390] sm:$0xf]  ;;  %v13545_v49 = vld [vmem:[#allocation28 + $0x394] sm:$0xf0] }
0x10e5   : > { %7945 = vmatpush.bf16.msrb.mxu1 %v12109_v0  ;;  %7955 = vmatpush.bf16.msra.mxu2 %v12205_v53  ;;  %v12299_v0 = vor.u32 %v13541_v63, %v12298_v21  ;;  %v13513_v53 = vld [vmem:[#allocation28 + $0x2a4] sm:$0xf]  ;;  %v12322_v21 = vld [vmem:[#allocation28 + $0x3a0] sm:$0xf]  ;;  %v13547_v63 = vld [vmem:[#allocation28 + $0x3a4] sm:$0xf0] }
0x10e6   : > { %v12193_v45 = vor.u32 %v13513_v53, %v12190_v12  ;;  %v12323_v12 = vor.u32 %v13547_v63, %v12322_v21  ;;  %v13550_v21 = vld [vmem:[#allocation28 + $0x3c4] sm:$0xf]  ;;  %v12340_v63 = vld [vmem:[#allocation28 + $0x3c8] sm:$0xf0] }
0x10e7   : > { %7967 = vmatpush.bf16.msra.mxu3 %v12161_v38  ;;  %7984 = vmatpush.bf16.msra.mxu0 %v12201_v1  ;;  %v13509_v38 = vld [vmem:[#allocation28 + $0x284] sm:$0xf]  ;;  %v13527_v1 = vld [vmem:[#allocation28 + $0x304] sm:$0xf0] }
0x10e8   : > { %12104 = vmatmul.msk.bf16.vlgmr.msrb.gmra.mxu2 %vm2184_vm0, %v13492_v43  ;;  %v12177_v59 = vor.u32 %v13509_v38, %v12174_v32  ;;  %v12243_v17 = vor.u32 %v13527_v1, %v12242_v61  ;;  %v12348_v61 = vld [vmem:[#allocation28 + $0x3d8] sm:$0xf0] }
0x10e9   : > { %8013 = vmatpush.bf16.msra.mxu1 %v16660_v51  ;;  %7956 = vmatpush.bf16.msra.mxu2 %v12197_v48  ;;  %v12282_v48 = vld [vmem:[#allocation28 + $0x350] sm:$0xf] }
0x10ea   : > { %v12283_v15 = vor.u32 %v13537_v25, %v12282_v48  ;;  %v12306_v48 = vld [vmem:[#allocation28 + $0x380] sm:$0xf]  ;;  %v13543_v25 = vld [vmem:[#allocation28 + $0x384] sm:$0xf0] }
0x10eb   : > { %7968 = vmatpush.bf16.msra.mxu3 %v12153_v23  ;;  %7985 = vmatpush.bf16.msra.mxu0 %v12193_v45  ;;  %v12274_v23 = vld [vmem:[#allocation28 + $0x340] sm:$0xf] }
0x10ed   : > { %8014 = vmatpush.bf16.msra.mxu1 %v16647_v44  ;;  %7957 = vmatpush.bf16.msra.mxu2 %v12189_v55  ;;  %v12362_v55 = vld [vmem:[#allocation28 + $0x3f0] sm:$0xf] }
0x10ee   : > { %v12363_v13 = vor.u32 %v13557_v31, %v12362_v55 }
0x10ef   : > { %7969 = vmatpush.bf16.msra.mxu3 %v12145_v28  ;;  %v13553_v28 = vld [vmem:[#allocation28 + $0x3d4] sm:$0xf0] }
0x10f0   : > { %v12347_v26 = vor.u32 %v13553_v28, %v12346_v6  ;;  %v13536_v6 = vld [vmem:[#allocation28 + $0x354] sm:$0xf]  ;;  %v12284_v28 = vld [vmem:[#allocation28 + $0x358] sm:$0xf0] }
0x10f1   : > { %8015 = vmatpush.bf16.msra.mxu1 %v16635_v57  ;;  %7958 = vmatpush.bf16.msra.mxu2 %v12181_v58  ;;  %v13535_v58 = vld [vmem:[#allocation28 + $0x344] sm:$0xf0] }
0x10f2   : > { %12105 = vmatmul.msk.bf16.vlgmr.msrb.gmra.mxu3 %vm2184_vm0, %v13492_v43  ;;  %v12185_v43 = vor.u32 %v13511_v11, %v12182_v46  ;;  %v12275_v24 = vor.u32 %v13535_v58, %v12274_v23  ;;  %v13540_v58 = vld [vmem:[#allocation28 + $0x374] sm:$0xf] }
0x10f3   : > { %7970 = vmatpush.bf16.msra.mxu3 %v12137_v33  ;;  %v12259_v33 = vor.u32 %v13531_v3, %v12258_v18  ;;  %v12287_v18 = vor.u32 %v13536_v6, %v12284_v28  ;;  %v13534_v3 = vld [vmem:[#allocation28 + $0x344] sm:$0xf]  ;;  %v13544_v6 = vld [vmem:[#allocation28 + $0x394] sm:$0xf]  ;;  %v12316_v28 = vld [vmem:[#allocation28 + $0x398] sm:$0xf0] }
0x10f4   : > { %7986 = vmatpush.bf16.msra.mxu0 %v12185_v43 }
0x10f5   : > { %8016 = vmatpush.bf16.msra.mxu1 %v16623_v19  ;;  %7959 = vmatpush.bf16.msra.mxu2 %v12173_v20  ;;  %v12354_v20 = vld [vmem:[#allocation28 + $0x3e0] sm:$0xf] }
0x10f6   : > { %v12355_v30 = vor.u32 %v13555_v4, %v12354_v20 }
0x10f7   : > { %7971 = vmatpush.bf16.msra.mxu3 %v12129_v14  ;;  %v13529_v14 = vld [vmem:[#allocation28 + $0x314] sm:$0xf0] }
0x10f8   : > { %7987 = vmatpush.bf16.msra.mxu0 %v12177_v59  ;;  %v12251_v56 = vor.u32 %v13529_v14, %v12250_v5  ;;  %v13554_v5 = vld [vmem:[#allocation28 + $0x3e4] sm:$0xf]  ;;  %v12356_v14 = vld [vmem:[#allocation28 + $0x3e8] sm:$0xf0] }
0x10f9   : > { %8027 = vmatpush.bf16.msrb.mxu2 %v16655_v36 }
0x10fb   : > { %7972 = vmatpush.bf16.msra.mxu3 %v12121_v10  ;;  %v12331_v10 = vor.u32 %v13549_v41, %v12330_v37  ;;  %v12359_v37 = vor.u32 %v13554_v5, %v12356_v14  ;;  %v13525_v41 = vld [vmem:[#allocation37 + $0x18] sm:$0xff]  ;;  %v13566_v5 = vld [vmem:[#allocation28 + $0x434] sm:$0xf0]  ;;  %v12496_v14 = vld [vmem:[#allocation28 + $0x4f0] sm:$0xf] }
0x10fc   : > { %8246 = vmatpush.bf16.msrb.mxu0 %v12363_v13 }
0x10fd   : > { %8028 = vmatpush.bf16.msrb.mxu2 %v16643_v60 }
0x10ff   : > { %7973 = vmatpush.bf16.msra.mxu3 %v12113_v62 }
0x1100   : > { %8247 = vmatpush.bf16.msrb.mxu0 %v12355_v30  ;;  %v13538_v30 = vld [vmem:[#allocation28 + $0x364] sm:$0xf] }
0x1101   : > { %8029 = vmatpush.bf16.msrb.mxu2 %v16631_v29 }
0x1103   : > { %8232 = vmatpush.bf16.msrb.mxu3 %v12299_v0 }
0x1104   : > { %8248 = vmatpush.bf16.msrb.mxu0 %v12347_v26  ;;  %v13556_v26 = vld [vmem:[#allocation28 + $0x3f4] sm:$0xf] }
0x1105   : > { %8030 = vmatpush.bf16.msrb.mxu2 %v16619_v47 }
0x1107   : > { %8233 = vmatpush.bf16.msrb.mxu3 %v12291_v52  ;;  %v12315_v52 = vor.u32 %v13545_v49, %v12314_v22  ;;  %v12343_v22 = vor.u32 %v13550_v21, %v12340_v63  ;;  %v12480_v21 = vld [vmem:[#allocation28 + $0x4d0] sm:$0xf] }
0x1108   : > { %8249 = vmatpush.bf16.msrb.mxu0 %v12339_v8 }
0x110b   : > { %8234 = vmatpush.bf16.msrb.mxu3 %v12283_v15  ;;  %v12307_v15 = vor.u32 %v13543_v25, %v12306_v48  ;;  %v13574_v48 = vld [vmem:[#allocation28 + $0x474] sm:$0xf0] }
0x110c   : > { %8250 = vmatpush.bf16.msrb.mxu0 %v12331_v10  ;;  %v13552_v10 = vld [vmem:[#allocation28 + $0x3d4] sm:$0xf] }
0x110f   : > { %8235 = vmatpush.bf16.msrb.mxu3 %v12275_v24  ;;  %v12300_v24 = vld [vmem:[#allocation28 + $0x378] sm:$0xf0] }
0x1110   : > { %8251 = vmatpush.bf16.msrb.mxu0 %v12323_v12  ;;  %v12303_v20 = vor.u32 %v13540_v58, %v12300_v24  ;;  %v12252_v12 = vld [vmem:[#allocation28 + $0x318] sm:$0xf0]  ;;  %v12424_v58 = vld [vmem:[#allocation28 + $0x460] sm:$0xf]  ;;  %v13572_v24 = vld [vmem:[#allocation28 + $0x464] sm:$0xf0] }
0x1113   : > { %8236 = vmatpush.bf16.msrb.mxu3 %v12267_v54  ;;  %v12295_v54 = vor.u32 %v13538_v30, %v12292_v9  ;;  %v12416_v30 = vld [vmem:[#allocation28 + $0x450] sm:$0xf]  ;;  %v13570_v9 = vld [vmem:[#allocation28 + $0x454] sm:$0xf0] }
0x1114   : > { %8252 = vmatpush.bf16.msrb.mxu0 %v12315_v52  ;;  %v13526_v52 = vld [vmem:[#allocation28 + $0x304] sm:$0xf] }
0x1117   : > { %8237 = vmatpush.bf16.msrb.mxu3 %v12259_v33  ;;  %v12276_v33 = vld [vmem:[#allocation28 + $0x348] sm:$0xf0] }
0x1118   : > { %8253 = vmatpush.bf16.msrb.mxu0 %v12307_v15 }
0x111b   : > { %8238 = vmatpush.bf16.msrb.mxu3 %v12251_v56  ;;  %v13532_v56 = vld [vmem:[#allocation28 + $0x334] sm:$0xf] }
0x111f   : > { %8239 = vmatpush.bf16.msrb.mxu3 %v12243_v17  ;;  %v13530_v17 = vld [vmem:[#allocation28 + $0x324] sm:$0xf] }
0x1145   : > { %v7469_v2 = vpop.f32.mrf.mxu1 }
0x114b   : > { %v7441_v42 = vpop.f32.mrf.mxu2 }
0x114d   : > { %v16703_v7 = vpop.f32.mrf.mxu1 }
0x114f   : > { %v7483_v50 = vpop.f32.mrf.mxu0 }
0x1150   : > { %v7484_v27 = vadd.f32 %v7483_v50, %v7469_v2  ;;  %v12279_v50 = vor.u32 %v13534_v3, %v12276_v33  ;;  %v13542_v33 = vld [vmem:[#allocation28 + $0x384] sm:$0xf] }
0x1153   : > { %v16705_v34 = vpop.f32.mrf.mxu2 }
0x1155   : > { %v7455_v40 = vpop.f32.mrf.mxu3  ;;  %v7685_v62 = vpop.f32.mrf.mxu1 }
0x1156   : > { %v7456_v0 = vadd.f32 %v7455_v40, %v7441_v42  ;;  %v7686_v53 = vadd.f32 %v7685_v62, %v7484_v27  ;;  %v12364_v42 = vld [vmem:[#allocation28 + $0x3f8] sm:$0xf0]  ;;  %v12260_v40 = vld [vmem:[#allocation28 + $0x328] sm:$0xf0]  ;;  %v12351_v62 = vor.u32 %v13552_v10, %v12348_v61  ;;  %v12488_v10 = vld [vmem:[#allocation28 + $0x4e0] sm:$0xf] }
0x1157   : > { %v16707_v45 = vpop.f32.mrf.mxu0  ;;  %v12367_v35 = vor.u32 %v13556_v26, %v12364_v42  ;;  %v12268_v27 = vld [vmem:[#allocation28 + $0x338] sm:$0xf0]  ;;  %v12319_v26 = vor.u32 %v13544_v6, %v12316_v28  ;;  %v12408_v42 = vld [vmem:[#allocation28 + $0x440] sm:$0xf] }
0x1158   : > { %v12271_v1 = vor.u32 %v13532_v56, %v12268_v27  ;;  %v13590_v56 = vld [vmem:[#allocation28 + $0x4f4] sm:$0xf0] }
0x1159   : > { %v12497_v27 = vor.u32 %v13590_v56, %v12496_v14  ;;  %v13573_v56 = vld [vmem:[#allocation28 + $0x474] sm:$0xf] }
0x115b   : > { %v7657_v11 = vpop.f32.mrf.mxu2 }
0x115c   : > { %v7658_v46 = vadd.f32 %v7657_v11, %v7456_v0  ;;  %v12263_v0 = vor.u32 %v13530_v17, %v12260_v40  ;;  %v12244_v11 = vld [vmem:[#allocation28 + $0x308] sm:$0xf0]  ;;  %v12384_v40 = vld [vmem:[#allocation28 + $0x410] sm:$0xf] }
0x115d   : > { %v16709_v43 = vpop.f32.mrf.mxu3  ;;  %v12247_v25 = vor.u32 %v13526_v52, %v12244_v11  ;;  %v12472_v52 = vld [vmem:[#allocation28 + $0x4c0] sm:$0xf] }
0x115f   : > { %v7699_v38 = vpop.f32.mrf.mxu0 }
0x1160   : > { %v16711_v32 = vadd.f32 %v7699_v38, %v7686_v53  ;;  %v13528_v53 = vld [vmem:[#allocation28 + $0x314] sm:$0xf] }
0x1161   : > { %v12255_v49 = vor.u32 %v13528_v53, %v12252_v12  ;;  %v13548_v38 = vld [vmem:[#allocation28 + $0x3b4] sm:$0xf]  ;;  %v16729_v12 = vpop.f32.mrf.mxu1 }
0x1163   : > { %v16713_v59 = vpop.f32.mrf.mxu2 }
0x1165   : > { %v7671_v55 = vpop.f32.mrf.mxu3 }
0x1166   : > { %v16715_v31 = vadd.f32 %v7671_v55, %v7658_v46  ;;  %v12432_v46 = vld [vmem:[#allocation28 + $0x470] sm:$0xf]  ;;  %v12332_v55 = vld [vmem:[#allocation28 + $0x3b8] sm:$0xf0] }
0x1167   : > { %v12433_v15 = vor.u32 %v13574_v48, %v12432_v46  ;;  %v13584_v46 = vld [vmem:[#allocation28 + $0x4c4] sm:$0xf0] }
0x1168   : > { %v12473_v48 = vor.u32 %v13584_v46, %v12472_v52  ;;  %v13558_v52 = vld [vmem:[#allocation37 + $0x20] sm:$0xff] }
0x116b   : > { %v7724_v13 = vpop.f32.mrf.mxu2 }
0x116d   : > { %v16717_v23 = vpop.f32.mrf.mxu3 }
0x1173   : > { %v7726_v2 = vpop.f32.mrf.mxu2 }
0x1174   : > { %v7743_v4 = vpack.c.bf16 %v7726_v2, %v7724_v13  ;;  %v12335_v13 = vor.u32 %v13548_v38, %v12332_v55  ;;  %v13546_v2 = vld [vmem:[#allocation28 + $0x3a4] sm:$0xf] }
0x1175   : > { %v7738_v16 = vpop.f32.mrf.mxu3 }
0x1176   : > { %7946 = vmatmul.bf16.vlgmr.msrb.gmra.mxu1 %v7743_v4  ;;  %7974 = vmatmul.bf16.vlgmr.msra.gmra.mxu3 %v7743_v4  ;;  %v12324_v4 = vld [vmem:[#allocation28 + $0x3a8] sm:$0xf0] }
0x1177   : > { %8307 = vmatpush.bf16.msra.mxu3 %v16660_v51  ;;  %8260 = vmatpush.bf16.msrb.mxu1 %v12303_v20  ;;  %v12425_v20 = vor.u32 %v13572_v24, %v12424_v58  ;;  %v13580_v58 = vld [vmem:[#allocation28 + $0x4a4] sm:$0xf0] }
0x117b   : > { %8308 = vmatpush.bf16.msra.mxu3 %v16647_v44  ;;  %8261 = vmatpush.bf16.msrb.mxu1 %v12295_v54  ;;  %v12417_v54 = vor.u32 %v13570_v9, %v12416_v30 }
0x117d   : > { %v7740_v39 = vpop.f32.mrf.mxu3 }
0x117e   : > { %v7744_v8 = vpack.c.bf16 %v7740_v39, %v7738_v16  ;;  %v12327_v16 = vor.u32 %v13546_v2, %v12324_v4  ;;  %v12308_v39 = vld [vmem:[#allocation28 + $0x388] sm:$0xf0]  ;;  %v16731_v2 = vpop.f32.mrf.mxu0  ;;  %v13578_v4 = vld [vmem:[#allocation28 + $0x494] sm:$0xf0] }
0x117f   : > { %8309 = vmatpush.bf16.msra.mxu3 %v16635_v57  ;;  %8262 = vmatpush.bf16.msrb.mxu1 %v12287_v18  ;;  %v13568_v18 = vld [vmem:[#allocation28 + $0x444] sm:$0xf0] }
0x1180   : > { %7960 = vmatmul.bf16.vlgmr.msra.gmra.mxu2 %v7744_v8  ;;  %7988 = vmatmul.bf16.vlgmr.msra.gmra.mxu0 %v7744_v8  ;;  %v12409_v3 = vor.u32 %v13568_v18, %v12408_v42  ;;  %v12400_v8 = vld [vmem:[#allocation28 + $0x430] sm:$0xf] }
0x1181   : > { %8321 = vmatpush.bf16.msra.mxu0 %v16655_v36  ;;  %8274 = vmatpush.bf16.msra.mxu2 %v12367_v35  ;;  %v12311_v35 = vor.u32 %v13542_v33, %v12308_v39 }
0x1183   : > { %8310 = vmatpush.bf16.msra.mxu3 %v16623_v19  ;;  %8263 = vmatpush.bf16.msrb.mxu1 %v12279_v50  ;;  %v12401_v50 = vor.u32 %v13566_v5, %v12400_v8 }
0x1185   : > { %8322 = vmatpush.bf16.msra.mxu0 %v16643_v60  ;;  %8275 = vmatpush.bf16.msra.mxu2 %v12359_v37  ;;  %v12392_v37 = vld [vmem:[#allocation28 + $0x420] sm:$0xf] }
0x1186   : > { %12238 = vmatmul.msk.bf16.vlgmr.msra.gmra.mxu1 %vm2184_vm0, %v13525_v41 }
0x1187   : > { %8264 = vmatpush.bf16.msrb.mxu1 %v12271_v1  ;;  %v13588_v1 = vld [vmem:[#allocation28 + $0x4e4] sm:$0xf0] }
0x1188   : > { %v12489_v17 = vor.u32 %v13588_v1, %v12488_v10  ;;  %v12418_v1 = vld [vmem:[#allocation28 + $0x458] sm:$0xf0] }
0x1189   : > { %8323 = vmatpush.bf16.msra.mxu0 %v16631_v29  ;;  %8276 = vmatpush.bf16.msra.mxu2 %v12351_v62  ;;  %v13562_v62 = vld [vmem:[#allocation28 + $0x414] sm:$0xf0] }
0x118a   : > { %v12385_v63 = vor.u32 %v13562_v62, %v12384_v40  ;;  %v13567_v40 = vld [vmem:[#allocation28 + $0x444] sm:$0xf]  ;;  %v12410_v62 = vld [vmem:[#allocation28 + $0x448] sm:$0xf0] }
0x118b   : > { %8265 = vmatpush.bf16.msrb.mxu1 %v12263_v0  ;;  %v13586_v0 = vld [vmem:[#allocation28 + $0x4d4] sm:$0xf0] }
0x118c   : > { %v12481_v53 = vor.u32 %v13586_v0, %v12480_v21  ;;  %v13589_v21 = vld [vmem:[#allocation28 + $0x4f4] sm:$0xf]  ;;  %v12413_v0 = vor.u32 %v13567_v40, %v12410_v62  ;;  %v13603_v40 = vld [vmem:[#allocation28 + $0x554] sm:$0xf0] }
0x118d   : > { %8324 = vmatpush.bf16.msra.mxu0 %v16619_v47  ;;  %8277 = vmatpush.bf16.msra.mxu2 %v12343_v22  ;;  %v12376_v22 = vld [vmem:[#allocation28 + $0x400] sm:$0xf] }
0x118f   : > { %8266 = vmatpush.bf16.msrb.mxu1 %v12255_v49  ;;  %v13560_v49 = vld [vmem:[#allocation28 + $0x404] sm:$0xf0] }
0x1190   : > { %12239 = vmatmul.msk.bf16.vlgmr.msrb.gmra.mxu2 %vm2184_vm0, %v13525_v41  ;;  %v13564_v41 = vld [vmem:[#allocation28 + $0x424] sm:$0xf0]  ;;  %v12377_v11 = vor.u32 %v13560_v49, %v12376_v22  ;;  %v12402_v22 = vld [vmem:[#allocation28 + $0x438] sm:$0xf0] }
0x1191   : > { %8278 = vmatpush.bf16.msra.mxu2 %v12335_v13  ;;  %v12393_v61 = vor.u32 %v13564_v41, %v12392_v37  ;;  %v12456_v13 = vld [vmem:[#allocation28 + $0x4a0] sm:$0xf]  ;;  %v13571_v37 = vld [vmem:[#allocation28 + $0x464] sm:$0xf]  ;;  %v12426_v41 = vld [vmem:[#allocation28 + $0x468] sm:$0xf0] }
0x1192   : > { %v12457_v24 = vor.u32 %v13580_v58, %v12456_v13  ;;  %v12429_v10 = vor.u32 %v13571_v37, %v12426_v41  ;;  %v13585_v58 = vld [vmem:[#allocation28 + $0x4d4] sm:$0xf]  ;;  %v12458_v37 = vld [vmem:[#allocation28 + $0x4a8] sm:$0xf0]  ;;  %v12558_v41 = vld [vmem:[#allocation28 + $0x560] sm:$0xf] }
0x1193   : > { %8267 = vmatpush.bf16.msrb.mxu1 %v12247_v25  ;;  %v12464_v25 = vld [vmem:[#allocation28 + $0x4b0] sm:$0xf] }
0x1195   : > { %8279 = vmatpush.bf16.msra.mxu2 %v12327_v16  ;;  %v12440_v16 = vld [vmem:[#allocation28 + $0x480] sm:$0xf] }
0x1197   : > { %8526 = vmatpush.bf16.msra.mxu1 %v12433_v15  ;;  %v13582_v15 = vld [vmem:[#allocation28 + $0x4b4] sm:$0xf0] }
0x1198   : > { %v12465_v38 = vor.u32 %v13582_v15, %v12464_v25  ;;  %v12490_v25 = vld [vmem:[#allocation28 + $0x4e8] sm:$0xf0] }
0x1199   : > { %8280 = vmatpush.bf16.msra.mxu2 %v12319_v26 }
0x119b   : > { %8527 = vmatpush.bf16.msra.mxu1 %v12425_v20  ;;  %v12448_v20 = vld [vmem:[#allocation28 + $0x490] sm:$0xf] }
0x119c   : > { %v12449_v30 = vor.u32 %v13578_v4, %v12448_v20  ;;  %v13561_v4 = vld [vmem:[#allocation28 + $0x414] sm:$0xf] }
0x119d   : > { %8281 = vmatpush.bf16.msra.mxu2 %v12311_v35 }
0x119f   : > { %8528 = vmatpush.bf16.msra.mxu1 %v12417_v54  ;;  %v13576_v54 = vld [vmem:[#allocation28 + $0x484] sm:$0xf0] }
0x11a0   : > { %v12441_v6 = vor.u32 %v13576_v54, %v12440_v16  ;;  %v13583_v16 = vld [vmem:[#allocation28 + $0x4c4] sm:$0xf]  ;;  %v12474_v54 = vld [vmem:[#allocation28 + $0x4c8] sm:$0xf0] }
0x11a1   : > { %8540 = vmatpush.bf16.msrb.mxu2 %v12497_v27  ;;  %v12434_v27 = vld [vmem:[#allocation28 + $0x478] sm:$0xf0] }
0x11a3   : > { %8529 = vmatpush.bf16.msra.mxu1 %v12409_v3 }
0x11a5   : > { %8541 = vmatpush.bf16.msrb.mxu2 %v12489_v17 }
0x11a7   : > { %8530 = vmatpush.bf16.msra.mxu1 %v12401_v50 }
0x11a9   : > { %8542 = vmatpush.bf16.msrb.mxu2 %v12481_v53  ;;  %v13565_v53 = vld [vmem:[#allocation28 + $0x434] sm:$0xf] }
0x11aa   : > { %v12405_v15 = vor.u32 %v13565_v53, %v12402_v22  ;;  %v12630_v22 = vld [vmem:[#allocation28 + $0x5f0] sm:$0xf] }
0x11ab   : > { %8531 = vmatpush.bf16.msra.mxu1 %v12393_v61  ;;  %v13569_v61 = vld [vmem:[#allocation28 + $0x454] sm:$0xf] }
0x11ac   : > { %v12421_v17 = vor.u32 %v13569_v61, %v12418_v1  ;;  %v13577_v61 = vld [vmem:[#allocation28 + $0x494] sm:$0xf] }
0x11ad   : > { %8543 = vmatpush.bf16.msrb.mxu2 %v12473_v48  ;;  %v13587_v48 = vld [vmem:[#allocation28 + $0x4e4] sm:$0xf] }
0x11ae   : > { %v12493_v13 = vor.u32 %v13587_v48, %v12490_v25  ;;  %v12622_v25 = vld [vmem:[#allocation28 + $0x5e0] sm:$0xf] }
0x11af   : > { %8532 = vmatpush.bf16.msra.mxu1 %v12385_v63  ;;  %v12498_v63 = vld [vmem:[#allocation28 + $0x4f8] sm:$0xf0] }
0x11b0   : > { %v12501_v46 = vor.u32 %v13589_v21, %v12498_v63  ;;  %v13575_v21 = vld [vmem:[#allocation28 + $0x484] sm:$0xf]  ;;  %v12442_v63 = vld [vmem:[#allocation28 + $0x488] sm:$0xf0] }
0x11b1   : > { %8544 = vmatpush.bf16.msrb.mxu2 %v12465_v38  ;;  %v13563_v38 = vld [vmem:[#allocation28 + $0x424] sm:$0xf]  ;;  %v12445_v53 = vor.u32 %v13575_v21, %v12442_v63 }
0x11b3   : > { %8533 = vmatpush.bf16.msra.mxu1 %v12377_v11 }
0x11b5   : > { %8545 = vmatpush.bf16.msrb.mxu2 %v12457_v24  ;;  %v12482_v24 = vld [vmem:[#allocation28 + $0x4d8] sm:$0xf0] }
0x11b9   : > { %8546 = vmatpush.bf16.msrb.mxu2 %v12449_v30  ;;  %v12386_v30 = vld [vmem:[#allocation28 + $0x418] sm:$0xf0] }
0x11bd   : > { %8547 = vmatpush.bf16.msrb.mxu2 %v12441_v6  ;;  %v12389_v6 = vor.u32 %v13561_v4, %v12386_v30  ;;  %v12526_v30 = vld [vmem:[#allocation28 + $0x520] sm:$0xf] }
0x11f3   : > { %v7947_v55 = vpop.f32.mrf.mxu1 }
0x11f9   : > { %v7975_v28 = vpop.f32.mrf.mxu3 }
0x11fb   : > { %v7949_v9 = vpop.f32.mrf.mxu1 }
0x11fd   : > { %v7989_v26 = vpop.f32.mrf.mxu0 }
0x11fe   : > { %v7990_v42 = vadd.f32 %v7989_v26, %v7975_v28  ;;  %v13559_v28 = vld [vmem:[#allocation28 + $0x404] sm:$0xf]  ;;  %v12378_v26 = vld [vmem:[#allocation28 + $0x408] sm:$0xf0] }
0x1200   : > { %v16734_v18 = vadd.f32 %v7990_v42, %v16711_v32  ;;  %v12437_v32 = vor.u32 %v13573_v56, %v12434_v27  ;;  %v12566_v42 = vld [vmem:[#allocation28 + $0x570] sm:$0xf]  ;;  %v13579_v27 = vld [vmem:[#allocation28 + $0x4a4] sm:$0xf] }
0x1203   : > { %v7961_v3 = vpop.f32.mrf.mxu2  ;;  %v8018_v33 = vpop.f32.mrf.mxu1 }
0x1204   : > { %v7962_v39 = vadd.f32 %v7961_v3, %v7947_v55  ;;  %v12394_v55 = vld [vmem:[#allocation28 + $0x428] sm:$0xf0]  ;;  %v13607_v3 = vld [vmem:[#allocation28 + $0x574] sm:$0xf0] }
0x1205   : > { %v12397_v20 = vor.u32 %v13563_v38, %v12394_v55  ;;  %v12534_v55 = vld [vmem:[#allocation28 + $0x530] sm:$0xf] }
0x1206   : > { %v16737_v35 = vadd.f32 %v7962_v39, %v16715_v31  ;;  %v13581_v39 = vld [vmem:[#allocation28 + $0x4b4] sm:$0xf] }
0x120b   : > { %v7963_v8 = vpop.f32.mrf.mxu2  ;;  %v8020_v5 = vpop.f32.mrf.mxu1 }
0x120c   : > { %v16739_v14 = vadd.f32 %v7963_v8, %v7949_v9  ;;  %v8037_v50 = vpack.c.bf16 %v8020_v5, %v8018_v33  ;;  %v12485_v9 = vor.u32 %v13585_v58, %v12482_v24  ;;  %v12477_v33 = vor.u32 %v13583_v16, %v12474_v54  ;;  %v12466_v8 = vld [vmem:[#allocation28 + $0x4b8] sm:$0xf0]  ;;  %v12614_v24 = vld [vmem:[#allocation28 + $0x5d0] sm:$0xf]  ;;  %v12606_v54 = vld [vmem:[#allocation28 + $0x5c0] sm:$0xf] }
0x120d   : > { %v12381_v5 = vor.u32 %v13559_v28, %v12378_v26  ;;  %v12469_v56 = vor.u32 %v13581_v39, %v12466_v8  ;;  %v12518_v26 = vld [vmem:[#allocation28 + $0x510] sm:$0xf]  ;;  %v13615_v39 = vld [vmem:[#allocation28 + $0x5b4] sm:$0xf0] }
0x120e   : > { %8240 = vmatmul.bf16.vlgmr.msrb.gmra.mxu3 %v8037_v50  ;;  %8268 = vmatmul.bf16.vlgmr.msrb.gmra.mxu1 %v8037_v50  ;;  %v12567_v50 = vor.u32 %v13607_v3, %v12566_v42  ;;  %v13595_v42 = vld [vmem:[#allocation28 + $0x514] sm:$0xf0] }
0x120f   : > { %8601 = vmatpush.bf16.msrb.mxu1 %v16660_v51  ;;  %8554 = vmatpush.bf16.msrb.mxu3 %v12437_v32  ;;  %v12461_v32 = vor.u32 %v13579_v27, %v12458_v37  ;;  %v12519_v3 = vor.u32 %v13595_v42, %v12518_v26  ;;  %v12590_v37 = vld [vmem:[#allocation28 + $0x5a0] sm:$0xf]  ;;  %v13600_v42 = vld [vmem:[#allocation28 + $0x544] sm:$0xf] }
0x1213   : > { %8602 = vmatpush.bf16.msrb.mxu1 %v16647_v44  ;;  %v8032_v31 = vpop.f32.mrf.mxu2  ;;  %8555 = vmatpush.bf16.msrb.mxu3 %v12429_v10  ;;  %v13605_v10 = vld [vmem:[#allocation28 + $0x564] sm:$0xf0] }
0x1214   : > { %v12559_v1 = vor.u32 %v13605_v10, %v12558_v41  ;;  %v12582_v10 = vld [vmem:[#allocation28 + $0x590] sm:$0xf] }
0x1217   : > { %8603 = vmatpush.bf16.msrb.mxu1 %v16635_v57  ;;  %8556 = vmatpush.bf16.msrb.mxu3 %v12421_v17  ;;  %v12550_v17 = vld [vmem:[#allocation28 + $0x550] sm:$0xf] }
0x121b   : > { %8604 = vmatpush.bf16.msrb.mxu1 %v16623_v19  ;;  %v8034_v49 = vpop.f32.mrf.mxu2  ;;  %8557 = vmatpush.bf16.msrb.mxu3 %v12413_v0  ;;  %v12551_v0 = vor.u32 %v13603_v40, %v12550_v17  ;;  %v16753_v17 = vpop.f32.mrf.mxu0  ;;  %v12574_v40 = vld [vmem:[#allocation28 + $0x580] sm:$0xf] }
0x121c   : > { %v8038_v11 = vpack.c.bf16 %v8034_v49, %v8032_v31  ;;  %v12450_v31 = vld [vmem:[#allocation28 + $0x498] sm:$0xf0]  ;;  %v13623_v49 = vld [vmem:[#allocation28 + $0x5f4] sm:$0xf0] }
0x121d   : > { %v12453_v62 = vor.u32 %v13577_v61, %v12450_v31  ;;  %v13611_v61 = vld [vmem:[#allocation28 + $0x594] sm:$0xf0] }
0x121e   : > { %8254 = vmatmul.bf16.vlgmr.msrb.gmra.mxu0 %v8038_v11  ;;  %8282 = vmatmul.bf16.vlgmr.msra.gmra.mxu2 %v8038_v11  ;;  %v12542_v11 = vld [vmem:[#allocation28 + $0x540] sm:$0xf]  ;;  %v12583_v31 = vor.u32 %v13611_v61, %v12582_v10  ;;  %v12616_v10 = vld [vmem:[#allocation28 + $0x5d8] sm:$0xf0] }
0x121f   : > { %12372 = vmatmul.msk.bf16.vlgmr.msra.gmra.mxu3 %vm2184_vm0, %v13558_v52  ;;  %8615 = vmatpush.bf16.msra.mxu2 %v16655_v36 }
0x1220   : > { %8568 = vmatpush.bf16.msrb.mxu0 %v12501_v46  ;;  %8558 = vmatpush.bf16.msrb.mxu3 %v12405_v15  ;;  %v13601_v46 = vld [vmem:[#allocation28 + $0x544] sm:$0xf0] }
0x1221   : > { %v12543_v48 = vor.u32 %v13601_v46, %v12542_v11  ;;  %v13621_v15 = vld [vmem:[#allocation28 + $0x5e4] sm:$0xf0] }
0x1222   : > { %v12623_v38 = vor.u32 %v13621_v15, %v12622_v25 }
0x1223   : > { %8616 = vmatpush.bf16.msra.mxu2 %v16643_v60 }
0x1224   : > { %8569 = vmatpush.bf16.msrb.mxu0 %v12493_v13  ;;  %8559 = vmatpush.bf16.msrb.mxu3 %v12397_v20  ;;  %v13599_v13 = vld [vmem:[#allocation28 + $0x534] sm:$0xf0] }
0x1225   : > { %v12535_v58 = vor.u32 %v13599_v13, %v12534_v55  ;;  %v13619_v20 = vld [vmem:[#allocation28 + $0x5d4] sm:$0xf0] }
0x1226   : > { %v12615_v4 = vor.u32 %v13619_v20, %v12614_v24 }
0x1227   : > { %8617 = vmatpush.bf16.msra.mxu2 %v16631_v29 }
0x1228   : > { %8570 = vmatpush.bf16.msrb.mxu0 %v12485_v9  ;;  %8560 = vmatpush.bf16.msrb.mxu3 %v12389_v6  ;;  %v13597_v9 = vld [vmem:[#allocation28 + $0x524] sm:$0xf0] }
0x1229   : > { %v12527_v16 = vor.u32 %v13597_v9, %v12526_v30  ;;  %v13617_v6 = vld [vmem:[#allocation28 + $0x5c4] sm:$0xf0]  ;;  %v13604_v30 = vld [vmem:[#allocation28 + $0x564] sm:$0xf]  ;;  %v12560_v9 = vld [vmem:[#allocation28 + $0x568] sm:$0xf0] }
0x122a   : > { %v12607_v28 = vor.u32 %v13617_v6, %v12606_v54  ;;  %v12632_v54 = vld [vmem:[#allocation28 + $0x5f8] sm:$0xf0] }
0x122b   : > { %8618 = vmatpush.bf16.msra.mxu2 %v16619_v47 }
0x122c   : > { %8571 = vmatpush.bf16.msrb.mxu0 %v12477_v33  ;;  %8561 = vmatpush.bf16.msrb.mxu3 %v12381_v5  ;;  %v12598_v33 = vld [vmem:[#allocation28 + $0x5b0] sm:$0xf]  ;;  %v16751_v5 = vpop.f32.mrf.mxu3 }
0x122d   : > { %v12599_v8 = vor.u32 %v13615_v39, %v12598_v33  ;;  %v13620_v39 = vld [vmem:[#allocation28 + $0x5e4] sm:$0xf] }
0x122e   : > { %12373 = vmatmul.msk.bf16.vlgmr.msra.gmra.mxu0 %vm2184_vm0, %v13558_v52  ;;  %v12631_v52 = vor.u32 %v13623_v49, %v12630_v22  ;;  %v7458_v22 = vadd.f32 %v16709_v43, %v16705_v34  ;;  %v13606_v34 = vld [vmem:[#allocation28 + $0x574] sm:$0xf]  ;;  %v12568_v43 = vld [vmem:[#allocation28 + $0x578] sm:$0xf0] }
0x122f   : > { %v12571_v20 = vor.u32 %v13606_v34, %v12568_v43  ;;  %v12692_v43 = vld [vmem:[#allocation28 + $0x660] sm:$0xf] }
0x1230   : > { %8820 = vmatpush.bf16.msra.mxu3 %v12567_v50  ;;  %8572 = vmatpush.bf16.msrb.mxu0 %v12469_v56  ;;  %v12510_v50 = vld [vmem:[#allocation28 + $0x500] sm:$0xf]  ;;  %v13593_v56 = vld [vmem:[#allocation28 + $0x504] sm:$0xf0] }
0x1231   : > { %v12511_v27 = vor.u32 %v13593_v56, %v12510_v50  ;;  %v13598_v56 = vld [vmem:[#allocation28 + $0x534] sm:$0xf] }
0x1234   : > { %8573 = vmatpush.bf16.msrb.mxu0 %v12461_v32  ;;  %8821 = vmatpush.bf16.msra.mxu3 %v12559_v1  ;;  %v13613_v32 = vld [vmem:[#allocation28 + $0x5a4] sm:$0xf0] }
0x1235   : > { %v12591_v41 = vor.u32 %v13613_v32, %v12590_v37  ;;  %v13591_v32 = vld [vmem:[#allocation37 + $0x28] sm:$0xff] }
0x1238   : > { %8574 = vmatpush.bf16.msrb.mxu0 %v12453_v62  ;;  %8822 = vmatpush.bf16.msra.mxu3 %v12551_v0  ;;  %v13609_v62 = vld [vmem:[#allocation28 + $0x584] sm:$0xf0] }
0x1239   : > { %v12575_v21 = vor.u32 %v13609_v62, %v12574_v40  ;;  %v13616_v62 = vld [vmem:[#allocation28 + $0x5c4] sm:$0xf] }
0x123c   : > { %8575 = vmatpush.bf16.msrb.mxu0 %v12445_v53  ;;  %8823 = vmatpush.bf16.msra.mxu3 %v12543_v48 }
0x1240   : > { %8834 = vmatpush.bf16.msra.mxu0 %v12631_v52  ;;  %8824 = vmatpush.bf16.msra.mxu3 %v12535_v58  ;;  %v7660_v52 = vadd.f32 %v16713_v59, %v7458_v22 }
0x1242   : > { %v7674_v48 = vadd.f32 %v16717_v23, %v7660_v52  ;;  %v12563_v23 = vor.u32 %v13604_v30, %v12560_v9  ;;  %v12684_v30 = vld [vmem:[#allocation28 + $0x650] sm:$0xf]  ;;  %v13636_v9 = vld [vmem:[#allocation28 + $0x654] sm:$0xf0] }
0x1244   : > { %8835 = vmatpush.bf16.msra.mxu0 %v12623_v38  ;;  %8825 = vmatpush.bf16.msra.mxu3 %v12527_v16  ;;  %v7996_v55 = vadd.f32 %v16739_v14, %v7674_v48  ;;  %v13602_v14 = vld [vmem:[#allocation28 + $0x554] sm:$0xf]  ;;  %v12700_v48 = vld [vmem:[#allocation28 + $0x670] sm:$0xf] }
0x1245   : > { %v13622_v16 = vld [vmem:[#allocation28 + $0x5f4] sm:$0xf] }
0x1246   : > { %v12635_v33 = vor.u32 %v13622_v16, %v12632_v54  ;;  %v12584_v16 = vld [vmem:[#allocation28 + $0x598] sm:$0xf0] }
0x1248   : > { %8836 = vmatpush.bf16.msra.mxu0 %v12615_v4  ;;  %8826 = vmatpush.bf16.msra.mxu3 %v12519_v3  ;;  %v12544_v3 = vld [vmem:[#allocation28 + $0x548] sm:$0xf0] }
0x1249   : > { %v12547_v50 = vor.u32 %v13600_v42, %v12544_v3  ;;  %v13608_v42 = vld [vmem:[#allocation28 + $0x584] sm:$0xf]  ;;  %v12576_v3 = vld [vmem:[#allocation28 + $0x588] sm:$0xf0] }
0x124c   : > { %8837 = vmatpush.bf16.msra.mxu0 %v12607_v28  ;;  %8827 = vmatpush.bf16.msra.mxu3 %v12511_v27  ;;  %v12536_v27 = vld [vmem:[#allocation28 + $0x538] sm:$0xf0] }
0x124d   : > { %v12539_v61 = vor.u32 %v13598_v56, %v12536_v27  ;;  %v13656_v27 = vld [vmem:[#allocation28 + $0x6f4] sm:$0xf0] }
0x1250   : > { %8838 = vmatpush.bf16.msra.mxu0 %v12599_v8  ;;  %v12624_v8 = vld [vmem:[#allocation28 + $0x5e8] sm:$0xf0] }
0x1251   : > { %v12627_v37 = vor.u32 %v13620_v39, %v12624_v8  ;;  %v12668_v39 = vld [vmem:[#allocation28 + $0x630] sm:$0xf]  ;;  %v13632_v8 = vld [vmem:[#allocation28 + $0x634] sm:$0xf0] }
0x1252   : > { %v12669_v56 = vor.u32 %v13632_v8, %v12668_v39 }
0x1254   : > { %8839 = vmatpush.bf16.msra.mxu0 %v12591_v41  ;;  %v13618_v41 = vld [vmem:[#allocation28 + $0x5d4] sm:$0xf] }
0x1255   : > { %v12619_v40 = vor.u32 %v13618_v41, %v12616_v10  ;;  %v13630_v41 = vld [vmem:[#allocation28 + $0x624] sm:$0xf0]  ;;  %v12756_v10 = vld [vmem:[#allocation28 + $0x6e0] sm:$0xf] }
0x1258   : > { %8840 = vmatpush.bf16.msra.mxu0 %v12583_v31  ;;  %v12528_v31 = vld [vmem:[#allocation28 + $0x528] sm:$0xf0] }
0x125c   : > { %8841 = vmatpush.bf16.msra.mxu0 %v12575_v21  ;;  %v12608_v21 = vld [vmem:[#allocation28 + $0x5c8] sm:$0xf0] }
0x125d   : > { %v12611_v22 = vor.u32 %v13616_v62, %v12608_v21  ;;  %v13628_v62 = vld [vmem:[#allocation28 + $0x614] sm:$0xf0]  ;;  %v12748_v21 = vld [vmem:[#allocation28 + $0x6d0] sm:$0xf] }
0x128b   : > { %v8269_v11 = vpop.f32.mrf.mxu1 }
0x1291   : > { %v8241_v1 = vpop.f32.mrf.mxu3 }
0x1299   : > { %v8243_v63 = vpop.f32.mrf.mxu3 }
0x129b   : > { %v8255_v0 = vpop.f32.mrf.mxu0 }
0x129c   : > { %v8256_v53 = vadd.f32 %v8255_v0, %v8241_v1  ;;  %v13596_v1 = vld [vmem:[#allocation28 + $0x524] sm:$0xf]  ;;  %v13594_v0 = vld [vmem:[#allocation28 + $0x514] sm:$0xf] }
0x129e   : > { %v16758_v49 = vadd.f32 %v8256_v53, %v16737_v35  ;;  %v12520_v53 = vld [vmem:[#allocation28 + $0x518] sm:$0xf0] }
0x129f   : > { %v12523_v52 = vor.u32 %v13594_v0, %v12520_v53  ;;  %v13652_v0 = vld [vmem:[#allocation28 + $0x6d4] sm:$0xf0] }
0x12a0   : > { %v12749_v53 = vor.u32 %v13652_v0, %v12748_v21  ;;  %v12678_v21 = vld [vmem:[#allocation28 + $0x648] sm:$0xf0]  ;;  %v12766_v0 = vld [vmem:[#allocation28 + $0x6f8] sm:$0xf0] }
0x12a1   : > { %v8283_v46 = vpop.f32.mrf.mxu2 }
0x12a2   : > { %v8284_v25 = vadd.f32 %v8283_v46, %v8269_v11  ;;  %v8312_v15 = vpop.f32.mrf.mxu3  ;;  %v13592_v11 = vld [vmem:[#allocation28 + $0x504] sm:$0xf]  ;;  %v12512_v46 = vld [vmem:[#allocation28 + $0x508] sm:$0xf0] }
0x12a3   : > { %v8257_v38 = vpop.f32.mrf.mxu0 }
0x12a4   : > { %v16764_v13 = vadd.f32 %v8284_v25, %v16734_v18  ;;  %v8258_v58 = vadd.f32 %v8257_v38, %v8243_v63  ;;  %v12552_v18 = vld [vmem:[#allocation28 + $0x558] sm:$0xf0]  ;;  %v12531_v63 = vor.u32 %v13596_v1, %v12528_v31  ;;  %v13640_v25 = vld [vmem:[#allocation28 + $0x674] sm:$0xf0]  ;;  %v13654_v1 = vld [vmem:[#allocation28 + $0x6e4] sm:$0xf0] }
0x12a5   : > { %v12555_v28 = vor.u32 %v13602_v14, %v12552_v18  ;;  %v12701_v38 = vor.u32 %v13640_v25, %v12700_v48  ;;  %v12685_v14 = vor.u32 %v13636_v9, %v12684_v30  ;;  %v13610_v18 = vld [vmem:[#allocation28 + $0x594] sm:$0xf]  ;;  %v12757_v31 = vor.u32 %v13654_v1, %v12756_v10  ;;  %v13650_v25 = vld [vmem:[#allocation28 + $0x6c4] sm:$0xf0]  ;;  %v13637_v10 = vld [vmem:[#allocation28 + $0x664] sm:$0xf] }
0x12a6   : > { %v16766_v24 = vadd.f32 %v8258_v58, %v7996_v55  ;;  %v13614_v55 = vld [vmem:[#allocation28 + $0x5b4] sm:$0xf]  ;;  %v12600_v58 = vld [vmem:[#allocation28 + $0x5b8] sm:$0xf0]  ;;  %v12587_v54 = vor.u32 %v13610_v18, %v12584_v16  ;;  %v13642_v18 = vld [vmem:[#allocation28 + $0x684] sm:$0xf0] }
0x12a7   : > { %v12603_v34 = vor.u32 %v13614_v55, %v12600_v58  ;;  %v13648_v55 = vld [vmem:[#allocation28 + $0x6b4] sm:$0xf0] }
0x12a9   : > { %v16780_v9 = vpop.f32.mrf.mxu2 }
0x12aa   : > { %v8314_v35 = vpop.f32.mrf.mxu3 }
0x12ab   : > { %v8331_v59 = vpack.c.bf16 %v8314_v35, %v8312_v15  ;;  %v8326_v4 = vpop.f32.mrf.mxu0  ;;  %v12515_v15 = vor.u32 %v13592_v11, %v12512_v46  ;;  %v13638_v35 = vld [vmem:[#allocation28 + $0x664] sm:$0xf0]  ;;  %v12740_v46 = vld [vmem:[#allocation28 + $0x6c0] sm:$0xf] }
0x12ac   : > { %v13626_v11 = vld [vmem:[#allocation28 + $0x604] sm:$0xf0] }
0x12ad   : > { %8534 = vmatmul.bf16.vlgmr.msra.gmra.mxu1 %v8331_v59  ;;  %8562 = vmatmul.bf16.vlgmr.msrb.gmra.mxu3 %v8331_v59  ;;  %v12693_v59 = vor.u32 %v13638_v35, %v12692_v43  ;;  %v12724_v43 = vld [vmem:[#allocation28 + $0x6a0] sm:$0xf]  ;;  %v13646_v35 = vld [vmem:[#allocation28 + $0x6a4] sm:$0xf0] }
0x12ae   : > { %8895 = vmatpush.bf16.msrb.mxu3 %v16660_v51  ;;  %8848 = vmatpush.bf16.msra.mxu1 %v12571_v20  ;;  %v13612_v20 = vld [vmem:[#allocation28 + $0x5a4] sm:$0xf] }
0x12b2   : > { %8896 = vmatpush.bf16.msrb.mxu3 %v16647_v44  ;;  %8849 = vmatpush.bf16.msra.mxu1 %v12563_v23 }
0x12b3   : > { %v8328_v6 = vpop.f32.mrf.mxu0 }
0x12b4   : > { %v8332_v26 = vpack.c.bf16 %v8328_v6, %v8326_v4  ;;  %v12592_v4 = vld [vmem:[#allocation28 + $0x5a8] sm:$0xf0]  ;;  %v12676_v6 = vld [vmem:[#allocation28 + $0x640] sm:$0xf] }
0x12b5   : > { %v12595_v23 = vor.u32 %v13612_v20, %v12592_v4  ;;  %v12725_v20 = vor.u32 %v13646_v35, %v12724_v43  ;;  %v13644_v4 = vld [vmem:[#allocation28 + $0x694] sm:$0xf0]  ;;  %v12662_v43 = vld [vmem:[#allocation28 + $0x628] sm:$0xf0] }
0x12b6   : > { %8897 = vmatpush.bf16.msrb.mxu3 %v16635_v57  ;;  %8548 = vmatmul.bf16.vlgmr.msrb.gmra.mxu2 %v8332_v26 }
0x12b7   : > { %8576 = vmatmul.bf16.vlgmr.msrb.gmra.mxu0 %v8332_v26  ;;  %8850 = vmatpush.bf16.msra.mxu1 %v12555_v28  ;;  %v13634_v28 = vld [vmem:[#allocation28 + $0x644] sm:$0xf0] }
0x12b8   : > { %8909 = vmatpush.bf16.msrb.mxu0 %v16655_v36  ;;  %8862 = vmatpush.bf16.msrb.mxu2 %v12635_v33  ;;  %v12677_v26 = vor.u32 %v13634_v28, %v12676_v6  ;;  %v12579_v33 = vor.u32 %v13608_v42, %v12576_v3 }
0x12ba   : > { %8898 = vmatpush.bf16.msrb.mxu3 %v16623_v19 }
0x12bb   : > { %8851 = vmatpush.bf16.msra.mxu1 %v12547_v50  ;;  %v12764_v50 = vld [vmem:[#allocation28 + $0x6f0] sm:$0xf] }
0x12bc   : > { %8910 = vmatpush.bf16.msrb.mxu0 %v16643_v60  ;;  %8863 = vmatpush.bf16.msrb.mxu2 %v12627_v37  ;;  %v12765_v37 = vor.u32 %v13656_v27, %v12764_v50 }
0x12bd   : > { %12506 = vmatmul.msk.bf16.vlgmr.msrb.gmra.mxu1 %vm2184_vm0, %v13591_v32 }
0x12bf   : > { %8852 = vmatpush.bf16.msra.mxu1 %v12539_v61 }
0x12c0   : > { %8911 = vmatpush.bf16.msrb.mxu0 %v16631_v29  ;;  %8864 = vmatpush.bf16.msrb.mxu2 %v12619_v40  ;;  %v12652_v40 = vld [vmem:[#allocation28 + $0x610] sm:$0xf] }
0x12c3   : > { %8853 = vmatpush.bf16.msra.mxu1 %v12531_v63  ;;  %v12653_v63 = vor.u32 %v13628_v62, %v12652_v40 }
0x12c4   : > { %8912 = vmatpush.bf16.msrb.mxu0 %v16619_v47  ;;  %8865 = vmatpush.bf16.msrb.mxu2 %v12611_v22  ;;  %v16778_v22 = vpop.f32.mrf.mxu1 }
0x12c6   : > { %12507 = vmatmul.msk.bf16.vlgmr.msra.gmra.mxu2 %vm2184_vm0, %v13591_v32  ;;  %v12660_v32 = vld [vmem:[#allocation28 + $0x620] sm:$0xf] }
0x12c7   : > { %8854 = vmatpush.bf16.msra.mxu1 %v12523_v52  ;;  %v12661_v61 = vor.u32 %v13630_v41, %v12660_v32  ;;  %v12644_v52 = vld [vmem:[#allocation28 + $0x600] sm:$0xf]  ;;  %v13639_v32 = vld [vmem:[#allocation28 + $0x674] sm:$0xf]  ;;  %v12702_v41 = vld [vmem:[#allocation28 + $0x678] sm:$0xf0] }
0x12c8   : > { %8866 = vmatpush.bf16.msrb.mxu2 %v12603_v34  ;;  %v12645_v48 = vor.u32 %v13626_v11, %v12644_v52  ;;  %v13631_v52 = vld [vmem:[#allocation28 + $0x634] sm:$0xf]  ;;  %v12670_v11 = vld [vmem:[#allocation28 + $0x638] sm:$0xf0] }
0x12cb   : > { %8855 = vmatpush.bf16.msra.mxu1 %v12515_v15  ;;  %v12741_v15 = vor.u32 %v13650_v25, %v12740_v46 }
0x12cc   : > { %8867 = vmatpush.bf16.msrb.mxu2 %v12595_v23 }
0x12cf   : > { %9114 = vmatpush.bf16.msrb.mxu1 %v12701_v38  ;;  %v12732_v38 = vld [vmem:[#allocation28 + $0x6b0] sm:$0xf] }
0x12d0   : > { %8868 = vmatpush.bf16.msrb.mxu2 %v12587_v54  ;;  %v12733_v58 = vor.u32 %v13648_v55, %v12732_v38  ;;  %v13653_v38 = vld [vmem:[#allocation28 + $0x6e4] sm:$0xf]  ;;  %v12758_v55 = vld [vmem:[#allocation28 + $0x6e8] sm:$0xf0] }
0x12d1   : > { %v12761_v35 = vor.u32 %v13653_v38, %v12758_v55  ;;  %v12890_v55 = vld [vmem:[#allocation28 + $0x7e0] sm:$0xf] }
0x12d3   : > { %9115 = vmatpush.bf16.msrb.mxu1 %v12693_v59  ;;  %v12716_v59 = vld [vmem:[#allocation28 + $0x690] sm:$0xf] }
0x12d4   : > { %8869 = vmatpush.bf16.msrb.mxu2 %v12579_v33  ;;  %v12717_v30 = vor.u32 %v13644_v4, %v12716_v59  ;;  %v12750_v59 = vld [vmem:[#allocation28 + $0x6d8] sm:$0xf0] }
0x12d7   : > { %9116 = vmatpush.bf16.msrb.mxu1 %v12685_v14  ;;  %v12708_v14 = vld [vmem:[#allocation28 + $0x680] sm:$0xf] }
0x12d8   : > { %9128 = vmatpush.bf16.msra.mxu2 %v12765_v37  ;;  %v12709_v16 = vor.u32 %v13642_v18, %v12708_v14  ;;  %v13649_v18 = vld [vmem:[#allocation28 + $0x6c4] sm:$0xf] }
0x12db   : > { %9117 = vmatpush.bf16.msrb.mxu1 %v12677_v26 }
0x12dc   : > { %9129 = vmatpush.bf16.msra.mxu2 %v12757_v31  ;;  %v12686_v31 = vld [vmem:[#allocation28 + $0x658] sm:$0xf0] }
0x12df   : > { %9118 = vmatpush.bf16.msrb.mxu1 %v12669_v56 }
0x12e0   : > { %9130 = vmatpush.bf16.msra.mxu2 %v12749_v53 }
0x12e3   : > { %9119 = vmatpush.bf16.msrb.mxu1 %v12661_v61  ;;  %v12694_v61 = vld [vmem:[#allocation28 + $0x668] sm:$0xf0] }
0x12e4   : > { %9131 = vmatpush.bf16.msra.mxu2 %v12741_v15  ;;  %v12697_v1 = vor.u32 %v13637_v10, %v12694_v61  ;;  %v12726_v10 = vld [vmem:[#allocation28 + $0x6a8] sm:$0xf0]  ;;  %v12826_v61 = vld [vmem:[#allocation28 + $0x760] sm:$0xf] }
0x12e7   : > { %9120 = vmatpush.bf16.msrb.mxu1 %v12653_v63  ;;  %v13655_v63 = vld [vmem:[#allocation28 + $0x6f4] sm:$0xf] }
0x12e8   : > { %9132 = vmatpush.bf16.msra.mxu2 %v12733_v58  ;;  %v12769_v15 = vor.u32 %v13655_v63, %v12766_v0  ;;  %v12673_v58 = vor.u32 %v13631_v52, %v12670_v11  ;;  %v13641_v63 = vld [vmem:[#allocation28 + $0x684] sm:$0xf]  ;;  %v12710_v0 = vld [vmem:[#allocation28 + $0x688] sm:$0xf0]  ;;  %v12898_v11 = vld [vmem:[#allocation28 + $0x7f0] sm:$0xf] }
0x12e9   : > { %v12713_v52 = vor.u32 %v13641_v63, %v12710_v0 }
0x12eb   : > { %9121 = vmatpush.bf16.msrb.mxu1 %v12645_v48  ;;  %v13624_v48 = vld [vmem:[#allocation37 + $0x30] sm:$0xff] }
0x12ec   : > { %9133 = vmatpush.bf16.msra.mxu2 %v12725_v20  ;;  %v13651_v20 = vld [vmem:[#allocation28 + $0x6d4] sm:$0xf] }
0x12ed   : > { %v12753_v14 = vor.u32 %v13651_v20, %v12750_v59  ;;  %v12882_v59 = vld [vmem:[#allocation28 + $0x7d0] sm:$0xf] }
0x12f0   : > { %9134 = vmatpush.bf16.msra.mxu2 %v12717_v30  ;;  %v13627_v30 = vld [vmem:[#allocation28 + $0x614] sm:$0xf] }
0x12f4   : > { %9135 = vmatpush.bf16.msra.mxu2 %v12709_v16  ;;  %v12742_v16 = vld [vmem:[#allocation28 + $0x6c8] sm:$0xf0] }
0x132a   : > { %v8535_v34 = vpop.f32.mrf.mxu1 }
0x1330   : > { %v8563_v54 = vpop.f32.mrf.mxu3 }
0x1332   : > { %v8537_v23 = vpop.f32.mrf.mxu1 }
0x1334   : > { %v8577_v6 = vpop.f32.mrf.mxu0 }
0x1335   : > { %v8578_v28 = vadd.f32 %v8577_v6, %v8563_v54  ;;  %v13625_v6 = vld [vmem:[#allocation28 + $0x604] sm:$0xf] }
0x1337   : > { %v16783_v26 = vadd.f32 %v8578_v28, %v16764_v13  ;;  %v12705_v13 = vor.u32 %v13639_v32, %v12702_v41  ;;  %v12646_v28 = vld [vmem:[#allocation28 + $0x608] sm:$0xf0]  ;;  %v13645_v41 = vld [vmem:[#allocation28 + $0x6a4] sm:$0xf] }
0x1339   : > { %v8549_v42 = vpop.f32.mrf.mxu2 }
0x133a   : > { %v8550_v3 = vadd.f32 %v8549_v42, %v8535_v34  ;;  %v8606_v33 = vpop.f32.mrf.mxu1  ;;  %v13629_v34 = vld [vmem:[#allocation28 + $0x624] sm:$0xf]  ;;  %v12834_v42 = vld [vmem:[#allocation28 + $0x770] sm:$0xf] }
0x133b   : > { %v12665_v4 = vor.u32 %v13629_v34, %v12662_v43  ;;  %v12802_v43 = vld [vmem:[#allocation28 + $0x730] sm:$0xf] }
0x133c   : > { %v16786_v39 = vadd.f32 %v8550_v3, %v16758_v49  ;;  %v13635_v49 = vld [vmem:[#allocation28 + $0x654] sm:$0xf]  ;;  %v13673_v3 = vld [vmem:[#allocation28 + $0x774] sm:$0xf0] }
0x133d   : > { %v12689_v62 = vor.u32 %v13635_v49, %v12686_v31  ;;  %v13643_v49 = vld [vmem:[#allocation28 + $0x694] sm:$0xf] }
0x1341   : > { %v8551_v8 = vpop.f32.mrf.mxu2 }
0x1342   : > { %v8552_v50 = vadd.f32 %v8551_v8, %v8537_v23  ;;  %v8608_v56 = vpop.f32.mrf.mxu1  ;;  %v12654_v23 = vld [vmem:[#allocation28 + $0x618] sm:$0xf0]  ;;  %v13647_v8 = vld [vmem:[#allocation28 + $0x6b4] sm:$0xf] }
0x1343   : > { %v8625_v27 = vpack.c.bf16 %v8608_v56, %v8606_v33  ;;  %v12657_v54 = vor.u32 %v13627_v30, %v12654_v23  ;;  %v12745_v33 = vor.u32 %v13649_v18, %v12742_v16  ;;  %v12649_v56 = vor.u32 %v13625_v6, %v12646_v28  ;;  %v12794_v23 = vld [vmem:[#allocation28 + $0x720] sm:$0xf]  ;;  %v12786_v28 = vld [vmem:[#allocation28 + $0x710] sm:$0xf] }
0x1344   : > { %v16789_v37 = vadd.f32 %v8552_v50, %v16766_v24  ;;  %v13633_v24 = vld [vmem:[#allocation28 + $0x644] sm:$0xf]  ;;  %v12734_v50 = vld [vmem:[#allocation28 + $0x6b8] sm:$0xf0]  ;;  %v12874_v16 = vld [vmem:[#allocation28 + $0x7c0] sm:$0xf] }
0x1345   : > { %8828 = vmatmul.bf16.vlgmr.msra.gmra.mxu3 %v8625_v27  ;;  %8856 = vmatmul.bf16.vlgmr.msra.gmra.mxu1 %v8625_v27  ;;  %v12681_v53 = vor.u32 %v13633_v24, %v12678_v21  ;;  %v12835_v27 = vor.u32 %v13673_v3, %v12834_v42  ;;  %v12737_v32 = vor.u32 %v13647_v8, %v12734_v50  ;;  %v13669_v24 = vld [vmem:[#allocation28 + $0x754] sm:$0xf0] }
0x1346   : > { %9189 = vmatpush.bf16.msra.mxu1 %v16660_v51  ;;  %9142 = vmatpush.bf16.msra.mxu3 %v12705_v13  ;;  %v12729_v13 = vor.u32 %v13645_v41, %v12726_v10  ;;  %v13661_v42 = vld [vmem:[#allocation28 + $0x714] sm:$0xf0]  ;;  %v12858_v10 = vld [vmem:[#allocation28 + $0x7a0] sm:$0xf] }
0x1347   : > { %v12787_v3 = vor.u32 %v13661_v42, %v12786_v28  ;;  %v13681_v8 = vld [vmem:[#allocation28 + $0x7b4] sm:$0xf0]  ;;  %v13686_v42 = vld [vmem:[#allocation28 + $0x7e4] sm:$0xf] }
0x1349   : > { %v8620_v40 = vpop.f32.mrf.mxu2 }
0x134a   : > { %9190 = vmatpush.bf16.msra.mxu1 %v16647_v44  ;;  %9143 = vmatpush.bf16.msra.mxu3 %v12697_v1  ;;  %v13671_v1 = vld [vmem:[#allocation28 + $0x764] sm:$0xf0] }
0x134b   : > { %v12827_v31 = vor.u32 %v13671_v1, %v12826_v61  ;;  %v12850_v1 = vld [vmem:[#allocation28 + $0x790] sm:$0xf] }
0x134e   : > { %9191 = vmatpush.bf16.msra.mxu1 %v16635_v57  ;;  %9144 = vmatpush.bf16.msra.mxu3 %v12689_v62  ;;  %v12818_v62 = vld [vmem:[#allocation28 + $0x750] sm:$0xf] }
0x1351   : > { %v8622_v46 = vpop.f32.mrf.mxu2 }
0x1352   : > { %9192 = vmatpush.bf16.msra.mxu1 %v16623_v19  ;;  %v8626_v25 = vpack.c.bf16 %v8622_v46, %v8620_v40  ;;  %9145 = vmatpush.bf16.msra.mxu3 %v12681_v53  ;;  %v12718_v40 = vld [vmem:[#allocation28 + $0x698] sm:$0xf0]  ;;  %v12819_v53 = vor.u32 %v13669_v24, %v12818_v62  ;;  %v13689_v46 = vld [vmem:[#allocation28 + $0x7f4] sm:$0xf0]  ;;  %v16803_v62 = vpop.f32.mrf.mxu0  ;;  %v12842_v24 = vld [vmem:[#allocation28 + $0x780] sm:$0xf] }
0x1353   : > { %v12721_v21 = vor.u32 %v13643_v49, %v12718_v40  ;;  %v13677_v49 = vld [vmem:[#allocation28 + $0x794] sm:$0xf0] }
0x1354   : > { %8842 = vmatmul.bf16.vlgmr.msra.gmra.mxu0 %v8626_v25  ;;  %8870 = vmatmul.bf16.vlgmr.msrb.gmra.mxu2 %v8626_v25  ;;  %v12810_v25 = vld [vmem:[#allocation28 + $0x740] sm:$0xf] }
0x1355   : > { %12640 = vmatmul.msk.bf16.vlgmr.msrb.gmra.mxu3 %vm2184_vm0, %v13624_v48  ;;  %9203 = vmatpush.bf16.msrb.mxu2 %v16655_v36 }
0x1356   : > { %9156 = vmatpush.bf16.msra.mxu0 %v12769_v15  ;;  %9146 = vmatpush.bf16.msra.mxu3 %v12673_v58  ;;  %v13667_v15 = vld [vmem:[#allocation28 + $0x744] sm:$0xf0] }
0x1357   : > { %v12811_v38 = vor.u32 %v13667_v15, %v12810_v25  ;;  %v13687_v58 = vld [vmem:[#allocation28 + $0x7e4] sm:$0xf0] }
0x1358   : > { %v12891_v34 = vor.u32 %v13687_v58, %v12890_v55 }
0x1359   : > { %9204 = vmatpush.bf16.msrb.mxu2 %v16643_v60 }
0x135a   : > { %9157 = vmatpush.bf16.msra.mxu0 %v12761_v35  ;;  %9147 = vmatpush.bf16.msra.mxu3 %v12665_v4  ;;  %v13665_v35 = vld [vmem:[#allocation28 + $0x734] sm:$0xf0] }
0x135b   : > { %v12803_v20 = vor.u32 %v13665_v35, %v12802_v43  ;;  %v13685_v4 = vld [vmem:[#allocation28 + $0x7d4] sm:$0xf0] }
0x135c   : > { %v12883_v30 = vor.u32 %v13685_v4, %v12882_v59  ;;  %v12828_v4 = vld [vmem:[#allocation28 + $0x768] sm:$0xf0] }
0x135d   : > { %9205 = vmatpush.bf16.msrb.mxu2 %v16631_v29 }
0x135e   : > { %9158 = vmatpush.bf16.msra.mxu0 %v12753_v14  ;;  %9148 = vmatpush.bf16.msra.mxu3 %v12657_v54  ;;  %v13663_v14 = vld [vmem:[#allocation28 + $0x724] sm:$0xf0] }
0x135f   : > { %v12795_v18 = vor.u32 %v13663_v14, %v12794_v23  ;;  %v13683_v54 = vld [vmem:[#allocation28 + $0x7c4] sm:$0xf0]  ;;  %v12812_v14 = vld [vmem:[#allocation28 + $0x748] sm:$0xf0] }
0x1360   : > { %v12875_v6 = vor.u32 %v13683_v54, %v12874_v16  ;;  %v13664_v16 = vld [vmem:[#allocation28 + $0x734] sm:$0xf] }
0x1361   : > { %9206 = vmatpush.bf16.msrb.mxu2 %v16619_v47 }
0x1362   : > { %9159 = vmatpush.bf16.msra.mxu0 %v12745_v33  ;;  %9149 = vmatpush.bf16.msra.mxu3 %v12649_v56  ;;  %v12866_v33 = vld [vmem:[#allocation28 + $0x7b0] sm:$0xf]  ;;  %v16801_v56 = vpop.f32.mrf.mxu3 }
0x1363   : > { %v12867_v50 = vor.u32 %v13681_v8, %v12866_v33  ;;  %v13662_v33 = vld [vmem:[#allocation28 + $0x724] sm:$0xf] }
0x1364   : > { %12641 = vmatmul.msk.bf16.vlgmr.msrb.gmra.mxu0 %vm2184_vm0, %v13624_v48  ;;  %v12899_v48 = vor.u32 %v13689_v46, %v12898_v11 }
0x1366   : > { %9408 = vmatpush.bf16.msrb.mxu3 %v12835_v27  ;;  %9160 = vmatpush.bf16.msra.mxu0 %v12737_v32  ;;  %v12778_v27 = vld [vmem:[#allocation28 + $0x700] sm:$0xf]  ;;  %v13659_v32 = vld [vmem:[#allocation28 + $0x704] sm:$0xf0] }
0x1367   : > { %v12779_v41 = vor.u32 %v13659_v32, %v12778_v27  ;;  %v13684_v32 = vld [vmem:[#allocation28 + $0x7d4] sm:$0xf] }
0x136a   : > { %9161 = vmatpush.bf16.msra.mxu0 %v12729_v13  ;;  %9409 = vmatpush.bf16.msrb.mxu3 %v12827_v31  ;;  %v13679_v13 = vld [vmem:[#allocation28 + $0x7a4] sm:$0xf0]  ;;  %v12851_v31 = vor.u32 %v13677_v49, %v12850_v1  ;;  %v13682_v49 = vld [vmem:[#allocation28 + $0x7c4] sm:$0xf] }
0x136b   : > { %v12859_v61 = vor.u32 %v13679_v13, %v12858_v10  ;;  %v13660_v10 = vld [vmem:[#allocation28 + $0x714] sm:$0xf] }
0x136e   : > { %9162 = vmatpush.bf16.msra.mxu0 %v12721_v21  ;;  %9410 = vmatpush.bf16.msrb.mxu3 %v12819_v53  ;;  %v13675_v21 = vld [vmem:[#allocation28 + $0x784] sm:$0xf0] }
0x136f   : > { %v12843_v63 = vor.u32 %v13675_v21, %v12842_v24  ;;  %v12780_v21 = vld [vmem:[#allocation28 + $0x708] sm:$0xf0] }
0x1372   : > { %9163 = vmatpush.bf16.msra.mxu0 %v12713_v52  ;;  %9411 = vmatpush.bf16.msrb.mxu3 %v12811_v38 }
0x1376   : > { %9422 = vmatpush.bf16.msrb.mxu0 %v12899_v48  ;;  %9412 = vmatpush.bf16.msrb.mxu3 %v12803_v20 }
0x137a   : > { %9423 = vmatpush.bf16.msrb.mxu0 %v12891_v34  ;;  %9413 = vmatpush.bf16.msrb.mxu3 %v12795_v18 }
0x137e   : > { %9424 = vmatpush.bf16.msrb.mxu0 %v12883_v30  ;;  %9414 = vmatpush.bf16.msrb.mxu3 %v12787_v3  ;;  %v13668_v30 = vld [vmem:[#allocation28 + $0x754] sm:$0xf]  ;;  %v12892_v3 = vld [vmem:[#allocation28 + $0x7e8] sm:$0xf0] }
0x137f   : > { %v12895_v8 = vor.u32 %v13686_v42, %v12892_v3  ;;  %v13690_v42 = vld [vmem:[#allocation37 + $0x40] sm:$0xff] }
0x1382   : > { %9425 = vmatpush.bf16.msrb.mxu0 %v12875_v6  ;;  %9415 = vmatpush.bf16.msrb.mxu3 %v12779_v41  ;;  %v12804_v6 = vld [vmem:[#allocation28 + $0x738] sm:$0xf0] }
0x1383   : > { %v12807_v28 = vor.u32 %v13664_v16, %v12804_v6  ;;  %v12884_v41 = vld [vmem:[#allocation28 + $0x7d8] sm:$0xf0]  ;;  %v13705_v16 = vld [vmem:[#allocation28 + $0x874] sm:$0xf] }
0x1384   : > { %v12887_v13 = vor.u32 %v13684_v32, %v12884_v41  ;;  %v13704_v41 = vld [vmem:[#allocation28 + $0x864] sm:$0xf0] }
0x1386   : > { %9426 = vmatpush.bf16.msrb.mxu0 %v12867_v50  ;;  %v12796_v50 = vld [vmem:[#allocation28 + $0x728] sm:$0xf0] }
0x1387   : > { %v12799_v27 = vor.u32 %v13662_v33, %v12796_v50  ;;  %v13706_v33 = vld [vmem:[#allocation28 + $0x874] sm:$0xf0]  ;;  %v12962_v50 = vld [vmem:[#allocation28 + $0x868] sm:$0xf0] }
0x138a   : > { %9427 = vmatpush.bf16.msrb.mxu0 %v12859_v61  ;;  %v12788_v61 = vld [vmem:[#allocation28 + $0x718] sm:$0xf0] }
0x138b   : > { %v12791_v1 = vor.u32 %v13660_v10, %v12788_v61  ;;  %v13032_v10 = vld [vmem:[#allocation28 + $0x8f0] sm:$0xf]  ;;  %v13721_v61 = vld [vmem:[#allocation28 + $0x8f4] sm:$0xf] }
0x138e   : > { %9428 = vmatpush.bf16.msrb.mxu0 %v12851_v31  ;;  %v12876_v31 = vld [vmem:[#allocation28 + $0x7c8] sm:$0xf0] }
0x138f   : > { %v12879_v24 = vor.u32 %v13682_v49, %v12876_v31  ;;  %v13034_v31 = vld [vmem:[#allocation28 + $0x8f8] sm:$0xf0] }
0x1392   : > { %9429 = vmatpush.bf16.msrb.mxu0 %v12843_v63 }
0x13c2   : > { %v8857_v46 = vpop.f32.mrf.mxu1 }
0x13c8   : > { %v8829_v40 = vpop.f32.mrf.mxu3 }
0x13ca   : > { %v16824_v63 = vpop.f32.mrf.mxu1 }
0x13d0   : > { %v8831_v0 = vpop.f32.mrf.mxu3 }
0x13d1   : > { %v8843_v53 = vpop.f32.mrf.mxu0 }
0x13d2   : > { %v8844_v52 = vadd.f32 %v8843_v53, %v8829_v40  ;;  %v13658_v40 = vld [vmem:[#allocation28 + $0x704] sm:$0xf]  ;;  %v13680_v53 = vld [vmem:[#allocation28 + $0x7b4] sm:$0xf] }
0x13d4   : > { %v16806_v11 = vadd.f32 %v8844_v52, %v16786_v39  ;;  %v12868_v52 = vld [vmem:[#allocation28 + $0x7b8] sm:$0xf0] }
0x13d7   : > { %v8871_v48 = vpop.f32.mrf.mxu2 }
0x13d8   : > { %v8872_v25 = vadd.f32 %v8871_v48, %v8857_v46  ;;  %v8900_v15 = vpop.f32.mrf.mxu3  ;;  %v12871_v46 = vor.u32 %v13680_v53, %v12868_v52  ;;  %v13678_v48 = vld [vmem:[#allocation28 + $0x7a4] sm:$0xf]  ;;  %v12952_v53 = vld [vmem:[#allocation28 + $0x850] sm:$0xf]  ;;  %v13702_v52 = vld [vmem:[#allocation28 + $0x854] sm:$0xf0] }
0x13d9   : > { %v8845_v38 = vpop.f32.mrf.mxu0 }
0x13da   : > { %v16809_v55 = vadd.f32 %v8872_v25, %v16783_v26  ;;  %v8846_v58 = vadd.f32 %v8845_v38, %v8831_v0  ;;  %v13657_v26 = vld [vmem:[#allocation37 + $0x38] sm:$0xff]  ;;  %v12783_v0 = vor.u32 %v13658_v40, %v12780_v21  ;;  %v12860_v25 = vld [vmem:[#allocation28 + $0x7a8] sm:$0xf0]  ;;  %v13676_v38 = vld [vmem:[#allocation28 + $0x794] sm:$0xf]  ;;  %v13037_v21 = vor.u32 %v13721_v61, %v13034_v31 }
0x13db   : > { %v13701_v40 = vld [vmem:[#allocation28 + $0x854] sm:$0xf]  ;;  %v12920_v61 = vld [vmem:[#allocation28 + $0x810] sm:$0xf] }
0x13dc   : > { %v16812_v34 = vadd.f32 %v8846_v58, %v16789_v37  ;;  %v13670_v37 = vld [vmem:[#allocation28 + $0x764] sm:$0xf]  ;;  %v12852_v58 = vld [vmem:[#allocation28 + $0x798] sm:$0xf0]  ;;  %v13000_v31 = vld [vmem:[#allocation28 + $0x8b0] sm:$0xf] }
0x13e0   : > { %v8902_v43 = vpop.f32.mrf.mxu3 }
0x13e1   : > { %v8919_v35 = vpack.c.bf16 %v8902_v43, %v8900_v15  ;;  %v8914_v20 = vpop.f32.mrf.mxu0  ;;  %v12863_v15 = vor.u32 %v13678_v48, %v12860_v25  ;;  %v13699_v48 = vld [vmem:[#allocation28 + $0x844] sm:$0xf]  ;;  %v12946_v25 = vld [vmem:[#allocation28 + $0x848] sm:$0xf0] }
0x13e3   : > { %9150 = vmatmul.bf16.vlgmr.msra.gmra.mxu3 %v8919_v35  ;;  %9122 = vmatmul.bf16.vlgmr.msrb.gmra.mxu1 %v8919_v35  ;;  %v12855_v35 = vor.u32 %v13676_v38, %v12852_v58  ;;  %v12949_v38 = vor.u32 %v13699_v48, %v12946_v25  ;;  %v13700_v58 = vld [vmem:[#allocation28 + $0x844] sm:$0xf0]  ;;  %v12914_v48 = vld [vmem:[#allocation28 + $0x808] sm:$0xf0]  ;;  %v12912_v25 = vld [vmem:[#allocation28 + $0x800] sm:$0xf] }
0x13e4   : > { %9483 = vmatpush.bf16.msra.mxu3 %v16660_v51  ;;  %v12836_v51 = vld [vmem:[#allocation28 + $0x778] sm:$0xf0] }
0x13e8   : > { %9484 = vmatpush.bf16.msra.mxu3 %v16647_v44  ;;  %v13672_v44 = vld [vmem:[#allocation28 + $0x774] sm:$0xf] }
0x13e9   : > { %v8916_v39 = vpop.f32.mrf.mxu0 }
0x13ea   : > { %v8920_v59 = vpack.c.bf16 %v8916_v39, %v8914_v20  ;;  %v13674_v20 = vld [vmem:[#allocation28 + $0x784] sm:$0xf]  ;;  %v12844_v39 = vld [vmem:[#allocation28 + $0x788] sm:$0xf0] }
0x13ec   : > { %9485 = vmatpush.bf16.msra.mxu3 %v16635_v57  ;;  %9136 = vmatmul.bf16.vlgmr.msra.gmra.mxu2 %v8920_v59  ;;  %v12839_v57 = vor.u32 %v13672_v44, %v12836_v51 }
0x13ed   : > { %9164 = vmatmul.bf16.vlgmr.msra.gmra.mxu0 %v8920_v59  ;;  %v16826_v59 = vpop.f32.mrf.mxu2 }
0x13ee   : > { %9497 = vmatpush.bf16.msra.mxu0 %v16655_v36  ;;  %9436 = vmatpush.bf16.msrb.mxu1 %v12839_v57  ;;  %v12831_v36 = vor.u32 %v13670_v37, %v12828_v4 }
0x13f0   : > { %9486 = vmatpush.bf16.msra.mxu3 %v16623_v19  ;;  %v12820_v19 = vld [vmem:[#allocation28 + $0x758] sm:$0xf0] }
0x13f1   : > { %v12823_v23 = vor.u32 %v13668_v30, %v12820_v19 }
0x13f2   : > { %9498 = vmatpush.bf16.msra.mxu0 %v16643_v60  ;;  %9437 = vmatpush.bf16.msrb.mxu1 %v12831_v36  ;;  %v13666_v60 = vld [vmem:[#allocation28 + $0x744] sm:$0xf] }
0x13f3   : > { %12774 = vmatmul.msk.bf16.vlgmr.msra.gmra.mxu1 %vm2184_vm0, %v13657_v26  ;;  %v12815_v18 = vor.u32 %v13666_v60, %v12812_v14 }
0x13f6   : > { %9499 = vmatpush.bf16.msra.mxu0 %v16631_v29  ;;  %9438 = vmatpush.bf16.msrb.mxu1 %v12823_v23  ;;  %v13688_v29 = vld [vmem:[#allocation28 + $0x7f4] sm:$0xf] }
0x13fa   : > { %9500 = vmatpush.bf16.msra.mxu0 %v16619_v47  ;;  %9439 = vmatpush.bf16.msrb.mxu1 %v12815_v18  ;;  %v12900_v47 = vld [vmem:[#allocation28 + $0x7f8] sm:$0xf0] }
0x13fb   : > { %v12903_v54 = vor.u32 %v13688_v29, %v12900_v47 }
0x13fc   : > { %12775 = vmatmul.msk.bf16.vlgmr.msrb.gmra.mxu2 %vm2184_vm0, %v13657_v26  ;;  %v12847_v26 = vor.u32 %v13674_v20, %v12844_v39  ;;  %v13719_v20 = vld [vmem:[#allocation28 + $0x8e4] sm:$0xf] }
0x13fd   : > { %9450 = vmatpush.bf16.msra.mxu2 %v12903_v54  ;;  %v12970_v54 = vld [vmem:[#allocation28 + $0x878] sm:$0xf0] }
0x13fe   : > { %9440 = vmatpush.bf16.msrb.mxu1 %v12807_v28  ;;  %v12973_v6 = vor.u32 %v13705_v16, %v12970_v54  ;;  %v13018_v54 = vld [vmem:[#allocation28 + $0x8d8] sm:$0xf0] }
0x1401   : > { %9451 = vmatpush.bf16.msra.mxu2 %v12895_v8  ;;  %v13703_v8 = vld [vmem:[#allocation28 + $0x864] sm:$0xf] }
0x1402   : > { %9441 = vmatpush.bf16.msrb.mxu1 %v12799_v27  ;;  %v12960_v27 = vld [vmem:[#allocation28 + $0x860] sm:$0xf]  ;;  %v12965_v32 = vor.u32 %v13703_v8, %v12962_v50  ;;  %v13715_v8 = vld [vmem:[#allocation28 + $0x8c4] sm:$0xf] }
0x1405   : > { %9452 = vmatpush.bf16.msra.mxu2 %v12887_v13  ;;  %v13722_v13 = vld [vmem:[#allocation28 + $0x8f4] sm:$0xf0] }
0x1406   : > { %9442 = vmatpush.bf16.msrb.mxu1 %v12791_v1  ;;  %v12961_v1 = vor.u32 %v13704_v41, %v12960_v27  ;;  %v13033_v49 = vor.u32 %v13722_v13, %v13032_v10  ;;  %v13693_v10 = vld [vmem:[#allocation28 + $0x814] sm:$0xf]  ;;  %v12922_v13 = vld [vmem:[#allocation28 + $0x818] sm:$0xf0] }
0x1409   : > { %9453 = vmatpush.bf16.msra.mxu2 %v12879_v24  ;;  %v12954_v24 = vld [vmem:[#allocation28 + $0x858] sm:$0xf0] }
0x140a   : > { %9443 = vmatpush.bf16.msrb.mxu1 %v12783_v0  ;;  %v12957_v0 = vor.u32 %v13701_v40, %v12954_v24  ;;  %v13714_v40 = vld [vmem:[#allocation28 + $0x8b4] sm:$0xf0]  ;;  %v13713_v24 = vld [vmem:[#allocation28 + $0x8b4] sm:$0xf] }
0x140d   : > { %9454 = vmatpush.bf16.msra.mxu2 %v12871_v46  ;;  %v12953_v46 = vor.u32 %v13702_v52, %v12952_v53  ;;  %v13002_v53 = vld [vmem:[#allocation28 + $0x8b8] sm:$0xf0] }
0x140e   : > { %v13005_v52 = vor.u32 %v13713_v24, %v13002_v53  ;;  %v7992_v24 = vadd.f32 %v16753_v17, %v16751_v5  ;;  %v13737_v53 = vld [vmem:[%s16979_s17 + $0x70] sm:$0xff]  ;;  %v13728_v17 = vld [vmem:[%s16979_s17 + $0x28] sm:$0xff] }
0x1411   : > { %9455 = vmatpush.bf16.msra.mxu2 %v12863_v15  ;;  %v12944_v15 = vld [vmem:[#allocation28 + $0x840] sm:$0xf] }
0x1412   : > { %v12945_v39 = vor.u32 %v13700_v58, %v12944_v15 }
0x1415   : > { %9456 = vmatpush.bf16.msra.mxu2 %v12855_v35  ;;  %v13720_v35 = vld [vmem:[#allocation28 + $0x8e4] sm:$0xf0] }
0x1419   : > { %9457 = vmatpush.bf16.msra.mxu2 %v12847_v26 }
0x141d   : > { %9716 = vmatpush.bf16.msrb.mxu2 %v13033_v49  ;;  %v13694_v49 = vld [vmem:[#allocation28 + $0x814] sm:$0xf0] }
0x1460   : > { %v9123_v43 = vpop.f32.mrf.mxu1 }
0x1466   : > { %v9151_v51 = vpop.f32.mrf.mxu3 }
0x1468   : > { %v9125_v44 = vpop.f32.mrf.mxu1 }
0x146a   : > { %v9165_v57 = vpop.f32.mrf.mxu0 }
0x146b   : > { %v9166_v37 = vadd.f32 %v9165_v57, %v9151_v51  ;;  %v13697_v57 = vld [vmem:[#allocation28 + $0x834] sm:$0xf] }
0x146d   : > { %v16829_v4 = vadd.f32 %v9166_v37, %v16809_v55  ;;  %v12938_v37 = vld [vmem:[#allocation28 + $0x838] sm:$0xf0] }
0x146e   : > { %v16839_v58 = vpop.f32.mrf.mxu3 }
0x146f   : > { %v9137_v36 = vpop.f32.mrf.mxu2 }
0x1470   : > { %v9138_v30 = vadd.f32 %v9137_v36, %v9123_v43  ;;  %v9194_v19 = vpop.f32.mrf.mxu1  ;;  %v13024_v43 = vld [vmem:[#allocation28 + $0x8e0] sm:$0xf]  ;;  %v12936_v36 = vld [vmem:[#allocation28 + $0x830] sm:$0xf] }
0x1471   : > { %v13025_v26 = vor.u32 %v13720_v35, %v13024_v43  ;;  %v12992_v43 = vld [vmem:[#allocation28 + $0x8a0] sm:$0xf]  ;;  %v13712_v35 = vld [vmem:[#allocation28 + $0x8a4] sm:$0xf0] }
0x1472   : > { %v16832_v23 = vadd.f32 %v9138_v30, %v16806_v11  ;;  %v12968_v11 = vld [vmem:[#allocation28 + $0x870] sm:$0xf]  ;;  %v12941_v30 = vor.u32 %v13697_v57, %v12938_v37  ;;  %v13710_v37 = vld [vmem:[#allocation28 + $0x894] sm:$0xf0] }
0x1473   : > { %9717 = vmatpush.bf16.msrb.mxu2 %v13025_v26  ;;  %v12993_v26 = vor.u32 %v13712_v35, %v12992_v43  ;;  %v12984_v57 = vld [vmem:[#allocation28 + $0x890] sm:$0xf] }
0x1474   : > { %v13727_v35 = vld [vmem:[%s16979_s17 + $0x20] sm:$0xff] }
0x1477   : > { %v9139_v60 = vpop.f32.mrf.mxu2 }
0x1478   : > { %v9140_v14 = vadd.f32 %v9139_v60, %v9125_v44  ;;  %v9196_v18 = vpop.f32.mrf.mxu1  ;;  %v13026_v44 = vld [vmem:[#allocation28 + $0x8e8] sm:$0xf0]  ;;  %v13016_v60 = vld [vmem:[#allocation28 + $0x8d0] sm:$0xf] }
0x1479   : > { %v9213_v29 = vpack.c.bf16 %v9196_v18, %v9194_v19  ;;  %v13029_v51 = vor.u32 %v13719_v20, %v13026_v44  ;;  %v13698_v19 = vld [vmem:[#allocation28 + $0x834] sm:$0xf0]  ;;  %v13717_v18 = vld [vmem:[#allocation28 + $0x8d4] sm:$0xf]  ;;  %v13711_v20 = vld [vmem:[#allocation28 + $0x8a4] sm:$0xf] }
0x147a   : > { %v16835_v47 = vadd.f32 %v9140_v14, %v16812_v34  ;;  %v12969_v34 = vor.u32 %v13706_v33, %v12968_v11  ;;  %v13718_v14 = vld [vmem:[#allocation28 + $0x8d4] sm:$0xf0]  ;;  %v13696_v11 = vld [vmem:[#allocation28 + $0x824] sm:$0xf0]  ;;  %v13008_v33 = vld [vmem:[#allocation28 + $0x8c0] sm:$0xf] }
0x147b   : > { %9416 = vmatmul.bf16.vlgmr.msrb.gmra.mxu3 %v9213_v29  ;;  %9444 = vmatmul.bf16.vlgmr.msrb.gmra.mxu1 %v9213_v29  ;;  %v12937_v29 = vor.u32 %v13698_v19, %v12936_v36  ;;  %v13017_v16 = vor.u32 %v13718_v14, %v13016_v60  ;;  %v12994_v44 = vld [vmem:[#allocation28 + $0x8a8] sm:$0xf0]  ;;  %v13709_v36 = vld [vmem:[#allocation28 + $0x894] sm:$0xf]  ;;  %v12986_v19 = vld [vmem:[#allocation28 + $0x898] sm:$0xf0] }
0x147c   : > { %9730 = vmatpush.bf16.msrb.mxu3 %v12973_v6  ;;  %9702 = vmatpush.bf16.msra.mxu1 %v12969_v34  ;;  %v13021_v6 = vor.u32 %v13717_v18, %v13018_v54  ;;  %v13716_v34 = vld [vmem:[#allocation28 + $0x8c4] sm:$0xf0]  ;;  %v12989_v60 = vor.u32 %v13709_v36, %v12986_v19  ;;  %v12976_v18 = vld [vmem:[#allocation28 + $0x880] sm:$0xf]  ;;  %v9167_v54 = vpop.f32.mrf.mxu0 }
0x147d   : > { %9718 = vmatpush.bf16.msrb.mxu2 %v13017_v16  ;;  %v13009_v27 = vor.u32 %v13716_v34, %v13008_v33  ;;  %v13707_v16 = vld [vmem:[#allocation28 + $0x884] sm:$0xf] }
0x147f   : > { %v9208_v55 = vpop.f32.mrf.mxu2 }
0x1480   : > { %9731 = vmatpush.bf16.msrb.mxu3 %v12965_v32  ;;  %9703 = vmatpush.bf16.msra.mxu1 %v12961_v1  ;;  %v13010_v32 = vld [vmem:[#allocation28 + $0x8c8] sm:$0xf0]  ;;  %v12925_v1 = vor.u32 %v13693_v10, %v12922_v13 }
0x1481   : > { %v13013_v41 = vor.u32 %v13715_v8, %v13010_v32  ;;  %9719 = vmatpush.bf16.msrb.mxu2 %v13009_v27 }
0x1484   : > { %9732 = vmatpush.bf16.msrb.mxu3 %v12957_v0  ;;  %9704 = vmatpush.bf16.msra.mxu1 %v12953_v46  ;;  %v13001_v0 = vor.u32 %v13714_v40, %v13000_v31  ;;  %v13691_v46 = vld [vmem:[#allocation28 + $0x804] sm:$0xf] }
0x1485   : > { %v12917_v15 = vor.u32 %v13691_v46, %v12914_v48  ;;  %v13730_v31 = vld [vmem:[%s16979_s17 + $0x38] sm:$0xff]  ;;  %v8286_v46 = vadd.f32 %v16780_v9, %v16778_v22  ;;  %v9168_v22 = vadd.f32 %v9167_v54, %v16839_v58 }
0x1486   : > { %9720 = vmatpush.bf16.msrb.mxu2 %v13001_v0  ;;  %v13738_v40 = vld [vmem:[%s16979_s17 + $0x78] sm:$0xff]  ;;  %v13729_v0 = vld [vmem:[%s16979_s17 + $0x30] sm:$0xff] }
0x1487   : > { %v9210_v28 = vpop.f32.mrf.mxu2 }
0x1488   : > { %v9214_v3 = vpack.c.bf16 %v9210_v28, %v9208_v55  ;;  %9733 = vmatpush.bf16.msrb.mxu3 %v12949_v38  ;;  %9705 = vmatpush.bf16.msra.mxu1 %v12945_v39  ;;  %v13695_v55 = vld [vmem:[#allocation28 + $0x824] sm:$0xf]  ;;  %v12930_v28 = vld [vmem:[#allocation28 + $0x828] sm:$0xf0]  ;;  %v13692_v38 = vld [vmem:[#allocation28 + $0x804] sm:$0xf0] }
0x1489   : > { %v12913_v39 = vor.u32 %v13692_v38, %v12912_v25  ;;  %v13736_v25 = vld [vmem:[%s16979_s17 + $0x68] sm:$0xff] }
0x148a   : > { %9430 = vmatmul.bf16.vlgmr.msrb.gmra.mxu0 %v9214_v3  ;;  %9458 = vmatmul.bf16.vlgmr.msra.gmra.mxu2 %v9214_v3  ;;  %v12933_v3 = vor.u32 %v13695_v55, %v12930_v28  ;;  %v12978_v55 = vld [vmem:[#allocation28 + $0x888] sm:$0xf0] }
0x148b   : > { %12908 = vmatmul.msk.bf16.vlgmr.msra.gmra.mxu3 %vm2184_vm0, %v13690_v42  ;;  %9744 = vmatpush.bf16.msrb.mxu0 %v13037_v21  ;;  %v12921_v21 = vor.u32 %v13694_v49, %v12920_v61  ;;  %v12981_v28 = vor.u32 %v13707_v16, %v12978_v55  ;;  %v7486_v49 = vadd.f32 %v16707_v45, %v16703_v7  ;;  %v13733_v16 = vld [vmem:[%s16979_s17 + $0x50] sm:$0xff] }
0x148c   : > { %9734 = vmatpush.bf16.msrb.mxu3 %v12941_v30  ;;  %9706 = vmatpush.bf16.msra.mxu1 %v12937_v29  ;;  %v12985_v30 = vor.u32 %v13710_v37, %v12984_v57  ;;  %v13708_v29 = vld [vmem:[#allocation28 + $0x884] sm:$0xf0] }
0x148d   : > { %9721 = vmatpush.bf16.msrb.mxu2 %v12993_v26  ;;  %v9762_v26 = vld [vmem:[#allocation30] sm:$0x3]  ;;  %v13726_v57 = vld [vmem:[%s16979_s17 + $0x18] sm:$0xff] }
0x148e   : > { %v13734_v37 = vld [vmem:[%s16979_s17 + $0x58] sm:$0xff]  ;;  %v9765_v19 = vperm.slane %v9762_v26, 1 }
0x148f   : > { %9745 = vmatpush.bf16.msrb.mxu0 %v13029_v51  ;;  %v12997_v51 = vor.u32 %v13711_v20, %v12994_v44 }
0x1490   : > { %9735 = vmatpush.bf16.msrb.mxu3 %v12933_v3 }
0x1491   : > { %9722 = vmatpush.bf16.msrb.mxu2 %v12985_v30 }
0x1493   : > { %9746 = vmatpush.bf16.msrb.mxu0 %v13021_v6  ;;  %v12977_v6 = vor.u32 %v13708_v29, %v12976_v18  ;;  %v13725_v29 = vld [vmem:[%s16979_s17 + $0x10] sm:$0xff] }
0x1494   : > { %9736 = vmatpush.bf16.msrb.mxu3 %v12925_v1 }
0x1495   : > { %9723 = vmatpush.bf16.msrb.mxu2 %v12977_v6 }
0x1497   : > { %9747 = vmatpush.bf16.msrb.mxu0 %v13013_v41 }
0x1498   : > { %9737 = vmatpush.bf16.msrb.mxu3 %v12917_v15 }
0x149a   : > { %12909 = vmatmul.msk.bf16.vlgmr.msra.gmra.mxu0 %vm2184_vm0, %v13690_v42  ;;  %v12928_v42 = vld [vmem:[#allocation28 + $0x820] sm:$0xf] }
0x149b   : > { %v12929_v50 = vor.u32 %v13696_v11, %v12928_v42  ;;  %9748 = vmatpush.bf16.msrb.mxu0 %v13005_v52 }
0x149c   : > { %9939 = vmatpush.bf16.msra.mxu3 %v13730_v31 }
0x149d   : > { %9707 = vmatpush.bf16.msra.mxu1 %v12929_v50 }
0x149f   : > { %9749 = vmatpush.bf16.msrb.mxu0 %v12997_v51 }
0x14a0   : > { %9940 = vmatpush.bf16.msra.mxu3 %v13729_v0 }
0x14a1   : > { %9708 = vmatpush.bf16.msra.mxu1 %v12921_v21 }
0x14a3   : > { %9750 = vmatpush.bf16.msrb.mxu0 %v12989_v60 }
0x14a4   : > { %9941 = vmatpush.bf16.msra.mxu3 %v13728_v17 }
0x14a5   : > { %9709 = vmatpush.bf16.msra.mxu1 %v12913_v39 }
0x14a7   : > { %9751 = vmatpush.bf16.msrb.mxu0 %v12981_v28 }
0x14a8   : > { %9942 = vmatpush.bf16.msra.mxu3 %v13727_v35 }
0x14ab   : > { %9952 = vmatpush.bf16.msra.mxu0 %v13738_v40 }
0x14ac   : > { %9943 = vmatpush.bf16.msra.mxu3 %v13726_v57 }
0x14af   : > { %9953 = vmatpush.bf16.msra.mxu0 %v13737_v53 }
0x14b0   : > { %9944 = vmatpush.bf16.msra.mxu3 %v13725_v29 }
0x14b3   : > { %9954 = vmatpush.bf16.msra.mxu0 %v13736_v25 }
0x14fe   : > { %v9417_v14 = vpop.f32.mrf.mxu3 }
0x1506   : > { %v9419_v42 = vpop.f32.mrf.mxu3 }
0x1507   : > { %v9431_v3 = vpop.f32.mrf.mxu0 }
0x1508   : > { %v9432_v11 = vadd.f32 %v9431_v3, %v9417_v14 }
0x150a   : > { %v16842_v33 = vadd.f32 %v9432_v11, %v16832_v23  ;;  %v9445_v23 = vpop.f32.mrf.mxu1 }
0x150d   : > { %v9459_v1 = vpop.f32.mrf.mxu2 }
0x150e   : > { %v9488_v34 = vpop.f32.mrf.mxu3  ;;  %v9460_v9 = vadd.f32 %v9459_v1, %v9445_v23 }
0x150f   : > { %v9433_v8 = vpop.f32.mrf.mxu0 }
0x1510   : > { %v9434_v50 = vadd.f32 %v9433_v8, %v9419_v42  ;;  %v9764_v42 = vperm.slane %v9762_v26, 0 }
0x1512   : > { %v16845_v27 = vadd.f32 %v9434_v50, %v16835_v47  ;;  %v7688_v47 = vadd.f32 %v16729_v12, %v7486_v49  ;;  %v9447_v21 = vpop.f32.mrf.mxu1  ;;  %v8580_v12 = vadd.f32 %v16803_v62, %v16801_v56  ;;  %v13735_v56 = vld [vmem:[%s16979_s17 + $0x60] sm:$0xff] }
0x1513   : > { %9955 = vmatpush.bf16.msra.mxu0 %v13735_v56  ;;  %v9774_v50 = vld [vmem:[#allocation39] sm:$0x3] }
0x1514   : > { %v7702_v52 = vadd.f32 %v16731_v2, %v7688_v47  ;;  %v8874_v2 = vadd.f32 %v16826_v59, %v16824_v63  ;;  %v9465_v63 = vadd.f32 %v9460_v9, %v16829_v4 }
0x1515   : > { %v9461_v7 = vpop.f32.mrf.mxu2 }
0x1516   : > { %v9490_v32 = vpop.f32.mrf.mxu3  ;;  %v7997_v48 = vadd.f32 %v7992_v24, %v7702_v52  ;;  %v9462_v20 = vadd.f32 %v9461_v7, %v9447_v21  ;;  %v13970_v24 = vld [vmem:[#allocation31] ss:$0 sm:$0xff] }
0x1517   : > { %v9502_v41 = vpop.f32.mrf.mxu0  ;;  %v9507_v10 = vpack.c.bf16 %v9490_v32, %v9488_v34  ;;  %9956 = vmatpush.bf16.msra.mxu0 %v13734_v37  ;;  %v13724_v34 = vld [vmem:[%s16979_s17 + $0x8] sm:$0xff] }
0x1518   : > { %v8291_v15 = vadd.f32 %v8286_v46, %v7997_v48  ;;  %9945 = vmatpush.bf16.msra.mxu3 %v13724_v34 }
0x1519   : > { %9738 = vmatmul.bf16.vlgmr.msrb.gmra.mxu3 %v9507_v10  ;;  %9710 = vmatmul.bf16.vlgmr.msra.gmra.mxu1 %v9507_v10 }
0x151a   : > { %v8585_v38 = vadd.f32 %v8580_v12, %v8291_v15 }
0x151b   : > { %9957 = vmatpush.bf16.msra.mxu0 %v13733_v16 }
0x151c   : > { %v8879_v62 = vadd.f32 %v8874_v2, %v8585_v38 }
0x151e   : > { %v9173_v51 = vadd.f32 %v9168_v22, %v8879_v62 }
0x151f   : > { %v9504_v13 = vpop.f32.mrf.mxu0 }
0x1520   : > { %v9508_v61 = vpack.c.bf16 %v9504_v13, %v9502_v41  ;;  %v9467_v36 = vadd.f32 %v9462_v20, %v9173_v51  ;;  %v13723_v13 = vld [vmem:[%s16979_s17] sm:$0xff] }
0x1521   : > { %9946 = vmatpush.bf16.msra.mxu3 %v13723_v13 }
0x1522   : > { %9724 = vmatmul.bf16.vlgmr.msrb.gmra.mxu2 %v9508_v61  ;;  %9752 = vmatmul.bf16.vlgmr.msrb.gmra.mxu0 %v9508_v61  ;;  %v13731_v61 = vld [vmem:[%s16979_s17 + $0x40] sm:$0xff] }
0x1596   : > { %v9711_v43 = vpop.f32.mrf.mxu1 }
0x159c   : > { %v9739_v45 = vpop.f32.mrf.mxu3 }
0x159e   : > { %v9713_v6 = vpop.f32.mrf.mxu1 }
0x159f   : > { %v9753_v5 = vpop.f32.mrf.mxu0 }
0x15a0   : > { %v9754_v39 = vadd.f32 %v9753_v5, %v9739_v45 }
0x15a2   : > { %v9759_v30 = vadd.f32 %v9754_v39, %v9465_v63 }
0x15a4   : > { %v9741_v59 = vpop.f32.mrf.mxu3  ;;  %v9769_v54 = vadd.f32 %v9765_v19, %v9759_v30 }
0x15a5   : > { %v9725_v44 = vpop.f32.mrf.mxu2 }
0x15a6   : > { %v9726_v14 = vadd.f32 %v9725_v44, %v9711_v43 }
0x15a7   : > { %v9755_v58 = vpop.f32.mrf.mxu0 }
0x15a8   : > { %v9756_v60 = vadd.f32 %v9755_v58, %v9741_v59  ;;  %v9758_v28 = vadd.f32 %v9726_v14, %v16842_v33  ;;  %v13732_v33 = vld [vmem:[%s16979_s17 + $0x48] sm:$0xff] }
0x15a9   : > { %9958 = vmatpush.bf16.msra.mxu0 %v13732_v33 }
0x15aa   : > { %v9761_v18 = vadd.f32 %v9756_v60, %v9467_v36  ;;  %v9768_v32 = vadd.f32 %v9764_v42, %v9758_v28 }
0x15ac   : > { %v9771_v4 = vadd.f32 %v9765_v19, %v9761_v18 }
0x15ad   : > { %v9727_v55 = vpop.f32.mrf.mxu2  ;;  %9959 = vmatpush.bf16.msra.mxu0 %v13731_v61 }
0x15ae   : > { %v9773_v3 = vpack.c.bf16 %v9771_v4, %v9769_v54  ;;  %v9728_v11 = vadd.f32 %v9727_v55, %v9713_v6 }
0x15b0   : > { %v9760_v8 = vadd.f32 %v9728_v11, %v16845_v27  ;;  %9799 = vmatpush.bf16.msra.mxu2 %v9773_v3 }
0x15b2   : > { %v9770_v41 = vadd.f32 %v9764_v42, %v9760_v8 }
0x15b3   : > { %13039 = vmatmul.msk.bf16.vlgmr.msra.gmra.mxu2 %vm9775_vm1, %v9774_v50 }
0x15b4   : > { %v9772_v10 = vpack.c.bf16 %v9770_v41, %v9768_v32 }
0x15b6   : > { %9786 = vmatpush.bf16.msrb.mxu1 %v9772_v10 }
0x15b9   : > { %13038 = vmatmul.msk.bf16.vlgmr.msrb.gmra.mxu1 %vm9775_vm1, %v9774_v50 }
0x1636   : > { %v9788_v27 = vpop.f32.mrf.mxu1  ;;  %v9801_v23 = vpop.f32.mrf.mxu2 }
0x1637   : > { %v9805_v1 = vpack.c.bf16 %v9788_v27, %v9788_v27  ;;  %v9806_v49 = vpack.c.bf16 %v9801_v23, %v9801_v23 }
0x1639   : > { %9947 = vmatmul.bf16.vlgmr.msra.gmra.mxu3 %v9805_v1  ;;  %9960 = vmatmul.bf16.vlgmr.msra.gmra.mxu0 %v9806_v49 }
0x163e   : > { %v9790_v31 = vpop.f32.mrf.mxu1  ;;  %v9803_v40 = vpop.f32.mrf.mxu2 }
0x16b6   : > { %v9961_v47 = vpop.f32.mrf.mxu0 }
0x16bc   : > { %v9948_v21 = vpop.f32.mrf.mxu3 }
0x16bd   : > { %v9949_v0 = vadd.f32 %v13970_v24, %v9948_v21 }
0x16be   : > { %v9963_v53 = vpop.f32.mrf.mxu0 }
0x16bf   : > { %v9962_v52 = vadd.f32 %v9961_v47, %v9949_v0 }
0x16c1   : > { %9966 = vst.msk [vmem:[%s1317_s28] sm:$0xf] %vm9965_vm2, %v9962_v52 }
0x16c4   : > { %v9950_v46 = vpop.f32.mrf.mxu3 }
0x16c5 PF: > { %s84_s15 = sadd.s32 1, %s14765_s15  }
0x16c6   : > { %p81_p12 = scmp.ge.s32.totalorder %s84_s15, 4  }
0x16c8   :  { %83 = sbr.rel (!%p81_p12) target bundleno = 66 (0x42), region = 357 }
0x16cd   :  { %9986 = vsyncpa [#allocation3], 1 }
0x16ce   :  { %9988 = vsyncpa [#allocation3 + $0x1], 1 }
0x16cf   :  { %9989 = vsyncpa [#allocation5], 1 }
0x16d0   :  { %9990 = vsyncpa [#allocation8], 1 }
0x16d1   :  { %9991 = vsyncpa [#allocation11], 1 }
0x16d2   :  { %9992 = vsyncpa [#allocation14], 1 }
0x16d3   :  { %9993 = vsyncpa [#allocation17], 1 }
0x16d4   :  { %9994 = vsyncpa [#allocation20], 1 }
0x16d5   :  { %9995 = vsyncpa [#allocation23], 1 }
0x16d6   :  { %9996 = vsyncpa [#allocation26], 1 }
0x16d7   :  { %9997 = vsyncpa [#allocation29], 1 }
0x16d8   :  { %9998 = vsyncpa [#allocation32], 1 }
0x16d9   :  { %9999 = vsyncpa [#allocation35], 1 }
0x16da   :  { %10000 = vsyncpa [#allocation38], 1 }

</bundles_post_ra>
